<compile_context>
chip_gen: v7x
topology: tpu7x:2x2x1
jax: 0.10.0
libtpu: 0.0.40
codegen_flags: <defaults>
</compile_context>

<pallas_src>
import functools

import numpy as np
import jax
import jax.numpy as jnp
from jax import lax
from jax.experimental import pallas as pl
from jax.experimental.pallas import tpu as pltpu


def _round_up(x, m):
    return ((x + m - 1) // m) * m


# ----------------------------------------------------------------------------
# Host-side weight construction: fold fixed-size strided conv into a dense GEMM.
# ----------------------------------------------------------------------------
def conv2d_as_dense(w, b, H, W, stride, padding):
    """Fold a fixed-spatial-size Conv2d (cross-correlation, zero padding) into a
    dense matmul.

    w: (C_out, C_in, KH, KW), b: (C_out,)
    Input layout : flat (C_in, H, W)    (NCHW flatten of one sample)
    Output layout: flat (C_out, OH, OW) (NCHW flatten of one sample)
    Returns A (C_in*H*W, C_out*OH*OW), bias_expanded (C_out*OH*OW,), OH, OW.
    """
    w = np.asarray(w, np.float32)
    b = np.asarray(b, np.float32)
    C_out, C_in, KH, KW = w.shape
    OH = (H + 2 * padding - KH) // stride + 1
    OW = (W + 2 * padding - KW) // stride + 1
    A = np.zeros((C_in * H * W, C_out * OH * OW), np.float32)
    bexp = np.zeros((C_out * OH * OW,), np.float32)
    for co in range(C_out):
        for oh in range(OH):
            for ow in range(OW):
                j = co * OH * OW + oh * OW + ow
                bexp[j] = b[co]
                for ci in range(C_in):
                    for kh in range(KH):
                        h = oh * stride - padding + kh
                        if h < 0 or h >= H:
                            continue
                        for kw in range(KW):
                            wi = ow * stride - padding + kw
                            if wi < 0 or wi >= W:
                                continue
                            i = ci * H * W + h * W + wi
                            A[i, j] += w[co, ci, kh, kw]
    return A, bexp, OH, OW


def init_params(key, H, W, out_dim):
    ks = jax.random.split(key, 14)

    def lin(k, fan_in, shape):
        return jax.random.normal(k, shape, jnp.float32) / np.sqrt(float(fan_in))

    flat = 16 * (H // 4) * (W // 4)
    p = {}
    p["w1"] = lin(ks[0], 1 * 9, (8, 1, 3, 3))
    p["b1"] = lin(ks[1], 1 * 9, (8,))
    p["w2"] = lin(ks[2], 8 * 9, (16, 8, 3, 3))
    p["b2"] = lin(ks[3], 8 * 9, (16,))
    p["wfc"] = lin(ks[4], flat, (64, flat))
    p["bfc"] = lin(ks[5], flat, (64,))
    p["wp1"] = lin(ks[6], 64, (32, 64))
    p["bp1"] = lin(ks[7], 64, (32,))
    p["wp2"] = lin(ks[8], 32, (out_dim, 32))
    p["bp2"] = lin(ks[9], 32, (out_dim,))
    p["wv1"] = lin(ks[10], 64, (32, 64))
    p["bv1"] = lin(ks[11], 64, (32,))
    p["wv2"] = lin(ks[12], 32, (1, 32))
    p["bv2"] = lin(ks[13], 32, (1,))
    return p


def build_fused_weights(p, H, W, out_dim):
    """Build the 5 GEMM weights/biases used by the fused kernel."""
    A1, b1e, OH1, OW1 = conv2d_as_dense(p["w1"], p["b1"], H, W, stride=2, padding=1)
    A2, b2e, OH2, OW2 = conv2d_as_dense(p["w2"], p["b2"], OH1, OW1, stride=2, padding=1)

    # FC: kernel's hidden layout == PyTorch NCHW flatten by construction, so the
    # FC weight needs no runtime permutation — just a host-side transpose.
    wfc = np.asarray(p["wfc"], np.float32).T              # (flat, 64)
    bfc = np.asarray(p["bfc"], np.float32)

    # Fuse policy/value first layers into a single (64, 64) GEMM.
    wh1 = np.concatenate(
        [np.asarray(p["wp1"], np.float32).T, np.asarray(p["wv1"], np.float32).T], axis=1
    )                                                      # (64, 64)
    bh1 = np.concatenate([np.asarray(p["bp1"], np.float32),
                          np.asarray(p["bv1"], np.float32)])  # (64,)

    # Fuse second layers block-diagonally and pad to a lane-dense 128-wide output.
    nout = out_dim + 1
    nout_pad = max(128, _round_up(nout, 128))
    wh2 = np.zeros((64, nout_pad), np.float32)
    wh2[:32, :out_dim] = np.asarray(p["wp2"], np.float32).T
    wh2[32:64, out_dim:out_dim + 1] = np.asarray(p["wv2"], np.float32).T
    bh2 = np.zeros((nout_pad,), np.float32)
    bh2[:out_dim] = np.asarray(p["bp2"], np.float32)
    bh2[out_dim] = np.asarray(p["bv2"], np.float32)[0]

    fused = {
        "a1": jnp.asarray(A1), "b1": jnp.asarray(b1e)[None, :],
        "a2": jnp.asarray(A2), "b2": jnp.asarray(b2e)[None, :],
        "wfc": jnp.asarray(wfc), "bfc": jnp.asarray(bfc)[None, :],
        "wh1": jnp.asarray(wh1), "bh1": jnp.asarray(bh1)[None, :],
        "wh2": jnp.asarray(wh2), "bh2": jnp.asarray(bh2)[None, :],
    }
    return fused


# ----------------------------------------------------------------------------
# The fused Pallas kernel: conv1 -> conv2 -> FC -> heads, all in VMEM.
# ----------------------------------------------------------------------------
def _fused_forward_kernel(x_ref, a1_ref, b1_ref, a2_ref, b2_ref,
                          wfc_ref, bfc_ref, wh1_ref, bh1_ref, wh2_ref, bh2_ref,
                          out_ref):
    dot = functools.partial(jnp.dot, preferred_element_type=jnp.float32,
                            precision=lax.Precision.HIGHEST)
    x = x_ref[...]                                                    # (TB, H*W)
    h = jnp.maximum(dot(x, a1_ref[...]) + b1_ref[...], 0.0)          # conv1 + ReLU
    h = jnp.maximum(dot(h, a2_ref[...]) + b2_ref[...], 0.0)          # conv2 + ReLU
    h = jnp.maximum(dot(h, wfc_ref[...]) + bfc_ref[...], 0.0)        # flatten + FC + ReLU
    h = jnp.maximum(dot(h, wh1_ref[...]) + bh1_ref[...], 0.0)        # fused head layer-1 + ReLU
    out_ref[...] = dot(h, wh2_ref[...]) + bh2_ref[...]               # [policy | value | pad]


def representation_forward(obs, fused, H, W, out_dim):
    """Returns (policy_logits (B, out_dim), value (B, 1))."""
    x = jnp.asarray(obs, jnp.float32).reshape(-1, H * W)   # obs.view(-1,1,H,W) flattened
    B = x.shape[0]
    TB = 512 if B >= 512 else _round_up(max(B, 1), 8)      # batch tile, sublane aligned
    B_pad = _round_up(B, TB)
    if B_pad != B:
        x = jnp.pad(x, ((0, B_pad - B), (0, 0)))
    nout_pad = int(fused["wh2"].shape[1])

    in_arrays = [x, fused["a1"], fused["b1"], fused["a2"], fused["b2"],
                 fused["wfc"], fused["bfc"], fused["wh1"], fused["bh1"],
                 fused["wh2"], fused["bh2"]]

    x_spec = pl.BlockSpec((TB, H * W), lambda i: (i, 0))
    # Weights/biases: full-array blocks with a constant index_map -> VMEM-resident
    # for the whole grid, never re-DMA'd between batch tiles.
    const_specs = [pl.BlockSpec(tuple(a.shape), lambda i: (0, 0)) for a in in_arrays[1:]]
    out_spec = pl.BlockSpec((TB, nout_pad), lambda i: (i, 0))

    k1 = int(fused["a1"].shape[1])
    k2 = int(fused["a2"].shape[1])
    flops = 2 * B_pad * (H * W * k1 + k1 * k2 + k2 * 64 + 64 * 64 + 64 * nout_pad)
    bytes_accessed = sum(int(np.prod(a.shape)) * 4 for a in in_arrays) + B_pad * nout_pad * 4
    cost = pl.CostEstimate(flops=int(flops), transcendentals=0,
                           bytes_accessed=int(bytes_accessed))

    out = pl.pallas_call(
        _fused_forward_kernel,
        out_shape=jax.ShapeDtypeStruct((B_pad, nout_pad), jnp.float32),
        grid=(B_pad // TB,),
        in_specs=[x_spec] + const_specs,
        out_specs=out_spec,
        compiler_params=pltpu.CompilerParams(dimension_semantics=("parallel",)),
        cost_estimate=cost,
    )(*in_arrays)

    policy = out[:B, :out_dim]
    value = out[:B, out_dim:out_dim + 1]
    return policy, value


# ----------------------------------------------------------------------------
# Pure-JAX reference (mirrors the PyTorch module) for validation.
# ----------------------------------------------------------------------------
def reference_forward(obs, p, H, W):
    prec = lax.Precision.HIGHEST
    x = jnp.asarray(obs, jnp.float32).reshape(-1, 1, H, W)
    h = lax.conv_general_dilated(x, p["w1"], (2, 2), [(1, 1), (1, 1)],
                                 dimension_numbers=("NCHW", "OIHW", "NCHW"),
                                 precision=prec)
    h = jax.nn.relu(h + p["b1"][None, :, None, None])
    h = lax.conv_general_dilated(h, p["w2"], (2, 2), [(1, 1), (1, 1)],
                                 dimension_numbers=("NCHW", "OIHW", "NCHW"),
                                 precision=prec)
    h = jax.nn.relu(h + p["b2"][None, :, None, None])
    h = h.reshape(h.shape[0], -1)                           # NCHW flatten
    lat = jax.nn.relu(jnp.dot(h, p["wfc"].T, precision=prec) + p["bfc"])
    ph = jax.nn.relu(jnp.dot(lat, p["wp1"].T, precision=prec) + p["bp1"])
    policy = jnp.dot(ph, p["wp2"].T, precision=prec) + p["bp2"]
    vh = jax.nn.relu(jnp.dot(lat, p["wv1"].T, precision=prec) + p["bv1"])
    value = jnp.dot(vh, p["wv2"].T, precision=prec) + p["bv2"]
    return policy, value


if __name__ == "__main__":
    H = W = 16          # observation_space.shape
    out_dim = 6         # action dim
    batch = 4

    key = jax.random.PRNGKey(0)
    kp, kx = jax.random.split(key)
    params = init_params(kp, H, W, out_dim)
    fused = build_fused_weights(params, H, W, out_dim)

    obs = jax.random.normal(kx, (batch, H, W), jnp.float32)

    policy, value = representation_forward(obs, fused, H, W, out_dim)
    jax.block_until_ready((policy, value))

    pol_ref, val_ref = reference_forward(obs, params, H, W)
    np.testing.assert_allclose(np.asarray(policy), np.asarray(pol_ref), rtol=2e-2, atol=2e-2)
    np.testing.assert_allclose(np.asarray(value), np.asarray(val_ref), rtol=2e-2, atol=2e-2)

    print("KERNEL_OK")
</pallas_src>

<mosaic_0001>
module attributes {stable_mosaic.version = 11 : i64} {
  func.func @_fused_forward_kernel(%arg0: i32, %arg1: memref<8x256xf32, #tpu.memory_space<vmem>>, %arg2: memref<256x512xf32, #tpu.memory_space<vmem>>, %arg3: memref<1x512xf32, #tpu.memory_space<vmem>>, %arg4: memref<512x256xf32, #tpu.memory_space<vmem>>, %arg5: memref<1x256xf32, #tpu.memory_space<vmem>>, %arg6: memref<256x64xf32, #tpu.memory_space<vmem>>, %arg7: memref<1x64xf32, #tpu.memory_space<vmem>>, %arg8: memref<64x64xf32, #tpu.memory_space<vmem>>, %arg9: memref<1x64xf32, #tpu.memory_space<vmem>>, %arg10: memref<64x128xf32, #tpu.memory_space<vmem>>, %arg11: memref<1x128xf32, #tpu.memory_space<vmem>>, %arg12: memref<8x128xf32, #tpu.memory_space<vmem>>) attributes {dimension_semantics = [#tpu.dimension_semantics<parallel>], iteration_bounds = array<i64: 1>, scalar_prefetch = 0 : i64, scratch_operands = 0 : i64, tpu.core_type = #tpu.core_type<tc>, window_params = [{transform_indices = @transform_0, window_bounds = array<i64: 8, 256>}, {pipeline_mode = #tpu.pipeline_mode<synchronous>, transform_indices = @transform_1, window_bounds = array<i64: 256, 512>}, {pipeline_mode = #tpu.pipeline_mode<synchronous>, transform_indices = @transform_2, window_bounds = array<i64: 1, 512>}, {pipeline_mode = #tpu.pipeline_mode<synchronous>, transform_indices = @transform_3, window_bounds = array<i64: 512, 256>}, {pipeline_mode = #tpu.pipeline_mode<synchronous>, transform_indices = @transform_4, window_bounds = array<i64: 1, 256>}, {pipeline_mode = #tpu.pipeline_mode<synchronous>, transform_indices = @transform_5, window_bounds = array<i64: 256, 64>}, {pipeline_mode = #tpu.pipeline_mode<synchronous>, transform_indices = @transform_6, window_bounds = array<i64: 1, 64>}, {pipeline_mode = #tpu.pipeline_mode<synchronous>, transform_indices = @transform_7, window_bounds = array<i64: 64, 64>}, {pipeline_mode = #tpu.pipeline_mode<synchronous>, transform_indices = @transform_8, window_bounds = array<i64: 1, 64>}, {pipeline_mode = #tpu.pipeline_mode<synchronous>, transform_indices = @transform_9, window_bounds = array<i64: 64, 128>}, {pipeline_mode = #tpu.pipeline_mode<synchronous>, transform_indices = @transform_10, window_bounds = array<i64: 1, 128>}, {transform_indices = @transform_11, window_bounds = array<i64: 8, 128>}]} {
    %c0 = arith.constant 0 : index
    %c0_0 = arith.constant 0 : index
    %0 = vector.load %arg1[%c0, %c0_0] : memref<8x256xf32, #tpu.memory_space<vmem>>, vector<8x256xf32>
    %c0_1 = arith.constant 0 : index
    %c0_2 = arith.constant 0 : index
    %1 = vector.load %arg2[%c0_1, %c0_2] : memref<256x512xf32, #tpu.memory_space<vmem>>, vector<256x512xf32>
    %cst = arith.constant dense<0.000000e+00> : vector<8x512xf32>
    %2 = tpu.matmul %0, %1, %cst {dimension_numbers = #tpu.dot_dimension_numbers<[1], [0], [0], [1], [0, 0, 1, 1], [], []>, precision = #tpu.contract_precision<fp32>} : vector<8x256xf32>, vector<256x512xf32>, vector<8x512xf32> -> vector<8x512xf32>
    %c0_3 = arith.constant 0 : index
    %c0_4 = arith.constant 0 : index
    %3 = vector.load %arg3[%c0_3, %c0_4] : memref<1x512xf32, #tpu.memory_space<vmem>>, vector<1x512xf32>
    %4 = vector.broadcast %3 : vector<1x512xf32> to vector<8x512xf32>
    %5 = arith.addf %2, %4 : vector<8x512xf32>
    %cst_5 = arith.constant 0.000000e+00 : f32
    %6 = vector.broadcast %cst_5 : f32 to vector<8x512xf32>
    %7 = arith.maximumf %5, %6 : vector<8x512xf32>
    %c0_6 = arith.constant 0 : index
    %c0_7 = arith.constant 0 : index
    %8 = vector.load %arg4[%c0_6, %c0_7] : memref<512x256xf32, #tpu.memory_space<vmem>>, vector<512x256xf32>
    %cst_8 = arith.constant dense<0.000000e+00> : vector<8x256xf32>
    %9 = tpu.matmul %7, %8, %cst_8 {dimension_numbers = #tpu.dot_dimension_numbers<[1], [0], [0], [1], [0, 0, 1, 1], [], []>, precision = #tpu.contract_precision<fp32>} : vector<8x512xf32>, vector<512x256xf32>, vector<8x256xf32> -> vector<8x256xf32>
    %c0_9 = arith.constant 0 : index
    %c0_10 = arith.constant 0 : index
    %10 = vector.load %arg5[%c0_9, %c0_10] : memref<1x256xf32, #tpu.memory_space<vmem>>, vector<1x256xf32>
    %11 = vector.broadcast %10 : vector<1x256xf32> to vector<8x256xf32>
    %12 = arith.addf %9, %11 : vector<8x256xf32>
    %cst_11 = arith.constant 0.000000e+00 : f32
    %13 = vector.broadcast %cst_11 : f32 to vector<8x256xf32>
    %14 = arith.maximumf %12, %13 : vector<8x256xf32>
    %c0_12 = arith.constant 0 : index
    %c0_13 = arith.constant 0 : index
    %15 = vector.load %arg6[%c0_12, %c0_13] : memref<256x64xf32, #tpu.memory_space<vmem>>, vector<256x64xf32>
    %cst_14 = arith.constant dense<0.000000e+00> : vector<8x64xf32>
    %16 = tpu.matmul %14, %15, %cst_14 {dimension_numbers = #tpu.dot_dimension_numbers<[1], [0], [0], [1], [0, 0, 1, 1], [], []>, precision = #tpu.contract_precision<fp32>} : vector<8x256xf32>, vector<256x64xf32>, vector<8x64xf32> -> vector<8x64xf32>
    %c0_15 = arith.constant 0 : index
    %c0_16 = arith.constant 0 : index
    %17 = vector.load %arg7[%c0_15, %c0_16] : memref<1x64xf32, #tpu.memory_space<vmem>>, vector<1x64xf32>
    %18 = vector.broadcast %17 : vector<1x64xf32> to vector<8x64xf32>
    %19 = arith.addf %16, %18 : vector<8x64xf32>
    %cst_17 = arith.constant 0.000000e+00 : f32
    %20 = vector.broadcast %cst_17 : f32 to vector<8x64xf32>
    %21 = arith.maximumf %19, %20 : vector<8x64xf32>
    %c0_18 = arith.constant 0 : index
    %c0_19 = arith.constant 0 : index
    %22 = vector.load %arg8[%c0_18, %c0_19] : memref<64x64xf32, #tpu.memory_space<vmem>>, vector<64x64xf32>
    %cst_20 = arith.constant dense<0.000000e+00> : vector<8x64xf32>
    %23 = tpu.matmul %21, %22, %cst_20 {dimension_numbers = #tpu.dot_dimension_numbers<[1], [0], [0], [1], [0, 0, 1, 1], [], []>, precision = #tpu.contract_precision<fp32>} : vector<8x64xf32>, vector<64x64xf32>, vector<8x64xf32> -> vector<8x64xf32>
    %c0_21 = arith.constant 0 : index
    %c0_22 = arith.constant 0 : index
    %24 = vector.load %arg9[%c0_21, %c0_22] : memref<1x64xf32, #tpu.memory_space<vmem>>, vector<1x64xf32>
    %25 = vector.broadcast %24 : vector<1x64xf32> to vector<8x64xf32>
    %26 = arith.addf %23, %25 : vector<8x64xf32>
    %cst_23 = arith.constant 0.000000e+00 : f32
    %27 = vector.broadcast %cst_23 : f32 to vector<8x64xf32>
    %28 = arith.maximumf %26, %27 : vector<8x64xf32>
    %c0_24 = arith.constant 0 : index
    %c0_25 = arith.constant 0 : index
    %29 = vector.load %arg10[%c0_24, %c0_25] : memref<64x128xf32, #tpu.memory_space<vmem>>, vector<64x128xf32>
    %cst_26 = arith.constant dense<0.000000e+00> : vector<8x128xf32>
    %30 = tpu.matmul %28, %29, %cst_26 {dimension_numbers = #tpu.dot_dimension_numbers<[1], [0], [0], [1], [0, 0, 1, 1], [], []>, precision = #tpu.contract_precision<fp32>} : vector<8x64xf32>, vector<64x128xf32>, vector<8x128xf32> -> vector<8x128xf32>
    %c0_27 = arith.constant 0 : index
    %c0_28 = arith.constant 0 : index
    %31 = vector.load %arg11[%c0_27, %c0_28] : memref<1x128xf32, #tpu.memory_space<vmem>>, vector<1x128xf32>
    %32 = vector.broadcast %31 : vector<1x128xf32> to vector<8x128xf32>
    %33 = arith.addf %30, %32 : vector<8x128xf32>
    %c0_29 = arith.constant 0 : index
    %c0_30 = arith.constant 0 : index
    %34 = vector.load %arg12[%c0_29, %c0_30] : memref<8x128xf32, #tpu.memory_space<vmem>>, vector<8x128xf32>
    tpu.vector_store %arg12[%c0_29, %c0_30], %33 {strides = array<i32>} : memref<8x128xf32, #tpu.memory_space<vmem>>, vector<8x128xf32>,
    return
  }
  func.func @transform_0(%arg0: i32) -> (i32, i32) {
    %c0_i32 = arith.constant 0 : i32
    %c0_i32_0 = arith.constant 0 : i32
    return %arg0, %c0_i32 : i32, i32
  }
  func.func @transform_1(%arg0: i32) -> (i32, i32) {
    %c0_i32 = arith.constant 0 : i32
    %c0_i32_0 = arith.constant 0 : i32
    %c0_i32_1 = arith.constant 0 : i32
    return %c0_i32, %c0_i32_0 : i32, i32
  }
  func.func @transform_2(%arg0: i32) -> (i32, i32) {
    %c0_i32 = arith.constant 0 : i32
    %c0_i32_0 = arith.constant 0 : i32
    %c0_i32_1 = arith.constant 0 : i32
    return %c0_i32, %c0_i32_0 : i32, i32
  }
  func.func @transform_3(%arg0: i32) -> (i32, i32) {
    %c0_i32 = arith.constant 0 : i32
    %c0_i32_0 = arith.constant 0 : i32
    %c0_i32_1 = arith.constant 0 : i32
    return %c0_i32, %c0_i32_0 : i32, i32
  }
  func.func @transform_4(%arg0: i32) -> (i32, i32) {
    %c0_i32 = arith.constant 0 : i32
    %c0_i32_0 = arith.constant 0 : i32
    %c0_i32_1 = arith.constant 0 : i32
    return %c0_i32, %c0_i32_0 : i32, i32
  }
  func.func @transform_5(%arg0: i32) -> (i32, i32) {
    %c0_i32 = arith.constant 0 : i32
    %c0_i32_0 = arith.constant 0 : i32
    %c0_i32_1 = arith.constant 0 : i32
    return %c0_i32, %c0_i32_0 : i32, i32
  }
  func.func @transform_6(%arg0: i32) -> (i32, i32) {
    %c0_i32 = arith.constant 0 : i32
    %c0_i32_0 = arith.constant 0 : i32
    %c0_i32_1 = arith.constant 0 : i32
    return %c0_i32, %c0_i32_0 : i32, i32
  }
  func.func @transform_7(%arg0: i32) -> (i32, i32) {
    %c0_i32 = arith.constant 0 : i32
    %c0_i32_0 = arith.constant 0 : i32
    %c0_i32_1 = arith.constant 0 : i32
    return %c0_i32, %c0_i32_0 : i32, i32
  }
  func.func @transform_8(%arg0: i32) -> (i32, i32) {
    %c0_i32 = arith.constant 0 : i32
    %c0_i32_0 = arith.constant 0 : i32
    %c0_i32_1 = arith.constant 0 : i32
    return %c0_i32, %c0_i32_0 : i32, i32
  }
  func.func @transform_9(%arg0: i32) -> (i32, i32) {
    %c0_i32 = arith.constant 0 : i32
    %c0_i32_0 = arith.constant 0 : i32
    %c0_i32_1 = arith.constant 0 : i32
    return %c0_i32, %c0_i32_0 : i32, i32
  }
  func.func @transform_10(%arg0: i32) -> (i32, i32) {
    %c0_i32 = arith.constant 0 : i32
    %c0_i32_0 = arith.constant 0 : i32
    %c0_i32_1 = arith.constant 0 : i32
    return %c0_i32, %c0_i32_0 : i32, i32
  }
  func.func @transform_11(%arg0: i32) -> (i32, i32) {
    %c0_i32 = arith.constant 0 : i32
    %c0_i32_0 = arith.constant 0 : i32
    return %arg0, %c0_i32 : i32, i32
  }
}

</mosaic_0001>

<bundles_post_ra>
// kernel: tpu_custom_call.1
= control target key start
LH: loop header
LB: loop body
LE: loop exit
PB: predicated region body
PF: predicated region fallthrough
CT: control target
= control target key end

     0   :  { %16 = vsyncpa [#allocation3], 0  ;;  %s14904_s0 = inlined_call_operand.vmem [shape: f32[8,256], index: 0, kind: input, shape index: {}]   ;;  %s14905_s1 = inlined_call_operand.hbm [shape: f32[256,512], index: 1, kind: input, shape index: {}]   ;;  %s14906_s2 = inlined_call_operand.vmem [shape: f32[1,512], index: 2, kind: input, shape index: {}]   ;;  %s14907_s3 = inlined_call_operand.hbm [shape: f32[512,256], index: 3, kind: input, shape index: {}]   ;;  %s14908_s4 = inlined_call_operand.vmem [shape: f32[1,256], index: 4, kind: input, shape index: {}]   ;;  %s14909_s5 = inlined_call_operand.vmem [shape: f32[256,64], index: 5, kind: input, shape index: {}]   ;;  %s14910_s6 = inlined_call_operand.vmem [shape: f32[1,64], index: 6, kind: input, shape index: {}]   ;;  %s14911_s7 = inlined_call_operand.vmem [shape: f32[64,64], index: 7, kind: input, shape index: {}]   ;;  %s14912_s8 = inlined_call_operand.vmem [shape: f32[1,64], index: 8, kind: input, shape index: {}]   ;;  %s14913_s9 = inlined_call_operand.vmem [shape: f32[64,128], index: 9, kind: input, shape index: {}]   ;;  %s14914_s10 = inlined_call_operand.vmem [shape: f32[1,128], index: 10, kind: input, shape index: {}]   ;;  %s14915_s11 = inlined_call_operand.hbm [shape: f32[8,128], index: 11, kind: output, shape index: {}]  }
   0x1   :  { %17 = vsyncpa [#allocation6], 0 }
   0x2   :  { %18 = vsyncpa [#allocation4], 0  ;;  %s10106_s17 = smov [#allocation2]   ;;  %s10034_s21 = scalar_lea.hbm %s14905_s1, 16384 }
   0x3   :  { %s26_s18 = sshll.u32 %s10106_s17, 4  ;;  %p10035_p0 = scmp.ne.s32.totalorder %s14905_s1, %s10034_s21  ;;  %s27_s18 = int_to_ptr.vmem [resolvable:$true] %s26_s18 }
   0x4   :  { %p10038_p1 = scmp.lt.u32.totalorder %s10034_s21, %s14905_s1 }
   0x6   :  { %p10040_p2 = pnand %p10038_p1, %p10035_p0 }
   0x8   :  { %10043 = shalt.err (!%p10040_p2)
}
   0x9   :  { %s10044_s26 = scalar_lea.vmem %s27_s18, 16384  ;;  %p10049_p4 = scmp.lt.s32.totalorder %s27_s18, %s27_s18 }
   0xa   :  { %p10045_p3 = scmp.ne.s32.totalorder %s27_s18, %s10044_s26  ;;  %p10050_p5 = scmp.lt.s32.totalorder %s10044_s26, %s10044_s26 }
   0xc   :  { %p10051_p6 = por %p10050_p5, %p10049_p4 }
   0xe   :  { %p10052_p7 = pnand %p10051_p6, %p10045_p3 }
  0x10   :  { %10055 = shalt.err (!%p10052_p7)
}
  0x11   :  { %s10107_s27 = smov 512   ;;  %s10108_s28 = smov 32  }
  0x12   :  { %32 = dma.hbm_to_vmem [thread:$0]  %s14905_s1, 16384, %s27_s18, [#allocation3], %s10107_s27, %s10107_s27, %s10108_s28  }
  0x13   :  { %s10109_s12 = smov [#allocation5]   ;;  %s10056_s16 = scalar_lea.hbm %s14907_s3, 16384 }
  0x14   :  { %s40_s13 = sshll.u32 %s10109_s12, 4  ;;  %p10057_p8 = scmp.ne.s32.totalorder %s14907_s3, %s10056_s16  ;;  %s41_s13 = int_to_ptr.vmem [resolvable:$true] %s40_s13 }
  0x15   :  { %p10060_p9 = scmp.lt.u32.totalorder %s10056_s16, %s14907_s3 }
  0x17   :  { %p10062_p10 = pnand %p10060_p9, %p10057_p8 }
  0x19   :  { %10065 = shalt.err (!%p10062_p10)
}
  0x1a   :  { %s10066_s22 = scalar_lea.vmem %s41_s13, 16384  ;;  %p10071_p12 = scmp.lt.s32.totalorder %s41_s13, %s41_s13 }
  0x1b   :  { %p10067_p11 = scmp.ne.s32.totalorder %s41_s13, %s10066_s22  ;;  %p10072_p13 = scmp.lt.s32.totalorder %s10066_s22, %s10066_s22 }
  0x1d   :  { %p10073_p0 = por %p10072_p13, %p10071_p12 }
  0x1f   :  { %p10074_p1 = pnand %p10073_p0, %p10067_p11 }
  0x21   :  { %10077 = shalt.err (!%p10074_p1)
}
  0x22   :  { %s10110_s1 = smov 256   ;;  %s10111_s18 = smov 16  }
  0x23   :  { %46 = dma.hbm_to_vmem [thread:$0]  %s14907_s3, 16384, %s41_s13, [#allocation6], %s10110_s1, %s10110_s1, %s10111_s18  }
  0x24   :  { %10100 = dma.done.wait [#allocation3], 16384  }
  0x25   :  { %10101 = vsyncadd [#allocation3], 4294950912 }
  0x26   :  { %10102 = dma.done.wait [#allocation6], 16384  }
  0x27   :  { %10103 = vsyncadd [#allocation6], 4294950912  ;;  %v70_v0 = vld [vmem:[#allocation2 + $0x8] sm:$0xff]  ;;  %v69_v2 = vld [vmem:[#allocation2] sm:$0xff]  ;;  %vm10113_vm0 = vmmov 0   ;;  %vm6418_vm1 = vcmask 523264  }
  0x28   :  { %v74_v1 = vld [vmem:[#allocation2 + $0x28] sm:$0xff]  ;;  %v219_v3 = vand.u32 4294901760, %v70_v0  ;;  %v73_v5 = vld [vmem:[#allocation2 + $0x20] sm:$0xff]  ;;  %v221_v6 = vand.u32 4294901760, %v69_v2  ;;  %s10115_s15 = smov [#allocation7]  }
  0x29   :  { %v223_v4 = vand.u32 4294901760, %v74_v1  ;;  %v78_v7 = vld [vmem:[#allocation2 + $0x48] sm:$0xff]  ;;  %v225_v9 = vand.u32 4294901760, %v73_v5  ;;  %v77_v12 = vld [vmem:[#allocation2 + $0x40] sm:$0xff] }
  0x2a   :  { %v82_v8 = vld [vmem:[#allocation2 + $0x68] sm:$0xff]  ;;  %v227_v10 = vand.u32 4294901760, %v78_v7  ;;  %v81_v13 = vld [vmem:[#allocation2 + $0x60] sm:$0xff]  ;;  %v229_v23 = vand.u32 4294901760, %v77_v12  ;;  %v10233_v45 = vsub.f32 %v70_v0, %v219_v3  ;;  %v10237_v47 = vsub.f32 %v69_v2, %v221_v6 }
  0x2b   :  { %v231_v11 = vand.u32 4294901760, %v82_v8  ;;  %v86_v14 = vld [vmem:[#allocation2 + $0x88] sm:$0xff]  ;;  %v10200_v15 = vpack.c.bf16 %v223_v4, %v219_v3  ;;  %v10204_v17 = vld [vmem:[#allocation2 + $0x80] sm:$0xff]  ;;  %v10208_v19 = vpack.c.bf16 %v225_v9, %v221_v6  ;;  %v233_v24 = vand.u32 4294901760, %v81_v13 }
  0x2c   :  { %v10202_v16 = vld [vmem:[#allocation2 + $0xa8] sm:$0xff]  ;;  %v10206_v18 = vld [vmem:[#allocation2 + $0xa0] sm:$0xff]  ;;  %v235_v25 = vand.u32 4294901760, %v86_v14  ;;  %v237_v27 = vand.u32 4294901760, %v10204_v17  ;;  %15730 = vst [vmem:[#allocation18_spill] sm:$0xff] %v10233_v45  ;;  %v10235_v46 = vsub.f32 %v74_v1, %v223_v4  ;;  %15732 = vst [vmem:[#allocation20_spill] sm:$0xff] %v10237_v47  ;;  %v10239_v50 = vsub.f32 %v73_v5, %v225_v9 }
  0x2d   :  { %15723 = vst [vmem:[#allocation11_spill] sm:$0xff] %v10200_v15  ;;  %15724 = vst [vmem:[#allocation12_spill] sm:$0xff] %v10208_v19  ;;  %v10210_v20 = vpack.c.bf16 %v231_v11, %v227_v10  ;;  %v94_v21 = vld [vmem:[#allocation2 + $0xc8] sm:$0xff]  ;;  %8082 = vmatprep.subr.bf16.mxu1 %v10200_v15  ;;  %8274 = vmatprep.subr.bf16.mxu0 %v10200_v15  ;;  %v239_v26 = vand.u32 4294901760, %v10202_v16  ;;  %v241_v28 = vand.u32 4294901760, %v10206_v18  ;;  %v93_v32 = vld [vmem:[#allocation2 + $0xc0] sm:$0xff] }
  0x2e   :  { %v98_v22 = vld [vmem:[#allocation2 + $0xe8] sm:$0xff]  ;;  %8084 = vmatpush1.bf16.msra.mxu1 %v10208_v19  ;;  %8276 = vmatpush1.bf16.msra.mxu0 %v10208_v19  ;;  %v10221_v29 = vpack.c.bf16 %v233_v24, %v229_v23  ;;  %v243_v30 = vand.u32 4294901760, %v94_v21  ;;  %v97_v33 = vld [vmem:[#allocation2 + $0xe0] sm:$0xff]  ;;  %v245_v38 = vand.u32 4294901760, %v93_v32  ;;  %15731 = vst [vmem:[#allocation19_spill] sm:$0xff] %v10235_v46  ;;  %15733 = vst [vmem:[#allocation21_spill] sm:$0xff] %v10239_v50 }
  0x2f   :  { %15725 = vst [vmem:[#allocation13_spill] sm:$0xff] %v10210_v20  ;;  %8086 = vmatprep.subr.bf16.mxu1 %v10210_v20  ;;  %8278 = vmatprep.subr.bf16.mxu0 %v10210_v20  ;;  %v247_v31 = vand.u32 4294901760, %v98_v22  ;;  %v10223_v34 = vpack.c.bf16 %v239_v26, %v235_v25  ;;  %v102_v35 = vld [vmem:[#allocation2 + $0x108] sm:$0xff]  ;;  %v10227_v37 = vpack.c.bf16 %v241_v28, %v237_v27  ;;  %v249_v39 = vand.u32 4294901760, %v97_v33  ;;  %v101_v43 = vld [vmem:[#allocation2 + $0x100] sm:$0xff] }
  0x30   :  { %15726 = vst [vmem:[#allocation14_spill] sm:$0xff] %v10221_v29  ;;  %v106_v36 = vld [vmem:[#allocation2 + $0x128] sm:$0xff]  ;;  %v251_v41 = vand.u32 4294901760, %v102_v35  ;;  %v105_v44 = vld [vmem:[#allocation2 + $0x120] sm:$0xff]  ;;  %v10241_v51 = vsub.f32 %v78_v7, %v227_v10  ;;  %v10243_v52 = vsub.f32 %v82_v8, %v231_v11  ;;  %v10245_v53 = vsub.f32 %v77_v12, %v229_v23 }
  0x31   :  { %15727 = vst [vmem:[#allocation15_spill] sm:$0xff] %v10223_v34  ;;  %15728 = vst [vmem:[#allocation16_spill] sm:$0xff] %v10227_v37  ;;  %v10231_v40 = vpack.c.bf16 %v247_v31, %v243_v30  ;;  %v255_v42 = vand.u32 4294901760, %v106_v36  ;;  %v110_v48 = vld [vmem:[#allocation2 + $0x148] sm:$0xff]  ;;  %v10247_v54 = vsub.f32 %v81_v13, %v233_v24  ;;  %v10251_v55 = vpack.c.bf16 %v249_v39, %v245_v38  ;;  %v109_v58 = vld [vmem:[#allocation2 + $0x140] sm:$0xff] }
  0x32   :  { %8088 = vmatpush1.bf16.msra.mxu1 %v10221_v29  ;;  %8280 = vmatpush1.bf16.msra.mxu0 %v10221_v29  ;;  %v114_v49 = vld [vmem:[#allocation2 + $0x168] sm:$0xff]  ;;  %15734 = vst [vmem:[#allocation22_spill] sm:$0xff] %v10241_v51  ;;  %15735 = vst [vmem:[#allocation23_spill] sm:$0xff] %v10243_v52  ;;  %v253_v56 = vand.u32 4294901760, %v101_v43  ;;  %v257_v57 = vand.u32 4294901760, %v105_v44  ;;  %v113_v59 = vld [vmem:[#allocation2 + $0x160] sm:$0xff]  ;;  %v10253_v60 = vsub.f32 %v86_v14, %v235_v25 }
  0x33   :  { %8090 = vmatprep.subr.bf16.mxu1 %v10223_v34  ;;  %8282 = vmatprep.subr.bf16.mxu0 %v10223_v34  ;;  %15729 = vst [vmem:[#allocation17_spill] sm:$0xff] %v10231_v40  ;;  %15736 = vst [vmem:[#allocation24_spill] sm:$0xff] %v10251_v55  ;;  %v10257_v61 = vpack.c.bf16 %v255_v42, %v251_v41  ;;  %v259_v62 = vand.u32 4294901760, %v110_v48  ;;  %v263_v63 = vand.u32 4294901760, %v114_v49  ;;  %v118_v0 = vld [vmem:[#allocation2 + $0x188] sm:$0xff]  ;;  %v261_v8 = vand.u32 4294901760, %v109_v58 }
  0x34   :  { %v122_v1 = vld [vmem:[#allocation2 + $0x1a8] sm:$0xff]  ;;  %v10260_v2 = vsub.f32 %v10202_v16, %v239_v26  ;;  %v10263_v3 = vsub.f32 %v10204_v17, %v237_v27  ;;  %v10266_v4 = vsub.f32 %v10206_v18, %v241_v28  ;;  %v10268_v5 = vsub.f32 %v94_v21, %v243_v30  ;;  %v117_v10 = vld [vmem:[#allocation2 + $0x180] sm:$0xff] }
  0x35   :  { %15737 = vst [vmem:[#allocation25_spill] sm:$0xff] %v10257_v61  ;;  %v10270_v6 = vsub.f32 %v98_v22, %v247_v31  ;;  %v10272_v7 = vsub.f32 %v93_v32, %v245_v38  ;;  %v265_v9 = vand.u32 4294901760, %v113_v59  ;;  %v121_v11 = vld [vmem:[#allocation2 + $0x1a0] sm:$0xff]  ;;  %v10275_v12 = vsub.f32 %v97_v33, %v249_v39  ;;  %v126_v22 = vld [vmem:[#allocation2 + $0x1c8] sm:$0xff] }
  0x36   :  { %8092 = vmatpush1.bf16.msra.mxu1 %v10227_v37  ;;  %8284 = vmatpush1.bf16.msra.mxu0 %v10227_v37  ;;  %15738 = vst [vmem:[#allocation26_spill] sm:$0xff] %v10266_v4  ;;  %15739 = vst [vmem:[#allocation27_spill] sm:$0xff] %v10268_v5  ;;  %v10278_v13 = vpack.c.bf16 %v257_v57, %v253_v56  ;;  %v267_v14 = vand.u32 4294901760, %v118_v0  ;;  %v271_v16 = vand.u32 4294901760, %v122_v1  ;;  %v130_v23 = vld [vmem:[#allocation2 + $0x1e8] sm:$0xff]  ;;  %v269_v26 = vand.u32 4294901760, %v117_v10 }
  0x37   :  { %8094 = vmatprep.subr.bf16.mxu1 %v10231_v40  ;;  %8286 = vmatprep.subr.bf16.mxu0 %v10231_v40  ;;  %15740 = vst [vmem:[#allocation28_spill] sm:$0xff] %v10272_v7  ;;  %15741 = vst [vmem:[#allocation29_spill] sm:$0xff] %v10275_v12  ;;  %v10281_v17 = vsub.f32 %v102_v35, %v251_v41  ;;  %v10283_v18 = vsub.f32 %v106_v36, %v255_v42  ;;  %v273_v27 = vand.u32 4294901760, %v121_v11  ;;  %v125_v28 = vld [vmem:[#allocation2 + $0x1c0] sm:$0xff]  ;;  %v134_v36 = vld [vmem:[#allocation2 + $0x208] sm:$0xff] }
  0x38   :  { %15742 = vst [vmem:[#allocation30_spill] sm:$0xff] %v10278_v13  ;;  %v10286_v21 = vpack.c.bf16 %v263_v63, %v259_v62  ;;  %v10288_v24 = vsub.f32 %v101_v43, %v253_v56  ;;  %v10290_v25 = vsub.f32 %v105_v44, %v257_v57  ;;  %v129_v30 = vld [vmem:[#allocation2 + $0x1e0] sm:$0xff]  ;;  %v10292_v31 = vsub.f32 %v110_v48, %v259_v62  ;;  %v138_v38 = vld [vmem:[#allocation2 + $0x228] sm:$0xff] }
  0x39   :  { %15743 = vst [vmem:[#allocation31_spill] sm:$0xff] %v10281_v17  ;;  %15744 = vst [vmem:[#allocation32_spill] sm:$0xff] %v10283_v18  ;;  %v10294_v32 = vsub.f32 %v114_v49, %v263_v63  ;;  %v10296_v33 = vpack.c.bf16 %v265_v9, %v261_v8  ;;  %v10298_v35 = vsub.f32 %v109_v58, %v261_v8  ;;  %v275_v42 = vand.u32 4294901760, %v126_v22  ;;  %v133_v44 = vld [vmem:[#allocation2 + $0x200] sm:$0xff]  ;;  %v142_v62 = vld [vmem:[#allocation2 + $0x248] sm:$0xff] }
  0x3a   :  { %8096 = vmatpush1.bf16.msra.mxu1 %v10251_v55  ;;  %8288 = vmatpush1.bf16.msra.mxu0 %v10251_v55  ;;  %15745 = vst [vmem:[#allocation33_spill] sm:$0xff] %v10286_v21  ;;  %15746 = vst [vmem:[#allocation34_spill] sm:$0xff] %v10288_v24  ;;  %v10302_v39 = vsub.f32 %v113_v59, %v265_v9  ;;  %v10304_v41 = vpack.c.bf16 %v271_v16, %v267_v14  ;;  %v279_v43 = vand.u32 4294901760, %v130_v23  ;;  %v137_v48 = vld [vmem:[#allocation2 + $0x220] sm:$0xff]  ;;  %v146_v63 = vld [vmem:[#allocation2 + $0x268] sm:$0xff] }
  0x3b   :  { %8098 = vmatprep.subr.bf16.mxu1 %v10257_v61  ;;  %8290 = vmatprep.subr.bf16.mxu0 %v10257_v61  ;;  %15747 = vst [vmem:[#allocation35_spill] sm:$0xff] %v10290_v25  ;;  %15748 = vst [vmem:[#allocation36_spill] sm:$0xff] %v10292_v31  ;;  %v10308_v49 = vsub.f32 %v118_v0, %v267_v14  ;;  %v10310_v56 = vsub.f32 %v122_v1, %v271_v16  ;;  %v277_v57 = vand.u32 4294901760, %v125_v28  ;;  %v141_v61 = vld [vmem:[#allocation2 + $0x240] sm:$0xff]  ;;  %v154_v34 = vld [vmem:[#allocation2 + $0x2a8] sm:$0xff] }
  0x3c   :  { %15749 = vst [vmem:[#allocation37_spill] sm:$0xff] %v10294_v32  ;;  %15750 = vst [vmem:[#allocation38_spill] sm:$0xff] %v10296_v33  ;;  %v281_v58 = vand.u32 4294901760, %v129_v30  ;;  %v10312_v59 = vpack.c.bf16 %v273_v27, %v269_v26  ;;  %v10314_v8 = vsub.f32 %v117_v10, %v269_v26  ;;  %v283_v9 = vand.u32 4294901760, %v134_v36  ;;  %v145_v55 = vld [vmem:[#allocation2 + $0x260] sm:$0xff] }
  0x3d   :  { %15751 = vst [vmem:[#allocation39_spill] sm:$0xff] %v10298_v35  ;;  %15752 = vst [vmem:[#allocation40_spill] sm:$0xff] %v10302_v39  ;;  %v10316_v40 = vsub.f32 %v121_v11, %v273_v27  ;;  %v10318_v37 = vsub.f32 %v126_v22, %v275_v42  ;;  %v285_v0 = vand.u32 4294901760, %v133_v44  ;;  %v289_v14 = vand.u32 4294901760, %v137_v48  ;;  %v149_v20 = vld [vmem:[#allocation2 + $0x280] sm:$0xff] }
  0x3e   :  { %8100 = vmatpush1.bf16.msra.mxu1 %v10278_v13  ;;  %8292 = vmatpush1.bf16.msra.mxu0 %v10278_v13  ;;  %15753 = vst [vmem:[#allocation41_spill] sm:$0xff] %v10304_v41  ;;  %15754 = vst [vmem:[#allocation42_spill] sm:$0xff] %v10308_v49  ;;  %v287_v13 = vand.u32 4294901760, %v138_v38  ;;  %v10322_v1 = vpack.c.bf16 %v279_v43, %v275_v42  ;;  %v10324_v16 = vsub.f32 %v130_v23, %v279_v43 }
  0x3f   :  { %8102 = vmatprep.subr.bf16.mxu1 %v10286_v21  ;;  %8294 = vmatprep.subr.bf16.mxu0 %v10286_v21  ;;  %15755 = vst [vmem:[#allocation43_spill] sm:$0xff] %v10310_v56  ;;  %15756 = vst [vmem:[#allocation44_spill] sm:$0xff] %v10312_v59  ;;  %v291_v10 = vand.u32 4294901760, %v142_v62  ;;  %v295_v26 = vand.u32 4294901760, %v146_v63  ;;  %v150_v21 = vld [vmem:[#allocation2 + $0x288] sm:$0xff]  ;;  %v10328_v11 = vpack.c.bf16 %v281_v58, %v277_v57  ;;  %v293_v27 = vand.u32 4294901760, %v141_v61 }
  0x40   :  { %15757 = vst [vmem:[#allocation45_spill] sm:$0xff] %v10314_v8  ;;  %15758 = vst [vmem:[#allocation46_spill] sm:$0xff] %v10316_v40  ;;  %v10330_v22 = vsub.f32 %v125_v28, %v277_v57  ;;  %v297_v29 = vand.u32 4294901760, %v145_v55  ;;  %v10332_v42 = vsub.f32 %v129_v30, %v281_v58  ;;  %v10334_v23 = vpack.c.bf16 %v287_v13, %v283_v9  ;;  %v158_v28 = vld [vmem:[#allocation2 + $0x2c8] sm:$0xff] }
  0x41   :  { %15759 = vst [vmem:[#allocation47_spill] sm:$0xff] %v10318_v37  ;;  %15760 = vst [vmem:[#allocation48_spill] sm:$0xff] %v10322_v1  ;;  %v10336_v43 = vsub.f32 %v134_v36, %v283_v9  ;;  %v10338_v19 = vsub.f32 %v138_v38, %v287_v13  ;;  %v10340_v15 = vpack.c.bf16 %v289_v14, %v285_v0  ;;  %v303_v37 = vand.u32 4294901760, %v154_v34  ;;  %v162_v57 = vld [vmem:[#allocation2 + $0x2e8] sm:$0xff]  ;;  %v157_v13 = vld [vmem:[#allocation2 + $0x2c0] sm:$0xff] }
  0x42   :  { %8104 = vmatpush1.bf16.msra.mxu1 %v10296_v33  ;;  %8296 = vmatpush1.bf16.msra.mxu0 %v10296_v33  ;;  %15761 = vst [vmem:[#allocation49_spill] sm:$0xff] %v10324_v16  ;;  %15762 = vst [vmem:[#allocation50_spill] sm:$0xff] %v10328_v11  ;;  %v153_v33 = vld [vmem:[#allocation2 + $0x2a0] sm:$0xff]  ;;  %v10342_v16 = vsub.f32 %v133_v44, %v285_v0  ;;  %v10346_v30 = vsub.f32 %v137_v48, %v289_v14  ;;  %v301_v36 = vand.u32 4294901760, %v149_v20 }
  0x43   :  { %8106 = vmatprep.subr.bf16.mxu1 %v10304_v41  ;;  %8298 = vmatprep.subr.bf16.mxu0 %v10304_v41  ;;  %15763 = vst [vmem:[#allocation51_spill] sm:$0xff] %v10330_v22  ;;  %15764 = vst [vmem:[#allocation52_spill] sm:$0xff] %v10332_v42  ;;  %v299_v41 = vand.u32 4294901760, %v150_v21  ;;  %v10348_v58 = vpack.c.bf16 %v295_v26, %v291_v10  ;;  %v305_v9 = vand.u32 4294901760, %v153_v33  ;;  %v161_v38 = vld [vmem:[#allocation2 + $0x2e0] sm:$0xff] }
  0x44   :  { %15765 = vst [vmem:[#allocation53_spill] sm:$0xff] %v10334_v23  ;;  %15766 = vst [vmem:[#allocation54_spill] sm:$0xff] %v10336_v43  ;;  %v10352_v44 = vsub.f32 %v142_v62, %v291_v10  ;;  %v10354_v0 = vsub.f32 %v146_v63, %v295_v26  ;;  %v10358_v48 = vsub.f32 %v141_v61, %v293_v27  ;;  %v311_v43 = vand.u32 4294901760, %v162_v57  ;;  %v165_v42 = vld [vmem:[#allocation2 + $0x300] sm:$0xff]  ;;  %v174_v63 = vld [vmem:[#allocation2 + $0x348] sm:$0xff] }
  0x45   :  { %15767 = vst [vmem:[#allocation55_spill] sm:$0xff] %v10338_v19  ;;  %15768 = vst [vmem:[#allocation56_spill] sm:$0xff] %v10340_v15  ;;  %v166_v19 = vld [vmem:[#allocation2 + $0x308] sm:$0xff]  ;;  %v10360_v14 = vsub.f32 %v145_v55, %v297_v29  ;;  %v169_v22 = vld [vmem:[#allocation2 + $0x320] sm:$0xff]  ;;  %v10362_v40 = vpack.c.bf16 %v303_v37, %v299_v41  ;;  %v10364_v8 = vsub.f32 %v150_v21, %v299_v41  ;;  %v309_v62 = vand.u32 4294901760, %v157_v13 }
  0x46   :  { %15769 = vst [vmem:[#allocation57_spill] sm:$0xff] %v10342_v16  ;;  %8108 = vmatpush1.bf16.msra.mxu1 %v10312_v59  ;;  %8300 = vmatpush1.bf16.msra.mxu0 %v10312_v59  ;;  %15770 = vst [vmem:[#allocation58_spill] sm:$0xff] %v10346_v30  ;;  %v10356_v16 = vpack.c.bf16 %v297_v29, %v293_v27  ;;  %v170_v59 = vld [vmem:[#allocation2 + $0x328] sm:$0xff]  ;;  %v307_v30 = vand.u32 4294901760, %v158_v28  ;;  %v313_v10 = vand.u32 4294901760, %v161_v38  ;;  %v315_v55 = vand.u32 4294901760, %v166_v19 }
  0x47   :  { %15771 = vst [vmem:[#allocation59_spill] sm:$0xff] %v10348_v58  ;;  %8110 = vmatprep.subr.bf16.mxu1 %v10322_v1  ;;  %8302 = vmatprep.subr.bf16.mxu0 %v10322_v1  ;;  %15772 = vst [vmem:[#allocation60_spill] sm:$0xff] %v10352_v44  ;;  %v178_v26 = vld [vmem:[#allocation2 + $0x368] sm:$0xff]  ;;  %v10368_v61 = vsub.f32 %v154_v34, %v303_v37  ;;  %v10370_v29 = vpack.c.bf16 %v305_v9, %v301_v36  ;;  %v319_v27 = vand.u32 4294901760, %v170_v59 }
  0x48   :  { %15773 = vst [vmem:[#allocation61_spill] sm:$0xff] %v10354_v0  ;;  %15774 = vst [vmem:[#allocation62_spill] sm:$0xff] %v10356_v16  ;;  %v10374_v21 = vsub.f32 %v149_v20, %v301_v36  ;;  %v10376_v41 = vsub.f32 %v153_v33, %v305_v9  ;;  %v317_v1 = vand.u32 4294901760, %v165_v42  ;;  %v323_v34 = vand.u32 4294901760, %v174_v63  ;;  %v68_v33 = vld [vmem:[%s14904_s0 + $0x8] sm:$0xff]  ;;  %v67_v9 = vld [vmem:[%s14904_s0] sm:$0xff] }
  0x49   :  { %15775 = vst [vmem:[#allocation63_spill] sm:$0xff] %v10358_v48  ;;  %15776 = vst [vmem:[#allocation64_spill] sm:$0xff] %v10360_v14  ;;  %v10378_v14 = vpack.c.bf16 %v311_v43, %v307_v30  ;;  %v10380_v48 = vsub.f32 %v158_v28, %v307_v30  ;;  %v327_v37 = vand.u32 4294901760, %v178_v26  ;;  %v10382_v0 = vsub.f32 %v162_v57, %v311_v43  ;;  %v182_v57 = vld [vmem:[#allocation2 + $0x388] sm:$0xff] }
  0x4a   :  { %15777 = vst [vmem:[#allocation65_spill] sm:$0xff] %v10362_v40  ;;  %15778 = vst [vmem:[#allocation66_spill] sm:$0xff] %v10364_v8  ;;  %8112 = vmatpush1.bf16.msra.mxu1 %v10328_v11  ;;  %8304 = vmatpush1.bf16.msra.mxu0 %v10328_v11  ;;  %v321_v8 = vand.u32 4294901760, %v169_v22  ;;  %v173_v11 = vld [vmem:[#allocation2 + $0x340] sm:$0xff]  ;;  %v10384_v44 = vpack.c.bf16 %v313_v10, %v309_v62  ;;  %v10386_v56 = vsub.f32 %v157_v13, %v309_v62  ;;  %v186_v36 = vld [vmem:[#allocation2 + $0x3a8] sm:$0xff] }
  0x4b   :  { %15779 = vst [vmem:[#allocation67_spill] sm:$0xff] %v10368_v61  ;;  %15780 = vst [vmem:[#allocation68_spill] sm:$0xff] %v10370_v29  ;;  %8114 = vmatprep.subr.bf16.mxu1 %v10334_v23  ;;  %8306 = vmatprep.subr.bf16.mxu0 %v10334_v23  ;;  %v177_v61 = vld [vmem:[#allocation2 + $0x360] sm:$0xff]  ;;  %v10388_v20 = vsub.f32 %v161_v38, %v313_v10  ;;  %v10395_v28 = vpack.c.bf16 %v319_v27, %v315_v55  ;;  %v325_v62 = vand.u32 4294901760, %v173_v11 }
  0x4c   :  { %15781 = vst [vmem:[#allocation69_spill] sm:$0xff] %v10374_v21  ;;  %15782 = vst [vmem:[#allocation70_spill] sm:$0xff] %v10376_v41  ;;  %v10397_v30 = vsub.f32 %v166_v19, %v315_v55  ;;  %v10399_v43 = vsub.f32 %v170_v59, %v319_v27  ;;  %v10406_v13 = vpack.c.bf16 %v321_v8, %v317_v1  ;;  %v329_v10 = vand.u32 4294901760, %v177_v61  ;;  %v181_v19 = vld [vmem:[#allocation2 + $0x380] sm:$0xff] }
  0x4d   :  { %15783 = vst [vmem:[#allocation71_spill] sm:$0xff] %v10378_v14  ;;  %15784 = vst [vmem:[#allocation72_spill] sm:$0xff] %v10380_v48  ;;  %v10408_v38 = vsub.f32 %v165_v42, %v317_v1  ;;  %v185_v55 = vld [vmem:[#allocation2 + $0x3a0] sm:$0xff]  ;;  %v10410_v59 = vsub.f32 %v169_v22, %v321_v8  ;;  %v10412_v27 = vpack.c.bf16 %v327_v37, %v323_v34  ;;  %v10416_v23 = vand.u32 4294901760, %v68_v33  ;;  %v190_v42 = vld [vmem:[#allocation2 + $0x3c8] sm:$0xff] }
  0x4e   :  { %15785 = vst [vmem:[#allocation73_spill] sm:$0xff] %v10382_v0  ;;  %15786 = vst [vmem:[#allocation74_spill] sm:$0xff] %v10384_v44  ;;  %8116 = vmatpush1.bf16.msra.mxu1 %v10340_v15  ;;  %8308 = vmatpush1.bf16.msra.mxu0 %v10340_v15  ;;  %v10414_v15 = vsub.f32 %v174_v63, %v323_v34  ;;  %v10424_v1 = vsub.f32 %v173_v11, %v325_v62  ;;  %v333_v8 = vand.u32 4294901760, %v181_v19 }
  0x4f   :  { %15787 = vst [vmem:[#allocation75_spill] sm:$0xff] %v10386_v56  ;;  %15788 = vst [vmem:[#allocation76_spill] sm:$0xff] %v10388_v20  ;;  %8118 = vmatprep.subr.bf16.mxu1 %v10348_v58  ;;  %8310 = vmatprep.subr.bf16.mxu0 %v10348_v58  ;;  %v335_v58 = vand.u32 4294901760, %v186_v36  ;;  %v10420_v20 = vand.u32 4294901760, %v67_v9  ;;  %v337_v22 = vand.u32 4294901760, %v185_v55  ;;  %v10427_v63 = vsub.f32 %v68_v33, %v10416_v23 }
  0x50   :  { %15789 = vst [vmem:[#allocation77_spill] sm:$0xff] %v10395_v28  ;;  %15790 = vst [vmem:[#allocation78_spill] sm:$0xff] %v10397_v30  ;;  %v331_v30 = vand.u32 4294901760, %v182_v57  ;;  %v10433_v34 = vsub.f32 %v177_v61, %v329_v10  ;;  %v366_v11 = vand.u32 4294901760, %v10233_v45  ;;  %v372_v33 = vand.u32 4294901760, %v10237_v47 }
  0x51   :  { %15791 = vst [vmem:[#allocation79_spill] sm:$0xff] %v10399_v43  ;;  %15792 = vst [vmem:[#allocation80_spill] sm:$0xff] %v10406_v13  ;;  %v10418_v43 = vsub.f32 %v178_v26, %v327_v37  ;;  %v10431_v26 = vpack.c.bf16 %v329_v10, %v325_v62  ;;  %v10446_v62 = vsub.f32 %v186_v36, %v335_v58  ;;  %v339_v61 = vand.u32 4294901760, %v190_v42 }
  0x52   :  { %15793 = vst [vmem:[#allocation81_spill] sm:$0xff] %v10408_v38  ;;  %15794 = vst [vmem:[#allocation82_spill] sm:$0xff] %v10410_v59  ;;  %8120 = vmatpush1.bf16.msra.mxu1 %v10356_v16  ;;  %8312 = vmatpush1.bf16.msra.mxu0 %v10356_v16  ;;  %v10435_v37 = vsub.f32 %v182_v57, %v331_v30  ;;  %v10439_v16 = vand.u32 4294901760, %v10427_v63  ;;  %v10444_v59 = vpack.c.bf16 %v335_v58, %v331_v30 }
  0x53   :  { %15795 = vst [vmem:[#allocation83_spill] sm:$0xff] %v10412_v27  ;;  %15796 = vst [vmem:[#allocation84_spill] sm:$0xff] %v10414_v15  ;;  %8122 = vmatprep.subr.bf16.mxu1 %v10362_v40  ;;  %8314 = vmatprep.subr.bf16.mxu0 %v10362_v40  ;;  %v384_v15 = vand.u32 4294901760, %v10239_v50  ;;  %v10449_v57 = vsub.f32 %v67_v9, %v10420_v20  ;;  %v10453_v10 = vpack.c.bf16 %v337_v22, %v333_v8 }
  0x54   :  { %15797 = vst [vmem:[#allocation85_spill] sm:$0xff] %v10416_v23  ;;  %15798 = vst [vmem:[#allocation86_spill] sm:$0xff] %v10418_v43  ;;  %v194_v43 = vld [vmem:[#allocation2 + $0x3e8] sm:$0xff]  ;;  %v350_v38 = vsub.f32 %v10427_v63, %v10439_v16  ;;  %v390_v30 = vand.u32 4294901760, %v10241_v51  ;;  %v10460_v58 = vsub.f32 %v181_v19, %v333_v8  ;;  %v10462_v36 = vsub.f32 %v185_v55, %v337_v22 }
  0x55   :  { %15799 = vst [vmem:[#allocation87_spill] sm:$0xff] %v10420_v20  ;;  %15800 = vst [vmem:[#allocation88_spill] sm:$0xff] %v10424_v1  ;;  %v378_v1 = vand.u32 4294901760, %v10235_v46  ;;  %v343_v40 = vand.u32 4294901760, %v194_v43  ;;  %v367_v9 = vsub.f32 %v10233_v45, %v366_v11  ;;  %1091 = vmatprep.mubr.f32.mxu0 %v10439_v16  ;;  %v385_v56 = vsub.f32 %v10239_v50, %v384_v15 }
  0x56   :  { %15801 = vst [vmem:[#allocation89_spill] sm:$0xff] %v10427_v63  ;;  %15802 = vst [vmem:[#allocation90_spill] sm:$0xff] %v10431_v26  ;;  %8124 = vmatpush1.bf16.msra.mxu1 %v10370_v29  ;;  %8316 = vmatpush1.bf16.msra.mxu0 %v10370_v29  ;;  %v402_v29 = vand.u32 4294901760, %v10243_v52  ;;  %v10466_v20 = vand.u32 4294901760, %v350_v38  ;;  %v373_v63 = vsub.f32 %v10237_v47, %v372_v33  ;;  %v10475_v55 = vand.u32 4294901760, %v10449_v57 }
  0x57   :  { %15803 = vst [vmem:[#allocation91_spill] sm:$0xff] %v10433_v34  ;;  %15804 = vst [vmem:[#allocation92_spill] sm:$0xff] %v10435_v37  ;;  %v189_v37 = vld [vmem:[#allocation2 + $0x3c0] sm:$0xff]  ;;  %8126 = vmatprep.subr.bf16.mxu1 %v10378_v14  ;;  %8318 = vmatprep.subr.bf16.mxu0 %v10378_v14  ;;  %v10472_v0 = vsub.f32 %v190_v42, %v339_v61  ;;  %v391_v38 = vsub.f32 %v10241_v51, %v390_v30  ;;  %v408_v14 = vand.u32 4294901760, %v10247_v54 }
  0x58   :  { %15805 = vst [vmem:[#allocation93_spill] sm:$0xff] %v10439_v16  ;;  %15806 = vst [vmem:[#allocation94_spill] sm:$0xff] %v10444_v59  ;;  %v193_v34 = vld [vmem:[#allocation2 + $0x3e0] sm:$0xff]  ;;  %v341_v19 = vand.u32 4294901760, %v189_v37  ;;  %v403_v22 = vsub.f32 %v10243_v52, %v402_v29  ;;  %v396_v16 = vand.u32 4294901760, %v10245_v53  ;;  %v10485_v42 = vpack.c.bf16 %v343_v40, %v339_v61  ;;  %352 = vmatprep.mubr.f32.mxu1 %v10466_v20 }
  0x59   :  { %15807 = vst [vmem:[#allocation95_spill] sm:$0xff] %v10446_v62  ;;  %15808 = vst [vmem:[#allocation96_spill] sm:$0xff] %v10449_v57  ;;  %v379_v62 = vsub.f32 %v10235_v46, %v378_v1  ;;  %v345_v8 = vand.u32 4294901760, %v193_v34  ;;  %v10487_v50 = vsub.f32 %v194_v43, %v343_v40  ;;  %v374_v46 = vand.u32 4294901760, %v373_v63 }
  0x5a   :  { %15809 = vst [vmem:[#allocation97_spill] sm:$0xff] %v10453_v10  ;;  %15810 = vst [vmem:[#allocation98_spill] sm:$0xff] %v10462_v36  ;;  %8128 = vmatpush1.bf16.msra.mxu1 %v10384_v44  ;;  %8320 = vmatpush1.bf16.msra.mxu0 %v10384_v44  ;;  %v10489_v47 = vsub.f32 %v189_v37, %v341_v19  ;;  %v368_v44 = vand.u32 4294901760, %v367_v9  ;;  %v386_v52 = vand.u32 4294901760, %v385_v56  ;;  %v414_v36 = vand.u32 4294901760, %v10253_v60 }
  0x5b   :  { %15811 = vst [vmem:[#allocation99_spill] sm:$0xff] %v10466_v20  ;;  %15812 = vst [vmem:[#allocation100_spill] sm:$0xff] %v10472_v0  ;;  %8130 = vmatprep.subr.bf16.mxu1 %v10395_v28  ;;  %8322 = vmatprep.subr.bf16.mxu0 %v10395_v28  ;;  %v380_v51 = vand.u32 4294901760, %v379_v62  ;;  %v10492_v45 = vpack.c.bf16 %v345_v8, %v341_v19  ;;  %v356_v0 = vsub.f32 %v10449_v57, %v10475_v55 }
  0x5c   :  { %15813 = vst [vmem:[#allocation101_spill] sm:$0xff] %v10475_v55  ;;  %15814 = vst [vmem:[#allocation102_spill] sm:$0xff] %v10485_v42  ;;  %v426_v61 = vand.u32 4294901760, %v10260_v2  ;;  %v392_v40 = vand.u32 4294901760, %v391_v38  ;;  %v404_v43 = vand.u32 4294901760, %v403_v22  ;;  %v397_v37 = vsub.f32 %v10245_v53, %v396_v16 }
  0x5d   :  { %15815 = vst [vmem:[#allocation103_spill] sm:$0xff] %v10489_v47  ;;  %15816 = vst [vmem:[#allocation104_spill] sm:$0xff] %v10492_v45  ;;  %v409_v63 = vsub.f32 %v10247_v54, %v408_v14  ;;  %v10504_v56 = vsub.f32 %v193_v34, %v345_v8  ;;  %v8337_v62 = vpack.c.bf16 %v378_v1, %v366_v11  ;;  %v420_v19 = vand.u32 4294901760, %v10263_v3 }
  0x5e   :  { %8132 = vmatpush1.bf16.msra.mxu1 %v10406_v13  ;;  %8324 = vmatpush1.bf16.msra.mxu0 %v10406_v13  ;;  %v10506_v9 = vpack.c.bf16 %v384_v15, %v372_v33  ;;  %v8145_v20 = vpack.c.bf16 %v380_v51, %v368_v44  ;;  %v10509_v57 = vpack.c.bf16 %v386_v52, %v374_v46  ;;  %v432_v22 = vand.u32 4294901760, %v10266_v4 }
  0x5f   :  { %8134 = vmatprep.subr.bf16.mxu1 %v10412_v27  ;;  %8326 = vmatprep.subr.bf16.mxu0 %v10412_v27  ;;  %15817 = vst [vmem:[#allocation105_spill] sm:$0xff] %v10504_v56  ;;  %v10511_v38 = vpack.c.bf16 %v402_v29, %v390_v30  ;;  %v10514_v13 = vand.u32 4294901760, %v356_v0  ;;  %v10516_v28 = vpack.c.bf16 %v408_v14, %v396_v16  ;;  %v398_v46 = vand.u32 4294901760, %v397_v37 }
  0x60   :  { %v415_v27 = vsub.f32 %v10253_v60, %v414_v36  ;;  %v427_v34 = vsub.f32 %v10260_v2, %v426_v61  ;;  %v10522_v15 = vpack.c.bf16 %v404_v43, %v392_v40  ;;  %v410_v51 = vand.u32 4294901760, %v409_v63 }
  0x61   :  { %15818 = vst [vmem:[#allocation106_spill] sm:$0xff] %v10514_v13  ;;  %v438_v52 = vand.u32 4294901760, %v10268_v5  ;;  %v421_v16 = vsub.f32 %v10263_v3, %v420_v19  ;;  %v450_v44 = vand.u32 4294901760, %v10270_v6  ;;  %v444_v0 = vand.u32 4294901760, %v10272_v7 }
  0x62   :  { %8136 = vmatpush1.bf16.msra.mxu1 %v10431_v26  ;;  %8328 = vmatpush1.bf16.msra.mxu0 %v10431_v26  ;;  %v456_v14 = vand.u32 4294901760, %v10275_v12  ;;  %v433_v29 = vsub.f32 %v10266_v4, %v432_v22  ;;  %v462_v1 = vand.u32 4294901760, %v10281_v17  ;;  %v474_v11 = vand.u32 4294901760, %v10283_v18 }
  0x63   :  { %8138 = vmatprep.subr.bf16.mxu1 %v10444_v59  ;;  %8330 = vmatprep.subr.bf16.mxu0 %v10444_v59  ;;  %v468_v33 = vand.u32 4294901760, %v10288_v24  ;;  %v416_v30 = vand.u32 4294901760, %v415_v27  ;;  %v428_v8 = vand.u32 4294901760, %v427_v34  ;;  %v10535_v40 = vpack.c.bf16 %v426_v61, %v414_v36 }
  0x64   :  { %v480_v43 = vand.u32 4294901760, %v10290_v25  ;;  %v8151_v37 = vpack.c.bf16 %v410_v51, %v398_v46  ;;  %v439_v63 = vsub.f32 %v10268_v5, %v438_v52  ;;  %v486_v59 = vand.u32 4294901760, %v10292_v31 }
  0x65   :  { %v498_v26 = vand.u32 4294901760, %v10294_v32  ;;  %v422_v27 = vand.u32 4294901760, %v421_v16  ;;  %v451_v36 = vsub.f32 %v10270_v6, %v450_v44  ;;  %v445_v61 = vsub.f32 %v10272_v7, %v444_v0 }
  0x66   :  { %8140 = vmatpush1.bf16.msra.mxu1 %v10453_v10  ;;  %8332 = vmatpush1.bf16.msra.mxu0 %v10453_v10  ;;  %v457_v34 = vsub.f32 %v10275_v12, %v456_v14  ;;  %v434_v56 = vand.u32 4294901760, %v433_v29  ;;  %v463_v46 = vsub.f32 %v10281_v17, %v462_v1  ;;  %v475_v51 = vsub.f32 %v10283_v18, %v474_v11 }
  0x67   :  { %8142 = vmatprep.subr.bf16.mxu1 %v10485_v42  ;;  %8334 = vmatprep.subr.bf16.mxu0 %v10485_v42  ;;  %v469_v10 = vsub.f32 %v10288_v24, %v468_v33  ;;  %v8153_v47 = vpack.c.bf16 %v428_v8, %v416_v30  ;;  %v10551_v5 = vpack.c.bf16 %v432_v22, %v420_v19  ;;  %v492_v16 = vand.u32 4294901760, %v10298_v35 }
  0x68   :  { %v481_v4 = vsub.f32 %v10290_v25, %v480_v43  ;;  %v440_v42 = vand.u32 4294901760, %v439_v63  ;;  %v10557_v12 = vpack.c.bf16 %v450_v44, %v438_v52  ;;  %v487_v29 = vsub.f32 %v10292_v31, %v486_v59  ;;  %v15874_v31 = vld [vmem:[#allocation52_spill] sm:$0xff] }
  0x69   :  { %v499_v18 = vsub.f32 %v10294_v32, %v498_v26  ;;  %v452_v30 = vand.u32 4294901760, %v451_v36  ;;  %v446_v19 = vand.u32 4294901760, %v445_v61  ;;  %v458_v22 = vand.u32 4294901760, %v457_v34  ;;  %v15889_v32 = vld [vmem:[#allocation76_spill] sm:$0xff] }
  0x6a   :  { %8144 = vmatpush1.bf16.msra.mxu1 %v10492_v45  ;;  %8336 = vmatpush1.bf16.msra.mxu0 %v10492_v45  ;;  %v504_v8 = vand.u32 4294901760, %v10302_v39  ;;  %v8155_v25 = vpack.c.bf16 %v434_v56, %v422_v27  ;;  %v464_v24 = vand.u32 4294901760, %v463_v46  ;;  %v476_v17 = vand.u32 4294901760, %v475_v51  ;;  %v15820_v46 = vld [vmem:[#allocation45_spill] sm:$0xff] }
  0x6b   :  { %8146 = vmatprep.subr.bf16.mxu1 %v8145_v20  ;;  %8338 = vmatprep.subr.bf16.mxu0 %v8337_v62  ;;  %v470_v7 = vand.u32 4294901760, %v469_v10  ;;  %v482_v52 = vand.u32 4294901760, %v481_v4  ;;  %v493_v44 = vsub.f32 %v10298_v35, %v492_v16  ;;  %v510_v63 = vand.u32 4294901760, %v10308_v49  ;;  %v15819_v20 = vld [vmem:[#allocation43_spill] sm:$0xff] }
  0x6c   :  { %v522_v62 = vand.u32 4294901760, %v15819_v20  ;;  %v8351_v36 = vpack.c.bf16 %v456_v14, %v444_v0  ;;  %v10569_v56 = vpack.c.bf16 %v474_v11, %v462_v1  ;;  %v488_v27 = vand.u32 4294901760, %v487_v29  ;;  %v15823_v14 = vld [vmem:[#allocation49_spill] sm:$0xff]  ;;  %v15825_v29 = vld [vmem:[#allocation52_spill] sm:$0xff]  ;;  %v15832_v35 = vld [vmem:[#allocation63_spill] sm:$0xff] }
  0x6d   :  { %358 = vmatmul.mubr.f32.vlgmr.msra.gmra.mrb[0].mxu1 %v10514_v13  ;;  %1095 = vmatmul.mubr.f32.vlgmr.msra.gmra.mrb[0].mxu0 %v10475_v55  ;;  %v500_v10 = vand.u32 4294901760, %v499_v18  ;;  %v8157_v4 = vpack.c.bf16 %v452_v30, %v440_v42  ;;  %v8159_v61 = vpack.c.bf16 %v458_v22, %v446_v19  ;;  %v505_v34 = vsub.f32 %v10302_v39, %v504_v8  ;;  %v15827_v22 = vld [vmem:[#allocation55_spill] sm:$0xff] }
  0x6e   :  { %8148 = vmatpush1.bf16.msra.mxu1 %v10509_v57  ;;  %8340 = vmatpush1.bf16.msra.mxu0 %v10506_v9  ;;  %v516_v51 = vand.u32 4294901760, %v15820_v46  ;;  %v8161_v55 = vpack.c.bf16 %v476_v17, %v464_v24  ;;  %v10575_v13 = vpack.c.bf16 %v480_v43, %v468_v33  ;;  %v10577_v57 = vpack.c.bf16 %v498_v26, %v486_v59  ;;  %v15821_v9 = vld [vmem:[#allocation46_spill] sm:$0xff]  ;;  %v15822_v59 = vld [vmem:[#allocation47_spill] sm:$0xff] }
  0x6f   :  { %8150 = vmatprep.subr.bf16.mxu1 %v10522_v15  ;;  %8342 = vmatprep.subr.bf16.mxu0 %v10511_v38  ;;  %v528_v0 = vand.u32 4294901760, %v15821_v9  ;;  %v10581_v18 = vpack.c.bf16 %v482_v52, %v470_v7  ;;  %v494_v15 = vand.u32 4294901760, %v493_v44  ;;  %v511_v38 = vsub.f32 %v10308_v49, %v510_v63  ;;  %v15824_v33 = vld [vmem:[#allocation51_spill] sm:$0xff] }
  0x70   :  { %749 = vmatprep.mubr.f32.mxu1 %v10416_v23  ;;  %v523_v42 = vsub.f32 %v15819_v20, %v522_v62  ;;  %1358 = vmatprep.mubr.f32.mxu0 %v10416_v23  ;;  %v10587_v17 = vpack.c.bf16 %v500_v10, %v488_v27  ;;  %v10589_v24 = vpack.c.bf16 %v504_v8, %v492_v16  ;;  %v534_v26 = vand.u32 4294901760, %v15822_v59  ;;  %v15826_v16 = vld [vmem:[#allocation54_spill] sm:$0xff]  ;;  %v15831_v23 = vld [vmem:[#allocation61_spill] sm:$0xff] }
  0x71   :  { %v546_v1 = vand.u32 4294901760, %v15823_v14  ;;  %v506_v7 = vand.u32 4294901760, %v505_v34  ;;  %v517_v11 = vsub.f32 %v15820_v46, %v516_v51  ;;  %v540_v43 = vand.u32 4294901760, %v15824_v33 }
  0x72   :  { %8152 = vmatpush1.bf16.msra.mxu1 %v8151_v37  ;;  %8344 = vmatpush1.bf16.msra.mxu0 %v10516_v28  ;;  %v552_v37 = vand.u32 4294901760, %v15825_v29  ;;  %v10597_v30 = vpack.c.bf16 %v522_v62, %v510_v63  ;;  %v529_v28 = vsub.f32 %v15821_v9, %v528_v0  ;;  %v558_v19 = vand.u32 4294901760, %v15826_v16  ;;  %v15830_v62 = vld [vmem:[#allocation60_spill] sm:$0xff] }
  0x73   :  { %8154 = vmatprep.subr.bf16.mxu1 %v8153_v47  ;;  %8346 = vmatprep.subr.bf16.mxu0 %v10535_v40  ;;  %v570_v8 = vand.u32 4294901760, %v15827_v22  ;;  %v512_v52 = vand.u32 4294901760, %v511_v38  ;;  %v524_v44 = vand.u32 4294901760, %v523_v42  ;;  %v15828_v47 = vld [vmem:[#allocation57_spill] sm:$0xff]  ;;  %v15829_v40 = vld [vmem:[#allocation58_spill] sm:$0xff]  ;;  %v535_v34 = vsub.f32 %v15822_v59, %v534_v26 }
  0x74   :  { %v564_v27 = vand.u32 4294901760, %v15828_v47  ;;  %v576_v10 = vand.u32 4294901760, %v15829_v40  ;;  %v547_v63 = vsub.f32 %v15823_v14, %v546_v1  ;;  %v582_v45 = vand.u32 4294901760, %v15830_v62 }
  0x75   :  { %v594_v9 = vand.u32 4294901760, %v15831_v23  ;;  %v8167_v38 = vpack.c.bf16 %v506_v7, %v494_v15  ;;  %v518_v42 = vand.u32 4294901760, %v517_v11  ;;  %v541_v46 = vsub.f32 %v15824_v33, %v540_v43 }
  0x76   :  { %8156 = vmatpush1.bf16.msra.mxu1 %v8155_v25  ;;  %8348 = vmatpush1.bf16.msra.mxu0 %v10551_v5  ;;  %v553_v20 = vsub.f32 %v15825_v29, %v552_v37  ;;  %v530_v25 = vand.u32 4294901760, %v529_v28  ;;  %v10612_v49 = vpack.c.bf16 %v528_v0, %v516_v51  ;;  %v559_v5 = vsub.f32 %v15826_v16, %v558_v19 }
  0x77   :  { %8158 = vmatprep.subr.bf16.mxu1 %v8157_v4  ;;  %8350 = vmatprep.subr.bf16.mxu0 %v10557_v12  ;;  %v571_v14 = vsub.f32 %v15827_v22, %v570_v8  ;;  %v8169_v59 = vpack.c.bf16 %v524_v44, %v512_v52  ;;  %v565_v39 = vsub.f32 %v15828_v47, %v564_v27  ;;  %v588_v12 = vand.u32 4294901760, %v15832_v35  ;;  %v15833_v44 = vld [vmem:[#allocation64_spill] sm:$0xff] }
  0x78   :  { %v577_v4 = vsub.f32 %v15829_v40, %v576_v10  ;;  %v536_v15 = vand.u32 4294901760, %v535_v34  ;;  %v548_v7 = vand.u32 4294901760, %v547_v63  ;;  %v583_v11 = vsub.f32 %v15830_v62, %v582_v45  ;;  %v15834_v62 = vld [vmem:[#allocation66_spill] sm:$0xff] }
  0x79   :  { %v595_v51 = vsub.f32 %v15831_v23, %v594_v9  ;;  %v8365_v0 = vpack.c.bf16 %v546_v1, %v534_v26  ;;  %v542_v28 = vand.u32 4294901760, %v541_v46  ;;  %v554_v52 = vand.u32 4294901760, %v553_v20  ;;  %v15835_v46 = vld [vmem:[#allocation67_spill] sm:$0xff] }
  0x7a   :  { %8160 = vmatpush1.bf16.msra.mxu1 %v8159_v61  ;;  %8352 = vmatpush1.bf16.msra.mxu0 %v8351_v36  ;;  %v600_v47 = vand.u32 4294901760, %v15833_v44  ;;  %v8171_v22 = vpack.c.bf16 %v530_v25, %v518_v42  ;;  %v10623_v40 = vpack.c.bf16 %v552_v37, %v540_v43  ;;  %v560_v16 = vand.u32 4294901760, %v559_v5  ;;  %v15891_v23 = vld [vmem:[#allocation79_spill] sm:$0xff] }
  0x7b   :  { %8162 = vmatprep.subr.bf16.mxu1 %v8161_v55  ;;  %8354 = vmatprep.subr.bf16.mxu0 %v10569_v56  ;;  %v572_v61 = vand.u32 4294901760, %v571_v14  ;;  %v566_v36 = vand.u32 4294901760, %v565_v39  ;;  %v578_v34 = vand.u32 4294901760, %v577_v4  ;;  %v589_v63 = vsub.f32 %v15832_v35, %v588_v12 }
  0x7c   :  { %v606_v29 = vand.u32 4294901760, %v15834_v62  ;;  %v8173_v55 = vpack.c.bf16 %v548_v7, %v536_v15  ;;  %v584_v56 = vand.u32 4294901760, %v583_v11  ;;  %v596_v20 = vand.u32 4294901760, %v595_v51  ;;  %v15839_v7 = vld [vmem:[#allocation78_spill] sm:$0xff]  ;;  %v15840_v51 = vld [vmem:[#allocation79_spill] sm:$0xff] }
  0x7d   :  { %v618_v26 = vand.u32 4294901760, %v15835_v46  ;;  %v8175_v14 = vpack.c.bf16 %v554_v52, %v542_v28  ;;  %v8369_v39 = vpack.c.bf16 %v570_v8, %v558_v19  ;;  %v601_v1 = vsub.f32 %v15833_v44, %v600_v47 }
  0x7e   :  { %8164 = vmatpush1.bf16.msra.mxu1 %v10581_v18  ;;  %8356 = vmatpush1.bf16.msra.mxu0 %v10575_v13  ;;  %v612_v43 = vand.u32 4294901760, %v10374_v21  ;;  %v8177_v37 = vpack.c.bf16 %v572_v61, %v560_v16  ;;  %v10634_v42 = vpack.c.bf16 %v576_v10, %v564_v27  ;;  %v10636_v18 = vpack.c.bf16 %v594_v9, %v582_v45  ;;  %v15836_v45 = vld [vmem:[#allocation73_spill] sm:$0xff]  ;;  %v15837_v27 = vld [vmem:[#allocation75_spill] sm:$0xff] }
  0x7f   :  { %8166 = vmatprep.subr.bf16.mxu1 %v10587_v17  ;;  %8358 = vmatprep.subr.bf16.mxu0 %v10577_v57  ;;  %v624_v13 = vand.u32 4294901760, %v10376_v41  ;;  %v10639_v25 = vpack.c.bf16 %v578_v34, %v566_v36  ;;  %v590_v5 = vand.u32 4294901760, %v589_v63  ;;  %v10641_v4 = vpack.c.bf16 %v600_v47, %v588_v12  ;;  %v15838_v12 = vld [vmem:[#allocation76_spill] sm:$0xff]  ;;  %v15841_v61 = vld [vmem:[#allocation81_spill] sm:$0xff]  ;;  %v15842_v36 = vld [vmem:[#allocation82_spill] sm:$0xff] }
  0x80   :  { %v607_v57 = vsub.f32 %v15834_v62, %v606_v29  ;;  %v10645_v17 = vpack.c.bf16 %v596_v20, %v584_v56  ;;  %v619_v16 = vsub.f32 %v15835_v46, %v618_v26  ;;  %v630_v19 = vand.u32 4294901760, %v10380_v48  ;;  %v15843_v34 = vld [vmem:[#allocation84_spill] sm:$0xff] }
  0x81   :  { %v642_v9 = vand.u32 4294901760, %v15836_v45  ;;  %v602_v8 = vand.u32 4294901760, %v601_v1  ;;  %v613_v47 = vsub.f32 %v10374_v21, %v612_v43  ;;  %v636_v10 = vand.u32 4294901760, %v15837_v27 }
  0x82   :  { %8168 = vmatpush1.bf16.msra.mxu1 %v8167_v38  ;;  %8360 = vmatpush1.bf16.msra.mxu0 %v10589_v24  ;;  %v648_v38 = vand.u32 4294901760, %v15838_v12  ;;  %v10654_v15 = vpack.c.bf16 %v618_v26, %v606_v29  ;;  %v625_v24 = vsub.f32 %v10376_v41, %v624_v13  ;;  %v654_v11 = vand.u32 4294901760, %v15839_v7  ;;  %v15844_v26 = vld [vmem:[#allocation86_spill] sm:$0xff] }
  0x83   :  { %8170 = vmatprep.subr.bf16.mxu1 %v8169_v59  ;;  %8362 = vmatprep.subr.bf16.mxu0 %v10597_v30  ;;  %v666_v28 = vand.u32 4294901760, %v15840_v51  ;;  %v608_v52 = vand.u32 4294901760, %v607_v57  ;;  %v660_v59 = vand.u32 4294901760, %v15841_v61  ;;  %v672_v30 = vand.u32 4294901760, %v15842_v36 }
  0x84   :  { %v678_v63 = vand.u32 4294901760, %v15843_v34  ;;  %v620_v56 = vand.u32 4294901760, %v619_v16  ;;  %v631_v29 = vsub.f32 %v10380_v48, %v630_v19  ;;  %v643_v20 = vsub.f32 %v15836_v45, %v642_v9 }
  0x85   :  { %v690_v1 = vand.u32 4294901760, %v15844_v26  ;;  %v8183_v41 = vpack.c.bf16 %v602_v8, %v590_v5  ;;  %v614_v57 = vand.u32 4294901760, %v613_v47  ;;  %v637_v21 = vsub.f32 %v15837_v27, %v636_v10 }
  0x86   :  { %8172 = vmatpush1.bf16.msra.mxu1 %v8171_v22  ;;  %8364 = vmatpush1.bf16.msra.mxu0 %v10612_v49  ;;  %v649_v46 = vsub.f32 %v15838_v12, %v648_v38  ;;  %v626_v62 = vand.u32 4294901760, %v625_v24  ;;  %v10668_v44 = vpack.c.bf16 %v624_v13, %v612_v43  ;;  %v655_v49 = vsub.f32 %v15839_v7, %v654_v11  ;;  %v15845_v43 = vld [vmem:[#allocation88_spill] sm:$0xff] }
  0x87   :  { %8174 = vmatprep.subr.bf16.mxu1 %v8173_v55  ;;  %8366 = vmatprep.subr.bf16.mxu0 %v8365_v0  ;;  %v667_v22 = vsub.f32 %v15840_v51, %v666_v28  ;;  %v661_v16 = vsub.f32 %v15841_v61, %v660_v59  ;;  %v673_v45 = vsub.f32 %v15842_v36, %v672_v30  ;;  %v632_v8 = vand.u32 4294901760, %v631_v29  ;;  %v15846_v61 = vld [vmem:[#allocation91_spill] sm:$0xff] }
  0x88   :  { %v679_v55 = vsub.f32 %v15843_v34, %v678_v63  ;;  %v691_v0 = vsub.f32 %v15844_v26, %v690_v1  ;;  %v8185_v5 = vpack.c.bf16 %v620_v56, %v608_v52  ;;  %v644_v47 = vand.u32 4294901760, %v643_v20  ;;  %v15852_v20 = vld [vmem:[#allocation19_spill] sm:$0xff] }
  0x89   :  { %v15063_v13 = vand.u32 4294901760, %v15845_v43  ;;  %v8381_v24 = vpack.c.bf16 %v642_v9, %v630_v19  ;;  %v638_v51 = vand.u32 4294901760, %v637_v21  ;;  %v650_v7 = vand.u32 4294901760, %v649_v46 }
  0x8a   :  { %8176 = vmatpush1.bf16.msra.mxu1 %v8175_v14  ;;  %8368 = vmatpush1.bf16.msra.mxu0 %v10623_v40  ;;  %v15062_v12 = vand.u32 4294901760, %v15846_v61  ;;  %v8187_v36 = vpack.c.bf16 %v626_v62, %v614_v57  ;;  %v10679_v27 = vpack.c.bf16 %v648_v38, %v636_v10  ;;  %v656_v34 = vand.u32 4294901760, %v655_v49  ;;  %v15847_v62 = vld [vmem:[#allocation92_spill] sm:$0xff]  ;;  %v15873_v57 = vld [vmem:[#allocation49_spill] sm:$0xff] }
  0x8b   :  { %8178 = vmatprep.subr.bf16.mxu1 %v8177_v37  ;;  %8370 = vmatprep.subr.bf16.mxu0 %v8369_v39  ;;  %v668_v26 = vand.u32 4294901760, %v667_v22  ;;  %v662_v14 = vand.u32 4294901760, %v661_v16  ;;  %v674_v48 = vand.u32 4294901760, %v673_v45  ;;  %v680_v40 = vand.u32 4294901760, %v679_v55 }
  0x8c   :  { %v692_v52 = vand.u32 4294901760, %v691_v0  ;;  %v8189_v37 = vpack.c.bf16 %v644_v47, %v632_v8  ;;  %v10683_v39 = vpack.c.bf16 %v666_v28, %v654_v11  ;;  %v10688_v21 = vsub.f32 %v15845_v43, %v15063_v13  ;;  %v15849_v28 = vld [vmem:[#allocation98_spill] sm:$0xff] }
  0x8d   :  { %v15061_v46 = vand.u32 4294901760, %v15847_v62  ;;  %v8191_v19 = vpack.c.bf16 %v650_v7, %v638_v51  ;;  %v15059_v9 = vand.u32 4294901760, %v10460_v58  ;;  %v8193_v10 = vpack.c.bf16 %v668_v26, %v656_v34  ;;  %v15851_v51 = vld [vmem:[#allocation18_spill] sm:$0xff]  ;;  %v15854_v34 = vld [vmem:[#allocation21_spill] sm:$0xff]  ;;  %v15856_v26 = vld [vmem:[#allocation23_spill] sm:$0xff] }
  0x8e   :  { %8180 = vmatpush1.bf16.msra.mxu1 %v10639_v25  ;;  %8372 = vmatpush1.bf16.msra.mxu0 %v10634_v42  ;;  %v10696_v25 = vsub.f32 %v15846_v61, %v15062_v12  ;;  %v15848_v42 = vld [vmem:[#allocation95_spill] sm:$0xff]  ;;  %v10700_v38 = vpack.c.bf16 %v672_v30, %v660_v59  ;;  %v10702_v11 = vpack.c.bf16 %v690_v1, %v678_v63  ;;  %v15057_v56 = vand.u32 4294901760, %v15849_v28  ;;  %v15853_v30 = vld [vmem:[#allocation20_spill] sm:$0xff]  ;;  %v15855_v63 = vld [vmem:[#allocation22_spill] sm:$0xff] }
  0x8f   :  { %8182 = vmatprep.subr.bf16.mxu1 %v10645_v17  ;;  %8374 = vmatprep.subr.bf16.mxu0 %v10636_v18  ;;  %v15060_v45 = vand.u32 4294901760, %v15848_v42  ;;  %v8195_v17 = vpack.c.bf16 %v674_v48, %v662_v14  ;;  %v10705_v29 = vpack.c.bf16 %v692_v52, %v680_v40  ;;  %v15850_v18 = vld [vmem:[#allocation100_spill] sm:$0xff]  ;;  %v686_v49 = vand.u32 4294901760, %v10688_v21  ;;  %v15858_v14 = vld [vmem:[#allocation27_spill] sm:$0xff]  ;;  %v15860_v21 = vld [vmem:[#allocation29_spill] sm:$0xff] }
  0x90   :  { %v15058_v7 = vand.u32 4294901760, %v15850_v18  ;;  %v10715_v59 = vsub.f32 %v15847_v62, %v15061_v46  ;;  %v10729_v22 = vsub.f32 %v10460_v58, %v15059_v9  ;;  %v15066_v16 = vand.u32 4294901760, %v10487_v50  ;;  %v15859_v52 = vld [vmem:[#allocation28_spill] sm:$0xff]  ;;  %v15885_v40 = vld [vmem:[#allocation105_spill] sm:$0xff]  ;;  %v15890_v1 = vld [vmem:[#allocation78_spill] sm:$0xff] }
  0x91   :  { %v721_v55 = vsub.f32 %v15849_v28, %v15057_v56  ;;  %v744_v9 = vand.u32 4294901760, %v15885_v40  ;;  %v15892_v46 = vld [vmem:[#allocation81_spill] sm:$0xff]  ;;  %v15893_v8 = vld [vmem:[#allocation82_spill] sm:$0xff] }
  0x92   :  { %8184 = vmatpush1.bf16.msra.mxu1 %v8183_v41  ;;  %8376 = vmatpush1.bf16.msra.mxu0 %v10641_v4  ;;  %v698_v41 = vand.u32 4294901760, %v10696_v25  ;;  %v715_v4 = vsub.f32 %v15848_v42, %v15060_v45  ;;  %v10744_v47 = vsub.f32 %v15850_v18, %v15058_v7  ;;  %v704_v0 = vand.u32 4294901760, %v10715_v59  ;;  %v15880_v59 = vld [vmem:[#allocation64_spill] sm:$0xff]  ;;  %v15888_v45 = vld [vmem:[#allocation75_spill] sm:$0xff] }
  0x93   :  { %8186 = vmatprep.subr.bf16.mxu1 %v8185_v5  ;;  %8378 = vmatprep.subr.bf16.mxu0 %v10654_v15  ;;  %v15857_v5 = vld [vmem:[#allocation26_spill] sm:$0xff]  ;;  %v739_v15 = vsub.f32 %v10487_v50, %v15066_v16  ;;  %v15897_v7 = vand.u32 4294901760, %v15846_v61  ;;  %v710_v16 = vand.u32 4294901760, %v10729_v22  ;;  %v722_v56 = vand.u32 4294901760, %v721_v55 }
  0x94   :  { %v716_v12 = vand.u32 4294901760, %v715_v4  ;;  %v8199_v4 = vpack.c.bf16 %v698_v41, %v686_v49  ;;  %v745_v13 = vsub.f32 %v15885_v40, %v744_v9  ;;  %v15898_v41 = vand.u32 4294901760, %v15847_v62 }
  0x95   :  { %v8203_v22 = vpack.c.bf16 %v722_v56, %v710_v16  ;;  %v15900_v55 = vand.u32 4294901760, %v10460_v58  ;;  %v15904_v56 = vpack.c.bf16 %v15852_v20, %v15851_v51  ;;  %v15907_v16 = vpack.c.bf16 %v15854_v34, %v15853_v30  ;;  %v15911_v51 = vld [vmem:[#allocation89_spill] sm:$0xff]  ;;  %v15916_v34 = vld [vmem:[#allocation15_spill] sm:$0xff] }
  0x96   :  { %8188 = vmatpush1.bf16.msra.mxu1 %v8187_v36  ;;  %8380 = vmatpush1.bf16.msra.mxu0 %v10668_v44  ;;  %v15867_v36 = vld [vmem:[#allocation103_spill] sm:$0xff]  ;;  %v8201_v49 = vpack.c.bf16 %v716_v12, %v704_v0  ;;  %v15903_v0 = vand.u32 4294901760, %v10487_v50  ;;  %v15912_v20 = vld [vmem:[#allocation85_spill] sm:$0xff]  ;;  %v15915_v30 = vpack.c.bf16 %v10260_v2, %v10253_v60  ;;  %v15922_v60 = vld [vmem:[#allocation24_spill] sm:$0xff] }
  0x97   :  { %8190 = vmatprep.subr.bf16.mxu1 %v8189_v37  ;;  %8382 = vmatprep.subr.bf16.mxu0 %v8381_v24  ;;  %v732_v25 = vand.u32 4294901760, %v15867_v36  ;;  %v15886_v37 = vld [vmem:[#allocation72_spill] sm:$0xff]  ;;  %v15887_v24 = vld [vmem:[#allocation73_spill] sm:$0xff] }
  0x98   :  { %v15923_v2 = vld [vmem:[#allocation32_spill] sm:$0xff] }
  0x99   :  { %v733_v48 = vsub.f32 %v15867_v36, %v732_v25  ;;  %v746_v36 = vand.u32 4294901760, %v745_v13  ;;  %v15905_v13 = vld [vmem:[#allocation11_spill] sm:$0xff] }
  0x9a   :  { %8192 = vmatpush1.bf16.msra.mxu1 %v8191_v19  ;;  %8384 = vmatpush1.bf16.msra.mxu0 %v10679_v27  ;;  %v15895_v27 = vld [vmem:[#allocation86_spill] sm:$0xff]  ;;  %v15896_v19 = vand.u32 4294901760, %v15845_v43 }
  0x9b   :  { %8194 = vmatprep.subr.bf16.mxu1 %v8193_v10  ;;  %8386 = vmatprep.subr.bf16.mxu0 %v10683_v39  ;;  %v15899_v39 = vand.u32 4294901760, %v15848_v42 }
  0x9c   :  { %v8391_v44 = vpack.c.bf16 %v15897_v7, %v15896_v19  ;;  %v15901_v19 = vand.u32 4294901760, %v15849_v28 }
  0x9d   :  { %v8393_v7 = vpack.c.bf16 %v15899_v39, %v15898_v41 }
  0x9e   :  { %8196 = vmatpush1.bf16.msra.mxu1 %v8195_v17  ;;  %8388 = vmatpush1.bf16.msra.mxu0 %v10700_v38  ;;  %v728_v17 = vand.u32 4294901760, %v10744_v47  ;;  %v740_v38 = vand.u32 4294901760, %v739_v15  ;;  %v8395_v10 = vpack.c.bf16 %v15901_v19, %v15900_v55  ;;  %v8399_v47 = vpack.c.bf16 %v744_v9, %v732_v25  ;;  %v15910_v25 = vld [vmem:[#allocation13_spill] sm:$0xff]  ;;  %v15936_v55 = vld [vmem:[#allocation39_spill] sm:$0xff] }
  0x9f   :  { %8198 = vmatprep.subr.bf16.mxu1 %v10705_v29  ;;  %8390 = vmatprep.subr.bf16.mxu0 %v10702_v11  ;;  %v734_v29 = vand.u32 4294901760, %v733_v48  ;;  %v15902_v11 = vand.u32 4294901760, %v15850_v18  ;;  %v15906_v48 = vld [vmem:[#allocation87_spill] sm:$0xff]  ;;  %v15909_v9 = vpack.c.bf16 %v15856_v26, %v15855_v63  ;;  %v15917_v63 = vpack.c.bf16 %v15857_v5, %v10263_v3  ;;  %v15918_v26 = vld [vmem:[#allocation16_spill] sm:$0xff]  ;;  %v15926_v3 = vld [vmem:[#allocation25_spill] sm:$0xff] }
  0xa0   :  { %v8205_v12 = vpack.c.bf16 %v740_v38, %v728_v17  ;;  %v15927_v5 = vld [vmem:[#allocation35_spill] sm:$0xff]  ;;  %v15932_v38 = vld [vmem:[#allocation36_spill] sm:$0xff] }
  0xa1   :  { %v8397_v39 = vpack.c.bf16 %v15903_v0, %v15902_v11  ;;  %v8207_v15 = vpack.c.bf16 %v746_v36, %v734_v29  ;;  %v15908_v36 = vld [vmem:[#allocation12_spill] sm:$0xff]  ;;  %v15938_v29 = vld [vmem:[#allocation38_spill] sm:$0xff] }
  0xa2   :  { %8200 = vmatpush1.bf16.msra.mxu1 %v8199_v4  ;;  %8392 = vmatpush1.bf16.msra.mxu0 %v8391_v44  ;;  %v15913_v44 = vpack.c.bf16 %v10247_v54, %v10245_v53  ;;  %v15919_v4 = vpack.c.bf16 %v10270_v6, %v15858_v14  ;;  %v15920_v53 = vld [vmem:[#allocation17_spill] sm:$0xff]  ;;  %v15921_v54 = vpack.c.bf16 %v15860_v21, %v15859_v52  ;;  %v15930_v6 = vld [vmem:[#allocation30_spill] sm:$0xff]  ;;  %v15935_v21 = vld [vmem:[#allocation40_spill] sm:$0xff] }
  0xa3   :  { %8202 = vmatprep.subr.bf16.mxu1 %v8201_v49  ;;  %8394 = vmatprep.subr.bf16.mxu0 %v8393_v7  ;;  %v15924_v49 = vld [vmem:[#allocation31_spill] sm:$0xff]  ;;  %v15928_v7 = vld [vmem:[#allocation34_spill] sm:$0xff]  ;;  %v15931_v14 = vld [vmem:[#allocation37_spill] sm:$0xff]  ;;  %v15937_v19 = vpack.c.bf16 %v15935_v21, %v15936_v55 }
  0xa4   :  { %v15925_v41 = vpack.c.bf16 %v15923_v2, %v15924_v49  ;;  %v15929_v17 = vpack.c.bf16 %v15927_v5, %v15928_v7  ;;  %v15934_v52 = vld [vmem:[#allocation33_spill] sm:$0xff]  ;;  %v15940_v11 = vld [vmem:[#allocation42_spill] sm:$0xff]  ;;  %v83_v2 = vld [vmem:[#allocation2 + $0x70] sm:$0xff]  ;;  %v15950_v49 = vpack.c.bf16 %v15874_v31, %v15824_v33 }
  0xa5   :  { %v92_v7 = vld [vmem:[#allocation2 + $0xb8] sm:$0xff]  ;;  %v1517_v33 = vand.u32 4294901760, %v83_v2 }
  0xa6   :  { %8204 = vmatpush1.bf16.msra.mxu1 %v8203_v22  ;;  %8396 = vmatpush1.bf16.msra.mxu0 %v8395_v10  ;;  %v15914_v10 = vld [vmem:[#allocation14_spill] sm:$0xff]  ;;  %v15933_v22 = vpack.c.bf16 %v15931_v14, %v15932_v38  ;;  %v15955_v38 = vld [vmem:[#allocation53_spill] sm:$0xff] }
  0xa7   :  { %8206 = vmatprep.subr.bf16.mxu1 %v8205_v12  ;;  %8398 = vmatprep.subr.bf16.mxu0 %v8397_v39  ;;  %v15939_v12 = vld [vmem:[#allocation43_spill] sm:$0xff]  ;;  %v15942_v39 = vld [vmem:[#allocation41_spill] sm:$0xff] }
  0xa8   :  { %v15941_v0 = vpack.c.bf16 %v15939_v12, %v15940_v11  ;;  %v100_v12 = vld [vmem:[#allocation2 + $0xf8] sm:$0xff] }
  0xaa   :  { %8208 = vmatpush1.bf16.msra.mxu1 %v8207_v15  ;;  %8400 = vmatpush1.bf16.msra.mxu0 %v8399_v47  ;;  %v72_v15 = vld [vmem:[#allocation2 + $0x18] sm:$0xff] }
  0xab   :  { %8210 = vmatprep.subr.bf16.mxu1 %v15904_v56  ;;  %8402 = vmatprep.subr.bf16.mxu0 %v15905_v13  ;;  %v76_v47 = vld [vmem:[#allocation2 + $0x38] sm:$0xff]  ;;  %v15943_v56 = vld [vmem:[#allocation46_spill] sm:$0xff] }
  0xac   :  { %v15944_v13 = vld [vmem:[#allocation45_spill] sm:$0xff] }
  0xad   :  { %751 = vmatmul.mubr.f32.vlgmr.msra.gmra.mrb[0].mxu1 %v15906_v48  ;;  %1360 = vmatmul.mubr.f32.vlgmr.msra.gmra.mrb[0].mxu0 %v15906_v48 }
  0xae   :  { %8212 = vmatpush1.bf16.msra.mxu1 %v15907_v16  ;;  %8404 = vmatpush1.bf16.msra.mxu0 %v15908_v36  ;;  %v15945_v16 = vpack.c.bf16 %v15943_v56, %v15944_v13  ;;  %v15946_v36 = vld [vmem:[#allocation44_spill] sm:$0xff]  ;;  %v1523_v56 = vand.u32 4294901760, %v92_v7  ;;  %v15961_v13 = vld [vmem:[#allocation58_spill] sm:$0xff] }
  0xaf   :  { %8214 = vmatprep.subr.bf16.mxu1 %v15909_v9  ;;  %8406 = vmatprep.subr.bf16.mxu0 %v15910_v25  ;;  %v71_v9 = vld [vmem:[#allocation2 + $0x10] sm:$0xff] }
  0xb0   :  { %951 = vmatprep.mubr.f32.mxu1 %v15911_v51  ;;  %1495 = vmatprep.mubr.f32.mxu0 %v15912_v20  ;;  %v75_v25 = vld [vmem:[#allocation2 + $0x30] sm:$0xff]  ;;  %v116_v51 = vld [vmem:[#allocation2 + $0x178] sm:$0xff] }
  0xb2   :  { %8216 = vmatpush1.bf16.msra.mxu1 %v15913_v44  ;;  %8408 = vmatpush1.bf16.msra.mxu0 %v15914_v10  ;;  %v15947_v44 = vld [vmem:[#allocation47_spill] sm:$0xff] }
  0xb3   :  { %8218 = vmatprep.subr.bf16.mxu1 %v15915_v30  ;;  %8410 = vmatprep.subr.bf16.mxu0 %v15916_v34  ;;  %v15948_v10 = vpack.c.bf16 %v15873_v57, %v15947_v44  ;;  %v15949_v30 = vld [vmem:[#allocation48_spill] sm:$0xff]  ;;  %v1503_v34 = vand.u32 4294901760, %v72_v15  ;;  %v88_v57 = vld [vmem:[#allocation2 + $0x98] sm:$0xff] }
  0xb4   :  { %v15964_v44 = vld [vmem:[#allocation56_spill] sm:$0xff] }
  0xb5   :  { %v10904_v21 = vsub.f32 %v72_v15, %v1503_v34 }
  0xb6   :  { %8220 = vmatpush1.bf16.msra.mxu1 %v15917_v63  ;;  %8412 = vmatpush1.bf16.msra.mxu0 %v15918_v26  ;;  %v1507_v63 = vand.u32 4294901760, %v76_v47  ;;  %v80_v26 = vld [vmem:[#allocation2 + $0x58] sm:$0xff] }
  0xb7   :  { %8222 = vmatprep.subr.bf16.mxu1 %v15919_v4  ;;  %8414 = vmatprep.subr.bf16.mxu0 %v15920_v53  ;;  %v84_v4 = vld [vmem:[#allocation2 + $0x78] sm:$0xff]  ;;  %v1505_v53 = vand.u32 4294901760, %v71_v9  ;;  %15957 = vst [vmem:[#allocation63_spill] sm:$0xff] %v10904_v21 }
  0xb8   :  { %v1515_v5 = vand.u32 4294901760, %v84_v4  ;;  %v10906_v55 = vsub.f32 %v76_v47, %v1507_v63 }
  0xba   :  { %8224 = vmatpush1.bf16.msra.mxu1 %v15921_v54  ;;  %8416 = vmatpush1.bf16.msra.mxu0 %v15922_v60  ;;  %v1509_v54 = vand.u32 4294901760, %v75_v25  ;;  %v79_v60 = vld [vmem:[#allocation2 + $0x50] sm:$0xff]  ;;  %15958 = vst [vmem:[#allocation88_spill] sm:$0xff] %v10906_v55 }
  0xbb   :  { %8226 = vmatprep.subr.bf16.mxu1 %v15925_v41  ;;  %8418 = vmatprep.subr.bf16.mxu0 %v15926_v3  ;;  %v15951_v41 = vld [vmem:[#allocation50_spill] sm:$0xff]  ;;  %v1511_v3 = vand.u32 4294901760, %v80_v26  ;;  %v1513_v31 = vand.u32 4294901760, %v79_v60 }
  0xbc   :  { %v10908_v11 = vpack.c.bf16 %v1509_v54, %v1505_v53  ;;  %v10916_v15 = vsub.f32 %v75_v25, %v1509_v54  ;;  %v10926_v25 = vsub.f32 %v84_v4, %v1515_v5  ;;  %v15979_v4 = vld [vmem:[#allocation62_spill] sm:$0xff] }
  0xbd   :  { %v10918_v47 = vpack.c.bf16 %v1515_v5, %v1511_v3  ;;  %v10928_v54 = vpack.c.bf16 %v1517_v33, %v1513_v31  ;;  %v10942_v5 = vsub.f32 %v92_v7, %v1523_v56  ;;  %v111_v7 = vld [vmem:[#allocation2 + $0x150] sm:$0xff] }
  0xbe   :  { %8228 = vmatpush1.bf16.msra.mxu1 %v15929_v17  ;;  %8420 = vmatpush1.bf16.msra.mxu0 %v15930_v6  ;;  %v15952_v17 = vld [vmem:[#allocation55_spill] sm:$0xff]  ;;  %v15953_v6 = vld [vmem:[#allocation54_spill] sm:$0xff]  ;;  %15959 = vst [vmem:[#allocation91_spill] sm:$0xff] %v10908_v11  ;;  %15965 = vst [vmem:[#allocation95_spill] sm:$0xff] %v10916_v15 }
  0xbf   :  { %8230 = vmatprep.subr.bf16.mxu1 %v15933_v22  ;;  %8422 = vmatprep.subr.bf16.mxu0 %v15934_v52  ;;  %v15954_v14 = vpack.c.bf16 %v15952_v17, %v15953_v6  ;;  %v10902_v22 = vpack.c.bf16 %v1507_v63, %v1503_v34  ;;  %v87_v52 = vld [vmem:[#allocation2 + $0x90] sm:$0xff]  ;;  %15966 = vst [vmem:[#allocation98_spill] sm:$0xff] %v10918_v47  ;;  %v15968_v63 = vld [vmem:[#allocation61_spill] sm:$0xff]  ;;  %15972 = vst [vmem:[#allocation18_spill] sm:$0xff] %v10926_v25 }
  0xc0   :  { %v99_v34 = vld [vmem:[#allocation2 + $0xf0] sm:$0xff]  ;;  %15973 = vst [vmem:[#allocation19_spill] sm:$0xff] %v10928_v54  ;;  %15980 = vst [vmem:[#allocation26_spill] sm:$0xff] %v10942_v5 }
  0xc1   :  { %15956 = vst [vmem:[#allocation51_spill] sm:$0xff] %v10902_v22 }
  0xc2   :  { %8232 = vmatpush1.bf16.msra.mxu1 %v15937_v19  ;;  %8424 = vmatpush1.bf16.msra.mxu0 %v15938_v29  ;;  %v91_v19 = vld [vmem:[#allocation2 + $0xb0] sm:$0xff]  ;;  %v96_v29 = vld [vmem:[#allocation2 + $0xd8] sm:$0xff] }
  0xc3   :  { %8234 = vmatprep.subr.bf16.mxu1 %v15941_v0  ;;  %8426 = vmatprep.subr.bf16.mxu0 %v15942_v39  ;;  %v10910_v0 = vsub.f32 %v71_v9, %v1505_v53  ;;  %v1519_v39 = vand.u32 4294901760, %v88_v57  ;;  %v15971_v53 = vld [vmem:[#allocation59_spill] sm:$0xff]  ;;  %v1525_v17 = vand.u32 4294901760, %v91_v19  ;;  %v1527_v6 = vand.u32 4294901760, %v96_v29 }
  0xc5   :  { %15960 = vst [vmem:[#allocation92_spill] sm:$0xff] %v10910_v0 }
  0xc6   :  { %8236 = vmatpush1.bf16.msra.mxu1 %v15945_v16  ;;  %8428 = vmatpush1.bf16.msra.mxu0 %v15946_v36  ;;  %v15962_v16 = vld [vmem:[#allocation57_spill] sm:$0xff] }
  0xc7   :  { %8238 = vmatprep.subr.bf16.mxu1 %v15948_v10  ;;  %8430 = vmatprep.subr.bf16.mxu0 %v15949_v30  ;;  %v15963_v36 = vpack.c.bf16 %v15961_v13, %v15962_v16  ;;  %v10920_v10 = vsub.f32 %v80_v26, %v1511_v3  ;;  %v95_v30 = vld [vmem:[#allocation2 + $0xd0] sm:$0xff]  ;;  %v108_v13 = vld [vmem:[#allocation2 + $0x138] sm:$0xff]  ;;  %v10930_v26 = vsub.f32 %v79_v60, %v1513_v31 }
  0xc8   :  { %v10932_v3 = vsub.f32 %v83_v2, %v1517_v33  ;;  %v10934_v16 = vpack.c.bf16 %v1523_v56, %v1519_v39  ;;  %v1539_v31 = vand.u32 4294901760, %v108_v13  ;;  %v112_v33 = vld [vmem:[#allocation2 + $0x158] sm:$0xff]  ;;  %v115_v56 = vld [vmem:[#allocation2 + $0x170] sm:$0xff] }
  0xc9   :  { %15967 = vst [vmem:[#allocation100_spill] sm:$0xff] %v10920_v10  ;;  %15974 = vst [vmem:[#allocation20_spill] sm:$0xff] %v10930_v26 }
  0xca   :  { %8240 = vmatpush1.bf16.msra.mxu1 %v15950_v49  ;;  %8432 = vmatpush1.bf16.msra.mxu0 %v15951_v41  ;;  %v15969_v49 = vld [vmem:[#allocation60_spill] sm:$0xff]  ;;  %v1521_v41 = vand.u32 4294901760, %v87_v52  ;;  %15975 = vst [vmem:[#allocation21_spill] sm:$0xff] %v10932_v3  ;;  %15976 = vst [vmem:[#allocation22_spill] sm:$0xff] %v10934_v16 }
  0xcb   :  { %8242 = vmatprep.subr.bf16.mxu1 %v15954_v14  ;;  %8434 = vmatprep.subr.bf16.mxu0 %v15955_v38  ;;  %v15970_v9 = vpack.c.bf16 %v15968_v63, %v15969_v49  ;;  %v1531_v14 = vand.u32 4294901760, %v100_v12  ;;  %v104_v38 = vld [vmem:[#allocation2 + $0x118] sm:$0xff]  ;;  %v1533_v63 = vand.u32 4294901760, %v99_v34  ;;  %v103_v49 = vld [vmem:[#allocation2 + $0x110] sm:$0xff] }
  0xcc   :  { %v10944_v60 = vsub.f32 %v87_v52, %v1521_v41  ;;  %v1535_v2 = vand.u32 4294901760, %v104_v38  ;;  %v10950_v3 = vpack.c.bf16 %v1525_v17, %v1521_v41  ;;  %v10956_v52 = vsub.f32 %v96_v29, %v1527_v6  ;;  %v120_v41 = vld [vmem:[#allocation2 + $0x198] sm:$0xff] }
  0xcd   :  { %v10968_v29 = vsub.f32 %v99_v34, %v1533_v63  ;;  %v128_v34 = vld [vmem:[#allocation2 + $0x1d8] sm:$0xff] }
  0xce   :  { %8244 = vmatpush1.bf16.msra.mxu1 %v15963_v36  ;;  %8436 = vmatpush1.bf16.msra.mxu0 %v15964_v44  ;;  %v10936_v36 = vsub.f32 %v88_v57, %v1519_v39  ;;  %v1529_v44 = vand.u32 4294901760, %v95_v30  ;;  %15981 = vst [vmem:[#allocation27_spill] sm:$0xff] %v10944_v60  ;;  %v15982_v57 = vld [vmem:[#allocation67_spill] sm:$0xff]  ;;  %v15983_v39 = vld [vmem:[#allocation66_spill] sm:$0xff]  ;;  %15986 = vst [vmem:[#allocation28_spill] sm:$0xff] %v10950_v3 }
  0xcf   :  { %8246 = vmatprep.subr.bf16.mxu1 %v15970_v9  ;;  %8438 = vmatprep.subr.bf16.mxu0 %v15971_v53  ;;  %v107_v9 = vld [vmem:[#allocation2 + $0x130] sm:$0xff]  ;;  %v15978_v53 = vpack.c.bf16 %v15880_v59, %v15832_v35  ;;  %v15984_v20 = vpack.c.bf16 %v15982_v57, %v15983_v39  ;;  %v10952_v35 = vsub.f32 %v91_v19, %v1525_v17  ;;  %v124_v39 = vld [vmem:[#allocation2 + $0x1b8] sm:$0xff]  ;;  %v15993_v19 = vld [vmem:[#allocation70_spill] sm:$0xff] }
  0xd0   :  { %15977 = vst [vmem:[#allocation23_spill] sm:$0xff] %v10936_v36  ;;  %v15985_v36 = vld [vmem:[#allocation65_spill] sm:$0xff]  ;;  %v10954_v59 = vpack.c.bf16 %v1531_v14, %v1527_v6  ;;  %15989 = vst [vmem:[#allocation52_spill] sm:$0xff] %v10956_v52  ;;  %v1541_v60 = vand.u32 4294901760, %v107_v9  ;;  %v10960_v5 = vpack.c.bf16 %v1533_v63, %v1529_v44  ;;  %v10962_v57 = vsub.f32 %v95_v30, %v1529_v44  ;;  %v123_v52 = vld [vmem:[#allocation2 + $0x1b0] sm:$0xff] }
  0xd1   :  { %15987 = vst [vmem:[#allocation29_spill] sm:$0xff] %v10952_v35  ;;  %v15994_v17 = vld [vmem:[#allocation69_spill] sm:$0xff]  ;;  %15997 = vst [vmem:[#allocation73_spill] sm:$0xff] %v10968_v29  ;;  %v1545_v6 = vand.u32 4294901760, %v111_v7  ;;  %v15999_v30 = vpack.c.bf16 %v15887_v24, %v15886_v37  ;;  %v16000_v44 = vld [vmem:[#allocation71_spill] sm:$0xff]  ;;  %v1555_v29 = vand.u32 4294901760, %v124_v39 }
  0xd2   :  { %8248 = vmatpush1.bf16.msra.mxu1 %v15978_v53  ;;  %8440 = vmatpush1.bf16.msra.mxu0 %v15979_v4  ;;  %15988 = vst [vmem:[#allocation49_spill] sm:$0xff] %v10954_v59  ;;  %v10958_v53 = vsub.f32 %v100_v12, %v1531_v14  ;;  %v1537_v4 = vand.u32 4294901760, %v103_v49  ;;  %15991 = vst [vmem:[#allocation105_spill] sm:$0xff] %v10960_v5  ;;  %v15995_v35 = vpack.c.bf16 %v15993_v19, %v15994_v17  ;;  %v15996_v59 = vld [vmem:[#allocation68_spill] sm:$0xff] }
  0xd3   :  { %8250 = vmatprep.subr.bf16.mxu1 %v15984_v20  ;;  %8442 = vmatprep.subr.bf16.mxu0 %v15985_v36  ;;  %15992 = vst [vmem:[#allocation72_spill] sm:$0xff] %v10962_v57  ;;  %v1543_v20 = vand.u32 4294901760, %v112_v33  ;;  %v1547_v36 = vand.u32 4294901760, %v116_v51  ;;  %v10970_v12 = vpack.c.bf16 %v1539_v31, %v1535_v2  ;;  %v1549_v14 = vand.u32 4294901760, %v115_v56  ;;  %v127_v5 = vld [vmem:[#allocation2 + $0x1d0] sm:$0xff] }
  0xd4   :  { %15990 = vst [vmem:[#allocation64_spill] sm:$0xff] %v10958_v53  ;;  %v119_v53 = vld [vmem:[#allocation2 + $0x190] sm:$0xff]  ;;  %v10976_v57 = vsub.f32 %v104_v38, %v1535_v2  ;;  %v10978_v19 = vsub.f32 %v108_v13, %v1539_v31  ;;  %v10982_v63 = vpack.c.bf16 %v1541_v60, %v1537_v4  ;;  %v1551_v17 = vand.u32 4294901760, %v120_v41 }
  0xd5   :  { %15998 = vst [vmem:[#allocation75_spill] sm:$0xff] %v10970_v12  ;;  %v132_v12 = vld [vmem:[#allocation2 + $0x1f8] sm:$0xff]  ;;  %v131_v3 = vld [vmem:[#allocation2 + $0x1f0] sm:$0xff]  ;;  %v10986_v37 = vpack.c.bf16 %v1547_v36, %v1543_v20  ;;  %v10988_v24 = vsub.f32 %v112_v33, %v1543_v20  ;;  %v1553_v38 = vand.u32 4294901760, %v119_v53  ;;  %v1557_v2 = vand.u32 4294901760, %v123_v52 }
  0xd6   :  { %8252 = vmatpush1.bf16.msra.mxu1 %v15995_v35  ;;  %8444 = vmatpush1.bf16.msra.mxu0 %v15996_v59  ;;  %16001 = vst [vmem:[#allocation76_spill] sm:$0xff] %v10976_v57  ;;  %16002 = vst [vmem:[#allocation78_spill] sm:$0xff] %v10978_v19  ;;  %v10980_v35 = vsub.f32 %v103_v49, %v1537_v4  ;;  %v10984_v59 = vsub.f32 %v107_v9, %v1541_v60  ;;  %v16009_v49 = vld [vmem:[#allocation74_spill] sm:$0xff]  ;;  %v136_v4 = vld [vmem:[#allocation2 + $0x218] sm:$0xff] }
  0xd7   :  { %8254 = vmatprep.subr.bf16.mxu1 %v15999_v30  ;;  %8446 = vmatprep.subr.bf16.mxu0 %v16000_v44  ;;  %16004 = vst [vmem:[#allocation81_spill] sm:$0xff] %v10982_v63  ;;  %16006 = vst [vmem:[#allocation86_spill] sm:$0xff] %v10986_v37  ;;  %v16008_v13 = vpack.c.bf16 %v15889_v32, %v15888_v45  ;;  %v10994_v31 = vsub.f32 %v116_v51, %v1547_v36  ;;  %v140_v30 = vld [vmem:[#allocation2 + $0x238] sm:$0xff]  ;;  %v1559_v44 = vand.u32 4294901760, %v128_v34 }
  0xd8   :  { %16003 = vst [vmem:[#allocation79_spill] sm:$0xff] %v10980_v35  ;;  %16005 = vst [vmem:[#allocation82_spill] sm:$0xff] %v10984_v59  ;;  %v10996_v9 = vpack.c.bf16 %v1549_v14, %v1545_v6  ;;  %v10998_v60 = vsub.f32 %v111_v7, %v1545_v6  ;;  %v16013_v33 = vpack.c.bf16 %v15891_v23, %v15890_v1  ;;  %v16014_v20 = vld [vmem:[#allocation77_spill] sm:$0xff]  ;;  %v1563_v37 = vand.u32 4294901760, %v132_v12 }
  0xd9   :  { %16007 = vst [vmem:[#allocation11_spill] sm:$0xff] %v10988_v24  ;;  %16010 = vst [vmem:[#allocation12_spill] sm:$0xff] %v10994_v31  ;;  %v1561_v32 = vand.u32 4294901760, %v127_v5  ;;  %v1565_v45 = vand.u32 4294901760, %v131_v3  ;;  %v11004_v51 = vsub.f32 %v115_v56, %v1549_v14  ;;  %v11006_v36 = vpack.c.bf16 %v1555_v29, %v1551_v17  ;;  %v143_v31 = vld [vmem:[#allocation2 + $0x250] sm:$0xff] }
  0xda   :  { %8256 = vmatpush1.bf16.msra.mxu1 %v16008_v13  ;;  %8448 = vmatpush1.bf16.msra.mxu0 %v16009_v49  ;;  %16011 = vst [vmem:[#allocation13_spill] sm:$0xff] %v10996_v9  ;;  %16012 = vst [vmem:[#allocation14_spill] sm:$0xff] %v10998_v60  ;;  %v135_v13 = vld [vmem:[#allocation2 + $0x210] sm:$0xff]  ;;  %v11008_v7 = vsub.f32 %v120_v41, %v1551_v17  ;;  %v11010_v6 = vsub.f32 %v124_v39, %v1555_v29  ;;  %v144_v9 = vld [vmem:[#allocation2 + $0x258] sm:$0xff]  ;;  %v1567_v1 = vand.u32 4294901760, %v136_v4 }
  0xdb   :  { %8258 = vmatprep.subr.bf16.mxu1 %v16013_v33  ;;  %8450 = vmatprep.subr.bf16.mxu0 %v16014_v20  ;;  %v139_v49 = vld [vmem:[#allocation2 + $0x230] sm:$0xff]  ;;  %16015 = vst [vmem:[#allocation15_spill] sm:$0xff] %v11004_v51  ;;  %16016 = vst [vmem:[#allocation16_spill] sm:$0xff] %v11006_v36  ;;  %v11012_v60 = vpack.c.bf16 %v1557_v2, %v1553_v38  ;;  %v11014_v23 = vsub.f32 %v119_v53, %v1553_v38  ;;  %v1571_v33 = vand.u32 4294901760, %v140_v30  ;;  %v148_v20 = vld [vmem:[#allocation2 + $0x278] sm:$0xff] }
  0xdc   :  { %16017 = vst [vmem:[#allocation17_spill] sm:$0xff] %v11008_v7  ;;  %16018 = vst [vmem:[#allocation24_spill] sm:$0xff] %v11010_v6  ;;  %v147_v24 = vld [vmem:[#allocation2 + $0x270] sm:$0xff]  ;;  %v16021_v56 = vpack.c.bf16 %v15893_v8, %v15892_v46  ;;  %v11020_v41 = vsub.f32 %v123_v52, %v1557_v2  ;;  %v11022_v39 = vsub.f32 %v128_v34, %v1559_v44  ;;  %v1569_v29 = vand.u32 4294901760, %v135_v13  ;;  %v152_v34 = vld [vmem:[#allocation2 + $0x298] sm:$0xff] }
  0xdd   :  { %16019 = vst [vmem:[#allocation32_spill] sm:$0xff] %v11012_v60  ;;  %16020 = vst [vmem:[#allocation31_spill] sm:$0xff] %v11014_v23  ;;  %v16022_v14 = vld [vmem:[#allocation80_spill] sm:$0xff]  ;;  %v1573_v17 = vand.u32 4294901760, %v139_v49  ;;  %v16027_v60 = vld [vmem:[#allocation83_spill] sm:$0xff]  ;;  %v11028_v23 = vpack.c.bf16 %v1563_v37, %v1559_v44  ;;  %v11030_v36 = vsub.f32 %v132_v12, %v1563_v37  ;;  %v11032_v46 = vpack.c.bf16 %v1565_v45, %v1561_v32 }
  0xde   :  { %8260 = vmatpush1.bf16.msra.mxu1 %v16021_v56  ;;  %8452 = vmatpush1.bf16.msra.mxu0 %v16022_v14  ;;  %16023 = vst [vmem:[#allocation25_spill] sm:$0xff] %v11020_v41  ;;  %16024 = vst [vmem:[#allocation35_spill] sm:$0xff] %v11022_v39  ;;  %v16025_v53 = vld [vmem:[#allocation84_spill] sm:$0xff]  ;;  %v1575_v8 = vand.u32 4294901760, %v144_v9  ;;  %v1579_v56 = vand.u32 4294901760, %v148_v20  ;;  %v1577_v52 = vand.u32 4294901760, %v143_v31  ;;  %v11034_v39 = vsub.f32 %v127_v5, %v1561_v32 }
  0xdf   :  { %v16026_v38 = vpack.c.bf16 %v15895_v27, %v16025_v53  ;;  %8454 = vmatprep.subr.bf16.mxu0 %v16027_v60  ;;  %16028 = vst [vmem:[#allocation34_spill] sm:$0xff] %v11028_v23  ;;  %16029 = vst [vmem:[#allocation30_spill] sm:$0xff] %v11030_v36  ;;  %v1581_v2 = vand.u32 4294901760, %v147_v24  ;;  %v156_v14 = vld [vmem:[#allocation2 + $0x2b8] sm:$0xff]  ;;  %v11036_v41 = vsub.f32 %v131_v3, %v1565_v45  ;;  %v151_v60 = vld [vmem:[#allocation2 + $0x290] sm:$0xff] }
  0xe0   :  { %16030 = vst [vmem:[#allocation37_spill] sm:$0xff] %v11032_v46  ;;  %16031 = vst [vmem:[#allocation36_spill] sm:$0xff] %v11034_v39  ;;  %v11038_v27 = vpack.c.bf16 %v1571_v33, %v1567_v1  ;;  %v11040_v53 = vsub.f32 %v136_v4, %v1567_v1  ;;  %v16035_v12 = vpack.c.bf16 %v15846_v61, %v15845_v43  ;;  %v16036_v37 = vld [vmem:[#allocation90_spill] sm:$0xff]  ;;  %v155_v5 = vld [vmem:[#allocation2 + $0x2b0] sm:$0xff]  ;;  %v1583_v43 = vand.u32 4294901760, %v152_v34 }
  0xe1   :  { %8262 = vmatprep.subr.bf16.mxu1 %v16026_v38  ;;  %16032 = vst [vmem:[#allocation33_spill] sm:$0xff] %v11036_v41  ;;  %v11046_v44 = vsub.f32 %v140_v30, %v1571_v33  ;;  %v11048_v38 = vpack.c.bf16 %v1573_v17, %v1569_v29  ;;  %v11050_v46 = vsub.f32 %v135_v13, %v1569_v29  ;;  %v160_v3 = vld [vmem:[#allocation2 + $0x2d8] sm:$0xff]  ;;  %v16041_v45 = vld [vmem:[#allocation94_spill] sm:$0xff]  ;;  %v1587_v30 = vand.u32 4294901760, %v156_v14  ;;  %v159_v33 = vld [vmem:[#allocation2 + $0x2d0] sm:$0xff] }
  0xe2   :  { %16033 = vst [vmem:[#allocation40_spill] sm:$0xff] %v11038_v27  ;;  %16034 = vst [vmem:[#allocation39_spill] sm:$0xff] %v11040_v53  ;;  %8264 = vmatpush1.bf16.msra.mxu1 %v16035_v12  ;;  %8456 = vmatpush1.bf16.msra.mxu0 %v16036_v37  ;;  %v164_v32 = vld [vmem:[#allocation2 + $0x2f8] sm:$0xff]  ;;  %v16040_v4 = vpack.c.bf16 %v15848_v42, %v15847_v62  ;;  %v11056_v1 = vsub.f32 %v139_v49, %v1573_v17  ;;  %v163_v12 = vld [vmem:[#allocation2 + $0x2f0] sm:$0xff]  ;;  %v1591_v49 = vand.u32 4294901760, %v160_v3 }
  0xe3   :  { %16037 = vst [vmem:[#allocation38_spill] sm:$0xff] %v11046_v44  ;;  %16038 = vst [vmem:[#allocation43_spill] sm:$0xff] %v11048_v38  ;;  %8458 = vmatprep.subr.bf16.mxu0 %v16041_v45  ;;  %v11058_v61 = vsub.f32 %v144_v9, %v1575_v8  ;;  %v11060_v37 = vpack.c.bf16 %v1579_v56, %v1575_v8  ;;  %v11062_v13 = vsub.f32 %v148_v20, %v1579_v56  ;;  %v168_v62 = vld [vmem:[#allocation2 + $0x318] sm:$0xff]  ;;  %v167_v9 = vld [vmem:[#allocation2 + $0x310] sm:$0xff] }
  0xe4   :  { %16039 = vst [vmem:[#allocation42_spill] sm:$0xff] %v11050_v46  ;;  %8266 = vmatprep.subr.bf16.mxu1 %v16040_v4  ;;  %16042 = vst [vmem:[#allocation41_spill] sm:$0xff] %v11056_v1  ;;  %v11064_v29 = vpack.c.bf16 %v1581_v2, %v1577_v52  ;;  %v11066_v38 = vsub.f32 %v143_v31, %v1577_v52  ;;  %v172_v42 = vld [vmem:[#allocation2 + $0x338] sm:$0xff]  ;;  %v1585_v4 = vand.u32 4294901760, %v151_v60  ;;  %v1589_v45 = vand.u32 4294901760, %v155_v5 }
  0xe5   :  { %16043 = vst [vmem:[#allocation46_spill] sm:$0xff] %v11058_v61  ;;  %16044 = vst [vmem:[#allocation45_spill] sm:$0xff] %v11060_v37  ;;  %v1595_v17 = vand.u32 4294901760, %v164_v32  ;;  %v171_v61 = vld [vmem:[#allocation2 + $0x330] sm:$0xff]  ;;  %v16048_v1 = vpack.c.bf16 %v15849_v28, %v10460_v58  ;;  %v16049_v8 = vld [vmem:[#allocation97_spill] sm:$0xff]  ;;  %v11072_v20 = vsub.f32 %v147_v24, %v1581_v2  ;;  %v11074_v56 = vsub.f32 %v152_v34, %v1583_v43 }
  0xe6   :  { %16045 = vst [vmem:[#allocation44_spill] sm:$0xff] %v11062_v13  ;;  %16046 = vst [vmem:[#allocation47_spill] sm:$0xff] %v11064_v29  ;;  %8460 = vmatpush1.bf16.msra.mxu0 %v16049_v8  ;;  %v1593_v31 = vand.u32 4294901760, %v159_v33  ;;  %v1597_v52 = vand.u32 4294901760, %v163_v12  ;;  %v16052_v29 = vpack.c.bf16 %v10487_v50, %v15850_v18  ;;  %v11080_v37 = vpack.c.bf16 %v1587_v30, %v1583_v43  ;;  %v176_v28 = vld [vmem:[#allocation2 + $0x358] sm:$0xff]  ;;  %v16063_v43 = vld [vmem:[#allocation104_spill] sm:$0xff] }
  0xe7   :  { %16047 = vst [vmem:[#allocation48_spill] sm:$0xff] %v11066_v38  ;;  %8268 = vmatpush1.bf16.msra.mxu1 %v16048_v1  ;;  %16050 = vst [vmem:[#allocation50_spill] sm:$0xff] %v11072_v20  ;;  %v16053_v38 = vld [vmem:[#allocation102_spill] sm:$0xff]  ;;  %v11082_v13 = vsub.f32 %v156_v14, %v1587_v30  ;;  %v11084_v58 = vsub.f32 %v151_v60, %v1585_v4  ;;  %v180_v1 = vld [vmem:[#allocation2 + $0x378] sm:$0xff]  ;;  %v1599_v24 = vand.u32 4294901760, %v168_v62  ;;  %v1603_v2 = vand.u32 4294901760, %v172_v42 }
  0xe8   :  { %16051 = vst [vmem:[#allocation55_spill] sm:$0xff] %v11074_v56  ;;  %8270 = vmatprep.subr.bf16.mxu1 %v16052_v29  ;;  %8462 = vmatprep.subr.bf16.mxu0 %v16053_v38  ;;  %16054 = vst [vmem:[#allocation54_spill] sm:$0xff] %v11080_v37  ;;  %v1601_v34 = vand.u32 4294901760, %v167_v9  ;;  %v1605_v8 = vand.u32 4294901760, %v171_v61  ;;  %v175_v56 = vld [vmem:[#allocation2 + $0x350] sm:$0xff]  ;;  %v11086_v46 = vpack.c.bf16 %v1589_v45, %v1585_v4  ;;  %v16061_v14 = vld [vmem:[#allocation103_spill] sm:$0xff] }
  0xe9   :  { %16055 = vst [vmem:[#allocation53_spill] sm:$0xff] %v11082_v13  ;;  %16056 = vst [vmem:[#allocation58_spill] sm:$0xff] %v11084_v58  ;;  %v179_v20 = vld [vmem:[#allocation2 + $0x370] sm:$0xff]  ;;  %v11088_v50 = vsub.f32 %v155_v5, %v1589_v45  ;;  %v11090_v18 = vpack.c.bf16 %v1595_v17, %v1591_v49  ;;  %v11092_v38 = vsub.f32 %v160_v3, %v1591_v49  ;;  %v1607_v58 = vand.u32 4294901760, %v176_v28 }
  0xea   :  { %16057 = vst [vmem:[#allocation57_spill] sm:$0xff] %v11086_v46  ;;  %v16062_v60 = vpack.c.bf16 %v15885_v40, %v16061_v14  ;;  %8464 = vmatpush1.bf16.msra.mxu0 %v16063_v43  ;;  %v11098_v30 = vsub.f32 %v164_v32, %v1595_v17  ;;  %v11100_v29 = vpack.c.bf16 %v1597_v52, %v1593_v31  ;;  %v1611_v13 = vand.u32 4294901760, %v180_v1  ;;  %v184_v17 = vld [vmem:[#allocation2 + $0x398] sm:$0xff]  ;;  %v16072_v43 = vld [vmem:[#allocation96_spill] sm:$0xff] }
  0xeb   :  { %16058 = vst [vmem:[#allocation56_spill] sm:$0xff] %v11088_v50  ;;  %16059 = vst [vmem:[#allocation61_spill] sm:$0xff] %v11090_v18  ;;  %v11103_v5 = vsub.f32 %v159_v33, %v1593_v31  ;;  %v11105_v4 = vsub.f32 %v163_v12, %v1597_v52  ;;  %v1609_v3 = vand.u32 4294901760, %v175_v56  ;;  %v1613_v45 = vand.u32 4294901760, %v179_v20  ;;  %v183_v31 = vld [vmem:[#allocation2 + $0x390] sm:$0xff] }
  0xec   :  { %16060 = vst [vmem:[#allocation60_spill] sm:$0xff] %v11092_v38  ;;  %8272 = vmatpush1.bf16.msra.mxu1 %v16062_v60  ;;  %16064 = vst [vmem:[#allocation59_spill] sm:$0xff] %v11098_v30  ;;  %v11107_v49 = vpack.c.bf16 %v1603_v2, %v1599_v24  ;;  %v11109_v40 = vsub.f32 %v168_v62, %v1599_v24  ;;  %v11111_v14 = vsub.f32 %v172_v42, %v1603_v2  ;;  %v188_v60 = vld [vmem:[#allocation2 + $0x3b8] sm:$0xff]  ;;  %v187_v52 = vld [vmem:[#allocation2 + $0x3b0] sm:$0xff] }
  0xed   :  { %16065 = vst [vmem:[#allocation62_spill] sm:$0xff] %v11100_v29  ;;  %8466 = vmatprep.subr.bf16.mxu1 %v10902_v22  ;;  %16066 = vst [vmem:[#allocation67_spill] sm:$0xff] %v11103_v5  ;;  %v11113_v32 = vpack.c.bf16 %v1605_v8, %v1601_v34  ;;  %1497 = vmatmul.mubr.f32.vlgmr.msra.gmra.mrb[0].mxu0 %v15906_v48  ;;  %v11117_v33 = vsub.f32 %v167_v9, %v1601_v34  ;;  %v16077_v2 = vld [vmem:[#allocation99_spill] sm:$0xff]  ;;  %v1619_v62 = vand.u32 4294901760, %v188_v60  ;;  %v192_v48 = vld [vmem:[#allocation2 + $0x3d8] sm:$0xff] }
  0xee   :  { %16067 = vst [vmem:[#allocation66_spill] sm:$0xff] %v11105_v4  ;;  %16068 = vst [vmem:[#allocation65_spill] sm:$0xff] %v11107_v49  ;;  %v11119_v12 = vsub.f32 %v171_v61, %v1605_v8  ;;  %v11124_v42 = vpack.c.bf16 %v1611_v13, %v1607_v58  ;;  %v11126_v24 = vsub.f32 %v176_v28, %v1607_v58  ;;  %v1615_v8 = vand.u32 4294901760, %v184_v17  ;;  %v195_v9 = vld [vmem:[#allocation2 + $0x3f0] sm:$0xff] }
  0xef   :  { %16069 = vst [vmem:[#allocation70_spill] sm:$0xff] %v11109_v40  ;;  %16070 = vst [vmem:[#allocation69_spill] sm:$0xff] %v11111_v14  ;;  %954 = vmatmul.mubr.f32.vlgmr.msra.gmra.mrb[0].mxu1 %v16072_v43  ;;  %v11132_v61 = vsub.f32 %v180_v1, %v1611_v13  ;;  %v11134_v34 = vpack.c.bf16 %v1613_v45, %v1609_v3  ;;  %v11136_v22 = vsub.f32 %v175_v56, %v1609_v3 }
  0xf0   :  { %16071 = vst [vmem:[#allocation68_spill] sm:$0xff] %v11113_v32  ;;  %16073 = vst [vmem:[#allocation71_spill] sm:$0xff] %v11117_v33  ;;  %8468 = vmatpush1.bf16.msra.mxu1 %v10908_v11  ;;  %1636 = vmatprep.mubr.f32.mxu1 %v16077_v2  ;;  %v11138_v11 = vsub.f32 %v179_v20, %v1613_v45  ;;  %v1617_v58 = vand.u32 4294901760, %v183_v31  ;;  %v1621_v28 = vand.u32 4294901760, %v187_v52  ;;  %v196_v2 = vld [vmem:[#allocation2 + $0x3f8] sm:$0xff]  ;;  %v16084_v1 = vand.u32 4294901760, %v10906_v55 }
  0xf1   :  { %16074 = vst [vmem:[#allocation74_spill] sm:$0xff] %v11119_v12  ;;  %16075 = vst [vmem:[#allocation77_spill] sm:$0xff] %v11124_v42  ;;  %8470 = vmatprep.subr.bf16.mxu1 %v10918_v47  ;;  %v11140_v43 = vsub.f32 %v184_v17, %v1615_v8  ;;  %v16083_v47 = vand.u32 4294901760, %v10904_v21  ;;  %v16085_v20 = vand.u32 4294901760, %v10910_v0  ;;  %v16086_v45 = vand.u32 4294901760, %v10916_v15  ;;  %v16092_v12 = vld [vmem:[#allocation21_spill] sm:$0xff] }
  0xf2   :  { %16076 = vst [vmem:[#allocation80_spill] sm:$0xff] %v11126_v24  ;;  %16078 = vst [vmem:[#allocation84_spill] sm:$0xff] %v11132_v61  ;;  %v191_v24 = vld [vmem:[#allocation2 + $0x3d0] sm:$0xff]  ;;  %v1627_v56 = vand.u32 4294901760, %v196_v2  ;;  %v11163_v61 = vpack.c.bf16 %v1621_v28, %v1617_v58  ;;  %v1629_v42 = vand.u32 4294901760, %v195_v9 }
  0xf3   :  { %16079 = vst [vmem:[#allocation83_spill] sm:$0xff] %v11134_v34  ;;  %16080 = vst [vmem:[#allocation90_spill] sm:$0xff] %v11136_v22  ;;  %v1651_v13 = vsub.f32 %v10904_v21, %v16083_v47  ;;  %v1663_v34 = vsub.f32 %v10906_v55, %v16084_v1  ;;  %v1657_v3 = vsub.f32 %v10910_v0, %v16085_v20  ;;  %v1623_v1 = vand.u32 4294901760, %v192_v48  ;;  %v16134_v21 = vld [vmem:[#allocation35_spill] sm:$0xff]  ;;  %v16139_v55 = vld [vmem:[#allocation37_spill] sm:$0xff] }
  0xf4   :  { %16081 = vst [vmem:[#allocation94_spill] sm:$0xff] %v11138_v11  ;;  %16082 = vst [vmem:[#allocation97_spill] sm:$0xff] %v11140_v43  ;;  %8472 = vmatpush1.bf16.msra.mxu1 %v10928_v54  ;;  %v1669_v17 = vsub.f32 %v10916_v15, %v16086_v45  ;;  %v11159_v11 = vpack.c.bf16 %v1619_v62, %v1615_v8  ;;  %v1625_v22 = vand.u32 4294901760, %v191_v24  ;;  %v16091_v43 = vand.u32 4294901760, %v10920_v10  ;;  %v16093_v8 = vld [vmem:[#allocation28_spill] sm:$0xff] }
  0xf5   :  { %8474 = vmatprep.subr.bf16.mxu1 %v10934_v16  ;;  %v11161_v54 = vsub.f32 %v188_v60, %v1619_v62  ;;  %16089 = vst [vmem:[#allocation104_spill] sm:$0xff] %v11163_v61  ;;  %v11165_v20 = vsub.f32 %v183_v31, %v1617_v58  ;;  %v1652_v32 = vand.u32 4294901760, %v1651_v13  ;;  %v1664_v45 = vand.u32 4294901760, %v1663_v34  ;;  %v16096_v34 = vld [vmem:[#allocation49_spill] sm:$0xff] }
  0xf6   :  { %16087 = vst [vmem:[#allocation102_spill] sm:$0xff] %v11159_v11  ;;  %v1675_v47 = vsub.f32 %v10920_v10, %v16091_v43  ;;  %v1658_v11 = vand.u32 4294901760, %v1657_v3  ;;  %v1670_v33 = vand.u32 4294901760, %v1669_v17  ;;  %v16094_v60 = vand.u32 4294901760, %v10926_v25 }
  0xf7   :  { %16088 = vst [vmem:[#allocation103_spill] sm:$0xff] %v11161_v54  ;;  %16090 = vst [vmem:[#allocation99_spill] sm:$0xff] %v11165_v20  ;;  %v16095_v31 = vand.u32 4294901760, %v10930_v26  ;;  %v11181_v13 = vsub.f32 %v187_v52, %v1621_v28  ;;  %v11183_v43 = vpack.c.bf16 %v1627_v56, %v1623_v1  ;;  %v11185_v16 = vsub.f32 %v192_v48, %v1623_v1  ;;  %v16104_v20 = vld [vmem:[#allocation26_spill] sm:$0xff]  ;;  %v16116_v1 = vld [vmem:[#allocation12_spill] sm:$0xff] }
  0xf8   :  { %8476 = vmatpush1.bf16.msra.mxu1 %v16093_v8  ;;  %v1687_v62 = vsub.f32 %v10926_v25, %v16094_v60  ;;  %v16100_v8 = vld [vmem:[#allocation23_spill] sm:$0xff]  ;;  %v11188_v17 = vsub.f32 %v196_v2, %v1627_v56  ;;  %v11190_v61 = vpack.c.bf16 %v1629_v42, %v1625_v22  ;;  %v11192_v60 = vsub.f32 %v191_v24, %v1625_v22  ;;  %v16107_v2 = vld [vmem:[#allocation105_spill] sm:$0xff] }
  0xf9   :  { %v11178_v58 = vsub.f32 %v10930_v26, %v16095_v31  ;;  %8478 = vmatprep.subr.bf16.mxu1 %v16096_v34  ;;  %16097 = vst [vmem:[#allocation107_spill] sm:$0xff] %v11181_v13  ;;  %16098 = vst [vmem:[#allocation108_spill] sm:$0xff] %v11183_v43  ;;  %v15131_v3 = vand.u32 4294901760, %v16100_v8  ;;  %v15132_v54 = vand.u32 4294901760, %v16104_v20  ;;  %v11195_v31 = vsub.f32 %v195_v9, %v1629_v42  ;;  %v16108_v42 = vld [vmem:[#allocation75_spill] sm:$0xff]  ;;  %v16117_v26 = vld [vmem:[#allocation86_spill] sm:$0xff] }
  0xfa   :  { %16099 = vst [vmem:[#allocation109_spill] sm:$0xff] %v11185_v16  ;;  %16101 = vst [vmem:[#allocation110_spill] sm:$0xff] %v11188_v17  ;;  %v11197_v14 = vpack.c.bf16 %v1664_v45, %v1652_v32  ;;  %v16106_v52 = vand.u32 4294901760, %v16092_v12  ;;  %v11207_v56 = vpack.c.bf16 %v1670_v33, %v1658_v11  ;;  %v1676_v22 = vand.u32 4294901760, %v1675_v47  ;;  %v16109_v9 = vld [vmem:[#allocation27_spill] sm:$0xff]  ;;  %v16110_v47 = vld [vmem:[#allocation29_spill] sm:$0xff] }
  0xfb   :  { %16102 = vst [vmem:[#allocation111_spill] sm:$0xff] %v11190_v61  ;;  %16103 = vst [vmem:[#allocation112_spill] sm:$0xff] %v11192_v60  ;;  %v1688_v24 = vand.u32 4294901760, %v1687_v62  ;;  %v11214_v32 = vsub.f32 %v16100_v8, %v15131_v3  ;;  %v11224_v33 = vsub.f32 %v16104_v20, %v15132_v54  ;;  %v16112_v45 = vld [vmem:[#allocation64_spill] sm:$0xff]  ;;  %v16115_v8 = vld [vmem:[#allocation11_spill] sm:$0xff]  ;;  %v16119_v62 = vand.u32 4294901760, %v16109_v9 }
  0xfc   :  { %16105 = vst [vmem:[#allocation113_spill] sm:$0xff] %v11195_v31  ;;  %v11202_v28 = vsub.f32 %v16092_v12, %v16106_v52  ;;  %8480 = vmatpush1.bf16.msra.mxu1 %v16107_v2  ;;  %v16111_v52 = vld [vmem:[#allocation52_spill] sm:$0xff]  ;;  %v16114_v2 = vld [vmem:[#allocation73_spill] sm:$0xff]  ;;  %v16118_v12 = vld [vmem:[#allocation14_spill] sm:$0xff]  ;;  %v16123_v20 = vand.u32 4294901760, %v16112_v45 }
  0xfd   :  { %8482 = vmatprep.subr.bf16.mxu1 %v16108_v42  ;;  %v16113_v11 = vld [vmem:[#allocation72_spill] sm:$0xff]  ;;  %v11247_v42 = vpack.c.bf16 %v1688_v24, %v1676_v22  ;;  %v1705_v48 = vsub.f32 %v16109_v9, %v16119_v62  ;;  %v1700_v22 = vand.u32 4294901760, %v11214_v32  ;;  %v16120_v24 = vand.u32 4294901760, %v16110_v47  ;;  %v16127_v25 = vld [vmem:[#allocation25_spill] sm:$0xff] }
  0xfe   :  { %v1694_v34 = vand.u32 4294901760, %v11202_v28  ;;  %v1712_v62 = vand.u32 4294901760, %v11224_v33  ;;  %v16122_v3 = vand.u32 4294901760, %v16111_v52  ;;  %v1735_v32 = vsub.f32 %v16112_v45, %v16123_v20 }
  0xff   :  { %v1717_v28 = vsub.f32 %v16110_v47, %v16120_v24  ;;  %v16124_v24 = vld [vmem:[#allocation16_spill] sm:$0xff]  ;;  %v16125_v54 = vand.u32 4294901760, %v16113_v11  ;;  %v16126_v47 = vld [vmem:[#allocation31_spill] sm:$0xff]  ;;  %v16128_v0 = vand.u32 4294901760, %v16114_v2  ;;  %v16129_v9 = vand.u32 4294901760, %v10976_v57 }
 0x100   :  { %8484 = vmatpush1.bf16.msra.mxu1 %v10982_v63  ;;  %v1723_v10 = vsub.f32 %v16111_v52, %v16122_v3  ;;  %v1706_v52 = vand.u32 4294901760, %v1705_v48  ;;  %v16130_v45 = vand.u32 4294901760, %v10978_v19 }
 0x101   :  { %8486 = vmatprep.subr.bf16.mxu1 %v16117_v26  ;;  %v16121_v26 = vld [vmem:[#allocation13_spill] sm:$0xff]  ;;  %v1729_v63 = vsub.f32 %v16113_v11, %v16125_v54  ;;  %v1741_v20 = vsub.f32 %v16114_v2, %v16128_v0  ;;  %v16132_v11 = vand.u32 4294901760, %v10984_v59  ;;  %v16133_v2 = vld [vmem:[#allocation32_spill] sm:$0xff]  ;;  %v1718_v15 = vand.u32 4294901760, %v1717_v28 }
 0x102   :  { %v1759_v54 = vsub.f32 %v10978_v19, %v16130_v45 }
 0x103   :  { %v1765_v48 = vsub.f32 %v10984_v59, %v16132_v11  ;;  %v1730_v19 = vand.u32 4294901760, %v1729_v63  ;;  %v16136_v11 = vand.u32 4294901760, %v16116_v1  ;;  %v1742_v28 = vand.u32 4294901760, %v1741_v20 }
 0x104   :  { %8488 = vmatpush1.bf16.msra.mxu1 %v16121_v26  ;;  %v16131_v26 = vand.u32 4294901760, %v10980_v35  ;;  %v16137_v63 = vand.u32 4294901760, %v16118_v12  ;;  %v11326_v20 = vpack.c.bf16 %v1718_v15, %v1706_v52 }
 0x105   :  { %8490 = vmatprep.subr.bf16.mxu1 %v16124_v24  ;;  %v1747_v24 = vsub.f32 %v10976_v57, %v16129_v9  ;;  %v1724_v9 = vand.u32 4294901760, %v1723_v10  ;;  %v1736_v57 = vand.u32 4294901760, %v1735_v32  ;;  %v1783_v3 = vsub.f32 %v16116_v1, %v16136_v11 }
 0x106   :  { %v1753_v33 = vsub.f32 %v10980_v35, %v16131_v26  ;;  %v16135_v26 = vand.u32 4294901760, %v16115_v8  ;;  %v1760_v32 = vand.u32 4294901760, %v1759_v54  ;;  %v1766_v59 = vand.u32 4294901760, %v1765_v48 }
 0x107   :  { %v1748_v10 = vand.u32 4294901760, %v1747_v24  ;;  %v16140_v11 = vand.u32 4294901760, %v11178_v58  ;;  %v11324_v24 = vpack.c.bf16 %v1712_v62, %v1700_v22  ;;  %v11331_v54 = vpack.c.bf16 %v1736_v57, %v1724_v9  ;;  %v11350_v9 = vld [vmem:[#allocation5 + $0x18] sm:$0xff] }
 0x108   :  { %8492 = vmatpush1.bf16.msra.mxu1 %v16133_v2  ;;  %v1771_v35 = vsub.f32 %v16115_v8, %v16135_v26  ;;  %v1754_v45 = vand.u32 4294901760, %v1753_v33  ;;  %v16138_v26 = vand.u32 4294901760, %v11004_v51  ;;  %v16142_v2 = vld [vmem:[#allocation41_spill] sm:$0xff]  ;;  %16147 = vst [vmem:[#allocation117_spill] sm:$0xff] %v11350_v9  ;;  %v16153_v33 = vld [vmem:[#allocation48_spill] sm:$0xff] }
 0x109   :  { %8494 = vmatprep.subr.bf16.mxu1 %v11028_v23  ;;  %v1777_v23 = vsub.f32 %v16118_v12, %v16137_v63  ;;  %v11322_v0 = vpack.c.bf16 %v1694_v34, %v16140_v11  ;;  %v1784_v63 = vand.u32 4294901760, %v1783_v3  ;;  %v11335_v12 = vpack.c.bf16 %v1742_v28, %v1730_v19  ;;  %v11348_v3 = vld [vmem:[#allocation5 + $0x8] sm:$0xff] }
 0x10a   :  { %v1789_v8 = vsub.f32 %v11004_v51, %v16138_v26  ;;  %v1772_v48 = vand.u32 4294901760, %v1771_v35  ;;  %v16141_v26 = vld [vmem:[#allocation42_spill] sm:$0xff]  ;;  %v11337_v58 = vpack.c.bf16 %v1760_v32, %v1748_v10  ;;  %v16144_v34 = vand.u32 4294901760, %v11008_v7  ;;  %16146 = vst [vmem:[#allocation116_spill] sm:$0xff] %v11348_v3  ;;  %v16148_v19 = vld [vmem:[#allocation43_spill] sm:$0xff]  ;;  %v16150_v32 = vld [vmem:[#allocation44_spill] sm:$0xff] }
 0x10b   :  { %v11345_v22 = vpack.c.bf16 %v1766_v59, %v1754_v45  ;;  %v1778_v57 = vand.u32 4294901760, %v1777_v23  ;;  %v16149_v10 = vld [vmem:[#allocation46_spill] sm:$0xff]  ;;  %v2793_v23 = vld [vmem:[#allocation5 + $0x10] sm:$0xff]  ;;  %v16156_v59 = vand.u32 4294901760, %v11348_v3  ;;  %v16157_v51 = vand.u32 4294901760, %v11350_v9  ;;  %v16167_v9 = vld [vmem:[#allocation53_spill] sm:$0xff] }
 0x10c   :  { %8496 = vmatpush1.bf16.msra.mxu1 %v16139_v55  ;;  %16143 = vst [vmem:[#allocation114_spill] sm:$0xff] %v11337_v58  ;;  %v11342_v15 = vsub.f32 %v11008_v7, %v16144_v34  ;;  %v1790_v62 = vand.u32 4294901760, %v1789_v8  ;;  %v2791_v45 = vld [vmem:[#allocation5] sm:$0xff]  ;;  %v16151_v8 = vld [vmem:[#allocation45_spill] sm:$0xff]  ;;  %v11359_v55 = vpack.c.bf16 %v1784_v63, %v1772_v48  ;;  %v16155_v7 = vand.u32 4294901760, %v11010_v6  ;;  %v16162_v34 = vld [vmem:[#allocation47_spill] sm:$0xff] }
 0x10d   :  { %8498 = vmatprep.subr.bf16.mxu1 %v11038_v27  ;;  %16145 = vst [vmem:[#allocation115_spill] sm:$0xff] %v11345_v22  ;;  %v16154_v35 = vld [vmem:[#allocation50_spill] sm:$0xff]  ;;  %v2933_v27 = vand.u32 4294901760, %v2791_v45  ;;  %v16160_v63 = vand.u32 4294901760, %v16126_v47  ;;  %v16163_v3 = vand.u32 4294901760, %v16127_v25  ;;  %v2801_v58 = vld [vmem:[#allocation5 + $0x50] sm:$0xff] }
 0x10e   :  { %16152 = vst [vmem:[#allocation118_spill] sm:$0xff] %v11359_v55  ;;  %v1796_v28 = vand.u32 4294901760, %v11342_v15  ;;  %v1807_v11 = vsub.f32 %v11010_v6, %v16155_v7  ;;  %v11374_v48 = vpack.c.bf16 %v1790_v62, %v1778_v57  ;;  %v2796_v7 = vld [vmem:[#allocation5 + $0x28] sm:$0xff]  ;;  %v2798_v6 = vld [vmem:[#allocation5 + $0x38] sm:$0xff]  ;;  %v2797_v15 = vld [vmem:[#allocation5 + $0x30] sm:$0xff] }
 0x10f   :  { %v11379_v52 = vsub.f32 %v16126_v47, %v16160_v63  ;;  %v11392_v62 = vsub.f32 %v2791_v45, %v2933_v27  ;;  %v2795_v63 = vld [vmem:[#allocation5 + $0x20] sm:$0xff]  ;;  %v2943_v57 = vand.u32 4294901760, %v2798_v6 }
 0x110   :  { %8500 = vmatpush1.bf16.msra.mxu1 %v16148_v19  ;;  %v2937_v19 = vand.u32 4294901760, %v2793_v23  ;;  %16159 = vst [vmem:[#allocation120_spill] sm:$0xff] %v11374_v48  ;;  %v1808_v55 = vand.u32 4294901760, %v1807_v11  ;;  %v2802_v11 = vld [vmem:[#allocation5 + $0x58] sm:$0xff]  ;;  %v2799_v22 = vld [vmem:[#allocation5 + $0x40] sm:$0xff] }
 0x111   :  { %8502 = vmatprep.subr.bf16.mxu1 %v16151_v8  ;;  %v11372_v8 = vpack.c.bf16 %v16157_v51, %v16156_v59  ;;  %v11388_v51 = vsub.f32 %v16127_v25, %v16163_v3  ;;  %16164 = vst [vmem:[#allocation122_spill] sm:$0xff] %v11392_v62  ;;  %v2939_v59 = vand.u32 4294901760, %v2796_v7  ;;  %v16168_v3 = vld [vmem:[#allocation58_spill] sm:$0xff]  ;;  %v2945_v62 = vand.u32 4294901760, %v2797_v15  ;;  %v2800_v25 = vld [vmem:[#allocation5 + $0x48] sm:$0xff]  ;;  %v16184_v48 = vld [vmem:[#allocation69_spill] sm:$0xff] }
 0x112   :  { %v11382_v1 = vpack.c.bf16 %v2937_v19, %v2933_v27  ;;  %v11396_v47 = vsub.f32 %v2793_v23, %v2937_v19  ;;  %v16169_v27 = vand.u32 4294901760, %v16134_v21  ;;  %v16170_v19 = vand.u32 4294901760, %v11030_v36 }
 0x113   :  { %16158 = vst [vmem:[#allocation119_spill] sm:$0xff] %v11372_v8  ;;  %8850 = vmatprep.subr.bf16.mxu0 %v11372_v8  ;;  %v2941_v8 = vand.u32 4294901760, %v2795_v63 }
 0x114   :  { %16161 = vst [vmem:[#allocation121_spill] sm:$0xff] %v11382_v1  ;;  %8504 = vmatpush1.bf16.msra.mxu1 %v16162_v34  ;;  %8852 = vmatpush1.bf16.msra.mxu0 %v11382_v1  ;;  %16165 = vst [vmem:[#allocation123_spill] sm:$0xff] %v11396_v47  ;;  %v16166_v34 = vld [vmem:[#allocation55_spill] sm:$0xff]  ;;  %v11405_v45 = vsub.f32 %v16134_v21, %v16169_v27  ;;  %v11411_v23 = vsub.f32 %v11030_v36, %v16170_v19 }
 0x115   :  { %8506 = vmatprep.subr.bf16.mxu1 %v11080_v37  ;;  %v1802_v37 = vand.u32 4294901760, %v11379_v52  ;;  %v11414_v1 = vpack.c.bf16 %v2943_v57, %v2939_v59  ;;  %v11417_v47 = vsub.f32 %v2796_v7, %v2939_v59  ;;  %v11419_v27 = vsub.f32 %v2798_v6, %v2943_v57  ;;  %v2804_v7 = vld [vmem:[#allocation5 + $0x68] sm:$0xff] }
 0x116   :  { %v11421_v21 = vpack.c.bf16 %v2945_v62, %v2941_v8  ;;  %v11423_v52 = vsub.f32 %v2795_v63, %v2941_v8  ;;  %v11427_v19 = vsub.f32 %v2797_v15, %v2945_v62  ;;  %v2947_v6 = vand.u32 4294901760, %v2800_v25  ;;  %v16202_v36 = vld [vmem:[#allocation83_spill] sm:$0xff] }
 0x117   :  { %16171 = vst [vmem:[#allocation124_spill] sm:$0xff] %v11414_v1  ;;  %16172 = vst [vmem:[#allocation125_spill] sm:$0xff] %v11417_v47  ;;  %8854 = vmatprep.subr.bf16.mxu0 %v11414_v1  ;;  %v1814_v57 = vand.u32 4294901760, %v11388_v51  ;;  %v2951_v8 = vand.u32 4294901760, %v2802_v11  ;;  %v2949_v59 = vand.u32 4294901760, %v2799_v22  ;;  %v2953_v63 = vand.u32 4294901760, %v2801_v58 }
 0x118   :  { %8508 = vmatpush1.bf16.msra.mxu1 %v11086_v46  ;;  %16173 = vst [vmem:[#allocation126_spill] sm:$0xff] %v11419_v27  ;;  %16174 = vst [vmem:[#allocation127_spill] sm:$0xff] %v11421_v21  ;;  %8856 = vmatpush1.bf16.msra.mxu0 %v11421_v21  ;;  %v11435_v46 = vpack.c.bf16 %v1808_v55, %v1796_v28  ;;  %v1820_v1 = vand.u32 4294901760, %v11405_v45  ;;  %v16177_v15 = vand.u32 4294901760, %v11034_v39  ;;  %v2803_v28 = vld [vmem:[#allocation5 + $0x60] sm:$0xff]  ;;  %v2805_v45 = vld [vmem:[#allocation5 + $0x70] sm:$0xff] }
 0x119   :  { %16175 = vst [vmem:[#allocation128_spill] sm:$0xff] %v11423_v52  ;;  %8510 = vmatprep.subr.bf16.mxu1 %v11090_v18  ;;  %16176 = vst [vmem:[#allocation129_spill] sm:$0xff] %v11427_v19  ;;  %v2806_v18 = vld [vmem:[#allocation5 + $0x78] sm:$0xff]  ;;  %v11445_v51 = vpack.c.bf16 %v2951_v8, %v2947_v6  ;;  %v11447_v21 = vsub.f32 %v2800_v25, %v2947_v6  ;;  %v11449_v19 = vsub.f32 %v2802_v11, %v2951_v8  ;;  %v16189_v27 = vld [vmem:[#allocation68_spill] sm:$0xff] }
 0x11a   :  { %v11441_v62 = vsub.f32 %v11034_v39, %v16177_v15  ;;  %v11451_v55 = vpack.c.bf16 %v2953_v63, %v2949_v59  ;;  %v11454_v15 = vsub.f32 %v2799_v22, %v2949_v59  ;;  %v11456_v52 = vsub.f32 %v2801_v58, %v2953_v63  ;;  %v2808_v63 = vld [vmem:[#allocation5 + $0x88] sm:$0xff]  ;;  %v2810_v39 = vld [vmem:[#allocation5 + $0x98] sm:$0xff]  ;;  %v2809_v22 = vld [vmem:[#allocation5 + $0x90] sm:$0xff] }
 0x11b   :  { %16178 = vst [vmem:[#allocation130_spill] sm:$0xff] %v11445_v51  ;;  %16179 = vst [vmem:[#allocation131_spill] sm:$0xff] %v11447_v21  ;;  %8858 = vmatprep.subr.bf16.mxu0 %v11445_v51  ;;  %v2955_v25 = vand.u32 4294901760, %v2804_v7  ;;  %v2959_v11 = vand.u32 4294901760, %v2806_v18  ;;  %v2957_v6 = vand.u32 4294901760, %v2803_v28  ;;  %v2961_v8 = vand.u32 4294901760, %v2805_v45 }
 0x11c   :  { %8512 = vmatpush1.bf16.msra.mxu1 %v11100_v29  ;;  %16180 = vst [vmem:[#allocation132_spill] sm:$0xff] %v11449_v19  ;;  %16181 = vst [vmem:[#allocation133_spill] sm:$0xff] %v11451_v55  ;;  %v16185_v29 = vld [vmem:[#allocation71_spill] sm:$0xff]  ;;  %v11463_v19 = vpack.c.bf16 %v1814_v57, %v1802_v37  ;;  %v16188_v58 = vand.u32 4294901760, %v11036_v41  ;;  %8860 = vmatpush1.bf16.msra.mxu0 %v11451_v55  ;;  %v2807_v57 = vld [vmem:[#allocation5 + $0x80] sm:$0xff] }
 0x11d   :  { %8514 = vmatprep.subr.bf16.mxu1 %v11107_v49  ;;  %16182 = vst [vmem:[#allocation134_spill] sm:$0xff] %v11454_v15  ;;  %16183 = vst [vmem:[#allocation135_spill] sm:$0xff] %v11456_v52  ;;  %v1832_v49 = vand.u32 4294901760, %v11411_v23  ;;  %v11474_v51 = vpack.c.bf16 %v2959_v11, %v2955_v25  ;;  %v11476_v52 = vsub.f32 %v2804_v7, %v2955_v25  ;;  %v16194_v15 = vld [vmem:[#allocation77_spill] sm:$0xff]  ;;  %v16197_v55 = vld [vmem:[#allocation80_spill] sm:$0xff]  ;;  %v2967_v7 = vand.u32 4294901760, %v2810_v39 }
 0x11e   :  { %16187 = vst [vmem:[#allocation136_spill] sm:$0xff] %v11463_v19  ;;  %v11470_v59 = vsub.f32 %v11036_v41, %v16188_v58  ;;  %v11478_v37 = vsub.f32 %v2806_v18, %v2959_v11  ;;  %v11480_v23 = vpack.c.bf16 %v2961_v8, %v2957_v6  ;;  %v11483_v58 = vsub.f32 %v2803_v28, %v2957_v6  ;;  %v16198_v41 = vld [vmem:[#allocation84_spill] sm:$0xff]  ;;  %v2814_v47 = vld [vmem:[#allocation5 + $0xb8] sm:$0xff] }
 0x11f   :  { %16190 = vst [vmem:[#allocation137_spill] sm:$0xff] %v11474_v51  ;;  %16191 = vst [vmem:[#allocation138_spill] sm:$0xff] %v11476_v52  ;;  %v11485_v21 = vsub.f32 %v2805_v45, %v2961_v8  ;;  %8862 = vmatprep.subr.bf16.mxu0 %v11474_v51  ;;  %v2963_v18 = vand.u32 4294901760, %v2808_v63  ;;  %v2965_v25 = vand.u32 4294901760, %v2807_v57  ;;  %v2969_v11 = vand.u32 4294901760, %v2809_v22  ;;  %v2812_v8 = vld [vmem:[#allocation5 + $0xa8] sm:$0xff] }
 0x120   :  { %8516 = vmatpush1.bf16.msra.mxu1 %v16189_v27  ;;  %16192 = vst [vmem:[#allocation139_spill] sm:$0xff] %v11478_v37  ;;  %16193 = vst [vmem:[#allocation140_spill] sm:$0xff] %v11480_v23  ;;  %v11492_v37 = vpack.c.bf16 %v1832_v49, %v1820_v1  ;;  %v16201_v28 = vand.u32 4294901760, %v11040_v53  ;;  %8864 = vmatpush1.bf16.msra.mxu0 %v11480_v23  ;;  %v11507_v49 = vsub.f32 %v2810_v39, %v2967_v7  ;;  %v16210_v23 = vld [vmem:[#allocation97_spill] sm:$0xff]  ;;  %v16214_v19 = vld [vmem:[#allocation104_spill] sm:$0xff] }
 0x121   :  { %8518 = vmatprep.subr.bf16.mxu1 %v16194_v15  ;;  %16195 = vst [vmem:[#allocation141_spill] sm:$0xff] %v11483_v58  ;;  %16196 = vst [vmem:[#allocation142_spill] sm:$0xff] %v11485_v21  ;;  %v1838_v15 = vand.u32 4294901760, %v11470_v59  ;;  %v11503_v51 = vpack.c.bf16 %v2967_v7, %v2963_v18  ;;  %v11505_v21 = vsub.f32 %v2808_v63, %v2963_v18  ;;  %v2811_v59 = vld [vmem:[#allocation5 + $0xa0] sm:$0xff]  ;;  %v2813_v58 = vld [vmem:[#allocation5 + $0xb0] sm:$0xff]  ;;  %v2971_v39 = vand.u32 4294901760, %v2812_v8 }
 0x122   :  { %v11498_v45 = vsub.f32 %v11040_v53, %v16201_v28  ;;  %16205 = vst [vmem:[#allocation145_spill] sm:$0xff] %v11507_v49  ;;  %v11509_v1 = vpack.c.bf16 %v2969_v11, %v2965_v25  ;;  %v16207_v28 = vld [vmem:[#allocation102_spill] sm:$0xff]  ;;  %v11512_v52 = vsub.f32 %v2807_v57, %v2965_v25  ;;  %v11514_v6 = vsub.f32 %v2809_v22, %v2969_v11  ;;  %v16211_v53 = vld [vmem:[#allocation103_spill] sm:$0xff]  ;;  %v2818_v27 = vld [vmem:[#allocation5 + $0xd8] sm:$0xff] }
 0x123   :  { %16203 = vst [vmem:[#allocation143_spill] sm:$0xff] %v11503_v51  ;;  %16204 = vst [vmem:[#allocation144_spill] sm:$0xff] %v11505_v21  ;;  %8866 = vmatprep.subr.bf16.mxu0 %v11503_v51  ;;  %v2975_v63 = vand.u32 4294901760, %v2814_v47  ;;  %v2973_v18 = vand.u32 4294901760, %v2811_v59  ;;  %v2977_v7 = vand.u32 4294901760, %v2813_v58  ;;  %v2816_v11 = vld [vmem:[#allocation5 + $0xc8] sm:$0xff] }
 0x124   :  { %8520 = vmatpush1.bf16.msra.mxu1 %v16202_v36  ;;  %16206 = vst [vmem:[#allocation146_spill] sm:$0xff] %v11509_v1  ;;  %16208 = vst [vmem:[#allocation147_spill] sm:$0xff] %v11512_v52  ;;  %v16212_v36 = vld [vmem:[#allocation99_spill] sm:$0xff]  ;;  %8868 = vmatpush1.bf16.msra.mxu0 %v11509_v1  ;;  %v2817_v21 = vld [vmem:[#allocation5 + $0xd0] sm:$0xff] }
 0x125   :  { %8522 = vmatprep.subr.bf16.mxu1 %v16207_v28  ;;  %16209 = vst [vmem:[#allocation148_spill] sm:$0xff] %v11514_v6  ;;  %v16213_v28 = vand.u32 4294901760, %v11046_v44  ;;  %v11531_v51 = vpack.c.bf16 %v2975_v63, %v2971_v39  ;;  %v11533_v6 = vsub.f32 %v2812_v8, %v2971_v39  ;;  %v11535_v49 = vsub.f32 %v2814_v47, %v2975_v63  ;;  %v2822_v1 = vld [vmem:[#allocation5 + $0xf8] sm:$0xff] }
 0x126   :  { %v11537_v52 = vpack.c.bf16 %v2977_v7, %v2973_v18  ;;  %v11540_v22 = vsub.f32 %v2811_v59, %v2973_v18  ;;  %v11542_v25 = vsub.f32 %v2813_v58, %v2977_v7  ;;  %v2979_v47 = vand.u32 4294901760, %v2816_v11 }
 0x127   :  { %v11525_v57 = vsub.f32 %v11046_v44, %v16213_v28  ;;  %16215 = vst [vmem:[#allocation149_spill] sm:$0xff] %v11531_v51  ;;  %16216 = vst [vmem:[#allocation150_spill] sm:$0xff] %v11533_v6  ;;  %v2815_v28 = vld [vmem:[#allocation5 + $0xc0] sm:$0xff]  ;;  %8870 = vmatprep.subr.bf16.mxu0 %v11531_v51  ;;  %v2983_v8 = vand.u32 4294901760, %v2818_v27  ;;  %v2985_v63 = vand.u32 4294901760, %v2817_v21  ;;  %v16222_v59 = vand.u32 4294901760, %v16141_v26 }
 0x128   :  { %8524 = vmatpush1.bf16.msra.mxu1 %v16214_v19  ;;  %16217 = vst [vmem:[#allocation151_spill] sm:$0xff] %v11535_v49  ;;  %16218 = vst [vmem:[#allocation152_spill] sm:$0xff] %v11537_v52  ;;  %v2981_v39 = vand.u32 4294901760, %v2815_v28  ;;  %v16221_v49 = vand.u32 4294901760, %v11441_v62  ;;  %8872 = vmatpush1.bf16.msra.mxu0 %v11537_v52  ;;  %v2820_v19 = vld [vmem:[#allocation5 + $0xe8] sm:$0xff]  ;;  %v11564_v62 = vsub.f32 %v2816_v11, %v2979_v47 }
 0x129   :  { %8526 = vmatprep.subr.bf16.mxu1 %v11183_v43  ;;  %16219 = vst [vmem:[#allocation153_spill] sm:$0xff] %v11540_v22  ;;  %16220 = vst [vmem:[#allocation154_spill] sm:$0xff] %v11542_v25  ;;  %v11556_v58 = vsub.f32 %v16141_v26, %v16222_v59  ;;  %v11562_v51 = vpack.c.bf16 %v2983_v8, %v2979_v47  ;;  %v2819_v59 = vld [vmem:[#allocation5 + $0xe0] sm:$0xff]  ;;  %v2821_v43 = vld [vmem:[#allocation5 + $0xf0] sm:$0xff]  ;;  %v11573_v7 = vsub.f32 %v2817_v21, %v2985_v63 }
 0x12a   :  { %v11551_v6 = vpack.c.bf16 %v1838_v15, %v16221_v49  ;;  %16224 = vst [vmem:[#allocation156_spill] sm:$0xff] %v11564_v62  ;;  %v11566_v15 = vsub.f32 %v2818_v27, %v2983_v8  ;;  %v11568_v49 = vpack.c.bf16 %v2985_v63, %v2981_v39  ;;  %v11571_v18 = vsub.f32 %v2815_v28, %v2981_v39  ;;  %v16230_v8 = vld [vmem:[#allocation106_spill] sm:$0xff]  ;;  %v2824_v11 = vld [vmem:[#allocation5 + $0x108] sm:$0xff] }
 0x12b   :  { %16223 = vst [vmem:[#allocation155_spill] sm:$0xff] %v11562_v51  ;;  %16228 = vst [vmem:[#allocation160_spill] sm:$0xff] %v11573_v7  ;;  %v2987_v52 = vand.u32 4294901760, %v2820_v19  ;;  %v2991_v25 = vand.u32 4294901760, %v2822_v1  ;;  %8874 = vmatprep.subr.bf16.mxu0 %v11562_v51  ;;  %v2989_v27 = vand.u32 4294901760, %v2819_v59  ;;  %v2993_v47 = vand.u32 4294901760, %v2821_v43 }
 0x12c   :  { %8528 = vmatpush1.bf16.msra.mxu1 %v11190_v61  ;;  %16225 = vst [vmem:[#allocation157_spill] sm:$0xff] %v11566_v15  ;;  %16226 = vst [vmem:[#allocation158_spill] sm:$0xff] %v11568_v49  ;;  %v16229_v61 = vand.u32 4294901760, %v16142_v2  ;;  %v16231_v28 = vand.u32 4294901760, %v16149_v10  ;;  %v16232_v39 = vand.u32 4294901760, %v16150_v32  ;;  %8876 = vmatpush1.bf16.msra.mxu0 %v11568_v49  ;;  %v2826_v51 = vld [vmem:[#allocation5 + $0x118] sm:$0xff] }
 0x12d   :  { %8530 = vmatprep.subr.bf16.mxu1 %v11197_v14  ;;  %16227 = vst [vmem:[#allocation159_spill] sm:$0xff] %v11571_v18  ;;  %v1856_v14 = vand.u32 4294901760, %v11525_v57  ;;  %v11597_v57 = vsub.f32 %v2820_v19, %v2987_v52  ;;  %v11599_v7 = vsub.f32 %v2822_v1, %v2991_v25  ;;  %v2995_v18 = vand.u32 4294901760, %v2824_v11  ;;  %v2823_v15 = vld [vmem:[#allocation5 + $0x100] sm:$0xff] }
 0x12e   :  { %v1861_v22 = vsub.f32 %v16142_v2, %v16229_v61  ;;  %v11585_v21 = vsub.f32 %v16149_v10, %v16231_v28  ;;  %v11590_v63 = vsub.f32 %v16150_v32, %v16232_v39  ;;  %v11593_v61 = vpack.c.bf16 %v2991_v25, %v2987_v52  ;;  %v2825_v39 = vld [vmem:[#allocation5 + $0x110] sm:$0xff] }
 0x12f   :  { %1642 = vmatmul.mubr.f32.vlgmr.msra.gmra.mrb[2].mxu1 %v16230_v8  ;;  %v16234_v8 = vld [vmem:[#allocation85_spill] sm:$0xff]  ;;  %16235 = vst [vmem:[#allocation161_spill] sm:$0xff] %v11597_v57  ;;  %16236 = vst [vmem:[#allocation162_spill] sm:$0xff] %v11599_v7  ;;  %v11601_v28 = vpack.c.bf16 %v2993_v47, %v2989_v27  ;;  %v11605_v49 = vsub.f32 %v2819_v59, %v2989_v27  ;;  %v11607_v62 = vsub.f32 %v2821_v43, %v2993_v47 }
 0x130   :  { %16233 = vst [vmem:[#allocation106_spill] sm:$0xff] %v11593_v61  ;;  %8532 = vmatpush1.bf16.msra.mxu1 %v11207_v56  ;;  %2033 = vmatprep.mubr.f32.mxu1 %v16234_v8  ;;  %v2999_v56 = vand.u32 4294901760, %v2826_v51  ;;  %v2997_v10 = vand.u32 4294901760, %v2823_v15  ;;  %v1850_v52 = vand.u32 4294901760, %v11556_v58  ;;  %v1862_v19 = vand.u32 4294901760, %v1861_v22  ;;  %v2828_v58 = vld [vmem:[#allocation5 + $0x128] sm:$0xff] }
 0x131   :  { %16237 = vst [vmem:[#allocation163_spill] sm:$0xff] %v11601_v28  ;;  %8534 = vmatprep.subr.bf16.mxu1 %v11247_v42  ;;  %8878 = vmatprep.subr.bf16.mxu0 %v11593_v61  ;;  %16238 = vst [vmem:[#allocation164_spill] sm:$0xff] %v11605_v49  ;;  %v3001_v25 = vand.u32 4294901760, %v2825_v39  ;;  %v16240_v8 = vand.u32 4294901760, %v11498_v45  ;;  %v16241_v42 = vand.u32 4294901760, %v16153_v33  ;;  %v2830_v22 = vld [vmem:[#allocation5 + $0x138] sm:$0xff]  ;;  %v11625_v27 = vsub.f32 %v2824_v11, %v2995_v18 }
 0x132   :  { %16239 = vst [vmem:[#allocation165_spill] sm:$0xff] %v11607_v62  ;;  %8880 = vmatpush1.bf16.msra.mxu0 %v11601_v28  ;;  %v11622_v59 = vpack.c.bf16 %v2999_v56, %v2995_v18  ;;  %v11627_v45 = vsub.f32 %v2826_v51, %v2999_v56  ;;  %v3003_v1 = vand.u32 4294901760, %v2828_v58  ;;  %v3007_v28 = vand.u32 4294901760, %v2830_v22 }
 0x133   :  { %v11613_v7 = vpack.c.bf16 %v1856_v14, %v16240_v8  ;;  %v11618_v61 = vsub.f32 %v16153_v33, %v16241_v42  ;;  %16243 = vst [vmem:[#allocation167_spill] sm:$0xff] %v11625_v27  ;;  %v11629_v47 = vpack.c.bf16 %v3001_v25, %v2997_v10  ;;  %v11631_v14 = vsub.f32 %v2823_v15, %v2997_v10  ;;  %v2827_v8 = vld [vmem:[#allocation5 + $0x120] sm:$0xff]  ;;  %v2829_v42 = vld [vmem:[#allocation5 + $0x130] sm:$0xff] }
 0x134   :  { %16242 = vst [vmem:[#allocation166_spill] sm:$0xff] %v11622_v59  ;;  %8536 = vmatpush1.bf16.msra.mxu1 %v11322_v0  ;;  %16244 = vst [vmem:[#allocation168_spill] sm:$0xff] %v11627_v45  ;;  %8882 = vmatprep.subr.bf16.mxu0 %v11622_v59  ;;  %v11635_v43 = vsub.f32 %v2825_v39, %v3001_v25  ;;  %v3005_v62 = vand.u32 4294901760, %v2827_v8  ;;  %v1868_v0 = vand.u32 4294901760, %v11585_v21  ;;  %v1880_v51 = vand.u32 4294901760, %v11590_v63  ;;  %v2832_v25 = vld [vmem:[#allocation5 + $0x148] sm:$0xff] }
 0x135   :  { %16245 = vst [vmem:[#allocation169_spill] sm:$0xff] %v11629_v47  ;;  %16246 = vst [vmem:[#allocation170_spill] sm:$0xff] %v11631_v14  ;;  %8538 = vmatprep.subr.bf16.mxu1 %v11324_v24  ;;  %v16248_v18 = vand.u32 4294901760, %v16154_v35  ;;  %v3009_v15 = vand.u32 4294901760, %v2829_v42  ;;  %v11644_v11 = vpack.c.bf16 %v1862_v19, %v1850_v52  ;;  %v11649_v56 = vpack.c.bf16 %v3007_v28, %v3003_v1  ;;  %v2834_v21 = vld [vmem:[#allocation5 + $0x158] sm:$0xff]  ;;  %v2831_v19 = vld [vmem:[#allocation5 + $0x140] sm:$0xff] }
 0x136   :  { %16247 = vst [vmem:[#allocation171_spill] sm:$0xff] %v11635_v43  ;;  %8884 = vmatpush1.bf16.msra.mxu0 %v11629_v47  ;;  %v11652_v63 = vsub.f32 %v2828_v58, %v3003_v1  ;;  %v11654_v59 = vsub.f32 %v2830_v22, %v3007_v28  ;;  %v11658_v52 = vsub.f32 %v2827_v8, %v3005_v62  ;;  %v2833_v24 = vld [vmem:[#allocation5 + $0x150] sm:$0xff]  ;;  %v3011_v47 = vand.u32 4294901760, %v2832_v25 }
 0x137   :  { %v11642_v10 = vsub.f32 %v16154_v35, %v16248_v18  ;;  %16249 = vst [vmem:[#allocation172_spill] sm:$0xff] %v11649_v56  ;;  %v11656_v18 = vpack.c.bf16 %v3009_v15, %v3005_v62  ;;  %8886 = vmatprep.subr.bf16.mxu0 %v11649_v56  ;;  %v11662_v39 = vsub.f32 %v2829_v42, %v3009_v15  ;;  %v3015_v43 = vand.u32 4294901760, %v2834_v21  ;;  %v2838_v15 = vld [vmem:[#allocation5 + $0x178] sm:$0xff]  ;;  %v2837_v8 = vld [vmem:[#allocation5 + $0x170] sm:$0xff] }
 0x138   :  { %8540 = vmatpush1.bf16.msra.mxu1 %v11326_v20  ;;  %16250 = vst [vmem:[#allocation173_spill] sm:$0xff] %v11652_v63  ;;  %16251 = vst [vmem:[#allocation174_spill] sm:$0xff] %v11654_v59  ;;  %v3013_v14 = vand.u32 4294901760, %v2831_v19  ;;  %v11664_v20 = vpack.c.bf16 %v1880_v51, %v1868_v0  ;;  %v16255_v28 = vand.u32 4294901760, %v16166_v34  ;;  %v3017_v58 = vand.u32 4294901760, %v2833_v24  ;;  %v2836_v51 = vld [vmem:[#allocation5 + $0x168] sm:$0xff] }
 0x139   :  { %16252 = vst [vmem:[#allocation175_spill] sm:$0xff] %v11656_v18  ;;  %16253 = vst [vmem:[#allocation176_spill] sm:$0xff] %v11658_v52  ;;  %8542 = vmatprep.subr.bf16.mxu1 %v11331_v54  ;;  %v16256_v22 = vand.u32 4294901760, %v16167_v9  ;;  %v11680_v0 = vpack.c.bf16 %v3015_v43, %v3011_v47  ;;  %v11685_v62 = vsub.f32 %v2834_v21, %v3015_v43  ;;  %v16262_v52 = vld [vmem:[#allocation114_spill] sm:$0xff]  ;;  %v3023_v59 = vand.u32 4294901760, %v2838_v15  ;;  %v16291_v45 = vld [vmem:[#allocation136_spill] sm:$0xff] }
 0x13a   :  { %16254 = vst [vmem:[#allocation177_spill] sm:$0xff] %v11662_v39  ;;  %v11669_v1 = vsub.f32 %v16166_v34, %v16255_v28  ;;  %8888 = vmatpush1.bf16.msra.mxu0 %v11656_v18  ;;  %v11683_v28 = vsub.f32 %v2832_v25, %v3011_v47  ;;  %v11687_v56 = vpack.c.bf16 %v3017_v58, %v3013_v14  ;;  %v2835_v39 = vld [vmem:[#allocation5 + $0x160] sm:$0xff]  ;;  %v3019_v18 = vand.u32 4294901760, %v2836_v51  ;;  %v16267_v47 = vld [vmem:[#allocation115_spill] sm:$0xff] }
 0x13b   :  { %v11675_v54 = vsub.f32 %v16167_v9, %v16256_v22  ;;  %16257 = vst [vmem:[#allocation178_spill] sm:$0xff] %v11680_v0  ;;  %16259 = vst [vmem:[#allocation180_spill] sm:$0xff] %v11685_v62  ;;  %v11689_v22 = vsub.f32 %v2831_v19, %v3013_v14  ;;  %8890 = vmatprep.subr.bf16.mxu0 %v11680_v0  ;;  %v11693_v42 = vsub.f32 %v2833_v24, %v3017_v58  ;;  %v11714_v58 = vld [vmem:[#allocation5 + $0x198] sm:$0xff]  ;;  %v11727_v19 = vld [vmem:[#allocation5 + $0x190] sm:$0xff] }
 0x13c   :  { %8544 = vmatpush1.bf16.msra.mxu1 %v11335_v12  ;;  %16258 = vst [vmem:[#allocation179_spill] sm:$0xff] %v11683_v28  ;;  %16260 = vst [vmem:[#allocation181_spill] sm:$0xff] %v11687_v56  ;;  %v3021_v63 = vand.u32 4294901760, %v2835_v39  ;;  %v1886_v12 = vand.u32 4294901760, %v11642_v10  ;;  %v1892_v43 = vand.u32 4294901760, %v11669_v1  ;;  %v3025_v25 = vand.u32 4294901760, %v2837_v8 }
 0x13d   :  { %16261 = vst [vmem:[#allocation182_spill] sm:$0xff] %v11689_v22  ;;  %8546 = vmatprep.subr.bf16.mxu1 %v16262_v52  ;;  %16263 = vst [vmem:[#allocation114_spill] sm:$0xff] %v11693_v42  ;;  %v16264_v14 = vand.u32 4294901760, %v16168_v3  ;;  %v16265_v52 = vand.u32 4294901760, %v11088_v50  ;;  %v11710_v10 = vpack.c.bf16 %v3023_v59, %v3019_v18  ;;  %v11712_v1 = vld [vmem:[#allocation5 + $0x188] sm:$0xff]  ;;  %v11717_v0 = vsub.f32 %v2836_v51, %v3019_v18  ;;  %v11725_v22 = vld [vmem:[#allocation5 + $0x180] sm:$0xff] }
 0x13e   :  { %8892 = vmatpush1.bf16.msra.mxu0 %v11687_v56  ;;  %v11721_v42 = vpack.c.bf16 %v3025_v25, %v3021_v63  ;;  %v16272_v56 = vld [vmem:[#allocation118_spill] sm:$0xff]  ;;  %v1904_v62 = vand.u32 4294901760, %v11675_v54  ;;  %v16273_v28 = vand.u32 4294901760, %v11092_v38  ;;  %v15296_v54 = vand.u32 4294901760, %v11725_v22 }
 0x13f   :  { %v11701_v21 = vsub.f32 %v16168_v3, %v16264_v14  ;;  %v11706_v24 = vsub.f32 %v11088_v50, %v16265_v52  ;;  %16266 = vst [vmem:[#allocation183_spill] sm:$0xff] %v11710_v10  ;;  %16268 = vst [vmem:[#allocation115_spill] sm:$0xff] %v11717_v0  ;;  %v11719_v14 = vsub.f32 %v2838_v15, %v3023_v59  ;;  %8894 = vmatprep.subr.bf16.mxu0 %v11710_v10  ;;  %v11758_v10 = vld [vmem:[#allocation5 + $0x1b8] sm:$0xff]  ;;  %v16287_v0 = vld [vmem:[#allocation74_spill] sm:$0xff] }
 0x140   :  { %8548 = vmatpush1.bf16.msra.mxu1 %v16267_v47  ;;  %16270 = vst [vmem:[#allocation185_spill] sm:$0xff] %v11721_v42  ;;  %v11723_v52 = vsub.f32 %v2835_v39, %v3021_v63  ;;  %v11734_v47 = vsub.f32 %v11092_v38, %v16273_v28  ;;  %v11737_v59 = vsub.f32 %v2837_v8, %v3025_v25  ;;  %v16275_v63 = vand.u32 4294901760, %v11098_v30  ;;  %v2848_v39 = vld [vmem:[#allocation5 + $0x1c8] sm:$0xff]  ;;  %v2851_v3 = vld [vmem:[#allocation5 + $0x1e0] sm:$0xff] }
 0x141   :  { %16269 = vst [vmem:[#allocation184_spill] sm:$0xff] %v11719_v14  ;;  %8550 = vmatprep.subr.bf16.mxu1 %v16272_v56  ;;  %v16276_v15 = vand.u32 4294901760, %v11618_v61  ;;  %v1898_v8 = vand.u32 4294901760, %v11701_v21  ;;  %v1910_v25 = vand.u32 4294901760, %v11706_v24  ;;  %v16277_v56 = vld [vmem:[#allocation120_spill] sm:$0xff]  ;;  %v16278_v51 = vand.u32 4294901760, %v11712_v1 }
 0x142   :  { %16271 = vst [vmem:[#allocation186_spill] sm:$0xff] %v11723_v52  ;;  %16274 = vst [vmem:[#allocation118_spill] sm:$0xff] %v11737_v59  ;;  %v11743_v18 = vsub.f32 %v11098_v30, %v16275_v63  ;;  %8896 = vmatpush1.bf16.msra.mxu0 %v11721_v42  ;;  %v11756_v63 = vld [vmem:[#allocation5 + $0x1a8] sm:$0xff]  ;;  %v16279_v61 = vand.u32 4294901760, %v11714_v58  ;;  %v16281_v21 = vand.u32 4294901760, %v11727_v19  ;;  %v11775_v42 = vld [vmem:[#allocation5 + $0x1a0] sm:$0xff] }
 0x143   :  { %v11750_v28 = vpack.c.bf16 %v1886_v12, %v16276_v15  ;;  %v11777_v59 = vld [vmem:[#allocation5 + $0x1b0] sm:$0xff]  ;;  %v11788_v15 = vpack.c.bf16 %v1904_v62, %v1892_v43  ;;  %v16285_v14 = vand.u32 4294901760, %v11758_v10  ;;  %v16288_v62 = vand.u32 4294901760, %v11775_v42  ;;  %v16307_v34 = vld [vmem:[#allocation90_spill] sm:$0xff] }
 0x144   :  { %8552 = vmatpush1.bf16.msra.mxu1 %v16277_v56  ;;  %v11765_v12 = vpack.c.bf16 %v16279_v61, %v16278_v51  ;;  %v11771_v24 = vpack.c.bf16 %v16281_v21, %v15296_v54  ;;  %v16283_v56 = vand.u32 4294901760, %v11103_v5  ;;  %v16289_v43 = vand.u32 4294901760, %v11777_v59  ;;  %v16295_v21 = vld [vmem:[#allocation117_spill] sm:$0xff] }
 0x145   :  { %8554 = vmatprep.subr.bf16.mxu1 %v11435_v46  ;;  %v16284_v46 = vand.u32 4294901760, %v11756_v63  ;;  %v16296_v27 = vand.u32 4294901760, %v16295_v21  ;;  %v16298_v38 = vand.u32 4294901760, %v11105_v4  ;;  %v3053_v9 = vand.u32 4294901760, %v2851_v3 }
 0x146   :  { %16280 = vst [vmem:[#allocation120_spill] sm:$0xff] %v11765_v12  ;;  %16282 = vst [vmem:[#allocation187_spill] sm:$0xff] %v11771_v24  ;;  %v11783_v51 = vsub.f32 %v11103_v5, %v16283_v56  ;;  %8898 = vmatprep.subr.bf16.mxu0 %v11765_v12  ;;  %v11807_v52 = vpack.c.bf16 %v16289_v43, %v16288_v62  ;;  %v2850_v12 = vld [vmem:[#allocation5 + $0x1d8] sm:$0xff]  ;;  %v2847_v62 = vld [vmem:[#allocation5 + $0x1c0] sm:$0xff] }
 0x147   :  { %v11797_v56 = vpack.c.bf16 %v16285_v14, %v16284_v46  ;;  %8900 = vmatpush1.bf16.msra.mxu0 %v11771_v24  ;;  %v16292_v14 = vld [vmem:[#allocation116_spill] sm:$0xff]  ;;  %v11818_v54 = vsub.f32 %v16295_v21, %v16296_v27  ;;  %v3043_v24 = vand.u32 4294901760, %v2848_v39  ;;  %v3047_v49 = vand.u32 4294901760, %v2850_v12 }
 0x148   :  { %16290 = vst [vmem:[#allocation189_spill] sm:$0xff] %v11807_v52  ;;  %8556 = vmatpush1.bf16.msra.mxu1 %v16291_v45  ;;  %v16293_v46 = vand.u32 4294901760, %v16292_v14  ;;  %v2849_v43 = vld [vmem:[#allocation5 + $0x1d0] sm:$0xff]  ;;  %v3045_v5 = vand.u32 4294901760, %v2847_v62  ;;  %v11829_v27 = vsub.f32 %v11105_v4, %v16298_v38  ;;  %v16299_v21 = vand.u32 4294901760, %v11109_v40  ;;  %v2854_v4 = vld [vmem:[#allocation5 + $0x1f8] sm:$0xff] }
 0x149   :  { %16286 = vst [vmem:[#allocation188_spill] sm:$0xff] %v11797_v56  ;;  %16297 = vst [vmem:[#allocation116_spill] sm:$0xff] %v11818_v54  ;;  %8902 = vmatprep.subr.bf16.mxu0 %v11797_v56  ;;  %8558 = vmatprep.subr.bf16.mxu1 %v11492_v37  ;;  %v11836_v30 = vpack.c.bf16 %v3047_v49, %v3043_v24  ;;  %v16301_v37 = vand.u32 4294901760, %v16184_v48  ;;  %v16303_v38 = vand.u32 4294901760, %v16287_v0 }
 0x14a   :  { %v11813_v61 = vsub.f32 %v16292_v14, %v16293_v46  ;;  %v3049_v14 = vand.u32 4294901760, %v2849_v43  ;;  %v11824_v46 = vpack.c.bf16 %v1910_v25, %v1898_v8  ;;  %v11834_v56 = vsub.f32 %v11109_v40, %v16299_v21  ;;  %v2852_v40 = vld [vmem:[#allocation5 + $0x1e8] sm:$0xff] }
 0x14b   :  { %16300 = vst [vmem:[#allocation117_spill] sm:$0xff] %v11836_v30  ;;  %v11841_v57 = vsub.f32 %v16184_v48, %v16301_v37  ;;  %v16302_v8 = vand.u32 4294901760, %v16185_v29  ;;  %v11851_v45 = vsub.f32 %v16287_v0, %v16303_v38  ;;  %8904 = vmatpush1.bf16.msra.mxu0 %v11807_v52  ;;  %v3051_v37 = vand.u32 4294901760, %v2852_v40 }
 0x14c   :  { %16294 = vst [vmem:[#allocation136_spill] sm:$0xff] %v11813_v61  ;;  %v11854_v21 = vpack.c.bf16 %v3049_v14, %v3045_v5  ;;  %8560 = vmatpush1.bf16.msra.mxu1 %v11551_v6  ;;  %8906 = vmatprep.subr.bf16.mxu0 %v11836_v30  ;;  %v3055_v48 = vand.u32 4294901760, %v2854_v4  ;;  %v16305_v38 = vand.u32 4294901760, %v16197_v55  ;;  %v16306_v0 = vand.u32 4294901760, %v16198_v41 }
 0x14d   :  { %v11846_v25 = vsub.f32 %v16185_v29, %v16302_v8  ;;  %v2853_v8 = vld [vmem:[#allocation5 + $0x1f0] sm:$0xff]  ;;  %v15338_v29 = vand.u32 4294901760, %v11813_v61  ;;  %8562 = vmatprep.subr.bf16.mxu1 %v11613_v7  ;;  %v16309_v7 = vand.u32 4294901760, %v11818_v54 }
 0x14e   :  { %16304 = vst [vmem:[#allocation190_spill] sm:$0xff] %v11854_v21  ;;  %v1963_v52 = vsub.f32 %v16197_v55, %v16305_v38  ;;  %v1975_v6 = vsub.f32 %v16198_v41, %v16306_v0  ;;  %v11868_v33 = vpack.c.bf16 %v3055_v48, %v3051_v37  ;;  %v3057_v35 = vand.u32 4294901760, %v2853_v8 }
 0x14f   :  { %v3079_v50 = vsub.f32 %v11813_v61, %v15338_v29  ;;  %v3091_v32 = vsub.f32 %v11818_v54, %v16309_v7  ;;  %v16310_v38 = vand.u32 4294901760, %v11712_v1  ;;  %v16311_v0 = vand.u32 4294901760, %v11714_v58  ;;  %8908 = vmatpush1.bf16.msra.mxu0 %v11854_v21 }
 0x150   :  { %16308 = vst [vmem:[#allocation191_spill] sm:$0xff] %v11868_v33  ;;  %v16312_v41 = vand.u32 4294901760, %v11725_v22  ;;  %v16313_v29 = vand.u32 4294901760, %v11727_v19  ;;  %8564 = vmatpush1.bf16.msra.mxu1 %v11644_v11  ;;  %v11919_v11 = vsub.f32 %v2848_v39, %v3043_v24  ;;  %8910 = vmatprep.subr.bf16.mxu0 %v11868_v33  ;;  %v11937_v39 = vsub.f32 %v2853_v8, %v3057_v35  ;;  %v16371_v33 = vld [vmem:[#allocation31_spill] sm:$0xff] }
 0x151   :  { %v11879_v55 = vsub.f32 %v11712_v1, %v16310_v38  ;;  %v11884_v30 = vsub.f32 %v11714_v58, %v16311_v0  ;;  %v16314_v1 = vand.u32 4294901760, %v11756_v63  ;;  %v16315_v58 = vand.u32 4294901760, %v11758_v10  ;;  %8566 = vmatprep.subr.bf16.mxu1 %v11664_v20 }
 0x152   :  { %v11889_v26 = vsub.f32 %v11725_v22, %v16312_v41  ;;  %v11894_v61 = vsub.f32 %v11727_v19, %v16313_v29  ;;  %v16316_v41 = vand.u32 4294901760, %v11775_v42  ;;  %v16317_v29 = vand.u32 4294901760, %v11777_v59  ;;  %16325 = vst [vmem:[#allocation198_spill] sm:$0xff] %v11937_v39  ;;  %v16377_v39 = vld [vmem:[#allocation36_spill] sm:$0xff] }
 0x153   :  { %v11901_v7 = vsub.f32 %v11756_v63, %v16314_v1  ;;  %v11906_v38 = vsub.f32 %v11758_v10, %v16315_v58  ;;  %v11921_v63 = vsub.f32 %v2850_v12, %v3047_v49  ;;  %v11923_v0 = vsub.f32 %v2847_v62, %v3045_v5 }
 0x154   :  { %v11911_v22 = vsub.f32 %v11775_v42, %v16316_v41  ;;  %v11916_v19 = vsub.f32 %v11777_v59, %v16317_v29  ;;  %v11925_v10 = vsub.f32 %v2849_v43, %v3049_v14  ;;  %v11928_v1 = vsub.f32 %v2852_v40, %v3051_v37  ;;  %v16324_v41 = vld [vmem:[#allocation94_spill] sm:$0xff]  ;;  %8568 = vmatpush1.bf16.msra.mxu1 %v11750_v28 }
 0x155   :  { %16318 = vst [vmem:[#allocation192_spill] sm:$0xff] %v11923_v0  ;;  %v11930_v42 = vsub.f32 %v2854_v4, %v3055_v48  ;;  %v11932_v58 = vpack.c.bf16 %v3057_v35, %v3053_v9  ;;  %v11934_v59 = vsub.f32 %v2851_v3, %v3053_v9  ;;  %v15349_v20 = vand.u32 4294901760, %v16324_v41  ;;  %8570 = vmatprep.subr.bf16.mxu1 %v11788_v15 }
 0x156   :  { %16319 = vst [vmem:[#allocation193_spill] sm:$0xff] %v11925_v10  ;;  %16320 = vst [vmem:[#allocation194_spill] sm:$0xff] %v11928_v1  ;;  %v3080_v49 = vand.u32 4294901760, %v3079_v50  ;;  %v3092_v12 = vand.u32 4294901760, %v3091_v32  ;;  %v1922_v5 = vand.u32 4294901760, %v11783_v51  ;;  %v1934_v24 = vand.u32 4294901760, %v11829_v27 }
 0x157   :  { %16321 = vst [vmem:[#allocation195_spill] sm:$0xff] %v11930_v42  ;;  %16322 = vst [vmem:[#allocation196_spill] sm:$0xff] %v11932_v58  ;;  %v1940_v40 = vand.u32 4294901760, %v11834_v56  ;;  %v1952_v4 = vand.u32 4294901760, %v11841_v57  ;;  %8912 = vmatpush1.bf16.msra.mxu0 %v11932_v58  ;;  %v16326_v9 = vand.u32 4294901760, %v11734_v47  ;;  %v16327_v35 = vand.u32 4294901760, %v11743_v18 }
 0x158   :  { %16323 = vst [vmem:[#allocation197_spill] sm:$0xff] %v11934_v59  ;;  %v15348_v32 = vand.u32 4294901760, %v16210_v23  ;;  %v15347_v48 = vand.u32 4294901760, %v16211_v53  ;;  %v8913_v3 = vpack.c.bf16 %v3092_v12, %v3080_v49  ;;  %v1946_v28 = vand.u32 4294901760, %v11846_v25  ;;  %8572 = vmatpush1.bf16.msra.mxu1 %v11824_v46  ;;  %v16464_v1 = vld [vmem:[#allocation145_spill] sm:$0xff] }
 0x159   :  { %v8573_v50 = vpack.c.bf16 %v16327_v35, %v16326_v9  ;;  %v1958_v51 = vand.u32 4294901760, %v11851_v45  ;;  %v1964_v56 = vand.u32 4294901760, %v1963_v52  ;;  %v1976_v57 = vand.u32 4294901760, %v1975_v6 }
 0x15a   :  { %v16328_v62 = vand.u32 4294901760, %v16307_v34  ;;  %v1981_v47 = vsub.f32 %v16324_v41, %v15349_v20  ;;  %8914 = vmatprep.subr.bf16.mxu0 %v8913_v3  ;;  %v8575_v18 = vpack.c.bf16 %v1934_v24, %v1922_v5  ;;  %v8577_v43 = vpack.c.bf16 %v1952_v4, %v1940_v40  ;;  %v16368_v20 = vld [vmem:[#allocation17_spill] sm:$0xff] }
 0x15b   :  { %v15346_v14 = vand.u32 4294901760, %v16212_v36  ;;  %v15345_v27 = vand.u32 4294901760, %v11181_v13  ;;  %8574 = vmatprep.subr.bf16.mxu1 %v8573_v50  ;;  %v1987_v52 = vsub.f32 %v16210_v23, %v15348_v32  ;;  %v1999_v45 = vsub.f32 %v16211_v53, %v15347_v48  ;;  %v16365_v48 = vld [vmem:[#allocation14_spill] sm:$0xff] }
 0x15c   :  { %v1969_v15 = vsub.f32 %v16307_v34, %v16328_v62  ;;  %v15344_v25 = vand.u32 4294901760, %v11185_v16  ;;  %v15343_v37 = vand.u32 4294901760, %v11188_v17  ;;  %v8579_v46 = vpack.c.bf16 %v1958_v51, %v1946_v28  ;;  %8576 = vmatpush1.bf16.msra.mxu1 %v8575_v18 }
 0x15d   :  { %v8581_v8 = vpack.c.bf16 %v1976_v57, %v1964_v56  ;;  %v1982_v29 = vand.u32 4294901760, %v1981_v47  ;;  %v1993_v49 = vsub.f32 %v16212_v36, %v15346_v14  ;;  %v2005_v12 = vsub.f32 %v11181_v13, %v15345_v27  ;;  %8578 = vmatprep.subr.bf16.mxu1 %v8577_v43  ;;  %v16362_v27 = vld [vmem:[#allocation11_spill] sm:$0xff] }
 0x15e   :  { %v1970_v6 = vand.u32 4294901760, %v1969_v15  ;;  %v15342_v5 = vand.u32 4294901760, %v11192_v60  ;;  %v15341_v24 = vand.u32 4294901760, %v11195_v31  ;;  %v1988_v40 = vand.u32 4294901760, %v1987_v52 }
 0x15f   :  { %v2000_v4 = vand.u32 4294901760, %v1999_v45  ;;  %v2011_v9 = vsub.f32 %v11185_v16, %v15344_v25  ;;  %v2023_v35 = vsub.f32 %v11188_v17, %v15343_v37  ;;  %v1994_v3 = vand.u32 4294901760, %v1993_v49  ;;  %v16332_v49 = vld [vmem:[#allocation87_spill] sm:$0xff] }
 0x160   :  { %v8583_v50 = vpack.c.bf16 %v1982_v29, %v1970_v6  ;;  %8580 = vmatpush1.bf16.msra.mxu1 %v8579_v46  ;;  %v2006_v28 = vand.u32 4294901760, %v2005_v12  ;;  %v2017_v51 = vsub.f32 %v11192_v60, %v15342_v5  ;;  %v2029_v56 = vsub.f32 %v11195_v31, %v15341_v24  ;;  %v16329_v46 = vld [vmem:[#allocation88_spill] sm:$0xff]  ;;  %v16330_v6 = vld [vmem:[#allocation63_spill] sm:$0xff] }
 0x161   :  { %8582 = vmatprep.subr.bf16.mxu1 %v8581_v8  ;;  %v8585_v57 = vpack.c.bf16 %v2000_v4, %v1988_v40  ;;  %v2012_v62 = vand.u32 4294901760, %v2011_v9  ;;  %v2024_v15 = vand.u32 4294901760, %v2023_v35  ;;  %v16331_v29 = vpack.c.bf16 %v16329_v46, %v16330_v6  ;;  %v16333_v8 = vld [vmem:[#allocation95_spill] sm:$0xff]  ;;  %v16334_v12 = vld [vmem:[#allocation92_spill] sm:$0xff]  ;;  %v16336_v4 = vld [vmem:[#allocation89_spill] sm:$0xff] }
 0x162   :  { %v8587_v47 = vpack.c.bf16 %v2006_v28, %v1994_v3  ;;  %v2018_v18 = vand.u32 4294901760, %v2017_v51  ;;  %v2030_v43 = vand.u32 4294901760, %v2029_v56  ;;  %v16335_v40 = vpack.c.bf16 %v16333_v8, %v16334_v12  ;;  %v16337_v9 = vld [vmem:[#allocation18_spill] sm:$0xff]  ;;  %v16338_v35 = vld [vmem:[#allocation100_spill] sm:$0xff]  ;;  %v16340_v3 = vld [vmem:[#allocation21_spill] sm:$0xff] }
 0x163   :  { %v8589_v52 = vpack.c.bf16 %v2024_v15, %v2012_v62  ;;  %v16341_v28 = vld [vmem:[#allocation20_spill] sm:$0xff]  ;;  %v16343_v56 = vld [vmem:[#allocation26_spill] sm:$0xff]  ;;  %v16346_v15 = vld [vmem:[#allocation29_spill] sm:$0xff]  ;;  %v15402_v10 = vand.u32 4294901760, %v16464_v1 }
 0x164   :  { %8584 = vmatpush1.bf16.msra.mxu1 %v8583_v50  ;;  %v8591_v45 = vpack.c.bf16 %v2030_v43, %v2018_v18  ;;  %v16339_v50 = vpack.c.bf16 %v16337_v9, %v16338_v35  ;;  %v16342_v51 = vpack.c.bf16 %v16340_v3, %v16341_v28  ;;  %v16349_v43 = vld [vmem:[#allocation64_spill] sm:$0xff]  ;;  %v16359_v37 = vld [vmem:[#allocation79_spill] sm:$0xff] }
 0x165   :  { %8586 = vmatprep.subr.bf16.mxu1 %v8585_v57  ;;  %v16344_v57 = vld [vmem:[#allocation23_spill] sm:$0xff]  ;;  %v16356_v24 = vld [vmem:[#allocation76_spill] sm:$0xff] }
 0x166   :  { %v16345_v62 = vpack.c.bf16 %v16343_v56, %v16344_v57 }
 0x168   :  { %8588 = vmatpush1.bf16.msra.mxu1 %v8587_v47  ;;  %v16347_v47 = vld [vmem:[#allocation27_spill] sm:$0xff] }
 0x169   :  { %8590 = vmatprep.subr.bf16.mxu1 %v8589_v52  ;;  %v16348_v18 = vpack.c.bf16 %v16346_v15, %v16347_v47  ;;  %v16350_v52 = vld [vmem:[#allocation52_spill] sm:$0xff] }
 0x16c   :  { %8592 = vmatpush1.bf16.msra.mxu1 %v8591_v45  ;;  %v16351_v45 = vpack.c.bf16 %v16349_v43, %v16350_v52 }
 0x16d   :  { %8594 = vmatprep.subr.bf16.mxu1 %v16331_v29  ;;  %v16352_v29 = vld [vmem:[#allocation73_spill] sm:$0xff] }
 0x16f   :  { %2035 = vmatmul.mubr.f32.vlgmr.msra.gmra.mrb[2].mxu1 %v16332_v49  ;;  %v16374_v49 = vld [vmem:[#allocation35_spill] sm:$0xff] }
 0x170   :  { %8596 = vmatpush1.bf16.msra.mxu1 %v16335_v40  ;;  %2235 = vmatprep.mubr.f32.mxu1 %v16336_v4  ;;  %v16353_v40 = vld [vmem:[#allocation72_spill] sm:$0xff] }
 0x171   :  { %8598 = vmatprep.subr.bf16.mxu1 %v16339_v50  ;;  %v16354_v4 = vpack.c.bf16 %v16352_v29, %v16353_v40  ;;  %v16355_v50 = vld [vmem:[#allocation78_spill] sm:$0xff] }
 0x172   :  { %v16357_v5 = vpack.c.bf16 %v16355_v50, %v16356_v24 }
 0x174   :  { %8600 = vmatpush1.bf16.msra.mxu1 %v16342_v51  ;;  %v16358_v51 = vld [vmem:[#allocation82_spill] sm:$0xff] }
 0x175   :  { %8602 = vmatprep.subr.bf16.mxu1 %v16345_v62  ;;  %v16360_v25 = vpack.c.bf16 %v16358_v51, %v16359_v37  ;;  %v16361_v62 = vld [vmem:[#allocation12_spill] sm:$0xff] }
 0x176   :  { %v16363_v14 = vpack.c.bf16 %v16361_v62, %v16362_v27 }
 0x178   :  { %8604 = vmatpush1.bf16.msra.mxu1 %v16348_v18  ;;  %v16364_v18 = vld [vmem:[#allocation15_spill] sm:$0xff] }
 0x179   :  { %8606 = vmatprep.subr.bf16.mxu1 %v16351_v45  ;;  %v16366_v32 = vpack.c.bf16 %v16364_v18, %v16365_v48  ;;  %v16367_v45 = vld [vmem:[#allocation24_spill] sm:$0xff]  ;;  %v16462_v48 = vld [vmem:[#allocation142_spill] sm:$0xff] }
 0x17a   :  { %v16369_v58 = vpack.c.bf16 %v16367_v45, %v16368_v20  ;;  %v16384_v20 = vld [vmem:[#allocation46_spill] sm:$0xff] }
 0x17c   :  { %8608 = vmatpush1.bf16.msra.mxu1 %v16354_v4  ;;  %v16370_v4 = vld [vmem:[#allocation25_spill] sm:$0xff] }
 0x17d   :  { %8610 = vmatprep.subr.bf16.mxu1 %v16357_v5  ;;  %v16372_v21 = vpack.c.bf16 %v16370_v4, %v16371_v33  ;;  %v16373_v5 = vld [vmem:[#allocation30_spill] sm:$0xff]  ;;  %v16387_v33 = vld [vmem:[#allocation48_spill] sm:$0xff] }
 0x17e   :  { %v16375_v54 = vpack.c.bf16 %v16373_v5, %v16374_v49  ;;  %v16390_v49 = vld [vmem:[#allocation55_spill] sm:$0xff] }
 0x180   :  { %8612 = vmatpush1.bf16.msra.mxu1 %v16360_v25  ;;  %v16376_v25 = vld [vmem:[#allocation33_spill] sm:$0xff] }
 0x181   :  { %8614 = vmatprep.subr.bf16.mxu1 %v16363_v14  ;;  %v16378_v59 = vpack.c.bf16 %v16376_v25, %v16377_v39  ;;  %v16379_v14 = vld [vmem:[#allocation39_spill] sm:$0xff]  ;;  %v16393_v39 = vld [vmem:[#allocation58_spill] sm:$0xff] }
 0x182   :  { %v16380_v18 = vpack.c.bf16 %v11046_v44, %v16379_v14  ;;  %v16396_v14 = vld [vmem:[#allocation60_spill] sm:$0xff] }
 0x184   :  { %8616 = vmatpush1.bf16.msra.mxu1 %v16366_v32  ;;  %v16381_v32 = vld [vmem:[#allocation42_spill] sm:$0xff] }
 0x185   :  { %8618 = vmatprep.subr.bf16.mxu1 %v16369_v58  ;;  %v16382_v45 = vpack.c.bf16 %v16142_v2, %v16381_v32  ;;  %v16383_v58 = vld [vmem:[#allocation44_spill] sm:$0xff]  ;;  %v16399_v32 = vld [vmem:[#allocation67_spill] sm:$0xff] }
 0x186   :  { %v16385_v4 = vpack.c.bf16 %v16383_v58, %v16384_v20  ;;  %v16402_v20 = vld [vmem:[#allocation70_spill] sm:$0xff] }
 0x188   :  { %8620 = vmatpush1.bf16.msra.mxu1 %v16372_v21  ;;  %v16386_v21 = vld [vmem:[#allocation50_spill] sm:$0xff] }
 0x189   :  { %8622 = vmatprep.subr.bf16.mxu1 %v16375_v54  ;;  %v16388_v5 = vpack.c.bf16 %v16386_v21, %v16387_v33  ;;  %v16389_v54 = vld [vmem:[#allocation53_spill] sm:$0xff]  ;;  %v16405_v33 = vld [vmem:[#allocation71_spill] sm:$0xff] }
 0x18a   :  { %v16391_v25 = vpack.c.bf16 %v16389_v54, %v16390_v49  ;;  %v16408_v49 = vld [vmem:[#allocation80_spill] sm:$0xff] }
 0x18c   :  { %8624 = vmatpush1.bf16.msra.mxu1 %v16378_v59  ;;  %v16392_v59 = vld [vmem:[#allocation56_spill] sm:$0xff] }
 0x18d   :  { %8626 = vmatprep.subr.bf16.mxu1 %v16380_v18  ;;  %v16394_v44 = vpack.c.bf16 %v16392_v59, %v16393_v39  ;;  %v16395_v18 = vld [vmem:[#allocation59_spill] sm:$0xff] }
 0x18e   :  { %v16397_v2 = vpack.c.bf16 %v16395_v18, %v16396_v14 }
 0x190   :  { %8628 = vmatpush1.bf16.msra.mxu1 %v16382_v45  ;;  %v16398_v45 = vld [vmem:[#allocation66_spill] sm:$0xff] }
 0x191   :  { %8630 = vmatprep.subr.bf16.mxu1 %v16385_v4  ;;  %v16400_v58 = vpack.c.bf16 %v16398_v45, %v16399_v32  ;;  %v16401_v4 = vld [vmem:[#allocation69_spill] sm:$0xff]  ;;  %v16436_v45 = vld [vmem:[#allocation32_spill] sm:$0xff] }
 0x192   :  { %v16403_v21 = vpack.c.bf16 %v16401_v4, %v16402_v20  ;;  %v16435_v4 = vld [vmem:[#allocation128_spill] sm:$0xff]  ;;  %v16448_v32 = vld [vmem:[#allocation37_spill] sm:$0xff] }
 0x194   :  { %8632 = vmatpush1.bf16.msra.mxu1 %v16388_v5  ;;  %v16404_v5 = vld [vmem:[#allocation74_spill] sm:$0xff] }
 0x195   :  { %8634 = vmatprep.subr.bf16.mxu1 %v16391_v25  ;;  %v16406_v54 = vpack.c.bf16 %v16404_v5, %v16405_v33  ;;  %v16407_v25 = vld [vmem:[#allocation84_spill] sm:$0xff] }
 0x196   :  { %v16409_v59 = vpack.c.bf16 %v16407_v25, %v16408_v49  ;;  %v16430_v25 = vld [vmem:[#allocation122_spill] sm:$0xff]  ;;  %v16431_v5 = vld [vmem:[#allocation16_spill] sm:$0xff] }
 0x198   :  { %8636 = vmatpush1.bf16.msra.mxu1 %v16394_v44  ;;  %v16410_v44 = vpack.c.bf16 %v16324_v41, %v16307_v34  ;;  %v16416_v41 = vld [vmem:[#allocation96_spill] sm:$0xff]  ;;  %v16429_v34 = vld [vmem:[#allocation13_spill] sm:$0xff] }
 0x199   :  { %8638 = vmatprep.subr.bf16.mxu1 %v16397_v2  ;;  %v16411_v2 = vpack.c.bf16 %v16211_v53, %v16210_v23  ;;  %v16418_v53 = vld [vmem:[#allocation93_spill] sm:$0xff] }
 0x19c   :  { %8640 = vmatpush1.bf16.msra.mxu1 %v16400_v58  ;;  %v16412_v58 = vpack.c.bf16 %v11181_v13, %v16212_v36  ;;  %v199_v13 = vlaneseq  ;;  %v16421_v36 = vld [vmem:[#allocation22_spill] sm:$0xff] }
 0x19d   :  { %8642 = vmatprep.subr.bf16.mxu1 %v16403_v21  ;;  %v16413_v21 = vpack.c.bf16 %v11188_v17, %v11185_v16  ;;  %v16423_v17 = vld [vmem:[#allocation28_spill] sm:$0xff] }
 0x1a0   :  { %8644 = vmatpush1.bf16.msra.mxu1 %v16406_v54  ;;  %v16414_v54 = vpack.c.bf16 %v11195_v31, %v11192_v60 }
 0x1a1   :  { %8646 = vmatprep.subr.bf16.mxu1 %v16409_v59  ;;  %v16415_v59 = vld [vmem:[#allocation51_spill] sm:$0xff] }
 0x1a4   :  { %8648 = vmatpush1.bf16.msra.mxu1 %v16410_v44  ;;  %v16417_v44 = vld [vmem:[#allocation91_spill] sm:$0xff] }
 0x1a5   :  { %8650 = vmatprep.subr.bf16.mxu1 %v16411_v2  ;;  %v16419_v2 = vld [vmem:[#allocation98_spill] sm:$0xff] }
 0x1a8   :  { %8652 = vmatpush1.bf16.msra.mxu1 %v16412_v58  ;;  %v16420_v58 = vld [vmem:[#allocation19_spill] sm:$0xff] }
 0x1a9   :  { %8654 = vmatprep.subr.bf16.mxu1 %v16413_v21  ;;  %v12096_v21 = vshrl.u32 %v199_v13, 7 }
 0x1ab   :  { %16422 = vst [vmem:[#allocation88_spill] sm:$0xff] %v12096_v21 }
 0x1ac   :  { %8656 = vmatpush1.bf16.msra.mxu1 %v16414_v54  ;;  %v16424_v54 = vld [vmem:[#allocation49_spill] sm:$0xff] }
 0x1ad   :  { %8658 = vmatprep.subr.bf16.mxu1 %v16415_v59  ;;  %v15372_v59 = vsub.s32 0, %v12096_v21 }
 0x1af   :  { %2238 = vmatmul.mubr.f32.vlgmr.msra.gmra.mrb[2].mxu1 %v16416_v41  ;;  %v16425_v41 = vld [vmem:[#allocation105_spill] sm:$0xff] }
 0x1b0   :  { %8660 = vmatpush1.bf16.msra.mxu1 %v16417_v44  ;;  %2375 = vmatprep.mubr.f32.mxu1 %v16418_v53  ;;  %v197_v53 = vld [vmem:[%s14906_s2] sm:$0xf]  ;;  %v16426_v44 = vld [vmem:[#allocation75_spill] sm:$0xff] }
 0x1b1   :  { %8662 = vmatprep.subr.bf16.mxu1 %v16419_v2  ;;  %v15375_v2 = vsub.s32 1, %v12096_v21  ;;  %v202_v13 = vrot.slane %v197_v53, %v15372_v59  ;;  %v16432_v59 = vld [vmem:[#allocation123_spill] sm:$0xff]  ;;  %v16433_v21 = vld [vmem:[#allocation125_spill] sm:$0xff] }
 0x1b4   :  { %8664 = vmatpush1.bf16.msra.mxu1 %v16420_v58 }
 0x1b5   :  { %8666 = vmatprep.subr.bf16.mxu1 %v16421_v36  ;;  %v16427_v36 = vld [vmem:[#allocation81_spill] sm:$0xff] }
 0x1b8   :  { %8668 = vmatpush1.bf16.msra.mxu1 %v16423_v17  ;;  %v16428_v17 = vld [vmem:[#allocation86_spill] sm:$0xff] }
 0x1b9   :  { %8670 = vmatprep.subr.bf16.mxu1 %v16424_v54  ;;  %v206_v54 = vrot.slane %v197_v53, %v15375_v2  ;;  %v15377_v53 = vand.u32 4294901760, %v16433_v21  ;;  %v16434_v2 = vld [vmem:[#allocation126_spill] sm:$0xff] }
 0x1bc   :  { %8672 = vmatpush1.bf16.msra.mxu1 %v16425_v41 }
 0x1bd   :  { %8674 = vmatprep.subr.bf16.mxu1 %v16426_v44  ;;  %v15376_v44 = vand.u32 4294901760, %v16430_v25 }
 0x1c0   :  { %8676 = vmatpush1.bf16.msra.mxu1 %v16427_v36  ;;  %v1498_v41 = vpop.f32.mrb[0].mxu0  ;;  %v16439_v36 = vld [vmem:[#allocation34_spill] sm:$0xff] }
 0x1c1   :  { %8678 = vmatprep.subr.bf16.mxu1 %v16428_v17  ;;  %v1500_v16 = vpop.f32.mrb[1].mxu0  ;;  %v16441_v17 = vld [vmem:[#allocation131_spill] sm:$0xff] }
 0x1c2   :  { %v955_v58 = vpop.f32.mrb[0].mxu1 }
 0x1c3   :  { %v9953_v31 = vadd.f32 %v955_v58, %v202_v13  ;;  %v957_v60 = vpop.f32.mrb[1].mxu1 }
 0x1c4   :  { %v9955_v23 = vadd.f32 %v957_v60, %v206_v54  ;;  %8680 = vmatpush1.bf16.msra.mxu1 %v16429_v34  ;;  %v3085_v60 = vsub.f32 %v16430_v25, %v15376_v44  ;;  %v16443_v44 = vand.u32 4294901760, %v16434_v2  ;;  %v16456_v25 = vld [vmem:[#allocation139_spill] sm:$0xff] }
 0x1c5   :  { %v9954_v49 = vadd.f32 %v9953_v31, %v1498_v41  ;;  %8682 = vmatprep.subr.bf16.mxu1 %v16431_v5  ;;  %v16437_v31 = vld [vmem:[#allocation129_spill] sm:$0xff] }
 0x1c6   :  { %v9956_v33 = vadd.f32 %v9955_v23, %v1500_v16  ;;  %v16440_v16 = vand.u32 4294901760, %v16432_v59  ;;  %v3115_v54 = vsub.f32 %v16434_v2, %v16443_v44  ;;  %v3086_v18 = vand.u32 4294901760, %v3085_v60  ;;  %v16450_v44 = vld [vmem:[#allocation134_spill] sm:$0xff] }
 0x1c7   :  { %v2787_v58 = vmax.f32 %v9954_v49, 0.0 }
 0x1c8   :  { %v2788_v13 = vmax.f32 %v9956_v33, 0.0  ;;  %8684 = vmatpush1.bf16.msra.mxu1 %v16436_v45  ;;  %v3097_v23 = vsub.f32 %v16432_v59, %v16440_v16  ;;  %v3103_v33 = vsub.f32 %v16433_v21, %v15377_v53  ;;  %v16444_v45 = vand.u32 4294901760, %v16435_v4  ;;  %v16446_v16 = vld [vmem:[#allocation132_spill] sm:$0xff] }
 0x1c9   :  { %v12125_v41 = vand.u32 4294901760, %v2787_v58  ;;  %8686 = vmatprep.subr.bf16.mxu1 %v16439_v36  ;;  %v16449_v53 = vand.u32 4294901760, %v16437_v31  ;;  %v3116_v21 = vand.u32 4294901760, %v3115_v54  ;;  %v16454_v39 = vand.u32 4294901760, %v16446_v16 }
 0x1ca   :  { %v12132_v49 = vand.u32 4294901760, %v2788_v13  ;;  %v3109_v36 = vsub.f32 %v16435_v4, %v16444_v45  ;;  %v16451_v45 = vld [vmem:[#allocation40_spill] sm:$0xff]  ;;  %v16452_v4 = vand.u32 4294901760, %v16441_v17  ;;  %v3104_v60 = vand.u32 4294901760, %v3103_v33 }
 0x1cb   :  { %16438 = vst [vmem:[#allocation63_spill] sm:$0xff] %v12125_v41  ;;  %v12144_v5 = vsub.f32 %v2787_v58, %v12125_v41  ;;  %v3121_v14 = vsub.f32 %v16437_v31, %v16449_v53  ;;  %v3098_v58 = vand.u32 4294901760, %v3097_v23  ;;  %v16455_v23 = vld [vmem:[#allocation138_spill] sm:$0xff] }
 0x1cc   :  { %16442 = vst [vmem:[#allocation95_spill] sm:$0xff] %v12132_v49  ;;  %v12148_v20 = vsub.f32 %v2788_v13, %v12132_v49  ;;  %8688 = vmatpush1.bf16.msra.mxu1 %v16448_v32  ;;  %v3127_v34 = vsub.f32 %v16441_v17, %v16452_v4  ;;  %v16453_v13 = vld [vmem:[#allocation135_spill] sm:$0xff]  ;;  %v3110_v59 = vand.u32 4294901760, %v3109_v36  ;;  %v16458_v36 = vand.u32 4294901760, %v16450_v44  ;;  %v16460_v17 = vld [vmem:[#allocation45_spill] sm:$0xff] }
 0x1cd   :  { %16445 = vst [vmem:[#allocation92_spill] sm:$0xff] %v12144_v5  ;;  %v15386_v2 = vand.u32 4294901760, %v12144_v5  ;;  %8690 = vmatprep.subr.bf16.mxu1 %v16451_v45  ;;  %v3139_v45 = vsub.f32 %v16446_v16, %v16454_v39  ;;  %v16457_v4 = vld [vmem:[#allocation43_spill] sm:$0xff]  ;;  %v3122_v54 = vand.u32 4294901760, %v3121_v14  ;;  %v16461_v39 = vand.u32 4294901760, %v16453_v13 }
 0x1ce   :  { %16447 = vst [vmem:[#allocation89_spill] sm:$0xff] %v12148_v20  ;;  %v15394_v32 = vand.u32 4294901760, %v12148_v20  ;;  %v3133_v41 = vsub.f32 %v16450_v44, %v16458_v36  ;;  %v8915_v14 = vpack.c.bf16 %v3098_v58, %v3086_v18  ;;  %v3128_v0 = vand.u32 4294901760, %v3127_v34  ;;  %v16469_v34 = vld [vmem:[#allocation54_spill] sm:$0xff] }
 0x1cf   :  { %v3068_v53 = vsub.f32 %v12144_v5, %v15386_v2  ;;  %v16459_v2 = vld [vmem:[#allocation141_spill] sm:$0xff]  ;;  %v3145_v31 = vsub.f32 %v16453_v13, %v16461_v39  ;;  %v3140_v36 = vand.u32 4294901760, %v3139_v45  ;;  %v16465_v5 = vand.u32 4294901760, %v16455_v23  ;;  %v16467_v13 = vld [vmem:[#allocation47_spill] sm:$0xff] }
 0x1d0   :  { %8692 = vmatpush1.bf16.msra.mxu1 %v16457_v4  ;;  %v3062_v33 = vsub.f32 %v12148_v20, %v15394_v32  ;;  %v16463_v4 = vld [vmem:[#allocation144_spill] sm:$0xff]  ;;  %v8917_v20 = vpack.c.bf16 %v3116_v21, %v3104_v60  ;;  %v16466_v44 = vand.u32 4294901760, %v16456_v25  ;;  %v8919_v42 = vpack.c.bf16 %v3122_v54, %v3110_v59  ;;  %v16472_v59 = vld [vmem:[#allocation147_spill] sm:$0xff] }
 0x1d1   :  { %8694 = vmatprep.subr.bf16.mxu1 %v16460_v17  ;;  %v3069_v62 = vand.u32 4294901760, %v3068_v53  ;;  %v3151_v17 = vsub.f32 %v16455_v23, %v16465_v5  ;;  %v3134_v16 = vand.u32 4294901760, %v3133_v41  ;;  %v3146_v21 = vand.u32 4294901760, %v3145_v31  ;;  %v16473_v41 = vld [vmem:[#allocation148_spill] sm:$0xff]  ;;  %v16474_v31 = vld [vmem:[#allocation150_spill] sm:$0xff]  ;;  %v16475_v54 = vld [vmem:[#allocation151_spill] sm:$0xff] }
 0x1d2   :  { %v3063_v32 = vand.u32 4294901760, %v3062_v33  ;;  %v3163_v39 = vsub.f32 %v16456_v25, %v16466_v44  ;;  %v16468_v33 = vand.u32 4294901760, %v16459_v2  ;;  %v16470_v45 = vand.u32 4294901760, %v16462_v48 }
 0x1d3   :  { %v16471_v58 = vand.u32 4294901760, %v16463_v4  ;;  %v15408_v53 = vand.u32 4294901760, %v16474_v31 }
 0x1d4   :  { %8696 = vmatpush1.bf16.msra.mxu1 %v16467_v13  ;;  %3064 = vmatprep.mubr.f32.mxu0 %v3063_v32  ;;  %v3157_v18 = vsub.f32 %v16459_v2, %v16468_v33  ;;  %v3169_v5 = vsub.f32 %v16462_v48, %v16470_v45  ;;  %v3187_v32 = vsub.f32 %v16464_v1, %v15402_v10  ;;  %v3164_v13 = vand.u32 4294901760, %v3163_v39  ;;  %v16477_v48 = vld [vmem:[#allocation153_spill] sm:$0xff] }
 0x1d5   :  { %3070 = vmatmul.mubr.f32.vlgmr.msra.gmra.mrb[2].mxu0 %v3069_v62  ;;  %8698 = vmatprep.subr.bf16.mxu1 %v16469_v34  ;;  %v3175_v44 = vsub.f32 %v16463_v4, %v16471_v58  ;;  %v8921_v45 = vpack.c.bf16 %v3140_v36, %v3128_v0  ;;  %v3152_v34 = vand.u32 4294901760, %v3151_v17  ;;  %v16476_v58 = vld [vmem:[#allocation57_spill] sm:$0xff]  ;;  %v15410_v10 = vand.u32 4294901760, %v16477_v48 }
 0x1d6   :  { %8916 = vmatpush1.bf16.msra.mxu0 %v8915_v14  ;;  %3461 = vmatprep.mubr.f32.mxu0 %v12132_v49  ;;  %v3158_v4 = vand.u32 4294901760, %v3157_v18  ;;  %v16478_v14 = vld [vmem:[#allocation154_spill] sm:$0xff]  ;;  %v16479_v49 = vld [vmem:[#allocation61_spill] sm:$0xff]  ;;  %v8923_v62 = vpack.c.bf16 %v3146_v21, %v3134_v16  ;;  %v3170_v2 = vand.u32 4294901760, %v3169_v5  ;;  %v3188_v25 = vand.u32 4294901760, %v3187_v32  ;;  %v16483_v21 = vld [vmem:[#allocation156_spill] sm:$0xff] }
 0x1d7   :  { %8918 = vmatprep.subr.bf16.mxu0 %v8917_v20  ;;  %v15412_v1 = vand.u32 4294901760, %v16478_v14  ;;  %v3176_v60 = vand.u32 4294901760, %v3175_v44  ;;  %v16480_v33 = vand.u32 4294901760, %v16472_v59  ;;  %v16481_v17 = vand.u32 4294901760, %v16473_v41  ;;  %v16484_v5 = vld [vmem:[#allocation157_spill] sm:$0xff]  ;;  %v16485_v32 = vld [vmem:[#allocation62_spill] sm:$0xff] }
 0x1d8   :  { %8700 = vmatpush1.bf16.msra.mxu1 %v16476_v58  ;;  %v3199_v36 = vsub.f32 %v16474_v31, %v15408_v53  ;;  %v16482_v39 = vand.u32 4294901760, %v16475_v54  ;;  %v8925_v18 = vpack.c.bf16 %v3164_v13, %v3152_v34  ;;  %v16486_v53 = vld [vmem:[#allocation65_spill] sm:$0xff]  ;;  %v16488_v34 = vld [vmem:[#allocation160_spill] sm:$0xff] }
 0x1d9   :  { %8702 = vmatprep.subr.bf16.mxu1 %v16479_v49  ;;  %v3181_v0 = vsub.f32 %v16472_v59, %v16480_v33  ;;  %v3193_v20 = vsub.f32 %v16473_v41, %v16481_v17  ;;  %v3205_v33 = vsub.f32 %v16477_v48, %v15410_v10  ;;  %v3217_v17 = vsub.f32 %v16478_v14, %v15412_v1  ;;  %v16493_v13 = vld [vmem:[#allocation68_spill] sm:$0xff]  ;;  %v16503_v41 = vld [vmem:[#allocation83_spill] sm:$0xff] }
 0x1da   :  { %8920 = vmatpush1.bf16.msra.mxu0 %v8919_v42  ;;  %v3211_v16 = vsub.f32 %v16475_v54, %v16482_v39  ;;  %v8927_v49 = vpack.c.bf16 %v3170_v2, %v3158_v4  ;;  %v8929_v39 = vpack.c.bf16 %v3188_v25, %v3176_v60  ;;  %v16489_v10 = vand.u32 4294901760, %v16483_v21  ;;  %v16491_v2 = vld [vmem:[#allocation161_spill] sm:$0xff]  ;;  %v16492_v4 = vld [vmem:[#allocation162_spill] sm:$0xff]  ;;  %v16508_v14 = vld [vmem:[#allocation171_spill] sm:$0xff] }
 0x1db   :  { %8922 = vmatprep.subr.bf16.mxu0 %v8921_v45  ;;  %v16487_v45 = vld [vmem:[#allocation159_spill] sm:$0xff]  ;;  %v3182_v44 = vand.u32 4294901760, %v3181_v0  ;;  %v3194_v58 = vand.u32 4294901760, %v3193_v20  ;;  %v16490_v1 = vand.u32 4294901760, %v16484_v5  ;;  %v3218_v0 = vand.u32 4294901760, %v3217_v17  ;;  %v16494_v20 = vld [vmem:[#allocation164_spill] sm:$0xff] }
 0x1dc   :  { %8704 = vmatpush1.bf16.msra.mxu1 %v16485_v32  ;;  %v3200_v32 = vand.u32 4294901760, %v3199_v36  ;;  %v3212_v54 = vand.u32 4294901760, %v3211_v16  ;;  %v3223_v48 = vsub.f32 %v16483_v21, %v16489_v10  ;;  %v16495_v16 = vld [vmem:[#allocation165_spill] sm:$0xff]  ;;  %v16497_v10 = vand.u32 4294901760, %v16487_v45  ;;  %v16500_v17 = vld [vmem:[#allocation168_spill] sm:$0xff] }
 0x1dd   :  { %8706 = vmatprep.subr.bf16.mxu1 %v16486_v53  ;;  %v3235_v53 = vsub.f32 %v16484_v5, %v16490_v1  ;;  %v16496_v42 = vld [vmem:[#allocation77_spill] sm:$0xff]  ;;  %v16498_v1 = vand.u32 4294901760, %v16488_v34  ;;  %v8931_v60 = vpack.c.bf16 %v3194_v58, %v3182_v44  ;;  %v16505_v44 = vand.u32 4294901760, %v16495_v16 }
 0x1de   :  { %8924 = vmatpush1.bf16.msra.mxu0 %v8923_v62  ;;  %v3206_v62 = vand.u32 4294901760, %v3205_v33  ;;  %v3229_v21 = vsub.f32 %v16487_v45, %v16497_v10  ;;  %v8933_v5 = vpack.c.bf16 %v3212_v54, %v3200_v32  ;;  %v3224_v36 = vand.u32 4294901760, %v3223_v48 }
 0x1df   :  { %8926 = vmatprep.subr.bf16.mxu0 %v8925_v18  ;;  %v3241_v25 = vsub.f32 %v16488_v34, %v16498_v1  ;;  %v3236_v18 = vand.u32 4294901760, %v3235_v53  ;;  %v16502_v10 = vand.u32 4294901760, %v16492_v4  ;;  %v16504_v54 = vand.u32 4294901760, %v16494_v20  ;;  %v16506_v53 = vld [vmem:[#allocation102_spill] sm:$0xff]  ;;  %v16513_v1 = vld [vmem:[#allocation104_spill] sm:$0xff]  ;;  %v16515_v34 = vld [vmem:[#allocation177_spill] sm:$0xff] }
 0x1e0   :  { %8708 = vmatpush1.bf16.msra.mxu1 %v16493_v13  ;;  %v16499_v13 = vld [vmem:[#allocation167_spill] sm:$0xff]  ;;  %v3265_v48 = vsub.f32 %v16495_v16, %v16505_v44  ;;  %v3230_v32 = vand.u32 4294901760, %v3229_v21  ;;  %v16512_v44 = vld [vmem:[#allocation174_spill] sm:$0xff] }
 0x1e1   :  { %8710 = vmatprep.subr.bf16.mxu1 %v16496_v42  ;;  %v16501_v42 = vand.u32 4294901760, %v16491_v2  ;;  %v3259_v45 = vsub.f32 %v16492_v4, %v16502_v10  ;;  %v3253_v58 = vsub.f32 %v16494_v20, %v16504_v54  ;;  %v16509_v10 = vand.u32 4294901760, %v16499_v13  ;;  %v16514_v4 = vld [vmem:[#allocation176_spill] sm:$0xff] }
 0x1e2   :  { %8928 = vmatpush1.bf16.msra.mxu0 %v8927_v49  ;;  %v8935_v49 = vpack.c.bf16 %v3218_v0, %v3206_v62  ;;  %v16510_v0 = vand.u32 4294901760, %v16500_v17  ;;  %v8937_v21 = vpack.c.bf16 %v3236_v18, %v3224_v36  ;;  %v16518_v20 = vand.u32 4294901760, %v16329_v46 }
 0x1e3   :  { %8930 = vmatprep.subr.bf16.mxu0 %v8929_v39  ;;  %v3247_v31 = vsub.f32 %v16491_v2, %v16501_v42  ;;  %v3242_v39 = vand.u32 4294901760, %v3241_v25  ;;  %v16507_v42 = vld [vmem:[#allocation170_spill] sm:$0xff]  ;;  %v3271_v62 = vsub.f32 %v16499_v13, %v16509_v10  ;;  %v3254_v33 = vand.u32 4294901760, %v3253_v58  ;;  %v16516_v13 = vld [vmem:[#allocation108_spill] sm:$0xff]  ;;  %v16525_v10 = vld [vmem:[#allocation179_spill] sm:$0xff] }
 0x1e4   :  { %8712 = vmatpush1.bf16.msra.mxu1 %v16503_v41  ;;  %v3283_v54 = vsub.f32 %v16500_v17, %v16510_v0  ;;  %v16511_v41 = vld [vmem:[#allocation173_spill] sm:$0xff]  ;;  %v16517_v0 = vand.u32 4294901760, %v16330_v6  ;;  %v16522_v6 = vand.u32 4294901760, %v16512_v44 }
 0x1e5   :  { %8714 = vmatprep.subr.bf16.mxu1 %v16506_v53  ;;  %v3248_v25 = vand.u32 4294901760, %v3247_v31  ;;  %v3260_v53 = vand.u32 4294901760, %v3259_v45  ;;  %v8939_v59 = vpack.c.bf16 %v3242_v39, %v3230_v32  ;;  %v16520_v45 = vand.u32 4294901760, %v16508_v14 }
 0x1e6   :  { %8932 = vmatpush1.bf16.msra.mxu0 %v8931_v60  ;;  %v3266_v60 = vand.u32 4294901760, %v3265_v48  ;;  %v8721_v16 = vpack.c.bf16 %v16518_v20, %v16517_v0  ;;  %v3272_v18 = vand.u32 4294901760, %v3271_v62  ;;  %v3284_v58 = vand.u32 4294901760, %v3283_v54  ;;  %v16527_v54 = vld [vmem:[#allocation111_spill] sm:$0xff]  ;;  %v16535_v62 = vld [vmem:[#allocation114_spill] sm:$0xff] }
 0x1e7   :  { %8934 = vmatprep.subr.bf16.mxu0 %v8933_v5  ;;  %v16519_v5 = vand.u32 4294901760, %v16507_v42  ;;  %v3289_v36 = vsub.f32 %v16508_v14, %v16520_v45  ;;  %v16521_v48 = vand.u32 4294901760, %v16511_v41  ;;  %v3307_v46 = vsub.f32 %v16512_v44, %v16522_v6  ;;  %v16536_v45 = vld [vmem:[#allocation101_spill] sm:$0xff] }
 0x1e8   :  { %8716 = vmatpush1.bf16.msra.mxu1 %v16513_v1  ;;  %v16523_v20 = vand.u32 4294901760, %v16334_v12  ;;  %v16524_v39 = vand.u32 4294901760, %v16333_v8  ;;  %v8943_v2 = vpack.c.bf16 %v3266_v60, %v3254_v33  ;;  %v16531_v8 = vand.u32 4294901760, %v16515_v34 }
 0x1e9   :  { %8718 = vmatprep.subr.bf16.mxu1 %v16516_v13  ;;  %v3277_v31 = vsub.f32 %v16507_v42, %v16519_v5  ;;  %v3295_v32 = vsub.f32 %v16511_v41, %v16521_v48  ;;  %v8941_v5 = vpack.c.bf16 %v3260_v53, %v3248_v25  ;;  %v16528_v48 = vand.u32 4294901760, %v16338_v35  ;;  %v16534_v35 = vld [vmem:[#allocation182_spill] sm:$0xff] }
 0x1ea   :  { %8936 = vmatpush1.bf16.msra.mxu0 %v8935_v49  ;;  %v8723_v0 = vpack.c.bf16 %v16524_v39, %v16523_v20  ;;  %v16526_v49 = vld [vmem:[#allocation180_spill] sm:$0xff]  ;;  %v16529_v13 = vand.u32 4294901760, %v16337_v9  ;;  %v3313_v53 = vsub.f32 %v16515_v34, %v16531_v8  ;;  %v16532_v25 = vand.u32 4294901760, %v16341_v28 }
 0x1eb   :  { %8938 = vmatprep.subr.bf16.mxu0 %v8937_v21  ;;  %v16530_v21 = vand.u32 4294901760, %v16514_v4  ;;  %v16533_v6 = vand.u32 4294901760, %v16340_v3  ;;  %v3278_v33 = vand.u32 4294901760, %v3277_v31  ;;  %v3290_v60 = vand.u32 4294901760, %v3289_v36  ;;  %v16539_v36 = vld [vmem:[#allocation115_spill] sm:$0xff] }
 0x1ec   :  { %8720 = vmatpush1.bf16.msra.mxu1 %v16527_v54  ;;  %v8725_v1 = vpack.c.bf16 %v16529_v13, %v16528_v48  ;;  %v8945_v9 = vpack.c.bf16 %v3284_v58, %v3272_v18  ;;  %v3296_v13 = vand.u32 4294901760, %v3295_v32  ;;  %v3308_v48 = vand.u32 4294901760, %v3307_v46  ;;  %v16541_v32 = vld [vmem:[#allocation186_spill] sm:$0xff] }
 0x1ed   :  { %v3301_v12 = vsub.f32 %v16514_v4, %v16530_v21  ;;  %8722 = vmatprep.subr.bf16.mxu1 %v8721_v16  ;;  %v8727_v20 = vpack.c.bf16 %v16533_v6, %v16532_v25  ;;  %v16537_v16 = vand.u32 4294901760, %v16525_v10  ;;  %v16538_v3 = vand.u32 4294901760, %v16526_v49  ;;  %v16540_v25 = vld [vmem:[#allocation184_spill] sm:$0xff]  ;;  %v16542_v6 = vld [vmem:[#allocation118_spill] sm:$0xff] }
 0x1ee   :  { %8940 = vmatpush1.bf16.msra.mxu0 %v8939_v59  ;;  %v3314_v58 = vand.u32 4294901760, %v3313_v53  ;;  %v8947_v21 = vpack.c.bf16 %v3290_v60, %v3278_v33  ;;  %v16545_v39 = vand.u32 4294901760, %v16343_v56  ;;  %v16546_v8 = vand.u32 4294901760, %v16347_v47 }
 0x1ef   :  { %2379 = vmatmul.mubr.f32.vlgmr.msra.gmra.mrb[2].mxu1 %v16536_v45  ;;  %8942 = vmatprep.subr.bf16.mxu0 %v8941_v5  ;;  %v3319_v28 = vsub.f32 %v16525_v10, %v16537_v16  ;;  %v3331_v31 = vsub.f32 %v16526_v49, %v16538_v3  ;;  %v3302_v18 = vand.u32 4294901760, %v3301_v12  ;;  %v16543_v5 = vld [vmem:[#allocation85_spill] sm:$0xff]  ;;  %v16544_v16 = vand.u32 4294901760, %v16344_v57 }
 0x1f0   :  { %8724 = vmatpush1.bf16.msra.mxu1 %v8723_v0  ;;  %2642 = vmatprep.mubr.f32.mxu1 %v16543_v5  ;;  %v16547_v59 = vand.u32 4294901760, %v16346_v15  ;;  %v16548_v12 = vand.u32 4294901760, %v16534_v35  ;;  %v8949_v45 = vpack.c.bf16 %v3308_v48, %v3296_v13  ;;  %v16549_v46 = vand.u32 4294901760, %v16535_v62 }
 0x1f1   :  { %8726 = vmatprep.subr.bf16.mxu1 %v8725_v1  ;;  %v8729_v3 = vpack.c.bf16 %v16545_v39, %v16544_v16  ;;  %v15441_v57 = vand.u32 4294901760, %v11879_v55  ;;  %v15440_v56 = vand.u32 4294901760, %v11884_v30  ;;  %v3320_v33 = vand.u32 4294901760, %v3319_v28 }
 0x1f2   :  { %v8731_v0 = vpack.c.bf16 %v16547_v59, %v16546_v8  ;;  %v3325_v53 = vsub.f32 %v16534_v35, %v16548_v12  ;;  %8944 = vmatpush1.bf16.msra.mxu0 %v8943_v2  ;;  %v3337_v1 = vsub.f32 %v16535_v62, %v16549_v46  ;;  %v3332_v47 = vand.u32 4294901760, %v3331_v31 }
 0x1f3   :  { %8946 = vmatprep.subr.bf16.mxu0 %v8945_v9  ;;  %v16550_v15 = vand.u32 4294901760, %v16539_v36  ;;  %v16551_v39 = vand.u32 4294901760, %v16540_v25  ;;  %v8951_v13 = vpack.c.bf16 %v3314_v58, %v3302_v18  ;;  %v16552_v48 = vand.u32 4294901760, %v16541_v32 }
 0x1f4   :  { %8728 = vmatpush1.bf16.msra.mxu1 %v8727_v20  ;;  %v16553_v59 = vand.u32 4294901760, %v16542_v6  ;;  %v15432_v28 = vand.u32 4294901760, %v11889_v26  ;;  %v16554_v31 = vand.u32 4294901760, %v16350_v52  ;;  %v16555_v46 = vand.u32 4294901760, %v16349_v43 }
 0x1f5   :  { %v3343_v60 = vsub.f32 %v16539_v36, %v16550_v15  ;;  %v3355_v2 = vsub.f32 %v16540_v25, %v16551_v39  ;;  %v3349_v8 = vsub.f32 %v16541_v32, %v16552_v48  ;;  %8730 = vmatprep.subr.bf16.mxu1 %v8729_v3  ;;  %v16556_v12 = vand.u32 4294901760, %v16353_v40 }
 0x1f6   :  { %v3361_v9 = vsub.f32 %v16542_v6, %v16553_v59  ;;  %v8733_v16 = vpack.c.bf16 %v16555_v46, %v16554_v31  ;;  %v16557_v20 = vand.u32 4294901760, %v16352_v29  ;;  %v3326_v58 = vand.u32 4294901760, %v3325_v53  ;;  %8948 = vmatpush1.bf16.msra.mxu0 %v8947_v21 }
 0x1f7   :  { %v15431_v15 = vand.u32 4294901760, %v11894_v61  ;;  %v3338_v39 = vand.u32 4294901760, %v3337_v1  ;;  %v3367_v48 = vsub.f32 %v11879_v55, %v15441_v57  ;;  %v3379_v52 = vsub.f32 %v11884_v30, %v15440_v56  ;;  %8950 = vmatprep.subr.bf16.mxu0 %v8949_v45  ;;  %v16640_v56 = vld [vmem:[#allocation135_spill] sm:$0xff] }
 0x1f8   :  { %v8735_v18 = vpack.c.bf16 %v16557_v20, %v16556_v12  ;;  %v15430_v43 = vand.u32 4294901760, %v11901_v7  ;;  %v8953_v40 = vpack.c.bf16 %v3332_v47, %v3320_v33  ;;  %v3344_v3 = vand.u32 4294901760, %v3343_v60  ;;  %8732 = vmatpush1.bf16.msra.mxu1 %v8731_v0 }
 0x1f9   :  { %v3356_v29 = vand.u32 4294901760, %v3355_v2  ;;  %v15429_v53 = vand.u32 4294901760, %v11906_v38  ;;  %v16558_v21 = vand.u32 4294901760, %v16356_v24  ;;  %v16559_v1 = vand.u32 4294901760, %v16355_v50  ;;  %8734 = vmatprep.subr.bf16.mxu1 %v8733_v16 }
 0x1fa   :  { %v3350_v31 = vand.u32 4294901760, %v3349_v8  ;;  %v3362_v46 = vand.u32 4294901760, %v3361_v9  ;;  %v3373_v12 = vsub.f32 %v11889_v26, %v15432_v28  ;;  %v3385_v45 = vsub.f32 %v11894_v61, %v15431_v15  ;;  %8952 = vmatpush1.bf16.msra.mxu0 %v8951_v13 }
 0x1fb   :  { %v8737_v59 = vpack.c.bf16 %v16559_v1, %v16558_v21  ;;  %v15428_v33 = vand.u32 4294901760, %v11911_v22  ;;  %v15426_v0 = vand.u32 4294901760, %v11916_v19  ;;  %v15427_v24 = vand.u32 4294901760, %v11919_v11  ;;  %8954 = vmatprep.subr.bf16.mxu0 %v8953_v40 }
 0x1fc   :  { %v8955_v50 = vpack.c.bf16 %v3338_v39, %v3326_v58  ;;  %v3368_v47 = vand.u32 4294901760, %v3367_v48  ;;  %v3380_v60 = vand.u32 4294901760, %v3379_v52  ;;  %v3391_v2 = vsub.f32 %v11901_v7, %v15430_v43  ;;  %8736 = vmatpush1.bf16.msra.mxu1 %v8735_v18  ;;  %v16563_v52 = vld [vmem:[#allocation12_spill] sm:$0xff] }
 0x1fd   :  { %v8957_v8 = vpack.c.bf16 %v3356_v29, %v3344_v3  ;;  %v3403_v9 = vsub.f32 %v11906_v38, %v15429_v53  ;;  %v15433_v16 = vand.u32 4294901760, %v11921_v63  ;;  %v16560_v20 = vand.u32 4294901760, %v16359_v37  ;;  %8738 = vmatprep.subr.bf16.mxu1 %v8737_v59  ;;  %v16575_v53 = vld [vmem:[#allocation24_spill] sm:$0xff] }
 0x1fe   :  { %v16561_v13 = vand.u32 4294901760, %v16358_v51  ;;  %v8959_v39 = vpack.c.bf16 %v3362_v46, %v3350_v31  ;;  %v16562_v48 = vand.u32 4294901760, %v16362_v27  ;;  %v16564_v21 = vand.u32 4294901760, %v16563_v52  ;;  %8956 = vmatpush1.bf16.msra.mxu0 %v8955_v50  ;;  %v16565_v31 = vld [vmem:[#allocation192_spill] sm:$0xff]  ;;  %v16568_v52 = vld [vmem:[#allocation195_spill] sm:$0xff] }
 0x1ff   :  { %v3374_v40 = vand.u32 4294901760, %v3373_v12  ;;  %v3386_v3 = vand.u32 4294901760, %v3385_v45  ;;  %v3397_v29 = vsub.f32 %v11911_v22, %v15428_v33  ;;  %v3409_v37 = vsub.f32 %v11916_v19, %v15426_v0  ;;  %v16566_v12 = vld [vmem:[#allocation193_spill] sm:$0xff]  ;;  %8958 = vmatprep.subr.bf16.mxu0 %v8957_v8  ;;  %v16569_v0 = vld [vmem:[#allocation14_spill] sm:$0xff]  ;;  %v16571_v50 = vld [vmem:[#allocation15_spill] sm:$0xff] }
 0x200   :  { %v8739_v58 = vpack.c.bf16 %v16561_v13, %v16560_v20  ;;  %v8741_v1 = vpack.c.bf16 %v16564_v21, %v16562_v48  ;;  %v3415_v51 = vsub.f32 %v11919_v11, %v15427_v24  ;;  %v8961_v27 = vpack.c.bf16 %v3380_v60, %v3368_v47  ;;  %v16567_v13 = vld [vmem:[#allocation194_spill] sm:$0xff] }
 0x201   :  { %v3392_v18 = vand.u32 4294901760, %v3391_v2  ;;  %v15435_v46 = vand.u32 4294901760, %v16565_v31  ;;  %v15434_v59 = vand.u32 4294901760, %v16566_v12  ;;  %v3404_v45 = vand.u32 4294901760, %v3403_v9  ;;  %v16573_v2 = vld [vmem:[#allocation17_spill] sm:$0xff] }
 0x202   :  { %v3427_v20 = vsub.f32 %v11921_v63, %v15433_v16  ;;  %v15436_v48 = vand.u32 4294901760, %v16567_v13  ;;  %v15437_v21 = vand.u32 4294901760, %v16568_v52  ;;  %8740 = vmatpush1.bf16.msra.mxu1 %v8739_v58  ;;  %v16570_v24 = vand.u32 4294901760, %v16569_v0  ;;  %8960 = vmatpush1.bf16.msra.mxu0 %v8959_v39 }
 0x203   :  { %v16572_v47 = vand.u32 4294901760, %v16571_v50  ;;  %v16574_v33 = vand.u32 4294901760, %v16573_v2  ;;  %v16576_v43 = vand.u32 4294901760, %v16575_v53  ;;  %8742 = vmatprep.subr.bf16.mxu1 %v8741_v1  ;;  %v8963_v9 = vpack.c.bf16 %v3386_v3, %v3374_v40  ;;  %8962 = vmatprep.subr.bf16.mxu0 %v8961_v27  ;;  %v16579_v1 = vld [vmem:[#allocation31_spill] sm:$0xff]  ;;  %v16581_v3 = vld [vmem:[#allocation25_spill] sm:$0xff] }
 0x204   :  { %v3398_v15 = vand.u32 4294901760, %v3397_v29  ;;  %v3410_v28 = vand.u32 4294901760, %v3409_v37  ;;  %v3416_v16 = vand.u32 4294901760, %v3415_v51  ;;  %v3421_v58 = vsub.f32 %v16565_v31, %v15435_v46 }
 0x205   :  { %v8743_v60 = vpack.c.bf16 %v16572_v47, %v16570_v24  ;;  %v8745_v8 = vpack.c.bf16 %v16576_v43, %v16574_v33  ;;  %v3433_v0 = vsub.f32 %v16566_v12, %v15434_v59  ;;  %v16577_v24 = vld [vmem:[#allocation197_spill] sm:$0xff]  ;;  %v16578_v47 = vld [vmem:[#allocation198_spill] sm:$0xff]  ;;  %v8965_v43 = vpack.c.bf16 %v3404_v45, %v3392_v18  ;;  %v16583_v59 = vld [vmem:[#allocation35_spill] sm:$0xff] }
 0x206   :  { %v15438_v50 = vand.u32 4294901760, %v16577_v24  ;;  %v15439_v2 = vand.u32 4294901760, %v16578_v47  ;;  %v3428_v53 = vand.u32 4294901760, %v3427_v20  ;;  %v3439_v33 = vsub.f32 %v16567_v13, %v15436_v48  ;;  %v16585_v18 = vld [vmem:[#allocation30_spill] sm:$0xff]  ;;  %8964 = vmatpush1.bf16.msra.mxu0 %v8963_v9 }
 0x207   :  { %v3451_v39 = vsub.f32 %v16568_v52, %v15437_v21  ;;  %8744 = vmatpush1.bf16.msra.mxu1 %v8743_v60  ;;  %v16580_v40 = vand.u32 4294901760, %v16579_v1  ;;  %v16582_v29 = vand.u32 4294901760, %v16581_v3  ;;  %v8967_v51 = vpack.c.bf16 %v3410_v28, %v3398_v15  ;;  %8966 = vmatprep.subr.bf16.mxu0 %v8965_v43  ;;  %v16587_v15 = vld [vmem:[#allocation36_spill] sm:$0xff]  ;;  %v16595_v43 = vld [vmem:[#allocation42_spill] sm:$0xff] }
 0x208   :  { %8746 = vmatprep.subr.bf16.mxu1 %v8745_v8  ;;  %v16584_v27 = vand.u32 4294901760, %v16583_v59  ;;  %v16586_v45 = vand.u32 4294901760, %v16585_v18  ;;  %v3422_v46 = vand.u32 4294901760, %v3421_v58  ;;  %v3434_v48 = vand.u32 4294901760, %v3433_v0  ;;  %v16591_v58 = vld [vmem:[#allocation39_spill] sm:$0xff] }
 0x209   :  { %v8747_v37 = vpack.c.bf16 %v16582_v29, %v16580_v40  ;;  %v3445_v21 = vsub.f32 %v16577_v24, %v15438_v50  ;;  %v3457_v60 = vsub.f32 %v16578_v47, %v15439_v2  ;;  %v8969_v1 = vpack.c.bf16 %v3428_v53, %v3416_v16  ;;  %v16589_v40 = vld [vmem:[#allocation33_spill] sm:$0xff]  ;;  %v16593_v29 = vld [vmem:[#allocation38_spill] sm:$0xff] }
 0x20a   :  { %v8749_v20 = vpack.c.bf16 %v16586_v45, %v16584_v27  ;;  %v3440_v8 = vand.u32 4294901760, %v3439_v33  ;;  %v3452_v28 = vand.u32 4294901760, %v3451_v39  ;;  %v16588_v59 = vand.u32 4294901760, %v16587_v15  ;;  %8968 = vmatpush1.bf16.msra.mxu0 %v8967_v51  ;;  %v16597_v33 = vld [vmem:[#allocation41_spill] sm:$0xff]  ;;  %v16599_v15 = vld [vmem:[#allocation46_spill] sm:$0xff]  ;;  %v16605_v51 = vld [vmem:[#allocation48_spill] sm:$0xff] }
 0x20b   :  { %8748 = vmatpush1.bf16.msra.mxu1 %v8747_v37  ;;  %v16590_v3 = vand.u32 4294901760, %v16589_v40  ;;  %v16592_v0 = vand.u32 4294901760, %v16591_v58  ;;  %v16594_v27 = vand.u32 4294901760, %v16593_v29  ;;  %v8971_v45 = vpack.c.bf16 %v3434_v48, %v3422_v46  ;;  %8970 = vmatprep.subr.bf16.mxu0 %v8969_v1  ;;  %v16603_v46 = vld [vmem:[#allocation136_spill] sm:$0xff]  ;;  %v16607_v1 = vld [vmem:[#allocation50_spill] sm:$0xff]  ;;  %v16611_v29 = vld [vmem:[#allocation53_spill] sm:$0xff] }
 0x20c   :  { %8750 = vmatprep.subr.bf16.mxu1 %v8749_v20  ;;  %v3446_v50 = vand.u32 4294901760, %v3445_v21  ;;  %v3458_v2 = vand.u32 4294901760, %v3457_v60  ;;  %v8973_v16 = vpack.c.bf16 %v3452_v28, %v3440_v8  ;;  %v16596_v53 = vand.u32 4294901760, %v16595_v43  ;;  %v16604_v48 = vld [vmem:[#allocation116_spill] sm:$0xff]  ;;  %v16613_v43 = vld [vmem:[#allocation122_spill] sm:$0xff] }
 0x20d   :  { %v8751_v9 = vpack.c.bf16 %v16590_v3, %v16588_v59  ;;  %v8753_v18 = vpack.c.bf16 %v16594_v27, %v16592_v0  ;;  %v16598_v39 = vand.u32 4294901760, %v16597_v33  ;;  %v16600_v20 = vand.u32 4294901760, %v16599_v15  ;;  %v16601_v59 = vld [vmem:[#allocation44_spill] sm:$0xff]  ;;  %v16617_v33 = vld [vmem:[#allocation58_spill] sm:$0xff] }
 0x20e   :  { %v16602_v40 = vand.u32 4294901760, %v16601_v59  ;;  %8972 = vmatpush1.bf16.msra.mxu0 %v8971_v45  ;;  %v8975_v58 = vpack.c.bf16 %v3458_v2, %v3446_v50  ;;  %v8977_v21 = vpack.c.bf16 %v16604_v48, %v16603_v46  ;;  %v16606_v60 = vand.u32 4294901760, %v16605_v51  ;;  %v16614_v45 = vld [vmem:[#allocation123_spill] sm:$0xff]  ;;  %v16615_v2 = vld [vmem:[#allocation125_spill] sm:$0xff] }
 0x20f   :  { %8752 = vmatpush1.bf16.msra.mxu1 %v8751_v9  ;;  %v8755_v37 = vpack.c.bf16 %v16598_v39, %v16596_v53  ;;  %8974 = vmatprep.subr.bf16.mxu0 %v8973_v16  ;;  %v16608_v8 = vand.u32 4294901760, %v16607_v1  ;;  %v16609_v9 = vld [vmem:[#allocation55_spill] sm:$0xff]  ;;  %v16612_v27 = vand.u32 4294901760, %v16611_v29  ;;  %v8979_v50 = vpack.c.bf16 %v16614_v45, %v16613_v43  ;;  %v16616_v16 = vld [vmem:[#allocation126_spill] sm:$0xff]  ;;  %v16626_v1 = vld [vmem:[#allocation89_spill] sm:$0xff] }
 0x210   :  { %8754 = vmatprep.subr.bf16.mxu1 %v8753_v18  ;;  %v8757_v3 = vpack.c.bf16 %v16602_v40, %v16600_v20  ;;  %v16610_v0 = vand.u32 4294901760, %v16609_v9  ;;  %v8981_v53 = vpack.c.bf16 %v16616_v16, %v16615_v2  ;;  %v16618_v39 = vand.u32 4294901760, %v16617_v33  ;;  %v16621_v59 = vld [vmem:[#allocation63_spill] sm:$0xff]  ;;  %v16622_v40 = vld [vmem:[#allocation60_spill] sm:$0xff] }
 0x211   :  { %v8759_v28 = vpack.c.bf16 %v16608_v8, %v16606_v60  ;;  %v16624_v51 = vld [vmem:[#allocation59_spill] sm:$0xff]  ;;  %v16628_v8 = vld [vmem:[#allocation129_spill] sm:$0xff] }
 0x212   :  { %v8761_v18 = vpack.c.bf16 %v16612_v27, %v16610_v0  ;;  %8976 = vmatpush1.bf16.msra.mxu0 %v8975_v58  ;;  %v16625_v58 = vand.u32 4294901760, %v16624_v51  ;;  %v16630_v0 = vld [vmem:[#allocation132_spill] sm:$0xff]  ;;  %v16631_v27 = vld [vmem:[#allocation67_spill] sm:$0xff] }
 0x213   :  { %8756 = vmatpush1.bf16.msra.mxu1 %v8755_v37  ;;  %8978 = vmatprep.subr.bf16.mxu0 %v8977_v21  ;;  %v16619_v37 = vld [vmem:[#allocation56_spill] sm:$0xff]  ;;  %v16632_v33 = vand.u32 4294901760, %v16631_v27 }
 0x214   :  { %8758 = vmatprep.subr.bf16.mxu1 %v8757_v3  ;;  %v16620_v15 = vand.u32 4294901760, %v16619_v37  ;;  %v16623_v3 = vand.u32 4294901760, %v16622_v40  ;;  %v16627_v21 = vld [vmem:[#allocation128_spill] sm:$0xff] }
 0x215   :  { %3463 = vmatmul.mubr.f32.vlgmr.msra.gmra.mrb[2].mxu0 %v16621_v59  ;;  %v8983_v9 = vpack.c.bf16 %v16628_v8, %v16627_v21 }
 0x216   :  { %v8763_v20 = vpack.c.bf16 %v16620_v15, %v16618_v39  ;;  %v8765_v60 = vpack.c.bf16 %v16625_v58, %v16623_v3  ;;  %8980 = vmatpush1.bf16.msra.mxu0 %v8979_v50  ;;  %3663 = vmatprep.mubr.f32.mxu0 %v16626_v1  ;;  %v16633_v39 = vld [vmem:[#allocation66_spill] sm:$0xff]  ;;  %v16637_v3 = vld [vmem:[#allocation69_spill] sm:$0xff] }
 0x217   :  { %8760 = vmatpush1.bf16.msra.mxu1 %v8759_v28  ;;  %8982 = vmatprep.subr.bf16.mxu0 %v8981_v53  ;;  %v16629_v28 = vld [vmem:[#allocation131_spill] sm:$0xff]  ;;  %v16635_v15 = vld [vmem:[#allocation70_spill] sm:$0xff]  ;;  %v16638_v50 = vand.u32 4294901760, %v16637_v3 }
 0x218   :  { %8762 = vmatprep.subr.bf16.mxu1 %v8761_v18  ;;  %v8985_v29 = vpack.c.bf16 %v16630_v0, %v16629_v28  ;;  %v16634_v18 = vand.u32 4294901760, %v16633_v39  ;;  %v16636_v40 = vand.u32 4294901760, %v16635_v15  ;;  %v16639_v58 = vld [vmem:[#allocation134_spill] sm:$0xff]  ;;  %v16641_v53 = vld [vmem:[#allocation139_spill] sm:$0xff]  ;;  %v16648_v15 = vld [vmem:[#allocation84_spill] sm:$0xff] }
 0x219   :  { %v8987_v57 = vpack.c.bf16 %v16640_v56, %v16639_v58  ;;  %v8989_v59 = vpack.c.bf16 %v16641_v53, %v16455_v23  ;;  %v16644_v0 = vld [vmem:[#allocation74_spill] sm:$0xff]  ;;  %v16649_v3 = vand.u32 4294901760, %v16648_v15  ;;  %v16653_v58 = vld [vmem:[#allocation145_spill] sm:$0xff] }
 0x21a   :  { %v8767_v37 = vpack.c.bf16 %v16634_v18, %v16632_v33  ;;  %v8769_v51 = vpack.c.bf16 %v16638_v50, %v16636_v40  ;;  %8984 = vmatpush1.bf16.msra.mxu0 %v8983_v9  ;;  %v16645_v39 = vand.u32 4294901760, %v16644_v0  ;;  %v16650_v9 = vld [vmem:[#allocation141_spill] sm:$0xff]  ;;  %v16651_v50 = vld [vmem:[#allocation142_spill] sm:$0xff] }
 0x21b   :  { %8764 = vmatpush1.bf16.msra.mxu1 %v8763_v20  ;;  %8986 = vmatprep.subr.bf16.mxu0 %v8985_v29  ;;  %v16642_v20 = vld [vmem:[#allocation71_spill] sm:$0xff]  ;;  %v8991_v56 = vpack.c.bf16 %v16651_v50, %v16650_v9  ;;  %v16652_v29 = vld [vmem:[#allocation144_spill] sm:$0xff]  ;;  %v16656_v23 = vld [vmem:[#allocation94_spill] sm:$0xff] }
 0x21c   :  { %8766 = vmatprep.subr.bf16.mxu1 %v8765_v60  ;;  %v16643_v27 = vand.u32 4294901760, %v16642_v20  ;;  %v16646_v60 = vld [vmem:[#allocation80_spill] sm:$0xff]  ;;  %v8993_v53 = vpack.c.bf16 %v16653_v58, %v16652_v29  ;;  %v16657_v0 = vand.u32 4294901760, %v16656_v23  ;;  %v16665_v9 = vld [vmem:[#allocation151_spill] sm:$0xff] }
 0x21d   :  { %v16647_v18 = vand.u32 4294901760, %v16646_v60  ;;  %v16660_v60 = vld [vmem:[#allocation103_spill] sm:$0xff] }
 0x21e   :  { %v8771_v33 = vpack.c.bf16 %v16645_v39, %v16643_v27  ;;  %8988 = vmatpush1.bf16.msra.mxu0 %v8987_v57  ;;  %v16661_v15 = vand.u32 4294901760, %v16660_v60  ;;  %v16662_v57 = vld [vmem:[#allocation147_spill] sm:$0xff] }
 0x21f   :  { %8768 = vmatpush1.bf16.msra.mxu1 %v8767_v37  ;;  %v8773_v40 = vpack.c.bf16 %v16649_v3, %v16647_v18  ;;  %8990 = vmatprep.subr.bf16.mxu0 %v8989_v59  ;;  %v16654_v37 = vld [vmem:[#allocation90_spill] sm:$0xff]  ;;  %v16663_v3 = vld [vmem:[#allocation148_spill] sm:$0xff]  ;;  %v16668_v29 = vld [vmem:[#allocation107_spill] sm:$0xff] }
 0x220   :  { %8770 = vmatprep.subr.bf16.mxu1 %v8769_v51  ;;  %v16655_v20 = vand.u32 4294901760, %v16654_v37  ;;  %v16658_v51 = vld [vmem:[#allocation97_spill] sm:$0xff]  ;;  %v8995_v50 = vpack.c.bf16 %v16663_v3, %v16662_v57  ;;  %v16664_v59 = vld [vmem:[#allocation150_spill] sm:$0xff]  ;;  %v16669_v23 = vand.u32 4294901760, %v16668_v29 }
 0x221   :  { %v16659_v39 = vand.u32 4294901760, %v16658_v51  ;;  %v8997_v58 = vpack.c.bf16 %v16665_v9, %v16664_v59  ;;  %v16672_v51 = vld [vmem:[#allocation110_spill] sm:$0xff]  ;;  %v16677_v57 = vld [vmem:[#allocation157_spill] sm:$0xff] }
 0x222   :  { %v8775_v27 = vpack.c.bf16 %v16657_v0, %v16655_v20  ;;  %8992 = vmatpush1.bf16.msra.mxu0 %v8991_v56  ;;  %v16673_v60 = vand.u32 4294901760, %v16672_v51  ;;  %v16674_v56 = vld [vmem:[#allocation153_spill] sm:$0xff] }
 0x223   :  { %8772 = vmatpush1.bf16.msra.mxu1 %v8771_v33  ;;  %v8777_v18 = vpack.c.bf16 %v16661_v15, %v16659_v39  ;;  %8994 = vmatprep.subr.bf16.mxu0 %v8993_v53  ;;  %v16666_v33 = vld [vmem:[#allocation99_spill] sm:$0xff]  ;;  %v16675_v15 = vld [vmem:[#allocation154_spill] sm:$0xff]  ;;  %v16676_v53 = vld [vmem:[#allocation156_spill] sm:$0xff] }
 0x224   :  { %8774 = vmatprep.subr.bf16.mxu1 %v8773_v40  ;;  %v16667_v37 = vand.u32 4294901760, %v16666_v33  ;;  %v16670_v40 = vld [vmem:[#allocation109_spill] sm:$0xff]  ;;  %v8999_v3 = vpack.c.bf16 %v16675_v15, %v16674_v56  ;;  %v9001_v9 = vpack.c.bf16 %v16677_v57, %v16676_v53 }
 0x225   :  { %v16671_v0 = vand.u32 4294901760, %v16670_v40  ;;  %v16680_v59 = vld [vmem:[#allocation113_spill] sm:$0xff] }
 0x226   :  { %v8779_v20 = vpack.c.bf16 %v16669_v23, %v16667_v37  ;;  %8996 = vmatpush1.bf16.msra.mxu0 %v8995_v50  ;;  %v16681_v29 = vand.u32 4294901760, %v16680_v59  ;;  %v16683_v23 = vld [vmem:[#allocation160_spill] sm:$0xff]  ;;  %v16684_v50 = vld [vmem:[#allocation161_spill] sm:$0xff]  ;;  %v16690_v59 = vld [vmem:[#allocation167_spill] sm:$0xff] }
 0x227   :  { %8776 = vmatpush1.bf16.msra.mxu1 %v8775_v27  ;;  %v8781_v39 = vpack.c.bf16 %v16673_v60, %v16671_v0  ;;  %8998 = vmatprep.subr.bf16.mxu0 %v8997_v58  ;;  %v16678_v27 = vld [vmem:[#allocation112_spill] sm:$0xff]  ;;  %v16685_v0 = vld [vmem:[#allocation162_spill] sm:$0xff]  ;;  %v16686_v58 = vld [vmem:[#allocation51_spill] sm:$0xff] }
 0x228   :  { %8778 = vmatprep.subr.bf16.mxu1 %v8777_v18  ;;  %v16679_v33 = vand.u32 4294901760, %v16678_v27  ;;  %v16682_v18 = vld [vmem:[#allocation159_spill] sm:$0xff]  ;;  %v9005_v51 = vpack.c.bf16 %v16685_v0, %v16684_v50  ;;  %v16687_v60 = vld [vmem:[#allocation164_spill] sm:$0xff] }
 0x229   :  { %v9003_v40 = vpack.c.bf16 %v16683_v23, %v16682_v18  ;;  %v16689_v27 = vld [vmem:[#allocation87_spill] sm:$0xff] }
 0x22a   :  { %v8783_v37 = vpack.c.bf16 %v16681_v29, %v16679_v33  ;;  %9000 = vmatpush1.bf16.msra.mxu0 %v8999_v3  ;;  %v9009_v3 = vpack.c.bf16 %v16500_v17, %v16690_v59  ;;  %v9011_v33 = vpack.c.bf16 %v16508_v14, %v16507_v42  ;;  %v9013_v29 = vpack.c.bf16 %v16512_v44, %v16511_v41 }
 0x22b   :  { %8780 = vmatpush1.bf16.msra.mxu1 %v8779_v20  ;;  %9002 = vmatprep.subr.bf16.mxu0 %v9001_v9  ;;  %v16688_v20 = vld [vmem:[#allocation165_spill] sm:$0xff]  ;;  %v16692_v9 = vld [vmem:[#allocation98_spill] sm:$0xff] }
 0x22c   :  { %8782 = vmatprep.subr.bf16.mxu1 %v8781_v39  ;;  %v9007_v57 = vpack.c.bf16 %v16688_v20, %v16687_v60  ;;  %v16691_v39 = vld [vmem:[#allocation91_spill] sm:$0xff] }
 0x22e   :  { %9004 = vmatpush1.bf16.msra.mxu0 %v9003_v40  ;;  %v16694_v40 = vld [vmem:[#allocation22_spill] sm:$0xff] }
 0x22f   :  { %8784 = vmatpush1.bf16.msra.mxu1 %v8783_v37  ;;  %9006 = vmatprep.subr.bf16.mxu0 %v9005_v51  ;;  %v16693_v37 = vld [vmem:[#allocation19_spill] sm:$0xff]  ;;  %v9015_v51 = vpack.c.bf16 %v16515_v34, %v16514_v4 }
 0x230   :  { %8786 = vmatprep.subr.bf16.mxu1 %v16686_v58  ;;  %v16696_v58 = vld [vmem:[#allocation49_spill] sm:$0xff] }
 0x232   :  { %2644 = vmatmul.mubr.f32.vlgmr.msra.gmra.mrb[2].mxu1 %v16689_v27  ;;  %9008 = vmatpush1.bf16.msra.mxu0 %v9007_v57  ;;  %v16695_v57 = vld [vmem:[#allocation28_spill] sm:$0xff] }
 0x233   :  { %8788 = vmatpush1.bf16.msra.mxu1 %v16691_v39  ;;  %2779 = vmatprep.mubr.f32.mxu1 %v16543_v5  ;;  %v9017_v5 = vpack.c.bf16 %v16526_v49, %v16525_v10  ;;  %v9021_v39 = vpack.c.bf16 %v16540_v25, %v16539_v36 }
 0x234   :  { %8790 = vmatprep.subr.bf16.mxu1 %v16692_v9  ;;  %9010 = vmatprep.subr.bf16.mxu0 %v9009_v3  ;;  %v9019_v3 = vpack.c.bf16 %v16535_v62, %v16534_v35  ;;  %v16697_v9 = vld [vmem:[#allocation105_spill] sm:$0xff] }
 0x236   :  { %9012 = vmatpush1.bf16.msra.mxu0 %v9011_v33  ;;  %v16698_v33 = vld [vmem:[#allocation75_spill] sm:$0xff] }
 0x237   :  { %8792 = vmatpush1.bf16.msra.mxu1 %v16693_v37  ;;  %9014 = vmatprep.subr.bf16.mxu0 %v9013_v29  ;;  %v9023_v29 = vpack.c.bf16 %v16542_v6, %v16541_v32  ;;  %v9025_v37 = vpack.c.bf16 %v11884_v30, %v11879_v55 }
 0x238   :  { %8794 = vmatprep.subr.bf16.mxu1 %v16694_v40  ;;  %v16699_v40 = vld [vmem:[#allocation81_spill] sm:$0xff] }
 0x23a   :  { %9016 = vmatpush1.bf16.msra.mxu0 %v9015_v51  ;;  %v16700_v51 = vld [vmem:[#allocation86_spill] sm:$0xff] }
 0x23b   :  { %8796 = vmatpush1.bf16.msra.mxu1 %v16695_v57  ;;  %9018 = vmatprep.subr.bf16.mxu0 %v9017_v5  ;;  %v9027_v5 = vpack.c.bf16 %v11894_v61, %v11889_v26  ;;  %v9029_v57 = vpack.c.bf16 %v11906_v38, %v11901_v7 }
 0x23c   :  { %8798 = vmatprep.subr.bf16.mxu1 %v16696_v58  ;;  %v16701_v58 = vld [vmem:[#allocation13_spill] sm:$0xff] }
 0x23e   :  { %9020 = vmatpush1.bf16.msra.mxu0 %v9019_v3  ;;  %v16702_v3 = vld [vmem:[#allocation16_spill] sm:$0xff] }
 0x23f   :  { %8800 = vmatpush1.bf16.msra.mxu1 %v16697_v9  ;;  %9022 = vmatprep.subr.bf16.mxu0 %v9021_v39  ;;  %v9031_v39 = vpack.c.bf16 %v11916_v19, %v11911_v22  ;;  %v9033_v9 = vpack.c.bf16 %v11921_v63, %v11919_v11 }
 0x240   :  { %8802 = vmatprep.subr.bf16.mxu1 %v16698_v33  ;;  %v16703_v33 = vld [vmem:[#allocation32_spill] sm:$0xff] }
 0x242   :  { %9024 = vmatpush1.bf16.msra.mxu0 %v9023_v29  ;;  %v16704_v29 = vld [vmem:[#allocation34_spill] sm:$0xff] }
 0x243   :  { %8804 = vmatpush1.bf16.msra.mxu1 %v16699_v40  ;;  %9026 = vmatprep.subr.bf16.mxu0 %v9025_v37  ;;  %v9035_v37 = vpack.c.bf16 %v16566_v12, %v16565_v31  ;;  %v9037_v40 = vpack.c.bf16 %v16568_v52, %v16567_v13 }
 0x244   :  { %8806 = vmatprep.subr.bf16.mxu1 %v16700_v51  ;;  %v16705_v51 = vld [vmem:[#allocation37_spill] sm:$0xff] }
 0x246   :  { %9028 = vmatpush1.bf16.msra.mxu0 %v9027_v5  ;;  %v16706_v5 = vld [vmem:[#allocation40_spill] sm:$0xff] }
 0x247   :  { %8808 = vmatpush1.bf16.msra.mxu1 %v16701_v58  ;;  %9030 = vmatprep.subr.bf16.mxu0 %v9029_v57  ;;  %v9039_v57 = vpack.c.bf16 %v16578_v47, %v16577_v24  ;;  %v16707_v58 = vld [vmem:[#allocation43_spill] sm:$0xff] }
 0x248   :  { %8810 = vmatprep.subr.bf16.mxu1 %v16702_v3  ;;  %v16708_v3 = vld [vmem:[#allocation45_spill] sm:$0xff] }
 0x24a   :  { %9032 = vmatpush1.bf16.msra.mxu0 %v9031_v39  ;;  %v16709_v39 = vld [vmem:[#allocation119_spill] sm:$0xff] }
 0x24b   :  { %8812 = vmatpush1.bf16.msra.mxu1 %v16703_v33  ;;  %9034 = vmatprep.subr.bf16.mxu0 %v9033_v9  ;;  %v16710_v9 = vld [vmem:[#allocation47_spill] sm:$0xff]  ;;  %v16711_v33 = vld [vmem:[#allocation92_spill] sm:$0xff] }
 0x24c   :  { %8814 = vmatprep.subr.bf16.mxu1 %v16704_v29  ;;  %v16712_v29 = vld [vmem:[#allocation54_spill] sm:$0xff] }
 0x24e   :  { %9036 = vmatpush1.bf16.msra.mxu0 %v9035_v37  ;;  %v16714_v37 = vand.u32 4294901760, %v16626_v1  ;;  %v16724_v1 = vld [vmem:[#allocation68_spill] sm:$0xff] }
 0x24f   :  { %8816 = vmatpush1.bf16.msra.mxu1 %v16705_v51  ;;  %9038 = vmatprep.subr.bf16.mxu0 %v9037_v40  ;;  %v16713_v51 = vld [vmem:[#allocation121_spill] sm:$0xff] }
 0x250   :  { %8818 = vmatprep.subr.bf16.mxu1 %v16706_v5  ;;  %v16715_v5 = vld [vmem:[#allocation124_spill] sm:$0xff]  ;;  %v16716_v40 = vld [vmem:[#allocation57_spill] sm:$0xff] }
 0x252   :  { %9040 = vmatpush1.bf16.msra.mxu0 %v9039_v57  ;;  %v16718_v57 = vld [vmem:[#allocation127_spill] sm:$0xff] }
 0x253   :  { %8820 = vmatpush1.bf16.msra.mxu1 %v16707_v58  ;;  %9042 = vmatprep.subr.bf16.mxu0 %v16709_v39  ;;  %v16717_v58 = vld [vmem:[#allocation61_spill] sm:$0xff] }
 0x254   :  { %8822 = vmatprep.subr.bf16.mxu1 %v16708_v3  ;;  %v16719_v3 = vld [vmem:[#allocation130_spill] sm:$0xff]  ;;  %v16721_v39 = vld [vmem:[#allocation65_spill] sm:$0xff] }
 0x255   :  { %3666 = vmatmul.mubr.f32.vlgmr.msra.gmra.mrb[2].mxu0 %v16711_v33 }
 0x256   :  { %9044 = vmatpush1.bf16.msra.mxu0 %v16713_v51  ;;  %3803 = vmatprep.mubr.f32.mxu0 %v16714_v37  ;;  %v16723_v51 = vld [vmem:[#allocation137_spill] sm:$0xff] }
 0x257   :  { %8824 = vmatpush1.bf16.msra.mxu1 %v16710_v9  ;;  %9046 = vmatprep.subr.bf16.mxu0 %v16715_v5  ;;  %v16720_v9 = vld [vmem:[#allocation62_spill] sm:$0xff]  ;;  %v16725_v37 = vld [vmem:[#allocation77_spill] sm:$0xff]  ;;  %v16726_v5 = vld [vmem:[#allocation140_spill] sm:$0xff] }
 0x258   :  { %8826 = vmatprep.subr.bf16.mxu1 %v16712_v29  ;;  %v16722_v29 = vld [vmem:[#allocation133_spill] sm:$0xff] }
 0x25a   :  { %9048 = vmatpush1.bf16.msra.mxu0 %v16718_v57  ;;  %v16729_v57 = vld [vmem:[#allocation102_spill] sm:$0xff] }
 0x25b   :  { %8828 = vmatpush1.bf16.msra.mxu1 %v16716_v40  ;;  %9050 = vmatprep.subr.bf16.mxu0 %v16719_v3  ;;  %v16727_v40 = vld [vmem:[#allocation143_spill] sm:$0xff]  ;;  %v16730_v3 = vld [vmem:[#allocation146_spill] sm:$0xff] }
 0x25c   :  { %8830 = vmatprep.subr.bf16.mxu1 %v16717_v58  ;;  %v16728_v58 = vld [vmem:[#allocation83_spill] sm:$0xff] }
 0x25e   :  { %9052 = vmatpush1.bf16.msra.mxu0 %v16722_v29  ;;  %v16733_v29 = vld [vmem:[#allocation108_spill] sm:$0xff] }
 0x25f   :  { %8832 = vmatpush1.bf16.msra.mxu1 %v16720_v9  ;;  %9054 = vmatprep.subr.bf16.mxu0 %v16723_v51  ;;  %v16731_v9 = vld [vmem:[#allocation149_spill] sm:$0xff]  ;;  %v16734_v51 = vld [vmem:[#allocation152_spill] sm:$0xff] }
 0x260   :  { %8834 = vmatprep.subr.bf16.mxu1 %v16721_v39  ;;  %v16732_v39 = vld [vmem:[#allocation104_spill] sm:$0xff] }
 0x262   :  { %9056 = vmatpush1.bf16.msra.mxu0 %v16726_v5 }
 0x263   :  { %8836 = vmatpush1.bf16.msra.mxu1 %v16724_v1  ;;  %9058 = vmatprep.subr.bf16.mxu0 %v16727_v40  ;;  %v16735_v1 = vld [vmem:[#allocation155_spill] sm:$0xff] }
 0x264   :  { %8838 = vmatprep.subr.bf16.mxu1 %v16725_v37  ;;  %v16736_v37 = vld [vmem:[#allocation158_spill] sm:$0xff] }
 0x266   :  { %9060 = vmatpush1.bf16.msra.mxu0 %v16730_v3  ;;  %v16739_v3 = vld [vmem:[#allocation166_spill] sm:$0xff] }
 0x267   :  { %8840 = vmatpush1.bf16.msra.mxu1 %v16728_v58  ;;  %9062 = vmatprep.subr.bf16.mxu0 %v16731_v9  ;;  %v16737_v58 = vld [vmem:[#allocation106_spill] sm:$0xff]  ;;  %v16740_v9 = vld [vmem:[#allocation169_spill] sm:$0xff] }
 0x268   :  { %8842 = vmatprep.subr.bf16.mxu1 %v16729_v57  ;;  %v16738_v57 = vld [vmem:[#allocation163_spill] sm:$0xff] }
 0x26a   :  { %9064 = vmatpush1.bf16.msra.mxu0 %v16734_v51  ;;  %v16743_v51 = vld [vmem:[#allocation178_spill] sm:$0xff] }
 0x26b   :  { %8844 = vmatpush1.bf16.msra.mxu1 %v16732_v39  ;;  %9066 = vmatprep.subr.bf16.mxu0 %v16735_v1  ;;  %v16741_v39 = vld [vmem:[#allocation172_spill] sm:$0xff]  ;;  %v16744_v1 = vld [vmem:[#allocation181_spill] sm:$0xff] }
 0x26c   :  { %8846 = vmatprep.subr.bf16.mxu1 %v16733_v29  ;;  %v16742_v29 = vld [vmem:[#allocation175_spill] sm:$0xff] }
 0x26e   :  { %9068 = vmatpush1.bf16.msra.mxu0 %v16736_v37  ;;  %v16746_v37 = vld [vmem:[#allocation185_spill] sm:$0xff] }
 0x26f   :  { %8848 = vmatpush1.bf16.msra.mxu1 %v16527_v54  ;;  %9070 = vmatprep.subr.bf16.mxu0 %v16737_v58  ;;  %v16745_v54 = vld [vmem:[#allocation183_spill] sm:$0xff] }
 0x270   :  { %v16748_v58 = vld [vmem:[#allocation187_spill] sm:$0xff] }
 0x272   :  { %2781 = vmatmul.mubr.f32.vlgmr.msra.gmra.mrb[2].mxu1 %v16689_v27  ;;  %9072 = vmatpush1.bf16.msra.mxu0 %v16738_v57  ;;  %v16747_v27 = vld [vmem:[#allocation120_spill] sm:$0xff] }
 0x273   :  { %9074 = vmatprep.subr.bf16.mxu0 %v16739_v3  ;;  %v16749_v57 = vld [vmem:[#allocation188_spill] sm:$0xff]  ;;  %v16750_v3 = vld [vmem:[#allocation189_spill] sm:$0xff] }
 0x276   :  { %9076 = vmatpush1.bf16.msra.mxu0 %v16740_v9  ;;  %v16751_v9 = vld [vmem:[#allocation117_spill] sm:$0xff] }
 0x277   :  { %9078 = vmatprep.subr.bf16.mxu0 %v16741_v39  ;;  %v16752_v39 = vld [vmem:[#allocation190_spill] sm:$0xff] }
 0x27a   :  { %9080 = vmatpush1.bf16.msra.mxu0 %v16742_v29  ;;  %v16753_v29 = vld [vmem:[#allocation191_spill] sm:$0xff] }
 0x27b   :  { %9082 = vmatprep.subr.bf16.mxu0 %v16743_v51 }
 0x27e   :  { %9084 = vmatpush1.bf16.msra.mxu0 %v16744_v1  ;;  %v16754_v1 = vand.u32 4294901760, %v16603_v46  ;;  %v16762_v46 = vld [vmem:[#allocation95_spill] sm:$0xff] }
 0x27f   :  { %9086 = vmatprep.subr.bf16.mxu0 %v16745_v54  ;;  %v16755_v54 = vand.u32 4294901760, %v16604_v48  ;;  %v16763_v48 = vand.u32 4294901760, %v16627_v21 }
 0x281   :  { %v9105_v51 = vpack.c.bf16 %v16755_v54, %v16754_v1  ;;  %v16764_v1 = vand.u32 4294901760, %v16628_v8  ;;  %v16776_v8 = vld [vmem:[#allocation141_spill] sm:$0xff] }
 0x282   :  { %9088 = vmatpush1.bf16.msra.mxu0 %v16746_v37  ;;  %v16756_v37 = vld [vmem:[#allocation196_spill] sm:$0xff] }
 0x283   :  { %9090 = vmatprep.subr.bf16.mxu0 %v16747_v27  ;;  %v16757_v27 = vand.u32 4294901760, %v16613_v43  ;;  %v9111_v43 = vpack.c.bf16 %v16764_v1, %v16763_v48  ;;  %v16778_v48 = vld [vmem:[#allocation142_spill] sm:$0xff] }
 0x286   :  { %9092 = vmatpush1.bf16.msra.mxu0 %v16748_v58  ;;  %v16758_v58 = vand.u32 4294901760, %v16614_v45  ;;  %v16765_v45 = vand.u32 4294901760, %v16629_v28  ;;  %v16779_v28 = vand.u32 4294901760, %v16778_v48 }
 0x287   :  { %9094 = vmatprep.subr.bf16.mxu0 %v16749_v57 }
 0x288   :  { %v9107_v57 = vpack.c.bf16 %v16758_v58, %v16757_v27  ;;  %v16774_v27 = vld [vmem:[#allocation139_spill] sm:$0xff] }
 0x289   :  { %v16775_v21 = vand.u32 4294901760, %v16774_v27  ;;  %v16790_v27 = vld [vmem:[#allocation151_spill] sm:$0xff] }
 0x28a   :  { %9096 = vmatpush1.bf16.msra.mxu0 %v16750_v3  ;;  %v16759_v3 = vand.u32 4294901760, %v16615_v2 }
 0x28b   :  { %9098 = vmatprep.subr.bf16.mxu0 %v16751_v9  ;;  %v16760_v9 = vand.u32 4294901760, %v16616_v16  ;;  %v16768_v16 = vld [vmem:[#allocation134_spill] sm:$0xff] }
 0x28e   :  { %9100 = vmatpush1.bf16.msra.mxu0 %v16752_v39  ;;  %v9109_v39 = vpack.c.bf16 %v16760_v9, %v16759_v3  ;;  %v16769_v3 = vand.u32 4294901760, %v16768_v16  ;;  %v16770_v9 = vld [vmem:[#allocation135_spill] sm:$0xff] }
 0x28f   :  { %9102 = vmatprep.subr.bf16.mxu0 %v16753_v29  ;;  %v16761_v29 = vand.u32 4294901760, %v16711_v33  ;;  %v16771_v33 = vand.u32 4294901760, %v16770_v9  ;;  %v16786_v9 = vld [vmem:[#allocation148_spill] sm:$0xff] }
 0x292   :  { %9104 = vmatpush1.bf16.msra.mxu0 %v16756_v37 }
 0x293   :  { %9106 = vmatprep.subr.bf16.mxu0 %v9105_v51  ;;  %v16766_v51 = vld [vmem:[#allocation132_spill] sm:$0xff] }
 0x294   :  { %v16767_v58 = vand.u32 4294901760, %v16766_v51  ;;  %v16782_v51 = vld [vmem:[#allocation145_spill] sm:$0xff] }
 0x295   :  { %3807 = vmatmul.mubr.f32.vlgmr.msra.gmra.mrb[2].mxu0 %v16761_v29  ;;  %v9115_v29 = vpack.c.bf16 %v16771_v33, %v16769_v3  ;;  %v16784_v3 = vld [vmem:[#allocation147_spill] sm:$0xff]  ;;  %v16787_v33 = vand.u32 4294901760, %v16786_v9 }
 0x296   :  { %9108 = vmatpush1.bf16.msra.mxu0 %v9107_v57  ;;  %4070 = vmatprep.mubr.f32.mxu0 %v16762_v46  ;;  %v9113_v2 = vpack.c.bf16 %v16767_v58, %v16765_v45  ;;  %v16772_v57 = vld [vmem:[#allocation138_spill] sm:$0xff]  ;;  %v16780_v45 = vld [vmem:[#allocation144_spill] sm:$0xff]  ;;  %v16783_v58 = vand.u32 4294901760, %v16782_v51  ;;  %v16797_v51 = vand.u32 4294901760, %v16682_v18  ;;  %v16804_v18 = vand.u32 4294901760, %v16500_v17 }
 0x297   :  { %9110 = vmatprep.subr.bf16.mxu0 %v9109_v39  ;;  %v16773_v54 = vand.u32 4294901760, %v16772_v57  ;;  %v16777_v39 = vand.u32 4294901760, %v16776_v8  ;;  %v16811_v17 = vand.u32 4294901760, %v16525_v10  ;;  %v16818_v10 = vand.u32 4294901760, %v16542_v6 }
 0x298   :  { %v16825_v6 = vand.u32 4294901760, %v11911_v22  ;;  %v16832_v22 = vand.u32 4294901760, %v16568_v52  ;;  %v16839_v52 = vld [vmem:[#allocation127_spill] sm:$0xff] }
 0x299   :  { %v9117_v37 = vpack.c.bf16 %v16775_v21, %v16773_v54  ;;  %v9119_v1 = vpack.c.bf16 %v16779_v28, %v16777_v39  ;;  %v16788_v54 = vld [vmem:[#allocation150_spill] sm:$0xff]  ;;  %v16791_v21 = vand.u32 4294901760, %v16790_v27  ;;  %v16793_v39 = vand.u32 4294901760, %v16675_v15 }
 0x29a   :  { %9112 = vmatpush1.bf16.msra.mxu0 %v9111_v43  ;;  %v16781_v43 = vand.u32 4294901760, %v16780_v45  ;;  %v16794_v28 = vand.u32 4294901760, %v16676_v53  ;;  %v16801_v15 = vand.u32 4294901760, %v16687_v60  ;;  %v16802_v53 = vand.u32 4294901760, %v16688_v20 }
 0x29b   :  { %9114 = vmatprep.subr.bf16.mxu0 %v9113_v2  ;;  %v16785_v2 = vand.u32 4294901760, %v16784_v3  ;;  %v16799_v3 = vand.u32 4294901760, %v16684_v50  ;;  %v16806_v50 = vand.u32 4294901760, %v16508_v14  ;;  %v16808_v60 = vand.u32 4294901760, %v16512_v44 }
 0x29c   :  { %v9121_v16 = vpack.c.bf16 %v16783_v58, %v16781_v43  ;;  %v16798_v58 = vand.u32 4294901760, %v16683_v23  ;;  %v9135_v9 = vpack.c.bf16 %v16802_v53, %v16801_v15  ;;  %v16805_v23 = vand.u32 4294901760, %v16507_v42  ;;  %v16845_v15 = vld [vmem:[#allocation152_spill] sm:$0xff]  ;;  %v16847_v53 = vld [vmem:[#allocation158_spill] sm:$0xff] }
 0x29d   :  { %v9123_v57 = vpack.c.bf16 %v16787_v33, %v16785_v2  ;;  %v16803_v33 = vand.u32 4294901760, %v16690_v59  ;;  %v16809_v20 = vand.u32 4294901760, %v16514_v4  ;;  %v16810_v59 = vand.u32 4294901760, %v16515_v34 }
 0x29e   :  { %9116 = vmatpush1.bf16.msra.mxu0 %v9115_v29  ;;  %v16789_v29 = vand.u32 4294901760, %v16788_v54  ;;  %v9139_v54 = vpack.c.bf16 %v16806_v50, %v16805_v23  ;;  %v16812_v42 = vand.u32 4294901760, %v16526_v49  ;;  %v16813_v14 = vand.u32 4294901760, %v16534_v35  ;;  %v16854_v23 = vld [vmem:[#allocation178_spill] sm:$0xff]  ;;  %v16855_v50 = vld [vmem:[#allocation181_spill] sm:$0xff] }
 0x29f   :  { %9118 = vmatprep.subr.bf16.mxu0 %v9117_v37  ;;  %v16792_v37 = vand.u32 4294901760, %v16674_v56  ;;  %v16800_v56 = vand.u32 4294901760, %v16685_v0  ;;  %v16807_v0 = vand.u32 4294901760, %v16511_v41  ;;  %v9143_v27 = vpack.c.bf16 %v16810_v59, %v16809_v20  ;;  %v16860_v20 = vld [vmem:[#allocation188_spill] sm:$0xff]  ;;  %v12827_v59 = vld [vmem:[#allocation5 + $0x208] sm:$0xff] }
 0x2a0   :  { %v9125_v8 = vpack.c.bf16 %v16791_v21, %v16789_v29  ;;  %v9145_v21 = vpack.c.bf16 %v16812_v42, %v16811_v17  ;;  %v16814_v41 = vand.u32 4294901760, %v16535_v62  ;;  %v16815_v44 = vand.u32 4294901760, %v16539_v36  ;;  %v16861_v17 = vld [vmem:[#allocation189_spill] sm:$0xff] }
 0x2a1   :  { %v9127_v48 = vpack.c.bf16 %v16793_v39, %v16792_v37  ;;  %v9133_v2 = vpack.c.bf16 %v16800_v56, %v16799_v3  ;;  %v9141_v29 = vpack.c.bf16 %v16808_v60, %v16807_v0  ;;  %v16816_v4 = vand.u32 4294901760, %v16540_v25  ;;  %v16840_v3 = vld [vmem:[#allocation130_spill] sm:$0xff]  ;;  %v16857_v0 = vld [vmem:[#allocation185_spill] sm:$0xff]  ;;  %v16858_v60 = vld [vmem:[#allocation120_spill] sm:$0xff] }
 0x2a2   :  { %9120 = vmatpush1.bf16.msra.mxu0 %v9119_v1  ;;  %v16795_v1 = vld [vmem:[#allocation157_spill] sm:$0xff]  ;;  %v16817_v34 = vand.u32 4294901760, %v16541_v32  ;;  %v16819_v49 = vand.u32 4294901760, %v11879_v55  ;;  %v16820_v35 = vand.u32 4294901760, %v11884_v30  ;;  %v16821_v62 = vand.u32 4294901760, %v11889_v26  ;;  %v16843_v56 = vld [vmem:[#allocation146_spill] sm:$0xff] }
 0x2a3   :  { %9122 = vmatprep.subr.bf16.mxu0 %v9121_v16  ;;  %v16796_v45 = vand.u32 4294901760, %v16795_v1  ;;  %v9131_v16 = vpack.c.bf16 %v16798_v58, %v16797_v51  ;;  %v9149_v37 = vpack.c.bf16 %v16816_v4, %v16815_v44  ;;  %v16822_v36 = vand.u32 4294901760, %v11894_v61  ;;  %v16862_v42 = vld [vmem:[#allocation117_spill] sm:$0xff]  ;;  %v12839_v44 = vld [vmem:[#allocation5 + $0x228] sm:$0xff] }
 0x2a4   :  { %v9151_v39 = vpack.c.bf16 %v16818_v10, %v16817_v34  ;;  %v16823_v25 = vand.u32 4294901760, %v11901_v7  ;;  %v16824_v32 = vand.u32 4294901760, %v11906_v38  ;;  %v16826_v55 = vand.u32 4294901760, %v11916_v19  ;;  %v12841_v4 = vld [vmem:[#allocation5 + $0x238] sm:$0xff] }
 0x2a5   :  { %v9129_v43 = vpack.c.bf16 %v16796_v45, %v16794_v28  ;;  %v9155_v28 = vpack.c.bf16 %v16822_v36, %v16821_v62  ;;  %v16827_v30 = vand.u32 4294901760, %v11919_v11  ;;  %v16828_v26 = vand.u32 4294901760, %v11921_v63  ;;  %v16835_v63 = vld [vmem:[#allocation119_spill] sm:$0xff]  ;;  %v12855_v62 = vld [vmem:[#allocation5 + $0x220] sm:$0xff]  ;;  %v12857_v36 = vld [vmem:[#allocation5 + $0x230] sm:$0xff] }
 0x2a6   :  { %9124 = vmatpush1.bf16.msra.mxu0 %v9123_v57  ;;  %v9137_v57 = vpack.c.bf16 %v16804_v18, %v16803_v33  ;;  %v9157_v1 = vpack.c.bf16 %v16824_v32, %v16823_v25  ;;  %v9159_v45 = vpack.c.bf16 %v16826_v55, %v16825_v6  ;;  %v16829_v61 = vand.u32 4294901760, %v16565_v31  ;;  %v16836_v31 = vld [vmem:[#allocation63_spill] sm:$0xff]  ;;  %v16850_v18 = vld [vmem:[#allocation166_spill] sm:$0xff]  ;;  %v12861_v25 = vld [vmem:[#allocation5 + $0x258] sm:$0xff] }
 0x2a7   :  { %9126 = vmatprep.subr.bf16.mxu0 %v9125_v8  ;;  %v9147_v8 = vpack.c.bf16 %v16814_v41, %v16813_v14  ;;  %v16830_v7 = vand.u32 4294901760, %v16566_v12  ;;  %v16831_v38 = vand.u32 4294901760, %v16567_v13  ;;  %v16833_v19 = vand.u32 4294901760, %v16577_v24  ;;  %v16837_v12 = vld [vmem:[#allocation121_spill] sm:$0xff]  ;;  %v16838_v13 = vld [vmem:[#allocation124_spill] sm:$0xff]  ;;  %v16849_v33 = vld [vmem:[#allocation163_spill] sm:$0xff] }
 0x2a8   :  { %v16834_v11 = vand.u32 4294901760, %v16578_v47  ;;  %v16841_v24 = vld [vmem:[#allocation133_spill] sm:$0xff]  ;;  %v12835_v41 = vld [vmem:[#allocation5 + $0x200] sm:$0xff]  ;;  %v16866_v32 = vld [vmem:[#allocation196_spill] sm:$0xff]  ;;  %v15462_v6 = vand.u32 4294901760, %v12855_v62  ;;  %v15461_v55 = vand.u32 4294901760, %v12857_v36 }
 0x2a9   :  { %v9163_v51 = vpack.c.bf16 %v16830_v7, %v16829_v61  ;;  %v9165_v58 = vpack.c.bf16 %v16832_v22, %v16831_v38  ;;  %v16842_v47 = vld [vmem:[#allocation137_spill] sm:$0xff]  ;;  %v4217_v34 = vand.u32 4294901760, %v12835_v41  ;;  %v12883_v61 = vld [vmem:[#allocation5 + $0x250] sm:$0xff]  ;;  %v12885_v7 = vld [vmem:[#allocation5 + $0x268] sm:$0xff] }
 0x2aa   :  { %9128 = vmatpush1.bf16.msra.mxu0 %v9127_v48  ;;  %v9153_v48 = vpack.c.bf16 %v16820_v35, %v16819_v49  ;;  %v15466_v35 = vand.u32 4294901760, %v12839_v44  ;;  %v12895_v38 = vpack.c.bf16 %v15461_v55, %v15462_v6  ;;  %v13038_v6 = vld [vmem:[#allocation5 + $0x300] sm:$0xff]  ;;  %v13081_v55 = vld [vmem:[#allocation5 + $0x330] sm:$0xff] }
 0x2ab   :  { %9130 = vmatprep.subr.bf16.mxu0 %v9129_v43  ;;  %v9161_v43 = vpack.c.bf16 %v16828_v26, %v16827_v30  ;;  %v15459_v26 = vand.u32 4294901760, %v12861_v25 }
 0x2ac   :  { %16869 = vst [vmem:[#allocation20_spill] sm:$0xff] %v12895_v38 }
 0x2ae   :  { %9132 = vmatpush1.bf16.msra.mxu0 %v9131_v16  ;;  %v9167_v16 = vpack.c.bf16 %v16834_v11, %v16833_v19  ;;  %v15452_v11 = vand.u32 4294901760, %v12885_v7 }
 0x2af   :  { %9134 = vmatprep.subr.bf16.mxu0 %v9133_v2  ;;  %v16844_v2 = vld [vmem:[#allocation149_spill] sm:$0xff] }
 0x2b2   :  { %9136 = vmatpush1.bf16.msra.mxu0 %v9135_v9  ;;  %v16848_v9 = vld [vmem:[#allocation106_spill] sm:$0xff] }
 0x2b3   :  { %9138 = vmatprep.subr.bf16.mxu0 %v9137_v57  ;;  %v16851_v57 = vld [vmem:[#allocation169_spill] sm:$0xff] }
 0x2b6   :  { %9140 = vmatpush1.bf16.msra.mxu0 %v9139_v54  ;;  %v16856_v54 = vld [vmem:[#allocation183_spill] sm:$0xff] }
 0x2b7   :  { %9142 = vmatprep.subr.bf16.mxu0 %v9141_v29  ;;  %v16859_v29 = vld [vmem:[#allocation187_spill] sm:$0xff] }
 0x2ba   :  { %9144 = vmatpush1.bf16.msra.mxu0 %v9143_v27  ;;  %v12829_v27 = vld [vmem:[#allocation5 + $0x218] sm:$0xff] }
 0x2bb   :  { %9146 = vmatprep.subr.bf16.mxu0 %v9145_v21  ;;  %v4215_v21 = vand.u32 4294901760, %v12827_v59  ;;  %v4219_v14 = vand.u32 4294901760, %v12829_v27 }
 0x2bd   :  { %v12851_v49 = vpack.c.bf16 %v4219_v14, %v4215_v21 }
 0x2be   :  { %9148 = vmatpush1.bf16.msra.mxu0 %v9147_v8  ;;  %v12837_v8 = vld [vmem:[#allocation5 + $0x210] sm:$0xff] }
 0x2bf   :  { %9150 = vmatprep.subr.bf16.mxu0 %v9149_v37  ;;  %v16863_v37 = vld [vmem:[#allocation190_spill] sm:$0xff]  ;;  %v15469_v10 = vand.u32 4294901760, %v12837_v8  ;;  %16865 = vst [vmem:[#allocation18_spill] sm:$0xff] %v12851_v49 }
 0x2c2   :  { %9152 = vmatpush1.bf16.msra.mxu0 %v9151_v39  ;;  %v16864_v39 = vld [vmem:[#allocation191_spill] sm:$0xff] }
 0x2c3   :  { %9154 = vmatprep.subr.bf16.mxu0 %v9153_v48  ;;  %v15465_v48 = vand.u32 4294901760, %v12841_v4 }
 0x2c6   :  { %9156 = vmatpush1.bf16.msra.mxu0 %v9155_v28  ;;  %v12859_v28 = vld [vmem:[#allocation5 + $0x248] sm:$0xff] }
 0x2c7   :  { %9158 = vmatprep.subr.bf16.mxu0 %v9157_v1  ;;  %v12868_v1 = vpack.c.bf16 %v15469_v10, %v4217_v34  ;;  %v15460_v30 = vand.u32 4294901760, %v12859_v28  ;;  %v16887_v10 = vand.u32 4294901760, %v12837_v8 }
 0x2c9   :  { %16867 = vst [vmem:[#allocation100_spill] sm:$0xff] %v12868_v1  ;;  %v12904_v19 = vpack.c.bf16 %v15459_v26, %v15460_v30 }
 0x2ca   :  { %9160 = vmatpush1.bf16.msra.mxu0 %v9159_v45  ;;  %v12877_v45 = vpack.c.bf16 %v15465_v48, %v15466_v35  ;;  %v13044_v48 = vld [vmem:[#allocation5 + $0x338] sm:$0xff]  ;;  %v13049_v35 = vsub.f32 %v12827_v59, %v4215_v21  ;;  %v13068_v59 = vsub.f32 %v12835_v41, %v4217_v34  ;;  %v13086_v41 = vsub.f32 %v12837_v8, %v16887_v10 }
 0x2cb   :  { %9162 = vmatprep.subr.bf16.mxu0 %v9161_v43  ;;  %v12881_v43 = vld [vmem:[#allocation5 + $0x240] sm:$0xff]  ;;  %16870 = vst [vmem:[#allocation26_spill] sm:$0xff] %v12904_v19  ;;  %v16889_v34 = vand.u32 4294901760, %v12839_v44  ;;  %v16895_v8 = vand.u32 4294901760, %v12857_v36 }
 0x2cc   :  { %16868 = vst [vmem:[#allocation21_spill] sm:$0xff] %v12877_v45  ;;  %v15458_v22 = vand.u32 4294901760, %v12881_v43  ;;  %16881 = vst [vmem:[#allocation79_spill] sm:$0xff] %v13049_v35 }
 0x2cd   :  { %16884 = vst [vmem:[#allocation93_spill] sm:$0xff] %v13068_v59  ;;  %16888 = vst [vmem:[#allocation170_spill] sm:$0xff] %v13086_v41  ;;  %v13110_v10 = vsub.f32 %v12857_v36, %v16895_v8 }
 0x2ce   :  { %9164 = vmatpush1.bf16.msra.mxu0 %v9163_v51  ;;  %v12887_v51 = vld [vmem:[#allocation5 + $0x278] sm:$0xff] }
 0x2cf   :  { %9166 = vmatprep.subr.bf16.mxu0 %v9165_v58  ;;  %v15455_v58 = vand.u32 4294901760, %v12883_v61  ;;  %16896 = vst [vmem:[#allocation176_spill] sm:$0xff] %v13110_v10 }
 0x2d2   :  { %9168 = vmatpush1.bf16.msra.mxu0 %v9167_v16  ;;  %v15451_v16 = vand.u32 4294901760, %v12887_v51 }
 0x2d3   :  { %9170 = vmatprep.subr.bf16.mxu0 %v16835_v63  ;;  %v12908_v63 = vld [vmem:[#allocation5 + $0x260] sm:$0xff] }
 0x2d5   :  { %4072 = vmatmul.mubr.f32.vlgmr.msra.gmra.mrb[2].mxu0 %v16836_v31 }
 0x2d6   :  { %9172 = vmatpush1.bf16.msra.mxu0 %v16837_v12  ;;  %4207 = vmatprep.mubr.f32.mxu0 %v16762_v46  ;;  %v16846_v46 = vld [vmem:[#allocation155_spill] sm:$0xff] }
 0x2d7   :  { %9174 = vmatprep.subr.bf16.mxu0 %v16838_v13  ;;  %v12912_v12 = vld [vmem:[#allocation5 + $0x288] sm:$0xff]  ;;  %v12914_v13 = vld [vmem:[#allocation5 + $0x298] sm:$0xff] }
 0x2da   :  { %9176 = vmatpush1.bf16.msra.mxu0 %v16839_v52  ;;  %v12921_v52 = vpack.c.bf16 %v15455_v58, %v15458_v22  ;;  %v13018_v58 = vld [vmem:[#allocation5 + $0x318] sm:$0xff] }
 0x2db   :  { %9178 = vmatprep.subr.bf16.mxu0 %v16840_v3  ;;  %v15450_v3 = vand.u32 4294901760, %v12908_v63 }
 0x2dc   :  { %16871 = vst [vmem:[#allocation23_spill] sm:$0xff] %v12921_v52 }
 0x2de   :  { %9180 = vmatpush1.bf16.msra.mxu0 %v16841_v24 }
 0x2df   :  { %9182 = vmatprep.subr.bf16.mxu0 %v16842_v47  ;;  %v12930_v47 = vpack.c.bf16 %v15451_v16, %v15452_v11  ;;  %v13012_v11 = vld [vmem:[#allocation5 + $0x2e0] sm:$0xff] }
 0x2e1   :  { %16872 = vst [vmem:[#allocation29_spill] sm:$0xff] %v12930_v47 }
 0x2e2   :  { %9184 = vmatpush1.bf16.msra.mxu0 %v16726_v5  ;;  %v16852_v5 = vld [vmem:[#allocation172_spill] sm:$0xff] }
 0x2e3   :  { %9186 = vmatprep.subr.bf16.mxu0 %v16727_v40  ;;  %v16853_v40 = vld [vmem:[#allocation175_spill] sm:$0xff] }
 0x2e6   :  { %9188 = vmatpush1.bf16.msra.mxu0 %v16843_v56  ;;  %v15448_v56 = vand.u32 4294901760, %v12912_v12 }
 0x2e7   :  { %9190 = vmatprep.subr.bf16.mxu0 %v16844_v2  ;;  %v15445_v2 = vand.u32 4294901760, %v12914_v13 }
 0x2ea   :  { %9192 = vmatpush1.bf16.msra.mxu0 %v16845_v15  ;;  %v12934_v15 = vld [vmem:[#allocation5 + $0x280] sm:$0xff] }
 0x2eb   :  { %9194 = vmatprep.subr.bf16.mxu0 %v16846_v46  ;;  %v12936_v46 = vld [vmem:[#allocation5 + $0x290] sm:$0xff] }
 0x2ee   :  { %9196 = vmatpush1.bf16.msra.mxu0 %v16847_v53  ;;  %v12938_v53 = vld [vmem:[#allocation5 + $0x2a8] sm:$0xff] }
 0x2ef   :  { %9198 = vmatprep.subr.bf16.mxu0 %v16848_v9  ;;  %v12940_v9 = vld [vmem:[#allocation5 + $0x2b8] sm:$0xff] }
 0x2f2   :  { %9200 = vmatpush1.bf16.msra.mxu0 %v16849_v33 }
 0x2f3   :  { %9202 = vmatprep.subr.bf16.mxu0 %v16850_v18  ;;  %v15444_v18 = vand.u32 4294901760, %v12934_v15 }
 0x2f6   :  { %9204 = vmatpush1.bf16.msra.mxu0 %v16851_v57  ;;  %v15443_v57 = vand.u32 4294901760, %v12936_v46 }
 0x2f7   :  { %9206 = vmatprep.subr.bf16.mxu0 %v16852_v5  ;;  %v12956_v5 = vpack.c.bf16 %v15445_v2, %v15448_v56  ;;  %v12992_v2 = vld [vmem:[#allocation5 + $0x2f8] sm:$0xff] }
 0x2f8   :  { %v15467_v16 = vand.u32 4294901760, %v12992_v2 }
 0x2f9   :  { %16874 = vst [vmem:[#allocation64_spill] sm:$0xff] %v12956_v5 }
 0x2fa   :  { %9208 = vmatpush1.bf16.msra.mxu0 %v16853_v40  ;;  %v15447_v40 = vand.u32 4294901760, %v12938_v53 }
 0x2fb   :  { %9210 = vmatprep.subr.bf16.mxu0 %v16854_v23  ;;  %v15446_v23 = vand.u32 4294901760, %v12940_v9 }
 0x2fe   :  { %9212 = vmatpush1.bf16.msra.mxu0 %v16855_v50  ;;  %v12960_v50 = vld [vmem:[#allocation5 + $0x2a0] sm:$0xff] }
 0x2ff   :  { %9214 = vmatprep.subr.bf16.mxu0 %v16856_v54  ;;  %v12962_v54 = vld [vmem:[#allocation5 + $0x2b0] sm:$0xff] }
 0x302   :  { %9216 = vmatpush1.bf16.msra.mxu0 %v16857_v0  ;;  %v12964_v0 = vld [vmem:[#allocation5 + $0x2c8] sm:$0xff] }
 0x303   :  { %9218 = vmatprep.subr.bf16.mxu0 %v16858_v60  ;;  %v12966_v60 = vld [vmem:[#allocation5 + $0x2d8] sm:$0xff] }
 0x306   :  { %9220 = vmatpush1.bf16.msra.mxu0 %v16859_v29  ;;  %v12973_v29 = vpack.c.bf16 %v15443_v57, %v15444_v18  ;;  %v12988_v57 = vld [vmem:[#allocation5 + $0x2d0] sm:$0xff]  ;;  %v12990_v18 = vld [vmem:[#allocation5 + $0x2e8] sm:$0xff] }
 0x307   :  { %9222 = vmatprep.subr.bf16.mxu0 %v16860_v20  ;;  %v15454_v20 = vand.u32 4294901760, %v12960_v50  ;;  %v15463_v56 = vand.u32 4294901760, %v12988_v57 }
 0x308   :  { %16875 = vst [vmem:[#allocation52_spill] sm:$0xff] %v12973_v29 }
 0x30a   :  { %9224 = vmatpush1.bf16.msra.mxu0 %v16861_v17  ;;  %v15453_v17 = vand.u32 4294901760, %v12962_v54 }
 0x30b   :  { %9226 = vmatprep.subr.bf16.mxu0 %v16862_v42  ;;  %v12982_v42 = vpack.c.bf16 %v15446_v23, %v15447_v40 }
 0x30c   :  { %v12999_v23 = vpack.c.bf16 %v15453_v17, %v15454_v20  ;;  %v13014_v17 = vld [vmem:[#allocation5 + $0x2f0] sm:$0xff]  ;;  %v13016_v20 = vld [vmem:[#allocation5 + $0x308] sm:$0xff] }
 0x30d   :  { %16876 = vst [vmem:[#allocation73_spill] sm:$0xff] %v12982_v42  ;;  %v15470_v22 = vand.u32 4294901760, %v13014_v17  ;;  %v15474_v30 = vand.u32 4294901760, %v13016_v20 }
 0x30e   :  { %9228 = vmatpush1.bf16.msra.mxu0 %v16863_v37  ;;  %v15457_v37 = vand.u32 4294901760, %v12964_v0  ;;  %16877 = vst [vmem:[#allocation72_spill] sm:$0xff] %v12999_v23 }
 0x30f   :  { %9230 = vmatprep.subr.bf16.mxu0 %v16864_v39  ;;  %v15456_v39 = vand.u32 4294901760, %v12966_v60 }
 0x312   :  { %9232 = vmatpush1.bf16.msra.mxu0 %v16866_v32  ;;  %v12986_v32 = vld [vmem:[#allocation5 + $0x2c0] sm:$0xff] }
 0x313   :  { %9234 = vmatprep.subr.bf16.mxu0 %v12851_v49  ;;  %v15464_v40 = vand.u32 4294901760, %v12986_v32  ;;  %v16950_v49 = vand.u32 4294901760, %v13016_v20 }
 0x315   :  { %4209 = vmatmul.mubr.f32.vlgmr.msra.gmra.mrb[2].mxu0 %v16836_v31  ;;  %v12910_v31 = vld [vmem:[#allocation5 + $0x270] sm:$0xff] }
 0x316   :  { %9236 = vmatpush1.bf16.msra.mxu0 %v12868_v1  ;;  %v15449_v24 = vand.u32 4294901760, %v12910_v31 }
 0x317   :  { %9238 = vmatprep.subr.bf16.mxu0 %v12877_v45  ;;  %v16944_v45 = vld [vmem:[#allocation88_spill] sm:$0xff] }
 0x318   :  { %v12947_v33 = vpack.c.bf16 %v15449_v24, %v15450_v3  ;;  %v13008_v24 = vpack.c.bf16 %v15456_v39, %v15457_v37  ;;  %v15468_v3 = vand.u32 4294901760, %v12990_v18  ;;  %v13025_v39 = vpack.c.bf16 %v15463_v56, %v15464_v40  ;;  %v13040_v56 = vld [vmem:[#allocation5 + $0x310] sm:$0xff]  ;;  %v13042_v40 = vld [vmem:[#allocation5 + $0x328] sm:$0xff] }
 0x319   :  { %v15471_v37 = vand.u32 4294901760, %v13012_v11  ;;  %v16903_v8 = vand.u32 4294901760, %v13040_v56 }
 0x31a   :  { %9240 = vmatpush1.bf16.msra.mxu0 %v12895_v38  ;;  %16873 = vst [vmem:[#allocation27_spill] sm:$0xff] %v12947_v33  ;;  %16878 = vst [vmem:[#allocation78_spill] sm:$0xff] %v13008_v24  ;;  %v13034_v26 = vpack.c.bf16 %v15467_v16, %v15468_v3  ;;  %v13054_v16 = vsub.f32 %v12829_v27, %v4219_v14  ;;  %v16885_v27 = vand.u32 4294901760, %v13018_v58 }
 0x31b   :  { %9242 = vmatprep.subr.bf16.mxu0 %v12904_v19  ;;  %16879 = vst [vmem:[#allocation76_spill] sm:$0xff] %v13025_v39  ;;  %v13061_v3 = vpack.c.bf16 %v15470_v22, %v15471_v37  ;;  %v13079_v37 = vld [vmem:[#allocation5 + $0x320] sm:$0xff]  ;;  %v16893_v22 = vand.u32 4294901760, %v12855_v62  ;;  %v13257_v19 = vld [vmem:[#allocation5 + $0x398] sm:$0xff] }
 0x31c   :  { %16880 = vst [vmem:[#allocation82_spill] sm:$0xff] %v13034_v26  ;;  %16882 = vst [vmem:[#allocation11_spill] sm:$0xff] %v13054_v16  ;;  %v13075_v21 = vpack.c.bf16 %v16885_v27, %v15474_v30  ;;  %v16891_v27 = vand.u32 4294901760, %v12841_v4 }
 0x31d   :  { %16883 = vst [vmem:[#allocation96_spill] sm:$0xff] %v13061_v3  ;;  %v13101_v14 = vsub.f32 %v12855_v62, %v16893_v22  ;;  %v16900_v62 = vand.u32 4294901760, %v12881_v43 }
 0x31e   :  { %9244 = vmatpush1.bf16.msra.mxu0 %v12921_v52  ;;  %16886 = vst [vmem:[#allocation168_spill] sm:$0xff] %v13075_v21  ;;  %v13096_v30 = vsub.f32 %v12841_v4, %v16891_v27  ;;  %v16899_v4 = vand.u32 4294901760, %v12861_v25  ;;  %v13255_v52 = vld [vmem:[#allocation5 + $0x388] sm:$0xff] }
 0x31f   :  { %9246 = vmatprep.subr.bf16.mxu0 %v12930_v47  ;;  %16894 = vst [vmem:[#allocation174_spill] sm:$0xff] %v13101_v14  ;;  %v13125_v22 = vsub.f32 %v12881_v43, %v16900_v62  ;;  %v16905_v43 = vand.u32 4294901760, %v12885_v7  ;;  %v16925_v47 = vand.u32 4294901760, %v12962_v54 }
 0x320   :  { %16892 = vst [vmem:[#allocation173_spill] sm:$0xff] %v13096_v30  ;;  %v13120_v27 = vsub.f32 %v12861_v25, %v16899_v4  ;;  %v13155_v25 = vld [vmem:[#allocation5 + $0x340] sm:$0xff]  ;;  %v13157_v4 = vld [vmem:[#allocation5 + $0x350] sm:$0xff] }
 0x321   :  { %v13144_v62 = vsub.f32 %v12885_v7, %v16905_v43  ;;  %v16910_v43 = vand.u32 4294901760, %v12908_v63 }
 0x322   :  { %9248 = vmatpush1.bf16.msra.mxu0 %v12947_v33  ;;  %v16917_v33 = vand.u32 4294901760, %v12940_v9 }
 0x323   :  { %9250 = vmatprep.subr.bf16.mxu0 %v12956_v5  ;;  %v13181_v5 = vld [vmem:[#allocation5 + $0x378] sm:$0xff] }
 0x326   :  { %9252 = vmatpush1.bf16.msra.mxu0 %v12973_v29  ;;  %v13179_v29 = vld [vmem:[#allocation5 + $0x368] sm:$0xff] }
 0x327   :  { %9254 = vmatprep.subr.bf16.mxu0 %v12982_v42  ;;  %v16909_v42 = vand.u32 4294901760, %v12887_v51 }
 0x329   :  { %v13162_v7 = vsub.f32 %v12887_v51, %v16909_v42  ;;  %v16913_v51 = vand.u32 4294901760, %v12914_v13 }
 0x32a   :  { %9256 = vmatpush1.bf16.msra.mxu0 %v12999_v23  ;;  %v16901_v23 = vand.u32 4294901760, %v12883_v61 }
 0x32b   :  { %9258 = vmatprep.subr.bf16.mxu0 %v13008_v24  ;;  %v13105_v24 = vld [vmem:[#allocation5 + $0x358] sm:$0xff]  ;;  %v13186_v42 = vsub.f32 %v12914_v13, %v16913_v51  ;;  %v13206_v13 = vsub.f32 %v12940_v9, %v16917_v33  ;;  %v16919_v51 = vand.u32 4294901760, %v13081_v55 }
 0x32c   :  { %v13130_v36 = vsub.f32 %v12883_v61, %v16901_v23  ;;  %v16906_v61 = vand.u32 4294901760, %v13042_v40  ;;  %v16907_v23 = vand.u32 4294901760, %v13044_v48  ;;  %v16923_v33 = vand.u32 4294901760, %v13105_v24 }
 0x32e   :  { %9260 = vmatpush1.bf16.msra.mxu0 %v13025_v39  ;;  %v13103_v39 = vld [vmem:[#allocation5 + $0x348] sm:$0xff] }
 0x32f   :  { %9262 = vmatprep.subr.bf16.mxu0 %v13034_v26  ;;  %v13091_v26 = vsub.f32 %v12839_v44, %v16889_v34  ;;  %v16897_v44 = vand.u32 4294901760, %v12859_v28  ;;  %v16922_v9 = vand.u32 4294901760, %v13103_v39 }
 0x331   :  { %16890 = vst [vmem:[#allocation171_spill] sm:$0xff] %v13091_v26  ;;  %v13115_v34 = vsub.f32 %v12859_v28, %v16897_v44  ;;  %v16902_v28 = vand.u32 4294901760, %v13038_v6 }
 0x332   :  { %9264 = vmatpush1.bf16.msra.mxu0 %v13061_v3  ;;  %v13151_v3 = vpack.c.bf16 %v16907_v23, %v16906_v61  ;;  %v16911_v61 = vand.u32 4294901760, %v12910_v31 }
 0x333   :  { %16898 = vst [vmem:[#allocation177_spill] sm:$0xff] %v13115_v34  ;;  %v13137_v44 = vpack.c.bf16 %v16903_v8, %v16902_v28  ;;  %9266 = vmatprep.subr.bf16.mxu0 %v13075_v21  ;;  %v13167_v21 = vsub.f32 %v12908_v63, %v16910_v43  ;;  %v16912_v8 = vand.u32 4294901760, %v12912_v12  ;;  %v16914_v63 = vand.u32 4294901760, %v12934_v15 }
 0x334   :  { %16908 = vst [vmem:[#allocation180_spill] sm:$0xff] %v13151_v3  ;;  %v13172_v23 = vsub.f32 %v12910_v31, %v16911_v61  ;;  %v16915_v31 = vand.u32 4294901760, %v12936_v46 }
 0x335   :  { %16904 = vst [vmem:[#allocation179_spill] sm:$0xff] %v13137_v44  ;;  %v13177_v28 = vsub.f32 %v12912_v12, %v16912_v8  ;;  %v13191_v43 = vsub.f32 %v12934_v15, %v16914_v63  ;;  %v16916_v12 = vand.u32 4294901760, %v12938_v53  ;;  %v16918_v15 = vand.u32 4294901760, %v13079_v37 }
 0x336   :  { %v13196_v61 = vsub.f32 %v12936_v46, %v16915_v31  ;;  %9268 = vmatpush1.bf16.msra.mxu0 %v13137_v44  ;;  %v13227_v44 = vpack.c.bf16 %v16923_v33, %v16922_v9  ;;  %v13231_v46 = vld [vmem:[#allocation5 + $0x360] sm:$0xff]  ;;  %v13233_v31 = vld [vmem:[#allocation5 + $0x370] sm:$0xff]  ;;  %v16929_v9 = vand.u32 4294901760, %v12966_v60 }
 0x337   :  { %v13201_v8 = vsub.f32 %v12938_v53, %v16916_v12  ;;  %v13213_v63 = vpack.c.bf16 %v16919_v51, %v16918_v15  ;;  %v16921_v53 = vand.u32 4294901760, %v12960_v50  ;;  %9270 = vmatprep.subr.bf16.mxu0 %v13151_v3  ;;  %v16931_v51 = vand.u32 4294901760, %v12986_v32 }
 0x338   :  { %16924 = vst [vmem:[#allocation182_spill] sm:$0xff] %v13227_v44  ;;  %v13248_v33 = vsub.f32 %v12966_v60, %v16929_v9  ;;  %v16937_v60 = vand.u32 4294901760, %v12992_v2 }
 0x339   :  { %16920 = vst [vmem:[#allocation111_spill] sm:$0xff] %v13213_v63  ;;  %v13220_v12 = vsub.f32 %v12960_v50, %v16921_v53  ;;  %v13238_v50 = vsub.f32 %v12962_v54, %v16925_v47  ;;  %v16927_v53 = vand.u32 4294901760, %v12964_v0  ;;  %v13253_v15 = vsub.f32 %v12986_v32, %v16931_v51 }
 0x33a   :  { %16930 = vst [vmem:[#allocation115_spill] sm:$0xff] %v13248_v33  ;;  %v16933_v47 = vand.u32 4294901760, %v12988_v57  ;;  %v13272_v9 = vsub.f32 %v12992_v2, %v16937_v60  ;;  %v16939_v32 = vand.u32 4294901760, %v13012_v11  ;;  %9272 = vmatpush1.bf16.msra.mxu0 %v13213_v63  ;;  %v209_v2 = vsub.s32 2, %v16944_v45 }
 0x33b   :  { %16926 = vst [vmem:[#allocation114_spill] sm:$0xff] %v13238_v50  ;;  %v13243_v3 = vsub.f32 %v12964_v0, %v16927_v53  ;;  %16932 = vst [vmem:[#allocation184_spill] sm:$0xff] %v13253_v15  ;;  %v16935_v0 = vand.u32 4294901760, %v12990_v18  ;;  %9274 = vmatprep.subr.bf16.mxu0 %v13227_v44  ;;  %v16945_v60 = vand.u32 4294901760, %v13179_v29  ;;  %v213_v63 = vsub.s32 3, %v16944_v45 }
 0x33c   :  { %v13262_v54 = vsub.f32 %v12988_v57, %v16933_v47  ;;  %16938 = vst [vmem:[#allocation85_spill] sm:$0xff] %v13272_v9  ;;  %v13277_v51 = vsub.f32 %v13012_v11, %v16939_v32  ;;  %v16941_v57 = vand.u32 4294901760, %v13155_v25  ;;  %v16942_v47 = vand.u32 4294901760, %v13157_v4  ;;  %v13325_v9 = vld [vmem:[#allocation5 + $0x3b8] sm:$0xff] }
 0x33d   :  { %16928 = vst [vmem:[#allocation101_spill] sm:$0xff] %v13243_v3  ;;  %v13267_v53 = vsub.f32 %v12990_v18, %v16935_v0  ;;  %v16946_v11 = vand.u32 4294901760, %v13181_v5  ;;  %v13301_v18 = vld [vmem:[#allocation5 + $0x390] sm:$0xff]  ;;  %v16948_v0 = vand.u32 4294901760, %v13014_v17 }
 0x33e   :  { %16934 = vst [vmem:[#allocation186_spill] sm:$0xff] %v13262_v54  ;;  %16940 = vst [vmem:[#allocation12_spill] sm:$0xff] %v13277_v51  ;;  %v13284_v38 = vpack.c.bf16 %v16942_v47, %v16941_v57  ;;  %v13299_v47 = vld [vmem:[#allocation5 + $0x380] sm:$0xff]  ;;  %v16954_v57 = vand.u32 4294901760, %v13038_v6  ;;  %v13323_v51 = vld [vmem:[#allocation5 + $0x3a8] sm:$0xff] }
 0x33f   :  { %16936 = vst [vmem:[#allocation118_spill] sm:$0xff] %v13267_v53  ;;  %v13294_v32 = vpack.c.bf16 %v16946_v11, %v16945_v60  ;;  %v13306_v44 = vsub.f32 %v13014_v17, %v16948_v0  ;;  %v13311_v60 = vsub.f32 %v13016_v20, %v16950_v49  ;;  %v16952_v11 = vand.u32 4294901760, %v13018_v58  ;;  %v13327_v17 = vld [vmem:[#allocation5 + $0x3a0] sm:$0xff] }
 0x340   :  { %16943 = vst [vmem:[#allocation192_spill] sm:$0xff] %v13284_v38  ;;  %v13321_v45 = vsub.f32 %v13038_v6, %v16954_v57  ;;  %v16956_v0 = vand.u32 4294901760, %v13040_v56  ;;  %v16958_v20 = vand.u32 4294901760, %v13042_v40  ;;  %v16962_v57 = vand.u32 4294901760, %v13079_v37  ;;  %9276 = vmatpush1.bf16.msra.mxu0 %v13284_v38 }
 0x341   :  { %16947 = vst [vmem:[#allocation193_spill] sm:$0xff] %v13294_v32  ;;  %16949 = vst [vmem:[#allocation194_spill] sm:$0xff] %v13306_v44  ;;  %v13316_v1 = vsub.f32 %v13018_v58, %v16952_v11  ;;  %v16960_v11 = vand.u32 4294901760, %v13044_v48  ;;  %9278 = vmatprep.subr.bf16.mxu0 %v13294_v32  ;;  %v16985_v32 = vand.u32 4294901760, %v13325_v9 }
 0x342   :  { %16951 = vst [vmem:[#allocation195_spill] sm:$0xff] %v13311_v60  ;;  %16955 = vst [vmem:[#allocation15_spill] sm:$0xff] %v13321_v45  ;;  %v13332_v49 = vsub.f32 %v13040_v56, %v16956_v0  ;;  %v13337_v58 = vsub.f32 %v13042_v40, %v16958_v20  ;;  %v13347_v45 = vsub.f32 %v13079_v37, %v16962_v57  ;;  %v13351_v60 = vld [vmem:[#allocation5 + $0x3c8] sm:$0xff]  ;;  %v13353_v56 = vld [vmem:[#allocation5 + $0x3d8] sm:$0xff]  ;;  %v16966_v40 = vand.u32 4294901760, %v13231_v46 }
 0x343   :  { %16953 = vst [vmem:[#allocation14_spill] sm:$0xff] %v13316_v1  ;;  %v13342_v6 = vsub.f32 %v13044_v48, %v16960_v11  ;;  %v13349_v1 = vld [vmem:[#allocation5 + $0x3b0] sm:$0xff]  ;;  %16965 = vst [vmem:[#allocation25_spill] sm:$0xff] %v13353_v56  ;;  %v16967_v0 = vand.u32 4294901760, %v13233_v31  ;;  %v10033_v48 = vld [vmem:[%s14906_s2] sm:$0xf] }
 0x344   :  { %16957 = vst [vmem:[#allocation17_spill] sm:$0xff] %v13332_v49  ;;  %16959 = vst [vmem:[#allocation24_spill] sm:$0xff] %v13337_v58  ;;  %v210_v37 = vrot.slane %v10033_v48, %v209_v2  ;;  %v214_v38 = vrot.slane %v10033_v48, %v213_v63  ;;  %v16971_v58 = vand.u32 4294901760, %v13255_v52  ;;  %v16974_v63 = vand.u32 4294901760, %v13081_v55 }
 0x345   :  { %16961 = vst [vmem:[#allocation197_spill] sm:$0xff] %v13342_v6  ;;  %16963 = vst [vmem:[#allocation198_spill] sm:$0xff] %v13347_v45  ;;  %v13360_v20 = vpack.c.bf16 %v16967_v0, %v16966_v40  ;;  %v13367_v45 = vld [vmem:[#allocation5 + $0x3c0] sm:$0xff]  ;;  %v13369_v6 = vld [vmem:[#allocation5 + $0x3d0] sm:$0xff]  ;;  %v16972_v40 = vand.u32 4294901760, %v13257_v19  ;;  %v16977_v57 = vand.u32 4294901760, %v13105_v24 }
 0x346   :  { %16964 = vst [vmem:[#allocation31_spill] sm:$0xff] %v13349_v1  ;;  %16969 = vst [vmem:[#allocation30_spill] sm:$0xff] %v13367_v45  ;;  %v13387_v48 = vsub.f32 %v13081_v55, %v16974_v63  ;;  %v2782_v53 = vpop.f32.mrb[2].mxu1  ;;  %v16979_v55 = vand.u32 4294901760, %v13299_v47  ;;  %v16980_v63 = vand.u32 4294901760, %v13301_v18  ;;  %v16982_v11 = vand.u32 4294901760, %v13155_v25 }
 0x347   :  { %16968 = vst [vmem:[#allocation35_spill] sm:$0xff] %v13360_v20  ;;  %16970 = vst [vmem:[#allocation36_spill] sm:$0xff] %v13369_v6  ;;  %v13376_v0 = vpack.c.bf16 %v16972_v40, %v16971_v58  ;;  %v16976_v58 = vand.u32 4294901760, %v13103_v39  ;;  %v13399_v44 = vsub.f32 %v13105_v24, %v16977_v57  ;;  %9280 = vmatpush1.bf16.msra.mxu0 %v13360_v20  ;;  %v2784_v57 = vpop.f32.mrb[3].mxu1  ;;  %v16984_v20 = vand.u32 4294901760, %v13323_v51 }
 0x348   :  { %16975 = vst [vmem:[#allocation39_spill] sm:$0xff] %v13387_v48  ;;  %v13406_v49 = vpack.c.bf16 %v16980_v63, %v16979_v55  ;;  %v13413_v2 = vsub.f32 %v13155_v25, %v16982_v11  ;;  %v9957_v24 = vadd.f32 %v2782_v53, %v210_v37  ;;  %v13422_v55 = vld [vmem:[#allocation5 + $0x3e8] sm:$0xff]  ;;  %v16988_v25 = vand.u32 4294901760, %v13349_v1 }
 0x349   :  { %16973 = vst [vmem:[#allocation33_spill] sm:$0xff] %v13376_v0  ;;  %v13392_v40 = vsub.f32 %v13103_v39, %v16976_v58  ;;  %16978 = vst [vmem:[#allocation38_spill] sm:$0xff] %v13399_v44  ;;  %9282 = vmatprep.subr.bf16.mxu0 %v13376_v0  ;;  %v13420_v44 = vpack.c.bf16 %v16985_v32, %v16984_v20  ;;  %v9958_v58 = vadd.f32 %v2784_v57, %v214_v38  ;;  %v13439_v32 = vld [vmem:[#allocation5 + $0x3e0] sm:$0xff] }
 0x34a   :  { %16981 = vst [vmem:[#allocation42_spill] sm:$0xff] %v13406_v49  ;;  %16983 = vst [vmem:[#allocation41_spill] sm:$0xff] %v13413_v2  ;;  %v16987_v39 = vand.u32 4294901760, %v13327_v17  ;;  %v16990_v53 = vand.u32 4294901760, %v13351_v60  ;;  %v16991_v37 = vand.u32 4294901760, %v13353_v56  ;;  %v13437_v2 = vld [vmem:[#allocation5 + $0x3f8] sm:$0xff] }
 0x34b   :  { %16986 = vst [vmem:[#allocation46_spill] sm:$0xff] %v13420_v44  ;;  %16993 = vst [vmem:[#allocation116_spill] sm:$0xff] %v13437_v2  ;;  %v2789_v63 = vmax.f32 %v9957_v24, 0.0  ;;  %v16994_v38 = vand.u32 4294901760, %v13367_v45  ;;  %v16995_v57 = vand.u32 4294901760, %v13369_v6  ;;  %9284 = vmatpush1.bf16.msra.mxu0 %v13406_v49  ;;  %v16997_v20 = vand.u32 4294901760, %v13049_v35 }
 0x34c   :  { %v13429_v11 = vpack.c.bf16 %v16988_v25, %v16987_v39  ;;  %v13435_v0 = vpack.c.bf16 %v16991_v37, %v16990_v53  ;;  %v13448_v39 = vld [vmem:[#allocation5 + $0x3f0] sm:$0xff]  ;;  %v2790_v37 = vmax.f32 %v9958_v58, 0.0  ;;  %v16998_v45 = vand.u32 4294901760, %v13054_v16  ;;  %9286 = vmatprep.subr.bf16.mxu0 %v13420_v44 }
 0x34d   :  { %v13446_v1 = vpack.c.bf16 %v16995_v57, %v16994_v38  ;;  %v4363_v24 = vsub.f32 %v13049_v35, %v16997_v20  ;;  %v13460_v57 = vand.u32 4294901760, %v2789_v63  ;;  %v17000_v53 = vand.u32 4294901760, %v13068_v59 }
 0x34e   :  { %16989 = vst [vmem:[#allocation44_spill] sm:$0xff] %v13429_v11  ;;  %16992 = vst [vmem:[#allocation136_spill] sm:$0xff] %v13435_v0  ;;  %v4375_v38 = vsub.f32 %v13054_v16, %v16998_v45  ;;  %v13468_v49 = vand.u32 4294901760, %v2790_v37  ;;  %v17002_v35 = vand.u32 4294901760, %v13086_v41  ;;  %v17004_v25 = vand.u32 4294901760, %v13091_v26 }
 0x34f   :  { %16996 = vst [vmem:[#allocation48_spill] sm:$0xff] %v13446_v1  ;;  %16999 = vst [vmem:[#allocation50_spill] sm:$0xff] %v13460_v57  ;;  %v4369_v56 = vsub.f32 %v13068_v59, %v17000_v53  ;;  %v13476_v44 = vsub.f32 %v2789_v63, %v13460_v57  ;;  %v17005_v6 = vand.u32 4294901760, %v13096_v30  ;;  %9288 = vmatpush1.bf16.msra.mxu0 %v13429_v11 }
 0x350   :  { %17001 = vst [vmem:[#allocation55_spill] sm:$0xff] %v13468_v49  ;;  %v4381_v45 = vsub.f32 %v13086_v41, %v17002_v35  ;;  %v4387_v58 = vsub.f32 %v13091_v26, %v17004_v25  ;;  %v13486_v20 = vsub.f32 %v2790_v37, %v13468_v49  ;;  %v4364_v35 = vand.u32 4294901760, %v4363_v24  ;;  %9290 = vmatprep.subr.bf16.mxu0 %v13435_v0 }
 0x351   :  { %17003 = vst [vmem:[#allocation53_spill] sm:$0xff] %v13476_v44  ;;  %v4399_v53 = vsub.f32 %v13096_v30, %v17005_v6  ;;  %v4376_v16 = vand.u32 4294901760, %v4375_v38  ;;  %v17006_v25 = vand.u32 4294901760, %v13422_v55  ;;  %v17007_v26 = vand.u32 4294901760, %v13437_v2 }
 0x352   :  { %v4370_v59 = vand.u32 4294901760, %v4369_v56  ;;  %v15582_v37 = vand.u32 4294901760, %v13120_v27  ;;  %v15571_v30 = vand.u32 4294901760, %v13486_v20  ;;  %v4382_v11 = vand.u32 4294901760, %v4381_v45 }
 0x353   :  { %v13496_v6 = vpack.c.bf16 %v17007_v26, %v17006_v25  ;;  %v4388_v63 = vand.u32 4294901760, %v4387_v58  ;;  %v4400_v57 = vand.u32 4294901760, %v4399_v53  ;;  %v17009_v0 = vand.u32 4294901760, %v13101_v14  ;;  %9292 = vmatpush1.bf16.msra.mxu0 %v13446_v1 }
 0x354   :  { %v17010_v2 = vand.u32 4294901760, %v13110_v10  ;;  %v17011_v56 = vand.u32 4294901760, %v13439_v32  ;;  %v17012_v45 = vand.u32 4294901760, %v13448_v39  ;;  %v4346_v58 = vsub.f32 %v13486_v20, %v15571_v30 }
 0x355   :  { %17008 = vst [vmem:[#allocation122_spill] sm:$0xff] %v13496_v6  ;;  %v4393_v41 = vsub.f32 %v13101_v14, %v17009_v0  ;;  %v9297_v53 = vpack.c.bf16 %v4376_v16, %v4364_v35  ;;  %v17014_v38 = vand.u32 4294901760, %v13115_v34  ;;  %v17015_v24 = vand.u32 4294901760, %v13476_v44  ;;  %9294 = vmatprep.subr.bf16.mxu0 %v13496_v6 }
 0x356   :  { %v4405_v26 = vsub.f32 %v13110_v10, %v17010_v2  ;;  %v13513_v25 = vpack.c.bf16 %v17012_v45, %v17011_v56  ;;  %v4423_v56 = vsub.f32 %v13120_v27, %v15582_v37  ;;  %v15584_v45 = vand.u32 4294901760, %v13144_v62 }
 0x357   :  { %v4411_v0 = vsub.f32 %v13115_v34, %v17014_v38  ;;  %v4352_v2 = vsub.f32 %v13476_v44, %v17015_v24  ;;  %v4347_v30 = vand.u32 4294901760, %v4346_v58  ;;  %v9299_v16 = vpack.c.bf16 %v4382_v11, %v4370_v59 }
 0x358   :  { %17013 = vst [vmem:[#allocation123_spill] sm:$0xff] %v13513_v25  ;;  %v17016_v35 = vand.u32 4294901760, %v13125_v22  ;;  %v17017_v34 = vand.u32 4294901760, %v13130_v36  ;;  %v9301_v44 = vpack.c.bf16 %v4400_v57, %v4388_v63  ;;  %v4394_v6 = vand.u32 4294901760, %v4393_v41  ;;  %9296 = vmatpush1.bf16.msra.mxu0 %v13513_v25 }
 0x359   :  { %v4406_v10 = vand.u32 4294901760, %v4405_v26  ;;  %v15583_v14 = vand.u32 4294901760, %v13167_v21  ;;  %4348 = vmatprep.mubr.f32.mxu0 %v4347_v30  ;;  %v4412_v37 = vand.u32 4294901760, %v4411_v0  ;;  %v15585_v58 = vand.u32 4294901760, %v13172_v23  ;;  %9298 = vmatprep.subr.bf16.mxu0 %v9297_v53 }
 0x35a   :  { %v4417_v38 = vsub.f32 %v13125_v22, %v17016_v35  ;;  %v4429_v24 = vsub.f32 %v13130_v36, %v17017_v34  ;;  %v15586_v11 = vand.u32 4294901760, %v13186_v42  ;;  %v4353_v35 = vand.u32 4294901760, %v4352_v2 }
 0x35b   :  { %v4424_v1 = vand.u32 4294901760, %v4423_v56  ;;  %v4435_v41 = vsub.f32 %v13144_v62, %v15584_v45  ;;  %v17018_v34 = vand.u32 4294901760, %v13162_v7  ;;  %v15588_v26 = vand.u32 4294901760, %v13191_v43 }
 0x35c   :  { %v4418_v63 = vand.u32 4294901760, %v4417_v38  ;;  %v4430_v30 = vand.u32 4294901760, %v4429_v24  ;;  %v15587_v0 = vand.u32 4294901760, %v13196_v61  ;;  %4354 = vmatmul.mubr.f32.vlgmr.msra.gmra.mrb[2].mxu0 %v4353_v35  ;;  %v9303_v59 = vpack.c.bf16 %v4406_v10, %v4394_v6 }
 0x35d   :  { %v4447_v57 = vsub.f32 %v13162_v7, %v17018_v34  ;;  %v4441_v53 = vsub.f32 %v13167_v21, %v15583_v14  ;;  %9300 = vmatpush1.bf16.msra.mxu0 %v9299_v16  ;;  %4745 = vmatprep.mubr.f32.mxu0 %v13468_v49  ;;  %v4453_v38 = vsub.f32 %v13172_v23, %v15585_v58  ;;  %v17019_v24 = vand.u32 4294901760, %v13177_v28 }
 0x35e   :  { %v4471_v10 = vsub.f32 %v13186_v42, %v15586_v11  ;;  %v17020_v6 = vand.u32 4294901760, %v13157_v4  ;;  %9302 = vmatprep.subr.bf16.mxu0 %v9301_v44  ;;  %v9305_v16 = vpack.c.bf16 %v4424_v1, %v4412_v37  ;;  %v4436_v14 = vand.u32 4294901760, %v4435_v41 }
 0x35f   :  { %v4459_v35 = vsub.f32 %v13177_v28, %v17019_v24  ;;  %v4448_v45 = vand.u32 4294901760, %v4447_v57  ;;  %v17022_v56 = vand.u32 4294901760, %v13179_v29  ;;  %v9307_v2 = vpack.c.bf16 %v4430_v30, %v4418_v63 }
 0x360   :  { %v13567_v34 = vsub.f32 %v13157_v4, %v17020_v6  ;;  %v4465_v24 = vsub.f32 %v13191_v43, %v15588_v26  ;;  %v4477_v11 = vsub.f32 %v13196_v61, %v15587_v0  ;;  %v17023_v4 = vand.u32 4294901760, %v13201_v8 }
 0x361   :  { %v13572_v58 = vsub.f32 %v13179_v29, %v17022_v56  ;;  %v17024_v44 = vand.u32 4294901760, %v13206_v13  ;;  %9304 = vmatpush1.bf16.msra.mxu0 %v9303_v59  ;;  %v4442_v57 = vand.u32 4294901760, %v4441_v53  ;;  %v4454_v63 = vand.u32 4294901760, %v4453_v38 }
 0x362   :  { %17021 = vst [vmem:[#allocation125_spill] sm:$0xff] %v13567_v34  ;;  %v4483_v1 = vsub.f32 %v13201_v8, %v17023_v4  ;;  %v4460_v30 = vand.u32 4294901760, %v4459_v35  ;;  %v4472_v56 = vand.u32 4294901760, %v4471_v10  ;;  %v17025_v6 = vand.u32 4294901760, %v13181_v5  ;;  %9306 = vmatprep.subr.bf16.mxu0 %v9305_v16 }
 0x363   :  { %v4495_v37 = vsub.f32 %v13206_v13, %v17024_v44  ;;  %v9309_v4 = vpack.c.bf16 %v4448_v45, %v4436_v14  ;;  %v15592_v26 = vand.u32 4294901760, %v13243_v3  ;;  %v15591_v44 = vand.u32 4294901760, %v13248_v33 }
 0x364   :  { %v13591_v0 = vsub.f32 %v13181_v5, %v17025_v6  ;;  %v4466_v49 = vand.u32 4294901760, %v4465_v24  ;;  %v4478_v29 = vand.u32 4294901760, %v4477_v11  ;;  %v4484_v53 = vand.u32 4294901760, %v4483_v1 }
 0x365   :  { %v4496_v38 = vand.u32 4294901760, %v4495_v37  ;;  %v17026_v35 = vand.u32 4294901760, %v13220_v12  ;;  %v17027_v5 = vand.u32 4294901760, %v13238_v50  ;;  %v17028_v45 = vand.u32 4294901760, %v13231_v46  ;;  %9308 = vmatpush1.bf16.msra.mxu0 %v9307_v2 }
 0x366   :  { %v17029_v11 = vand.u32 4294901760, %v13233_v31  ;;  %v9311_v1 = vpack.c.bf16 %v4454_v63, %v4442_v57  ;;  %v9313_v37 = vpack.c.bf16 %v4472_v56, %v4460_v30  ;;  %9310 = vmatprep.subr.bf16.mxu0 %v9309_v4  ;;  %v4507_v6 = vsub.f32 %v13243_v3, %v15592_v26 }
 0x367   :  { %v4489_v10 = vsub.f32 %v13220_v12, %v17026_v35  ;;  %v4501_v14 = vsub.f32 %v13238_v50, %v17027_v5  ;;  %v13606_v16 = vsub.f32 %v13231_v46, %v17028_v45  ;;  %v4519_v35 = vsub.f32 %v13248_v33, %v15591_v44  ;;  %v17030_v5 = vld [vmem:[#allocation118_spill] sm:$0xff]  ;;  %v17031_v45 = vld [vmem:[#allocation85_spill] sm:$0xff]  ;;  %v17040_v33 = vld [vmem:[#allocation195_spill] sm:$0xff] }
 0x368   :  { %v13611_v24 = vsub.f32 %v13233_v31, %v17029_v11  ;;  %v17032_v41 = vand.u32 4294901760, %v13255_v52  ;;  %v17034_v2 = vand.u32 4294901760, %v13257_v19  ;;  %v17036_v63 = vand.u32 4294901760, %v13253_v15  ;;  %v17039_v46 = vld [vmem:[#allocation194_spill] sm:$0xff] }
 0x369   :  { %v17037_v56 = vand.u32 4294901760, %v13262_v54  ;;  %v9315_v11 = vpack.c.bf16 %v4478_v29, %v4466_v49  ;;  %v9317_v44 = vpack.c.bf16 %v4496_v38, %v4484_v53  ;;  %v4490_v26 = vand.u32 4294901760, %v4489_v10  ;;  %9312 = vmatpush1.bf16.msra.mxu0 %v9311_v1  ;;  %v17044_v10 = vld [vmem:[#allocation15_spill] sm:$0xff]  ;;  %v17045_v1 = vld [vmem:[#allocation17_spill] sm:$0xff] }
 0x36a   :  { %v13624_v31 = vsub.f32 %v13255_v52, %v17032_v41  ;;  %v13629_v57 = vsub.f32 %v13257_v19, %v17034_v2  ;;  %v4513_v30 = vsub.f32 %v13253_v15, %v17036_v63  ;;  %v4502_v59 = vand.u32 4294901760, %v4501_v14  ;;  %v17038_v52 = vld [vmem:[#allocation12_spill] sm:$0xff]  ;;  %v17041_v2 = vld [vmem:[#allocation14_spill] sm:$0xff]  ;;  %9314 = vmatprep.subr.bf16.mxu0 %v9313_v37  ;;  %v17048_v41 = vld [vmem:[#allocation197_spill] sm:$0xff] }
 0x36b   :  { %v4525_v4 = vsub.f32 %v13262_v54, %v17037_v56  ;;  %v4508_v50 = vand.u32 4294901760, %v4507_v6  ;;  %v4520_v63 = vand.u32 4294901760, %v4519_v35  ;;  %v17042_v15 = vand.u32 4294901760, %v17030_v5  ;;  %v17047_v35 = vld [vmem:[#allocation24_spill] sm:$0xff] }
 0x36c   :  { %17033 = vst [vmem:[#allocation126_spill] sm:$0xff] %v13624_v31  ;;  %17035 = vst [vmem:[#allocation58_spill] sm:$0xff] %v13629_v57  ;;  %v17043_v49 = vand.u32 4294901760, %v17031_v45  ;;  %v4514_v53 = vand.u32 4294901760, %v4513_v30  ;;  %v17046_v19 = vand.u32 4294901760, %v13299_v47  ;;  %v9319_v6 = vpack.c.bf16 %v4502_v59, %v4490_v26 }
 0x36d   :  { %v4531_v56 = vsub.f32 %v17030_v5, %v17042_v15  ;;  %v4526_v38 = vand.u32 4294901760, %v4525_v4  ;;  %9316 = vmatpush1.bf16.msra.mxu0 %v9315_v11  ;;  %v17049_v5 = vand.u32 4294901760, %v17038_v52  ;;  %v17050_v4 = vand.u32 4294901760, %v17039_v46 }
 0x36e   :  { %v4543_v29 = vsub.f32 %v17031_v45, %v17043_v49  ;;  %v13652_v37 = vsub.f32 %v13299_v47, %v17046_v19  ;;  %v17051_v25 = vand.u32 4294901760, %v17040_v33  ;;  %v17052_v47 = vand.u32 4294901760, %v17041_v2  ;;  %9318 = vmatprep.subr.bf16.mxu0 %v9317_v44 }
 0x36f   :  { %v4537_v30 = vsub.f32 %v17038_v52, %v17049_v5  ;;  %v4549_v49 = vsub.f32 %v17039_v46, %v17050_v4  ;;  %v17053_v59 = vand.u32 4294901760, %v13301_v18  ;;  %v9321_v19 = vpack.c.bf16 %v4520_v63, %v4508_v50 }
 0x370   :  { %v4555_v14 = vsub.f32 %v17040_v33, %v17051_v25  ;;  %v4567_v26 = vsub.f32 %v17041_v2, %v17052_v47  ;;  %v4532_v5 = vand.u32 4294901760, %v4531_v56  ;;  %v4544_v15 = vand.u32 4294901760, %v4543_v29  ;;  %v17060_v56 = vld [vmem:[#allocation198_spill] sm:$0xff] }
 0x371   :  { %v13671_v11 = vsub.f32 %v13301_v18, %v17053_v59  ;;  %v17054_v3 = vand.u32 4294901760, %v13323_v51  ;;  %v9323_v46 = vpack.c.bf16 %v4526_v38, %v4514_v53  ;;  %v17056_v25 = vand.u32 4294901760, %v17044_v10  ;;  %9320 = vmatpush1.bf16.msra.mxu0 %v9319_v6 }
 0x372   :  { %v17057_v47 = vand.u32 4294901760, %v17045_v1  ;;  %v17058_v18 = vand.u32 4294901760, %v17047_v35  ;;  %v17059_v44 = vand.u32 4294901760, %v17048_v41  ;;  %v4538_v29 = vand.u32 4294901760, %v4537_v30  ;;  %9322 = vmatprep.subr.bf16.mxu0 %v9321_v19 }
 0x373   :  { %v13676_v4 = vsub.f32 %v13323_v51, %v17054_v3  ;;  %v4561_v33 = vsub.f32 %v17044_v10, %v17056_v25  ;;  %v4550_v53 = vand.u32 4294901760, %v4549_v49  ;;  %v4556_v38 = vand.u32 4294901760, %v4555_v14  ;;  %v17063_v10 = vld [vmem:[#allocation41_spill] sm:$0xff] }
 0x374   :  { %v4573_v2 = vsub.f32 %v17045_v1, %v17057_v47  ;;  %v4579_v50 = vsub.f32 %v17047_v35, %v17058_v18  ;;  %v4591_v63 = vsub.f32 %v17048_v41, %v17059_v44  ;;  %v4568_v59 = vand.u32 4294901760, %v4567_v26  ;;  %v17062_v1 = vld [vmem:[#allocation38_spill] sm:$0xff] }
 0x375   :  { %17055 = vst [vmem:[#allocation56_spill] sm:$0xff] %v13676_v4  ;;  %v17061_v25 = vand.u32 4294901760, %v13325_v9  ;;  %v9325_v18 = vpack.c.bf16 %v4544_v15, %v4532_v5  ;;  %v15612_v35 = vand.u32 4294901760, %v13392_v40  ;;  %v15611_v44 = vand.u32 4294901760, %v17062_v1  ;;  %9324 = vmatpush1.bf16.msra.mxu0 %v9323_v46  ;;  %v17071_v46 = vld [vmem:[#allocation25_spill] sm:$0xff] }
 0x376   :  { %v4562_v41 = vand.u32 4294901760, %v4561_v33  ;;  %v4574_v3 = vand.u32 4294901760, %v4573_v2  ;;  %v15613_v51 = vand.u32 4294901760, %v17063_v10  ;;  %v4580_v30 = vand.u32 4294901760, %v4579_v50  ;;  %v17067_v33 = vld [vmem:[#allocation31_spill] sm:$0xff] }
 0x377   :  { %v13695_v47 = vsub.f32 %v13325_v9, %v17061_v25  ;;  %v4592_v14 = vand.u32 4294901760, %v4591_v63  ;;  %v17064_v49 = vand.u32 4294901760, %v17060_v56  ;;  %v17065_v9 = vand.u32 4294901760, %v13387_v48  ;;  %9326 = vmatprep.subr.bf16.mxu0 %v9325_v18 }
 0x378   :  { %v17066_v19 = vand.u32 4294901760, %v13327_v17  ;;  %v17068_v2 = vand.u32 4294901760, %v17067_v33  ;;  %v9327_v50 = vpack.c.bf16 %v4550_v53, %v4538_v29  ;;  %v9329_v63 = vpack.c.bf16 %v4568_v59, %v4556_v38 }
 0x379   :  { %v4585_v26 = vsub.f32 %v17060_v56, %v17064_v49  ;;  %v4597_v15 = vsub.f32 %v13387_v48, %v17065_v9  ;;  %v4603_v49 = vsub.f32 %v13392_v40, %v15612_v35  ;;  %v4615_v9 = vsub.f32 %v17062_v1, %v15611_v44 }
 0x37a   :  { %v13710_v5 = vsub.f32 %v13327_v17, %v17066_v19  ;;  %v13715_v25 = vsub.f32 %v17067_v33, %v17068_v2  ;;  %v17070_v6 = vand.u32 4294901760, %v13351_v60  ;;  %v17072_v29 = vand.u32 4294901760, %v17071_v46  ;;  %9328 = vmatpush1.bf16.msra.mxu0 %v9327_v50  ;;  %v17076_v50 = vld [vmem:[#allocation30_spill] sm:$0xff] }
 0x37b   :  { %v4609_v38 = vsub.f32 %v17063_v10, %v15613_v51  ;;  %v17073_v59 = vand.u32 4294901760, %v13567_v34  ;;  %v9331_v2 = vpack.c.bf16 %v4574_v3, %v4562_v41  ;;  %v9333_v44 = vpack.c.bf16 %v4592_v14, %v4580_v30  ;;  %9330 = vmatprep.subr.bf16.mxu0 %v9329_v63 }
 0x37c   :  { %17069 = vst [vmem:[#allocation60_spill] sm:$0xff] %v13715_v25  ;;  %v13728_v33 = vsub.f32 %v13351_v60, %v17070_v6  ;;  %v13733_v53 = vsub.f32 %v17071_v46, %v17072_v29  ;;  %v4586_v35 = vand.u32 4294901760, %v4585_v26  ;;  %v4598_v19 = vand.u32 4294901760, %v4597_v15 }
 0x37d   :  { %v4621_v18 = vsub.f32 %v13567_v34, %v17073_v59  ;;  %v15615_v60 = vand.u32 4294901760, %v13606_v16  ;;  %v15616_v6 = vand.u32 4294901760, %v13611_v24  ;;  %v15619_v29 = vand.u32 4294901760, %v13629_v57 }
 0x37e   :  { %v4604_v17 = vand.u32 4294901760, %v4603_v49  ;;  %v4616_v51 = vand.u32 4294901760, %v4615_v9  ;;  %v17074_v10 = vand.u32 4294901760, %v13572_v58  ;;  %v17075_v41 = vand.u32 4294901760, %v13591_v0  ;;  %9332 = vmatpush1.bf16.msra.mxu0 %v9331_v2 }
 0x37f   :  { %v4610_v30 = vand.u32 4294901760, %v4609_v38  ;;  %v4622_v14 = vand.u32 4294901760, %v4621_v18  ;;  %v17077_v46 = vand.u32 4294901760, %v17076_v50  ;;  %v9335_v49 = vpack.c.bf16 %v4598_v19, %v4586_v35  ;;  %v17080_v19 = vld [vmem:[#allocation36_spill] sm:$0xff]  ;;  %9334 = vmatprep.subr.bf16.mxu0 %v9333_v44 }
 0x380   :  { %v4627_v59 = vsub.f32 %v13572_v58, %v17074_v10  ;;  %v4639_v3 = vsub.f32 %v13591_v0, %v17075_v41  ;;  %v4633_v38 = vsub.f32 %v13606_v16, %v15615_v60  ;;  %v4645_v18 = vsub.f32 %v13611_v24, %v15616_v6 }
 0x381   :  { %v13756_v63 = vsub.f32 %v17076_v50, %v17077_v46  ;;  %v17079_v41 = vand.u32 4294901760, %v13624_v31  ;;  %v4663_v35 = vsub.f32 %v13629_v57, %v15619_v29  ;;  %v17081_v46 = vand.u32 4294901760, %v17080_v19 }
 0x382   :  { %v9337_v50 = vpack.c.bf16 %v4616_v51, %v4604_v17  ;;  %v4628_v60 = vand.u32 4294901760, %v4627_v59  ;;  %v4640_v10 = vand.u32 4294901760, %v4639_v3  ;;  %v17083_v9 = vand.u32 4294901760, %v13422_v55  ;;  %9336 = vmatpush1.bf16.msra.mxu0 %v9335_v49 }
 0x383   :  { %17078 = vst [vmem:[#allocation59_spill] sm:$0xff] %v13756_v63  ;;  %v4651_v15 = vsub.f32 %v13624_v31, %v17079_v41  ;;  %v13775_v2 = vsub.f32 %v17080_v19, %v17081_v46  ;;  %v9339_v26 = vpack.c.bf16 %v4622_v14, %v4610_v30  ;;  %v17085_v41 = vand.u32 4294901760, %v13652_v37  ;;  %v17089_v46 = vld [vmem:[#allocation116_spill] sm:$0xff] }
 0x384   :  { %v13780_v6 = vsub.f32 %v13422_v55, %v17083_v9  ;;  %v17086_v29 = vand.u32 4294901760, %v13671_v11  ;;  %v17087_v19 = vand.u32 4294901760, %v13676_v4  ;;  %v17088_v44 = vand.u32 4294901760, %v13695_v47  ;;  %9338 = vmatprep.subr.bf16.mxu0 %v9337_v50 }
 0x385   :  { %17082 = vst [vmem:[#allocation89_spill] sm:$0xff] %v13775_v2  ;;  %v4657_v31 = vsub.f32 %v13652_v37, %v17085_v41  ;;  %v4634_v3 = vand.u32 4294901760, %v4633_v38  ;;  %v4646_v30 = vand.u32 4294901760, %v4645_v18  ;;  %v4652_v14 = vand.u32 4294901760, %v4651_v15 }
 0x386   :  { %17084 = vst [vmem:[#allocation128_spill] sm:$0xff] %v13780_v6  ;;  %v4669_v57 = vsub.f32 %v13671_v11, %v17086_v29  ;;  %v4675_v51 = vsub.f32 %v13676_v4, %v17087_v19  ;;  %v4687_v17 = vsub.f32 %v13695_v47, %v17088_v44  ;;  %v4664_v9 = vand.u32 4294901760, %v4663_v35  ;;  %9340 = vmatpush1.bf16.msra.mxu0 %v9339_v26 }
 0x387   :  { %v17090_v41 = vand.u32 4294901760, %v17089_v46  ;;  %v9341_v19 = vpack.c.bf16 %v4640_v10, %v4628_v60  ;;  %v15624_v4 = vand.u32 4294901760, %v13728_v33  ;;  %v17092_v55 = vand.u32 4294901760, %v13439_v32 }
 0x388   :  { %v17094_v49 = vand.u32 4294901760, %v13448_v39  ;;  %v4658_v38 = vand.u32 4294901760, %v4657_v31  ;;  %v4670_v18 = vand.u32 4294901760, %v4669_v57  ;;  %v4676_v35 = vand.u32 4294901760, %v4675_v51 }
 0x389   :  { %v13799_v29 = vsub.f32 %v17089_v46, %v17090_v41  ;;  %v13806_v59 = vsub.f32 %v13439_v32, %v17092_v55  ;;  %v4688_v46 = vand.u32 4294901760, %v4687_v17  ;;  %v17096_v60 = vand.u32 4294901760, %v13710_v5  ;;  %9342 = vmatprep.subr.bf16.mxu0 %v9341_v19 }
 0x38a   :  { %v13811_v15 = vsub.f32 %v13448_v39, %v17094_v49  ;;  %v17097_v50 = vand.u32 4294901760, %v13715_v25  ;;  %v9343_v32 = vpack.c.bf16 %v4646_v30, %v4634_v3  ;;  %v9345_v55 = vpack.c.bf16 %v4664_v9, %v4652_v14 }
 0x38b   :  { %17091 = vst [vmem:[#allocation129_spill] sm:$0xff] %v13799_v29  ;;  %17093 = vst [vmem:[#allocation131_spill] sm:$0xff] %v13806_v59  ;;  %v4681_v10 = vsub.f32 %v13710_v5, %v17096_v60  ;;  %v15629_v44 = vand.u32 4294901760, %v13756_v63  ;;  %v15626_v39 = vand.u32 4294901760, %v13775_v2  ;;  %v4699_v31 = vsub.f32 %v13728_v33, %v15624_v4 }
 0x38c   :  { %17095 = vst [vmem:[#allocation67_spill] sm:$0xff] %v13811_v15  ;;  %v4693_v41 = vsub.f32 %v13715_v25, %v17097_v50  ;;  %v17098_v57 = vand.u32 4294901760, %v13733_v53  ;;  %v15625_v17 = vand.u32 4294901760, %v13780_v6  ;;  %v15627_v49 = vand.u32 4294901760, %v13799_v29  ;;  %9344 = vmatpush1.bf16.msra.mxu0 %v9343_v32 }
 0x38d   :  { %v9347_v26 = vpack.c.bf16 %v4670_v18, %v4658_v38  ;;  %v9349_v3 = vpack.c.bf16 %v4688_v46, %v4676_v35  ;;  %v4682_v30 = vand.u32 4294901760, %v4681_v10  ;;  %v4705_v9 = vsub.f32 %v13756_v63, %v15629_v44  ;;  %9346 = vmatprep.subr.bf16.mxu0 %v9345_v55  ;;  %v17102_v44 = vld [vmem:[#allocation170_spill] sm:$0xff] }
 0x38e   :  { %v4711_v51 = vsub.f32 %v13733_v53, %v17098_v57  ;;  %v4694_v14 = vand.u32 4294901760, %v4693_v41  ;;  %v4717_v19 = vsub.f32 %v13775_v2, %v15626_v39  ;;  %v15628_v60 = vand.u32 4294901760, %v13806_v59 }
 0x38f   :  { %v15630_v50 = vand.u32 4294901760, %v13811_v15  ;;  %v4700_v57 = vand.u32 4294901760, %v4699_v31  ;;  %v4723_v38 = vsub.f32 %v13780_v6, %v15625_v17  ;;  %v4735_v18 = vsub.f32 %v13799_v29, %v15627_v49 }
 0x390   :  { %v4712_v4 = vand.u32 4294901760, %v4711_v51  ;;  %v9351_v35 = vpack.c.bf16 %v4694_v14, %v4682_v30  ;;  %9348 = vmatpush1.bf16.msra.mxu0 %v9347_v26  ;;  %v4706_v46 = vand.u32 4294901760, %v4705_v9  ;;  %v4718_v10 = vand.u32 4294901760, %v4717_v19  ;;  %v17099_v14 = vld [vmem:[#allocation79_spill] sm:$0xff] }
 0x391   :  { %v4729_v41 = vsub.f32 %v13806_v59, %v15628_v60  ;;  %v4741_v32 = vsub.f32 %v13811_v15, %v15630_v50  ;;  %9350 = vmatprep.subr.bf16.mxu0 %v9349_v3  ;;  %v4724_v31 = vand.u32 4294901760, %v4723_v38  ;;  %v4736_v51 = vand.u32 4294901760, %v4735_v18  ;;  %v17100_v9 = vld [vmem:[#allocation11_spill] sm:$0xff]  ;;  %v17101_v60 = vld [vmem:[#allocation93_spill] sm:$0xff]  ;;  %v17105_v38 = vld [vmem:[#allocation50_spill] sm:$0xff] }
 0x392   :  { %v9353_v55 = vpack.c.bf16 %v4712_v4, %v4700_v57  ;;  %v9355_v17 = vpack.c.bf16 %v4718_v10, %v4706_v46  ;;  %v9361_v19 = vpack.c.bf16 %v17100_v9, %v17099_v14  ;;  %v9363_v50 = vpack.c.bf16 %v17102_v44, %v17101_v60  ;;  %v17103_v4 = vld [vmem:[#allocation171_spill] sm:$0xff]  ;;  %v17104_v3 = vld [vmem:[#allocation173_spill] sm:$0xff]  ;;  %v17106_v18 = vld [vmem:[#allocation174_spill] sm:$0xff] }
 0x393   :  { %v4730_v39 = vand.u32 4294901760, %v4729_v41  ;;  %v4742_v49 = vand.u32 4294901760, %v4741_v32  ;;  %v9357_v26 = vpack.c.bf16 %v4736_v51, %v4724_v31  ;;  %v9365_v57 = vpack.c.bf16 %v17104_v3, %v17103_v4  ;;  %v17109_v31 = vld [vmem:[#allocation114_spill] sm:$0xff] }
 0x394   :  { %9352 = vmatpush1.bf16.msra.mxu0 %v9351_v35  ;;  %v9371_v46 = vpack.c.bf16 %v13130_v36, %v13125_v22  ;;  %v9373_v10 = vpack.c.bf16 %v13162_v7, %v13144_v62  ;;  %v9377_v41 = vpack.c.bf16 %v13186_v42, %v13177_v28  ;;  %v9379_v32 = vpack.c.bf16 %v13196_v61, %v13191_v43 }
 0x395   :  { %9354 = vmatprep.subr.bf16.mxu0 %v9353_v55  ;;  %v9359_v30 = vpack.c.bf16 %v4742_v49, %v4730_v39  ;;  %v17108_v49 = vld [vmem:[#allocation177_spill] sm:$0xff]  ;;  %v9381_v55 = vpack.c.bf16 %v13206_v13, %v13201_v8  ;;  %v9383_v51 = vpack.c.bf16 %v17109_v31, %v13220_v12 }
 0x396   :  { %v9369_v35 = vpack.c.bf16 %v13120_v27, %v17108_v49  ;;  %v17118_v31 = vld [vmem:[#allocation17_spill] sm:$0xff] }
 0x398   :  { %9356 = vmatpush1.bf16.msra.mxu0 %v9355_v17  ;;  %v17107_v17 = vld [vmem:[#allocation176_spill] sm:$0xff] }
 0x399   :  { %9358 = vmatprep.subr.bf16.mxu0 %v9357_v26  ;;  %v9367_v39 = vpack.c.bf16 %v17107_v17, %v17106_v18  ;;  %v17110_v26 = vld [vmem:[#allocation101_spill] sm:$0xff] }
 0x39c   :  { %9360 = vmatpush1.bf16.msra.mxu0 %v9359_v30  ;;  %v17111_v30 = vld [vmem:[#allocation115_spill] sm:$0xff] }
 0x39d   :  { %9362 = vmatprep.subr.bf16.mxu0 %v9361_v19  ;;  %v9385_v19 = vpack.c.bf16 %v17111_v30, %v17110_v26  ;;  %v17120_v26 = vld [vmem:[#allocation197_spill] sm:$0xff] }
 0x39f   :  { %4747 = vmatmul.mubr.f32.vlgmr.msra.gmra.mrb[2].mxu0 %v17105_v38 }
 0x3a0   :  { %9364 = vmatpush1.bf16.msra.mxu0 %v9363_v50  ;;  %4947 = vmatprep.mubr.f32.mxu0 %v13486_v20  ;;  %v9375_v50 = vpack.c.bf16 %v13172_v23, %v13167_v21 }
 0x3a1   :  { %9366 = vmatprep.subr.bf16.mxu0 %v9365_v57  ;;  %v17112_v57 = vld [vmem:[#allocation184_spill] sm:$0xff] }
 0x3a4   :  { %9368 = vmatpush1.bf16.msra.mxu0 %v9367_v39  ;;  %v9387_v39 = vpack.c.bf16 %v13262_v54, %v17112_v57 }
 0x3a5   :  { %9370 = vmatprep.subr.bf16.mxu0 %v9369_v35  ;;  %v17113_v35 = vld [vmem:[#allocation118_spill] sm:$0xff] }
 0x3a8   :  { %9372 = vmatpush1.bf16.msra.mxu0 %v9371_v46  ;;  %v9389_v46 = vpack.c.bf16 %v17031_v45, %v17113_v35 }
 0x3a9   :  { %9374 = vmatprep.subr.bf16.mxu0 %v9373_v10  ;;  %v17114_v10 = vld [vmem:[#allocation194_spill] sm:$0xff] }
 0x3ac   :  { %9376 = vmatpush1.bf16.msra.mxu0 %v9375_v50  ;;  %v9391_v50 = vpack.c.bf16 %v17114_v10, %v17038_v52 }
 0x3ad   :  { %9378 = vmatprep.subr.bf16.mxu0 %v9377_v41  ;;  %v17115_v41 = vld [vmem:[#allocation195_spill] sm:$0xff] }
 0x3b0   :  { %9380 = vmatpush1.bf16.msra.mxu0 %v9379_v32  ;;  %v17116_v32 = vld [vmem:[#allocation14_spill] sm:$0xff] }
 0x3b1   :  { %9382 = vmatprep.subr.bf16.mxu0 %v9381_v55  ;;  %v9393_v38 = vpack.c.bf16 %v17116_v32, %v17115_v41  ;;  %v17117_v55 = vld [vmem:[#allocation15_spill] sm:$0xff] }
 0x3b2   :  { %v9395_v30 = vpack.c.bf16 %v17118_v31, %v17117_v55 }
 0x3b4   :  { %9384 = vmatpush1.bf16.msra.mxu0 %v9383_v51  ;;  %v17119_v51 = vld [vmem:[#allocation24_spill] sm:$0xff] }
 0x3b5   :  { %9386 = vmatprep.subr.bf16.mxu0 %v9385_v19  ;;  %v9397_v54 = vpack.c.bf16 %v17120_v26, %v17119_v51  ;;  %v9399_v19 = vpack.c.bf16 %v13387_v48, %v17060_v56  ;;  %v17123_v26 = vld [vmem:[#allocation58_spill] sm:$0xff] }
 0x3b8   :  { %9388 = vmatpush1.bf16.msra.mxu0 %v9387_v39  ;;  %v9401_v39 = vpack.c.bf16 %v17062_v1, %v13392_v40 }
 0x3b9   :  { %9390 = vmatprep.subr.bf16.mxu0 %v9389_v46  ;;  %v17121_v46 = vld [vmem:[#allocation41_spill] sm:$0xff] }
 0x3ba   :  { %v9403_v32 = vpack.c.bf16 %v13567_v34, %v17121_v46 }
 0x3bc   :  { %9392 = vmatpush1.bf16.msra.mxu0 %v9391_v50  ;;  %v9405_v50 = vpack.c.bf16 %v13591_v0, %v13572_v58 }
 0x3bd   :  { %9394 = vmatprep.subr.bf16.mxu0 %v9393_v38  ;;  %v9407_v38 = vpack.c.bf16 %v13611_v24, %v13606_v16 }
 0x3c0   :  { %9396 = vmatpush1.bf16.msra.mxu0 %v9395_v30  ;;  %v17122_v30 = vld [vmem:[#allocation126_spill] sm:$0xff] }
 0x3c1   :  { %9398 = vmatprep.subr.bf16.mxu0 %v9397_v54  ;;  %v9409_v48 = vpack.c.bf16 %v17123_v26, %v17122_v30  ;;  %v9411_v54 = vpack.c.bf16 %v13671_v11, %v13652_v37 }
 0x3c4   :  { %9400 = vmatpush1.bf16.msra.mxu0 %v9399_v19  ;;  %v17124_v19 = vld [vmem:[#allocation56_spill] sm:$0xff] }
 0x3c5   :  { %9402 = vmatprep.subr.bf16.mxu0 %v9401_v39  ;;  %v9413_v34 = vpack.c.bf16 %v13695_v47, %v17124_v19  ;;  %v9415_v39 = vpack.c.bf16 %v13715_v25, %v13710_v5  ;;  %v17127_v25 = vld [vmem:[#allocation100_spill] sm:$0xff] }
 0x3c8   :  { %9404 = vmatpush1.bf16.msra.mxu0 %v9403_v32  ;;  %v9417_v32 = vpack.c.bf16 %v13733_v53, %v13728_v33 }
 0x3c9   :  { %9406 = vmatprep.subr.bf16.mxu0 %v9405_v50  ;;  %v9419_v50 = vpack.c.bf16 %v13775_v2, %v13756_v63  ;;  %v17129_v2 = vld [vmem:[#allocation21_spill] sm:$0xff] }
 0x3cc   :  { %9408 = vmatpush1.bf16.msra.mxu0 %v9407_v38  ;;  %v9421_v38 = vpack.c.bf16 %v13799_v29, %v13780_v6  ;;  %v17131_v29 = vld [vmem:[#allocation26_spill] sm:$0xff] }
 0x3cd   :  { %9410 = vmatprep.subr.bf16.mxu0 %v9409_v48  ;;  %v9423_v48 = vpack.c.bf16 %v13811_v15, %v13806_v59  ;;  %v17133_v15 = vld [vmem:[#allocation29_spill] sm:$0xff] }
 0x3d0   :  { %9412 = vmatpush1.bf16.msra.mxu0 %v9411_v54  ;;  %v17125_v54 = vld [vmem:[#allocation18_spill] sm:$0xff] }
 0x3d1   :  { %9414 = vmatprep.subr.bf16.mxu0 %v9413_v34  ;;  %v17126_v34 = vld [vmem:[#allocation53_spill] sm:$0xff] }
 0x3d4   :  { %9416 = vmatpush1.bf16.msra.mxu0 %v9415_v39  ;;  %v17128_v39 = vand.u32 4294901760, %v13486_v20  ;;  %v17138_v20 = vld [vmem:[#allocation72_spill] sm:$0xff] }
 0x3d5   :  { %9418 = vmatprep.subr.bf16.mxu0 %v9417_v32  ;;  %v17130_v32 = vld [vmem:[#allocation20_spill] sm:$0xff] }
 0x3d8   :  { %9420 = vmatpush1.bf16.msra.mxu0 %v9419_v50  ;;  %v17132_v50 = vld [vmem:[#allocation23_spill] sm:$0xff] }
 0x3d9   :  { %9422 = vmatprep.subr.bf16.mxu0 %v9421_v38  ;;  %v17134_v38 = vld [vmem:[#allocation27_spill] sm:$0xff] }
 0x3dc   :  { %9424 = vmatpush1.bf16.msra.mxu0 %v9423_v48  ;;  %v17135_v48 = vld [vmem:[#allocation64_spill] sm:$0xff] }
 0x3dd   :  { %9426 = vmatprep.subr.bf16.mxu0 %v17125_v54  ;;  %v17136_v54 = vld [vmem:[#allocation52_spill] sm:$0xff] }
 0x3df   :  { %4950 = vmatmul.mubr.f32.vlgmr.msra.gmra.mrb[2].mxu0 %v17126_v34 }
 0x3e0   :  { %9428 = vmatpush1.bf16.msra.mxu0 %v17127_v25  ;;  %5087 = vmatprep.mubr.f32.mxu0 %v17128_v39  ;;  %v17137_v25 = vld [vmem:[#allocation73_spill] sm:$0xff]  ;;  %v17139_v39 = vld [vmem:[#allocation78_spill] sm:$0xff] }
 0x3e1   :  { %9430 = vmatprep.subr.bf16.mxu0 %v17129_v2  ;;  %v17140_v2 = vld [vmem:[#allocation76_spill] sm:$0xff] }
 0x3e4   :  { %9432 = vmatpush1.bf16.msra.mxu0 %v17130_v32  ;;  %v17141_v32 = vld [vmem:[#allocation82_spill] sm:$0xff] }
 0x3e5   :  { %9434 = vmatprep.subr.bf16.mxu0 %v17131_v29  ;;  %v17142_v29 = vld [vmem:[#allocation96_spill] sm:$0xff] }
 0x3e8   :  { %9436 = vmatpush1.bf16.msra.mxu0 %v17132_v50  ;;  %v17143_v50 = vld [vmem:[#allocation168_spill] sm:$0xff] }
 0x3e9   :  { %9438 = vmatprep.subr.bf16.mxu0 %v17133_v15  ;;  %v17144_v15 = vld [vmem:[#allocation179_spill] sm:$0xff] }
 0x3ec   :  { %9440 = vmatpush1.bf16.msra.mxu0 %v17134_v38  ;;  %v17145_v38 = vld [vmem:[#allocation180_spill] sm:$0xff] }
 0x3ed   :  { %9442 = vmatprep.subr.bf16.mxu0 %v17135_v48  ;;  %v17146_v48 = vld [vmem:[#allocation111_spill] sm:$0xff] }
 0x3f0   :  { %9444 = vmatpush1.bf16.msra.mxu0 %v17136_v54  ;;  %v17147_v54 = vld [vmem:[#allocation182_spill] sm:$0xff] }
 0x3f1   :  { %9446 = vmatprep.subr.bf16.mxu0 %v17137_v25  ;;  %v17148_v25 = vld [vmem:[#allocation192_spill] sm:$0xff] }
 0x3f4   :  { %9448 = vmatpush1.bf16.msra.mxu0 %v17138_v20  ;;  %v17149_v20 = vld [vmem:[#allocation193_spill] sm:$0xff] }
 0x3f5   :  { %9450 = vmatprep.subr.bf16.mxu0 %v17139_v39  ;;  %v17150_v39 = vld [vmem:[#allocation35_spill] sm:$0xff] }
 0x3f8   :  { %9452 = vmatpush1.bf16.msra.mxu0 %v17140_v2  ;;  %v17151_v2 = vld [vmem:[#allocation33_spill] sm:$0xff] }
 0x3f9   :  { %9454 = vmatprep.subr.bf16.mxu0 %v17141_v32  ;;  %v17152_v32 = vld [vmem:[#allocation42_spill] sm:$0xff] }
 0x3fc   :  { %9456 = vmatpush1.bf16.msra.mxu0 %v17142_v29  ;;  %v17153_v29 = vld [vmem:[#allocation46_spill] sm:$0xff] }
 0x3fd   :  { %9458 = vmatprep.subr.bf16.mxu0 %v17143_v50  ;;  %v17154_v50 = vld [vmem:[#allocation44_spill] sm:$0xff] }
 0x400   :  { %9460 = vmatpush1.bf16.msra.mxu0 %v17144_v15  ;;  %v17155_v15 = vld [vmem:[#allocation136_spill] sm:$0xff] }
 0x401   :  { %9462 = vmatprep.subr.bf16.mxu0 %v17145_v38  ;;  %v17156_v38 = vld [vmem:[#allocation48_spill] sm:$0xff] }
 0x404   :  { %9464 = vmatpush1.bf16.msra.mxu0 %v17146_v48  ;;  %v17157_v48 = vld [vmem:[#allocation122_spill] sm:$0xff] }
 0x405   :  { %9466 = vmatprep.subr.bf16.mxu0 %v17147_v54 }
 0x408   :  { %9468 = vmatpush1.bf16.msra.mxu0 %v17148_v25  ;;  %v17158_v25 = vand.u32 4294901760, %v17099_v14  ;;  %v17166_v14 = vand.u32 4294901760, %v17106_v18  ;;  %v17171_v18 = vand.u32 4294901760, %v13125_v22  ;;  %v17173_v22 = vand.u32 4294901760, %v13144_v62 }
 0x409   :  { %9470 = vmatprep.subr.bf16.mxu0 %v17149_v20  ;;  %v17159_v20 = vand.u32 4294901760, %v17100_v9 }
 0x40b   :  { %v9489_v54 = vpack.c.bf16 %v17159_v20, %v17158_v25  ;;  %v17167_v25 = vand.u32 4294901760, %v17107_v17  ;;  %v17168_v20 = vand.u32 4294901760, %v17108_v49 }
 0x40c   :  { %9472 = vmatpush1.bf16.msra.mxu0 %v17150_v39  ;;  %v17160_v39 = vld [vmem:[#allocation123_spill] sm:$0xff] }
 0x40d   :  { %9474 = vmatprep.subr.bf16.mxu0 %v17151_v2  ;;  %v17161_v2 = vand.u32 4294901760, %v17101_v60  ;;  %v9495_v9 = vpack.c.bf16 %v17167_v25, %v17166_v14  ;;  %v17169_v60 = vand.u32 4294901760, %v13120_v27  ;;  %v17172_v27 = vand.u32 4294901760, %v13130_v36 }
 0x40e   :  { %v17174_v36 = vand.u32 4294901760, %v13162_v7 }
 0x40f   :  { %v9499_v17 = vpack.c.bf16 %v17172_v27, %v17171_v18  ;;  %v5504_v18 = vld [vmem:[%s14909_s5 + $0x18] sm:$0xff] }
 0x410   :  { %9476 = vmatpush1.bf16.msra.mxu0 %v17152_v32  ;;  %v17162_v32 = vand.u32 4294901760, %v17102_v44  ;;  %v9497_v44 = vpack.c.bf16 %v17169_v60, %v17168_v20  ;;  %v5503_v60 = vld [vmem:[%s14909_s5 + $0x10] sm:$0xff] }
 0x411   :  { %9478 = vmatprep.subr.bf16.mxu0 %v17153_v29 }
 0x412   :  { %v9491_v29 = vpack.c.bf16 %v17162_v32, %v17161_v2  ;;  %v5517_v2 = vld [vmem:[%s14909_s5 + $0x80] sm:$0xff] }
 0x413   :  { %v5589_v49 = vand.u32 4294901760, %v5517_v2 }
 0x414   :  { %9480 = vmatpush1.bf16.msra.mxu0 %v17154_v50  ;;  %v17163_v50 = vand.u32 4294901760, %v17103_v4  ;;  %v5501_v4 = vld [vmem:[%s14909_s5] sm:$0xff] }
 0x415   :  { %9482 = vmatprep.subr.bf16.mxu0 %v17155_v15  ;;  %v17164_v15 = vand.u32 4294901760, %v17104_v3  ;;  %v17170_v3 = vld [vmem:[#allocation55_spill] sm:$0xff]  ;;  %v5541_v32 = vand.u32 4294901760, %v5501_v4  ;;  %v14010_v62 = vsub.f32 %v5517_v2, %v5589_v49 }
 0x417   :  { %17176 = vst [vmem:[#allocation70_spill] sm:$0xff] %v14010_v62 }
 0x418   :  { %9484 = vmatpush1.bf16.msra.mxu0 %v17156_v38  ;;  %v9493_v38 = vpack.c.bf16 %v17164_v15, %v17163_v50  ;;  %v5518_v15 = vld [vmem:[%s14909_s5 + $0x88] sm:$0xff]  ;;  %v5519_v50 = vld [vmem:[%s14909_s5 + $0x90] sm:$0xff] }
 0x419   :  { %9486 = vmatprep.subr.bf16.mxu0 %v17157_v48  ;;  %v17165_v48 = vand.u32 4294901760, %v17126_v34  ;;  %v5502_v34 = vld [vmem:[%s14909_s5 + $0x8] sm:$0xff]  ;;  %v5595_v25 = vand.u32 4294901760, %v5519_v50 }
 0x41a   :  { %v5544_v14 = vand.u32 4294901760, %v5502_v34 }
 0x41c   :  { %9488 = vmatpush1.bf16.msra.mxu0 %v17160_v39  ;;  %v5505_v39 = vld [vmem:[%s14909_s5 + $0x20] sm:$0xff]  ;;  %v14025_v59 = vpack.c.bf16 %v5544_v14, %v5541_v32  ;;  %v14027_v2 = vsub.f32 %v5502_v34, %v5544_v14 }
 0x41d   :  { %9490 = vmatprep.subr.bf16.mxu0 %v9489_v54  ;;  %v5592_v54 = vand.u32 4294901760, %v5518_v15 }
 0x41e   :  { %17179 = vst [vmem:[#allocation74_spill] sm:$0xff] %v14025_v59  ;;  %17180 = vst [vmem:[#allocation80_spill] sm:$0xff] %v14027_v2 }
 0x41f   :  { %5091 = vmatmul.mubr.f32.vlgmr.msra.gmra.mrb[2].mxu0 %v17165_v48  ;;  %v9501_v48 = vpack.c.bf16 %v17174_v36, %v17173_v22  ;;  %v14008_v27 = vpack.c.bf16 %v5592_v54, %v5589_v49  ;;  %v14012_v7 = vsub.f32 %v5518_v15, %v5592_v54  ;;  %v14014_v22 = vsub.f32 %v5501_v4, %v5541_v32  ;;  %v5522_v36 = vld [vmem:[%s14909_s5 + $0xa8] sm:$0xff]  ;;  %v5523_v49 = vld [vmem:[%s14909_s5 + $0xb0] sm:$0xff] }
 0x420   :  { %9492 = vmatpush1.bf16.msra.mxu0 %v9491_v29  ;;  %5354 = vmatprep.mubr.f32.mxu0 %v17170_v3  ;;  %v5520_v29 = vld [vmem:[%s14909_s5 + $0x98] sm:$0xff]  ;;  %v5506_v3 = vld [vmem:[%s14909_s5 + $0x28] sm:$0xff]  ;;  %v14031_v4 = vsub.f32 %v5519_v50, %v5595_v25  ;;  %v5604_v34 = vand.u32 4294901760, %v5522_v36  ;;  %v5553_v32 = vand.u32 4294901760, %v5505_v39 }
 0x421   :  { %9494 = vmatprep.subr.bf16.mxu0 %v9493_v38  ;;  %v5598_v20 = vand.u32 4294901760, %v5520_v29  ;;  %v5521_v38 = vld [vmem:[%s14909_s5 + $0xa0] sm:$0xff]  ;;  %17175 = vst [vmem:[#allocation66_spill] sm:$0xff] %v14008_v27  ;;  %17177 = vst [vmem:[#allocation69_spill] sm:$0xff] %v14012_v7  ;;  %9618 = vmatprep.subr.bf16.mxu1 %v14008_v27  ;;  %v5550_v7 = vand.u32 4294901760, %v5504_v18  ;;  %v5556_v14 = vand.u32 4294901760, %v5506_v3 }
 0x422   :  { %17178 = vst [vmem:[#allocation71_spill] sm:$0xff] %v14014_v22  ;;  %17182 = vst [vmem:[#allocation90_spill] sm:$0xff] %v14031_v4  ;;  %v5547_v22 = vand.u32 4294901760, %v5503_v60  ;;  %v5601_v62 = vand.u32 4294901760, %v5521_v38  ;;  %9620 = vmatpush3.bf16.msra.mxu1 %v14025_v59  ;;  %v5524_v50 = vld [vmem:[%s14909_s5 + $0xb8] sm:$0xff]  ;;  %v17185_v4 = vand.u32 4294901760, %v13172_v23  ;;  %v14066_v63 = vsub.f32 %v5505_v39, %v5553_v32 }
 0x423   :  { %v14029_v15 = vpack.c.bf16 %v5598_v20, %v5595_v25  ;;  %v14037_v54 = vsub.f32 %v5520_v29, %v5598_v20  ;;  %v5607_v25 = vand.u32 4294901760, %v5523_v49  ;;  %v5508_v27 = vld [vmem:[%s14909_s5 + $0x38] sm:$0xff] }
 0x424   :  { %9496 = vmatpush1.bf16.msra.mxu0 %v9495_v9  ;;  %v5507_v9 = vld [vmem:[%s14909_s5 + $0x30] sm:$0xff]  ;;  %v14047_v29 = vpack.c.bf16 %v5550_v7, %v5547_v22  ;;  %v14049_v20 = vsub.f32 %v5503_v60, %v5547_v22  ;;  %v14053_v59 = vsub.f32 %v5521_v38, %v5601_v62  ;;  %v14062_v6 = vpack.c.bf16 %v5604_v34, %v5601_v62 }
 0x425   :  { %17181 = vst [vmem:[#allocation84_spill] sm:$0xff] %v14029_v15  ;;  %17183 = vst [vmem:[#allocation94_spill] sm:$0xff] %v14037_v54  ;;  %9498 = vmatprep.subr.bf16.mxu0 %v9497_v44  ;;  %9622 = vmatprep.subr.bf16.mxu1 %v14029_v15  ;;  %v14051_v44 = vsub.f32 %v5504_v18, %v5550_v7  ;;  %v17184_v54 = vand.u32 4294901760, %v13167_v21  ;;  %v14064_v15 = vsub.f32 %v5522_v36, %v5604_v34 }
 0x426   :  { %v14068_v60 = vsub.f32 %v5506_v3, %v5556_v14  ;;  %v5610_v18 = vand.u32 4294901760, %v5524_v50  ;;  %v14070_v38 = vsub.f32 %v5523_v49, %v5607_v25  ;;  %v5559_v7 = vand.u32 4294901760, %v5507_v9  ;;  %9624 = vmatpush3.bf16.msra.mxu1 %v14047_v29 }
 0x427   :  { %v9503_v2 = vpack.c.bf16 %v17185_v4, %v17184_v54  ;;  %v17186_v22 = vand.u32 4294901760, %v13177_v28  ;;  %v17187_v21 = vand.u32 4294901760, %v13186_v42  ;;  %v14077_v62 = vpack.c.bf16 %v5556_v14, %v5553_v32  ;;  %9626 = vmatprep.subr.bf16.mxu1 %v14062_v6 }
 0x428   :  { %9500 = vmatpush1.bf16.msra.mxu0 %v9499_v17  ;;  %v5562_v36 = vand.u32 4294901760, %v5508_v27  ;;  %v14080_v39 = vpack.c.bf16 %v5610_v18, %v5607_v25  ;;  %v14082_v3 = vsub.f32 %v5524_v50, %v5610_v18  ;;  %v14084_v17 = vsub.f32 %v5507_v9, %v5559_v7  ;;  %v17202_v25 = vld [vmem:[#allocation115_spill] sm:$0xff]  ;;  %v17205_v18 = vld [vmem:[#allocation186_spill] sm:$0xff] }
 0x429   :  { %9502 = vmatprep.subr.bf16.mxu0 %v9501_v48  ;;  %v9505_v23 = vpack.c.bf16 %v17187_v21, %v17186_v22  ;;  %v17192_v28 = vand.u32 4294901760, %v13191_v43  ;;  %v17193_v42 = vand.u32 4294901760, %v13196_v61  ;;  %v17194_v49 = vand.u32 4294901760, %v13201_v8  ;;  %v17200_v61 = vld [vmem:[#allocation101_spill] sm:$0xff] }
 0x42a   :  { %17188 = vst [vmem:[#allocation97_spill] sm:$0xff] %v14080_v39  ;;  %17189 = vst [vmem:[#allocation103_spill] sm:$0xff] %v14082_v3  ;;  %v14086_v4 = vsub.f32 %v5508_v27, %v5562_v36  ;;  %v17195_v54 = vand.u32 4294901760, %v13206_v13  ;;  %9628 = vmatpush3.bf16.msra.mxu1 %v14077_v62  ;;  %v14097_v32 = vpack.c.bf16 %v5562_v36, %v5559_v7  ;;  %v17197_v27 = vand.u32 4294901760, %v13220_v12 }
 0x42b   :  { %17190 = vst [vmem:[#allocation99_spill] sm:$0xff] %v14084_v17  ;;  %v9507_v48 = vpack.c.bf16 %v17193_v42, %v17192_v28  ;;  %9630 = vmatprep.subr.bf16.mxu1 %v14080_v39  ;;  %v17201_v50 = vand.u32 4294901760, %v17200_v61  ;;  %v17203_v8 = vand.u32 4294901760, %v17202_v25  ;;  %v17204_v13 = vand.u32 4294901760, %v17112_v57 }
 0x42c   :  { %17191 = vst [vmem:[#allocation107_spill] sm:$0xff] %v14086_v4  ;;  %9504 = vmatpush1.bf16.msra.mxu0 %v9503_v2  ;;  %v9509_v34 = vpack.c.bf16 %v17195_v54, %v17194_v49  ;;  %17196 = vst [vmem:[#allocation109_spill] sm:$0xff] %v14097_v32  ;;  %v17198_v2 = vld [vmem:[#allocation114_spill] sm:$0xff]  ;;  %v17206_v7 = vand.u32 4294901760, %v17205_v18  ;;  %v17207_v12 = vand.u32 4294901760, %v17113_v35  ;;  %v17208_v21 = vand.u32 4294901760, %v17031_v45 }
 0x42d   :  { %9506 = vmatprep.subr.bf16.mxu0 %v9505_v23  ;;  %v17199_v43 = vand.u32 4294901760, %v17198_v2  ;;  %v9513_v9 = vpack.c.bf16 %v17203_v8, %v17201_v50  ;;  %v17209_v36 = vand.u32 4294901760, %v17038_v52  ;;  %v17210_v28 = vand.u32 4294901760, %v17114_v10  ;;  %v17212_v49 = vld [vmem:[#allocation14_spill] sm:$0xff]  ;;  %v17217_v2 = vld [vmem:[#allocation197_spill] sm:$0xff] }
 0x42e   :  { %9632 = vmatpush3.bf16.msra.mxu1 %v14097_v32  ;;  %v9515_v22 = vpack.c.bf16 %v17206_v7, %v17204_v13  ;;  %v9517_v23 = vpack.c.bf16 %v17208_v21, %v17207_v12  ;;  %v17213_v57 = vand.u32 4294901760, %v17212_v49  ;;  %v17215_v35 = vand.u32 4294901760, %v17118_v31  ;;  %v17225_v8 = vld [vmem:[#allocation125_spill] sm:$0xff] }
 0x42f   :  { %v9511_v14 = vpack.c.bf16 %v17199_v43, %v17197_v27  ;;  %v9519_v42 = vpack.c.bf16 %v17210_v28, %v17209_v36  ;;  %v17216_v45 = vand.u32 4294901760, %v17119_v51  ;;  %v17218_v52 = vand.u32 4294901760, %v17217_v2  ;;  %v17238_v28 = vld [vmem:[#allocation60_spill] sm:$0xff] }
 0x430   :  { %9508 = vmatpush1.bf16.msra.mxu0 %v9507_v48  ;;  %v17211_v48 = vand.u32 4294901760, %v17115_v41  ;;  %v17219_v10 = vand.u32 4294901760, %v17060_v56  ;;  %v17222_v50 = vand.u32 4294901760, %v13392_v40  ;;  %v17224_v31 = vand.u32 4294901760, %v17121_v46 }
 0x431   :  { %9510 = vmatprep.subr.bf16.mxu0 %v9509_v34  ;;  %v17214_v34 = vand.u32 4294901760, %v17117_v55  ;;  %v9525_v43 = vpack.c.bf16 %v17218_v52, %v17216_v45  ;;  %v17223_v55 = vand.u32 4294901760, %v17062_v1  ;;  %v17226_v51 = vand.u32 4294901760, %v17225_v8  ;;  %v17250_v45 = vld [vmem:[#allocation131_spill] sm:$0xff] }
 0x432   :  { %v9521_v54 = vpack.c.bf16 %v17213_v57, %v17211_v48  ;;  %v17227_v13 = vand.u32 4294901760, %v13572_v58  ;;  %v17228_v56 = vand.u32 4294901760, %v13591_v0  ;;  %v17229_v7 = vand.u32 4294901760, %v13606_v16  ;;  %v17244_v57 = vld [vmem:[#allocation89_spill] sm:$0xff]  ;;  %v17252_v52 = vld [vmem:[#allocation67_spill] sm:$0xff] }
 0x433   :  { %v9523_v27 = vpack.c.bf16 %v17215_v35, %v17214_v34  ;;  %v9529_v25 = vpack.c.bf16 %v17223_v55, %v17222_v50  ;;  %v17230_v40 = vand.u32 4294901760, %v13611_v24  ;;  %v17231_v1 = vand.u32 4294901760, %v17122_v30  ;;  %v17248_v35 = vld [vmem:[#allocation129_spill] sm:$0xff]  ;;  %v17259_v50 = vld [vmem:[#allocation20_spill] sm:$0xff]  ;;  %v17260_v55 = vld [vmem:[#allocation26_spill] sm:$0xff] }
 0x434   :  { %9512 = vmatpush1.bf16.msra.mxu0 %v9511_v14  ;;  %v17220_v14 = vld [vmem:[#allocation39_spill] sm:$0xff]  ;;  %v9533_v18 = vpack.c.bf16 %v17228_v56, %v17227_v13  ;;  %v17232_v46 = vand.u32 4294901760, %v17123_v26  ;;  %v17233_v21 = vand.u32 4294901760, %v13652_v37  ;;  %v17234_v58 = vand.u32 4294901760, %v13671_v11  ;;  %v17266_v13 = vld [vmem:[#allocation73_spill] sm:$0xff]  ;;  %v17267_v56 = vld [vmem:[#allocation72_spill] sm:$0xff] }
 0x435   :  { %9514 = vmatprep.subr.bf16.mxu0 %v9513_v9  ;;  %v17221_v41 = vand.u32 4294901760, %v17220_v14  ;;  %v9531_v9 = vpack.c.bf16 %v17226_v51, %v17224_v31  ;;  %v17235_v0 = vand.u32 4294901760, %v17124_v19  ;;  %v17236_v16 = vand.u32 4294901760, %v13695_v47  ;;  %v17242_v11 = vld [vmem:[#allocation59_spill] sm:$0xff]  ;;  %v17246_v47 = vld [vmem:[#allocation128_spill] sm:$0xff]  ;;  %v17262_v31 = vld [vmem:[#allocation29_spill] sm:$0xff] }
 0x436   :  { %v9537_v12 = vpack.c.bf16 %v17232_v46, %v17231_v1  ;;  %v17237_v24 = vand.u32 4294901760, %v13710_v5  ;;  %v17239_v30 = vand.u32 4294901760, %v17238_v28  ;;  %v17240_v26 = vand.u32 4294901760, %v13728_v33  ;;  %v17256_v14 = vld [vmem:[#allocation100_spill] sm:$0xff]  ;;  %v17263_v8 = vld [vmem:[#allocation27_spill] sm:$0xff]  ;;  %v17282_v28 = vld [vmem:[#allocation46_spill] sm:$0xff] }
 0x437   :  { %v9527_v61 = vpack.c.bf16 %v17221_v41, %v17219_v10  ;;  %v9541_v36 = vpack.c.bf16 %v17236_v16, %v17235_v0  ;;  %v17241_v37 = vand.u32 4294901760, %v13733_v53  ;;  %v17243_v49 = vand.u32 4294901760, %v17242_v11  ;;  %v17254_v53 = vld [vmem:[#allocation18_spill] sm:$0xff]  ;;  %v17257_v41 = vld [vmem:[#allocation55_spill] sm:$0xff]  ;;  %v17264_v51 = vld [vmem:[#allocation64_spill] sm:$0xff] }
 0x438   :  { %9516 = vmatpush1.bf16.msra.mxu0 %v9515_v22  ;;  %v9535_v22 = vpack.c.bf16 %v17230_v40, %v17229_v7  ;;  %v17245_v19 = vand.u32 4294901760, %v17244_v57  ;;  %v17247_v34 = vand.u32 4294901760, %v17246_v47  ;;  %v17249_v5 = vand.u32 4294901760, %v17248_v35  ;;  %v17255_v10 = vld [vmem:[#allocation50_spill] sm:$0xff]  ;;  %v17269_v7 = vld [vmem:[#allocation76_spill] sm:$0xff]  ;;  %v17273_v46 = vld [vmem:[#allocation179_spill] sm:$0xff] }
 0x439   :  { %9518 = vmatprep.subr.bf16.mxu0 %v9517_v23  ;;  %v9539_v23 = vpack.c.bf16 %v17234_v58, %v17233_v21  ;;  %v9545_v48 = vpack.c.bf16 %v17241_v37, %v17240_v26  ;;  %v17251_v2 = vand.u32 4294901760, %v17250_v45  ;;  %v17253_v33 = vand.u32 4294901760, %v17252_v52  ;;  %v17270_v40 = vld [vmem:[#allocation82_spill] sm:$0xff]  ;;  %v17272_v1 = vld [vmem:[#allocation168_spill] sm:$0xff]  ;;  %v17275_v21 = vld [vmem:[#allocation111_spill] sm:$0xff] }
 0x43a   :  { %v17276_v58 = vld [vmem:[#allocation182_spill] sm:$0xff]  ;;  %v17278_v0 = vld [vmem:[#allocation193_spill] sm:$0xff]  ;;  %v17279_v16 = vld [vmem:[#allocation35_spill] sm:$0xff] }
 0x43b   :  { %v17285_v26 = vld [vmem:[#allocation48_spill] sm:$0xff]  ;;  %v17286_v37 = vld [vmem:[#allocation122_spill] sm:$0xff]  ;;  %v5510_v47 = vld [vmem:[%s14909_s5 + $0x48] sm:$0xff] }
 0x43c   :  { %9520 = vmatpush1.bf16.msra.mxu0 %v9519_v42  ;;  %v9543_v42 = vpack.c.bf16 %v17239_v30, %v17237_v24  ;;  %v17281_v24 = vld [vmem:[#allocation42_spill] sm:$0xff]  ;;  %v17283_v30 = vld [vmem:[#allocation44_spill] sm:$0xff]  ;;  %v5568_v35 = vand.u32 4294901760, %v5510_v47 }
 0x43d   :  { %9522 = vmatprep.subr.bf16.mxu0 %v9521_v54  ;;  %v9547_v54 = vpack.c.bf16 %v17245_v19, %v17243_v49  ;;  %v5525_v11 = vld [vmem:[%s14909_s5 + $0xc0] sm:$0xff]  ;;  %v5526_v49 = vld [vmem:[%s14909_s5 + $0xc8] sm:$0xff]  ;;  %v5527_v45 = vld [vmem:[%s14909_s5 + $0xd0] sm:$0xff] }
 0x43e   :  { %v5613_v57 = vand.u32 4294901760, %v5525_v11  ;;  %v5616_v19 = vand.u32 4294901760, %v5526_v49  ;;  %v5619_v52 = vand.u32 4294901760, %v5527_v45 }
 0x440   :  { %9524 = vmatpush1.bf16.msra.mxu0 %v9523_v27  ;;  %v9549_v27 = vpack.c.bf16 %v17249_v5, %v17247_v34  ;;  %v14232_v5 = vpack.c.bf16 %v5616_v19, %v5613_v57 }
 0x441   :  { %9526 = vmatprep.subr.bf16.mxu0 %v9525_v43  ;;  %v9551_v43 = vpack.c.bf16 %v17253_v33, %v17251_v2  ;;  %v5528_v2 = vld [vmem:[%s14909_s5 + $0xd8] sm:$0xff] }
 0x442   :  { %17288 = vst [vmem:[#allocation110_spill] sm:$0xff] %v14232_v5  ;;  %9634 = vmatprep.subr.bf16.mxu1 %v14232_v5  ;;  %v5622_v33 = vand.u32 4294901760, %v5528_v2 }
 0x444   :  { %9528 = vmatpush1.bf16.msra.mxu0 %v9527_v61  ;;  %v17258_v61 = vld [vmem:[#allocation21_spill] sm:$0xff] }
 0x445   :  { %9530 = vmatprep.subr.bf16.mxu0 %v9529_v25  ;;  %v17261_v25 = vld [vmem:[#allocation23_spill] sm:$0xff] }
 0x448   :  { %9532 = vmatpush1.bf16.msra.mxu0 %v9531_v9  ;;  %v17265_v9 = vld [vmem:[#allocation52_spill] sm:$0xff] }
 0x449   :  { %9534 = vmatprep.subr.bf16.mxu0 %v9533_v18  ;;  %v17268_v18 = vld [vmem:[#allocation78_spill] sm:$0xff] }
 0x44c   :  { %9536 = vmatpush1.bf16.msra.mxu0 %v9535_v22  ;;  %v17271_v22 = vld [vmem:[#allocation96_spill] sm:$0xff] }
 0x44d   :  { %9538 = vmatprep.subr.bf16.mxu0 %v9537_v12  ;;  %v17274_v12 = vld [vmem:[#allocation180_spill] sm:$0xff] }
 0x450   :  { %9540 = vmatpush1.bf16.msra.mxu0 %v9539_v23  ;;  %v17277_v23 = vld [vmem:[#allocation192_spill] sm:$0xff] }
 0x451   :  { %9542 = vmatprep.subr.bf16.mxu0 %v9541_v36  ;;  %v17280_v36 = vld [vmem:[#allocation33_spill] sm:$0xff] }
 0x454   :  { %9544 = vmatpush1.bf16.msra.mxu0 %v9543_v42  ;;  %v17284_v42 = vld [vmem:[#allocation136_spill] sm:$0xff] }
 0x455   :  { %9546 = vmatprep.subr.bf16.mxu0 %v9545_v48  ;;  %v17287_v48 = vld [vmem:[#allocation123_spill] sm:$0xff] }
 0x458   :  { %9548 = vmatpush1.bf16.msra.mxu0 %v9547_v54  ;;  %v5509_v54 = vld [vmem:[%s14909_s5 + $0x40] sm:$0xff] }
 0x459   :  { %9550 = vmatprep.subr.bf16.mxu0 %v9549_v27  ;;  %v5565_v34 = vand.u32 4294901760, %v5509_v54 }
 0x45b   :  { %v14234_v27 = vpack.c.bf16 %v5568_v35, %v5565_v34 }
 0x45c   :  { %9552 = vmatpush1.bf16.msra.mxu0 %v9551_v43  ;;  %v5511_v43 = vld [vmem:[%s14909_s5 + $0x50] sm:$0xff] }
 0x45d   :  { %9554 = vmatprep.subr.bf16.mxu0 %v17254_v53  ;;  %17289 = vst [vmem:[#allocation153_spill] sm:$0xff] %v14234_v27  ;;  %v5512_v53 = vld [vmem:[%s14909_s5 + $0x58] sm:$0xff]  ;;  %9636 = vmatpush3.bf16.msra.mxu1 %v14234_v27  ;;  %v14308_v27 = vsub.f32 %v5528_v2, %v5622_v33 }
 0x45f   :  { %5356 = vmatmul.mubr.f32.vlgmr.msra.gmra.mrb[2].mxu0 %v17255_v10  ;;  %17304 = vst [vmem:[#allocation165_spill] sm:$0xff] %v14308_v27 }
 0x460   :  { %9556 = vmatpush1.bf16.msra.mxu0 %v17256_v14  ;;  %5491 = vmatprep.mubr.f32.mxu0 %v17257_v41  ;;  %v5574_v14 = vand.u32 4294901760, %v5512_v53  ;;  %v14250_v41 = vpack.c.bf16 %v5622_v33, %v5619_v52 }
 0x461   :  { %9558 = vmatprep.subr.bf16.mxu0 %v17258_v61 }
 0x462   :  { %17290 = vst [vmem:[#allocation154_spill] sm:$0xff] %v14250_v41  ;;  %9638 = vmatprep.subr.bf16.mxu1 %v14250_v41  ;;  %v14304_v41 = vsub.f32 %v5510_v47, %v5568_v35 }
 0x464   :  { %9560 = vmatpush1.bf16.msra.mxu0 %v17259_v50  ;;  %v5529_v50 = vld [vmem:[%s14909_s5 + $0xe0] sm:$0xff]  ;;  %17302 = vst [vmem:[#allocation51_spill] sm:$0xff] %v14304_v41 }
 0x465   :  { %9562 = vmatprep.subr.bf16.mxu0 %v17260_v55  ;;  %v5530_v55 = vld [vmem:[%s14909_s5 + $0xe8] sm:$0xff] }
 0x468   :  { %9564 = vmatpush1.bf16.msra.mxu0 %v17261_v25  ;;  %v5625_v25 = vand.u32 4294901760, %v5529_v50 }
 0x469   :  { %9566 = vmatprep.subr.bf16.mxu0 %v17262_v31  ;;  %v5628_v31 = vand.u32 4294901760, %v5530_v55 }
 0x46c   :  { %9568 = vmatpush1.bf16.msra.mxu0 %v17263_v8  ;;  %v5513_v8 = vld [vmem:[%s14909_s5 + $0x60] sm:$0xff] }
 0x46d   :  { %9570 = vmatprep.subr.bf16.mxu0 %v17264_v51  ;;  %v5514_v51 = vld [vmem:[%s14909_s5 + $0x68] sm:$0xff] }
 0x470   :  { %9572 = vmatpush1.bf16.msra.mxu0 %v17265_v9  ;;  %v5577_v9 = vand.u32 4294901760, %v5513_v8 }
 0x471   :  { %9574 = vmatprep.subr.bf16.mxu0 %v17266_v13  ;;  %v5580_v13 = vand.u32 4294901760, %v5514_v51 }
 0x474   :  { %9576 = vmatpush1.bf16.msra.mxu0 %v17267_v56  ;;  %v14268_v56 = vpack.c.bf16 %v5628_v31, %v5625_v25 }
 0x475   :  { %9578 = vmatprep.subr.bf16.mxu0 %v17268_v18  ;;  %v14270_v18 = vpack.c.bf16 %v5580_v13, %v5577_v9 }
 0x476   :  { %17292 = vst [vmem:[#allocation112_spill] sm:$0xff] %v14268_v56 }
 0x477   :  { %17293 = vst [vmem:[#allocation113_spill] sm:$0xff] %v14270_v18 }
 0x478   :  { %9580 = vmatpush1.bf16.msra.mxu0 %v17269_v7  ;;  %v5531_v7 = vld [vmem:[%s14909_s5 + $0xf0] sm:$0xff] }
 0x479   :  { %9582 = vmatprep.subr.bf16.mxu0 %v17270_v40  ;;  %v5532_v40 = vld [vmem:[%s14909_s5 + $0xf8] sm:$0xff] }
 0x47c   :  { %9584 = vmatpush1.bf16.msra.mxu0 %v17271_v22  ;;  %v5631_v22 = vand.u32 4294901760, %v5531_v7 }
 0x47d   :  { %9586 = vmatprep.subr.bf16.mxu0 %v17272_v1  ;;  %v5634_v1 = vand.u32 4294901760, %v5532_v40 }
 0x480   :  { %9588 = vmatpush1.bf16.msra.mxu0 %v17273_v46  ;;  %v5515_v46 = vld [vmem:[%s14909_s5 + $0x70] sm:$0xff] }
 0x481   :  { %9590 = vmatprep.subr.bf16.mxu0 %v17274_v12  ;;  %v5516_v12 = vld [vmem:[%s14909_s5 + $0x78] sm:$0xff] }
 0x484   :  { %9592 = vmatpush1.bf16.msra.mxu0 %v17275_v21  ;;  %v17294_v21 = vld [vmem:[#allocation70_spill] sm:$0xff] }
 0x485   :  { %9594 = vmatprep.subr.bf16.mxu0 %v17276_v58  ;;  %v15665_v58 = vand.u32 4294901760, %v17294_v21 }
 0x488   :  { %9596 = vmatpush1.bf16.msra.mxu0 %v17277_v23  ;;  %v17295_v23 = vld [vmem:[#allocation69_spill] sm:$0xff] }
 0x489   :  { %9598 = vmatprep.subr.bf16.mxu0 %v17278_v0  ;;  %v15666_v0 = vand.u32 4294901760, %v17295_v23 }
 0x48c   :  { %9600 = vmatpush1.bf16.msra.mxu0 %v17279_v16  ;;  %v5583_v16 = vand.u32 4294901760, %v5515_v46 }
 0x48d   :  { %9602 = vmatprep.subr.bf16.mxu0 %v17280_v36  ;;  %v5586_v36 = vand.u32 4294901760, %v5516_v12 }
 0x48f   :  { %v14327_v47 = vpack.c.bf16 %v5586_v36, %v5583_v16  ;;  %v14331_v35 = vsub.f32 %v5516_v12, %v5586_v36  ;;  %v15667_v12 = vand.u32 4294901760, %v14066_v63 }
 0x490   :  { %9604 = vmatpush1.bf16.msra.mxu0 %v17281_v24  ;;  %v17296_v24 = vld [vmem:[#allocation71_spill] sm:$0xff] }
 0x491   :  { %9606 = vmatprep.subr.bf16.mxu0 %v17282_v28  ;;  %v14306_v28 = vsub.f32 %v5527_v45, %v5619_v52  ;;  %17313 = vst [vmem:[#allocation105_spill] sm:$0xff] %v14327_v47  ;;  %17315 = vst [vmem:[#allocation81_spill] sm:$0xff] %v14331_v35  ;;  %v17316_v52 = vand.u32 4294901760, %v17296_v24  ;;  %v15703_v32 = vand.u32 4294901760, %v14331_v35 }
 0x493   :  { %17303 = vst [vmem:[#allocation164_spill] sm:$0xff] %v14306_v28  ;;  %v5656_v33 = vsub.f32 %v17296_v24, %v17316_v52 }
 0x494   :  { %9608 = vmatpush1.bf16.msra.mxu0 %v17283_v30  ;;  %v14289_v30 = vpack.c.bf16 %v5634_v1, %v5631_v22 }
 0x495   :  { %9610 = vmatprep.subr.bf16.mxu0 %v17284_v42  ;;  %v5768_v42 = vsub.f32 %v17294_v21, %v15665_v58  ;;  %v14312_v58 = vsub.f32 %v5512_v53, %v5574_v14  ;;  %v17317_v53 = vld [vmem:[#allocation90_spill] sm:$0xff] }
 0x496   :  { %17297 = vst [vmem:[#allocation159_spill] sm:$0xff] %v14289_v30 }
 0x497   :  { %17306 = vst [vmem:[#allocation167_spill] sm:$0xff] %v14312_v58  ;;  %v5769_v45 = vand.u32 4294901760, %v5768_v42 }
 0x498   :  { %9612 = vmatpush1.bf16.msra.mxu0 %v17285_v26  ;;  %v5775_v26 = vsub.f32 %v17295_v23, %v15666_v0  ;;  %v14315_v0 = vsub.f32 %v5529_v50, %v5625_v25 }
 0x499   :  { %9614 = vmatprep.subr.bf16.mxu0 %v17286_v37  ;;  %v17298_v37 = vld [vmem:[#allocation80_spill] sm:$0xff] }
 0x49a   :  { %17307 = vst [vmem:[#allocation91_spill] sm:$0xff] %v14315_v0  ;;  %v5776_v2 = vand.u32 4294901760, %v5775_v26 }
 0x49c   :  { %9616 = vmatpush1.bf16.msra.mxu0 %v17287_v48  ;;  %v15687_v48 = vand.u32 4294901760, %v17298_v37  ;;  %v9649_v25 = vpack.c.bf16 %v5776_v2, %v5769_v45 }
 0x49f   :  { %5493 = vmatmul.mubr.f32.vlgmr.msra.gmra.mrb[2].mxu0 %v17255_v10  ;;  %v5571_v10 = vand.u32 4294901760, %v5511_v43 }
 0x4a1   :  { %v14252_v61 = vpack.c.bf16 %v5574_v14, %v5571_v10  ;;  %v14310_v5 = vsub.f32 %v5511_v43, %v5571_v10  ;;  %v5663_v43 = vsub.f32 %v17298_v37, %v15687_v48  ;;  %v15683_v10 = vand.u32 4294901760, %v17317_v53  ;;  %v17318_v14 = vld [vmem:[#allocation94_spill] sm:$0xff] }
 0x4a2   :  { %v15678_v50 = vand.u32 4294901760, %v17318_v14 }
 0x4a3   :  { %17291 = vst [vmem:[#allocation156_spill] sm:$0xff] %v14252_v61  ;;  %9640 = vmatpush3.bf16.msra.mxu1 %v14252_v61  ;;  %v14300_v61 = vsub.f32 %v5526_v49, %v5616_v19  ;;  %17305 = vst [vmem:[#allocation87_spill] sm:$0xff] %v14310_v5  ;;  %v14319_v49 = vsub.f32 %v5513_v8, %v5577_v9  ;;  %v14323_v19 = vsub.f32 %v5531_v7, %v5631_v22 }
 0x4a4   :  { %9642 = vmatprep.subr.bf16.mxu1 %v14268_v56  ;;  %v14298_v56 = vsub.f32 %v5525_v11, %v5613_v57  ;;  %v14317_v11 = vsub.f32 %v5530_v55, %v5628_v31  ;;  %v14321_v57 = vsub.f32 %v5514_v51, %v5580_v13  ;;  %v15675_v55 = vand.u32 4294901760, %v14049_v20 }
 0x4a5   :  { %17300 = vst [vmem:[#allocation161_spill] sm:$0xff] %v14300_v61  ;;  %17309 = vst [vmem:[#allocation19_spill] sm:$0xff] %v14319_v49  ;;  %v5657_v31 = vand.u32 4294901760, %v5656_v33  ;;  %v15674_v8 = vand.u32 4294901760, %v14051_v44  ;;  %v15670_v51 = vand.u32 4294901760, %v14053_v59  ;;  %v5664_v9 = vand.u32 4294901760, %v5663_v43 }
 0x4a6   :  { %17299 = vst [vmem:[#allocation160_spill] sm:$0xff] %v14298_v56  ;;  %17308 = vst [vmem:[#allocation98_spill] sm:$0xff] %v14317_v11  ;;  %v5782_v13 = vsub.f32 %v17317_v53, %v15683_v10  ;;  %v5789_v7 = vsub.f32 %v17318_v14, %v15678_v50  ;;  %v5684_v33 = vsub.f32 %v14066_v63, %v15667_v12  ;;  %v15676_v12 = vand.u32 4294901760, %v14086_v4 }
 0x4a7   :  { %9644 = vmatpush3.bf16.msra.mxu1 %v14270_v18  ;;  %v14302_v18 = vsub.f32 %v5509_v54, %v5565_v34  ;;  %17310 = vst [vmem:[#allocation22_spill] sm:$0xff] %v14321_v57  ;;  %17311 = vst [vmem:[#allocation28_spill] sm:$0xff] %v14323_v19  ;;  %v14325_v54 = vsub.f32 %v5532_v40, %v5634_v1  ;;  %v14329_v34 = vsub.f32 %v5515_v46, %v5583_v16 }
 0x4a8   :  { %9646 = vmatprep.subr.bf16.mxu1 %v14289_v30  ;;  %v5670_v40 = vsub.f32 %v14049_v20, %v15675_v55  ;;  %v5677_v22 = vsub.f32 %v14051_v44, %v15674_v8  ;;  %v5796_v1 = vsub.f32 %v14053_v59, %v15670_v51  ;;  %v15669_v46 = vand.u32 4294901760, %v14064_v15 }
 0x4a9   :  { %17301 = vst [vmem:[#allocation162_spill] sm:$0xff] %v14302_v18  ;;  %17312 = vst [vmem:[#allocation49_spill] sm:$0xff] %v14325_v54  ;;  %v14362_v16 = vpack.c.bf16 %v5664_v9, %v5657_v31  ;;  %v5783_v36 = vand.u32 4294901760, %v5782_v13  ;;  %v5790_v42 = vand.u32 4294901760, %v5789_v7  ;;  %v15671_v31 = vand.u32 4294901760, %v14070_v38 }
 0x4aa   :  { %17314 = vst [vmem:[#allocation75_spill] sm:$0xff] %v14329_v34  ;;  %v5671_v26 = vand.u32 4294901760, %v5670_v40  ;;  %v5678_v45 = vand.u32 4294901760, %v5677_v22  ;;  %v5797_v2 = vand.u32 4294901760, %v5796_v1  ;;  %v5803_v52 = vsub.f32 %v14064_v15, %v15669_v46 }
 0x4ab   :  { %9648 = vmatpush3.bf16.msra.mxu1 %v14327_v47  ;;  %v14370_v43 = vpack.c.bf16 %v5790_v42, %v5783_v36  ;;  %v15672_v9 = vand.u32 4294901760, %v14082_v3  ;;  %v5685_v40 = vand.u32 4294901760, %v5684_v33  ;;  %v15673_v22 = vand.u32 4294901760, %v14084_v17 }
 0x4ac   :  { %9650 = vmatprep.subr.bf16.mxu1 %v9649_v25  ;;  %v15668_v25 = vand.u32 4294901760, %v14068_v60  ;;  %v14375_v13 = vpack.c.bf16 %v5678_v45, %v5671_v26  ;;  %v5804_v7 = vand.u32 4294901760, %v5803_v52  ;;  %v5810_v36 = vsub.f32 %v14070_v38, %v15671_v31 }
 0x4ad   :  { %v5817_v42 = vsub.f32 %v14082_v3, %v15672_v9  ;;  %v5698_v45 = vsub.f32 %v14084_v17, %v15673_v22  ;;  %v15677_v52 = vand.u32 4294901760, %v14298_v56  ;;  %v15682_v33 = vand.u32 4294901760, %v14300_v61 }
 0x4ae   :  { %v5691_v1 = vsub.f32 %v14068_v60, %v15668_v25  ;;  %v14388_v26 = vpack.c.bf16 %v5804_v7, %v5797_v2  ;;  %v5811_v46 = vand.u32 4294901760, %v5810_v36  ;;  %v5705_v31 = vsub.f32 %v14086_v4, %v15676_v12 }
 0x4af   :  { %v5818_v51 = vand.u32 4294901760, %v5817_v42  ;;  %v5699_v9 = vand.u32 4294901760, %v5698_v45  ;;  %v5824_v2 = vsub.f32 %v14298_v56, %v15677_v52  ;;  %v5831_v7 = vsub.f32 %v14300_v61, %v15682_v33 }
 0x4b0   :  { %v5692_v25 = vand.u32 4294901760, %v5691_v1  ;;  %v15679_v22 = vand.u32 4294901760, %v14302_v18  ;;  %v5706_v36 = vand.u32 4294901760, %v5705_v31  ;;  %v15680_v42 = vand.u32 4294901760, %v14304_v41 }
 0x4b1   :  { %v14407_v1 = vpack.c.bf16 %v5818_v51, %v5811_v46  ;;  %v5825_v55 = vand.u32 4294901760, %v5824_v2  ;;  %v5832_v12 = vand.u32 4294901760, %v5831_v7  ;;  %v15681_v52 = vand.u32 4294901760, %v14306_v28 }
 0x4b2   :  { %v14405_v8 = vpack.c.bf16 %v5692_v25, %v5685_v40  ;;  %v5712_v45 = vsub.f32 %v14302_v18, %v15679_v22  ;;  %v14414_v50 = vpack.c.bf16 %v5706_v36, %v5699_v9  ;;  %v5719_v25 = vsub.f32 %v14304_v41, %v15680_v42 }
 0x4b3   :  { %v15684_v51 = vand.u32 4294901760, %v14308_v27  ;;  %v15685_v46 = vand.u32 4294901760, %v14310_v5  ;;  %v14421_v31 = vpack.c.bf16 %v5832_v12, %v5825_v55  ;;  %v5838_v2 = vsub.f32 %v14306_v28, %v15681_v52 }
 0x4b4   :  { %v5713_v40 = vand.u32 4294901760, %v5712_v45  ;;  %v15686_v7 = vand.u32 4294901760, %v14312_v58  ;;  %v5720_v22 = vand.u32 4294901760, %v5719_v25  ;;  %v15688_v12 = vand.u32 4294901760, %v14315_v0 }
 0x4b5   :  { %v5845_v9 = vsub.f32 %v14308_v27, %v15684_v51  ;;  %v5726_v36 = vsub.f32 %v14310_v5, %v15685_v46  ;;  %v5839_v42 = vand.u32 4294901760, %v5838_v2  ;;  %v15691_v45 = vand.u32 4294901760, %v14317_v11 }
 0x4b6   :  { %v5733_v55 = vsub.f32 %v14312_v58, %v15686_v7  ;;  %v14438_v52 = vpack.c.bf16 %v5720_v22, %v5713_v40  ;;  %v15697_v10 = vand.u32 4294901760, %v14319_v49  ;;  %v5852_v46 = vsub.f32 %v14315_v0, %v15688_v12 }
 0x4b7   :  { %v5846_v25 = vand.u32 4294901760, %v5845_v9  ;;  %v5727_v33 = vand.u32 4294901760, %v5726_v36  ;;  %v5859_v2 = vsub.f32 %v14317_v11, %v15691_v45  ;;  %v15696_v7 = vand.u32 4294901760, %v14321_v57 }
 0x4b8   :  { %v5734_v51 = vand.u32 4294901760, %v5733_v55  ;;  %v5740_v22 = vsub.f32 %v14319_v49, %v15697_v10  ;;  %v5853_v9 = vand.u32 4294901760, %v5852_v46  ;;  %v15700_v47 = vand.u32 4294901760, %v14323_v19 }
 0x4b9   :  { %v14448_v48 = vpack.c.bf16 %v5846_v25, %v5839_v42  ;;  %v5860_v36 = vand.u32 4294901760, %v5859_v2  ;;  %v5747_v55 = vsub.f32 %v14321_v57, %v15696_v7  ;;  %v15701_v45 = vand.u32 4294901760, %v14325_v54 }
 0x4ba   :  { %v14453_v40 = vpack.c.bf16 %v5734_v51, %v5727_v33  ;;  %v5741_v12 = vand.u32 4294901760, %v5740_v22  ;;  %v15702_v42 = vand.u32 4294901760, %v14329_v34  ;;  %v5866_v33 = vsub.f32 %v14323_v19, %v15700_v47 }
 0x4bb   :  { %v9673_v25 = vpack.c.bf16 %v5860_v36, %v5853_v9  ;;  %v5748_v30 = vand.u32 4294901760, %v5747_v55  ;;  %v5873_v51 = vsub.f32 %v14325_v54, %v15701_v45  ;;  %v5761_v22 = vsub.f32 %v14331_v35, %v15703_v32 }
 0x4bc   :  { %v5754_v46 = vsub.f32 %v14329_v34, %v15702_v42  ;;  %v5867_v9 = vand.u32 4294901760, %v5866_v33  ;;  %v9681_v47 = vpack.c.bf16 %v17295_v23, %v17294_v21  ;;  %v9683_v45 = vpack.c.bf16 %v17298_v37, %v17296_v24 }
 0x4bd   :  { %v9675_v2 = vpack.c.bf16 %v5748_v30, %v5741_v12  ;;  %v5874_v36 = vand.u32 4294901760, %v5873_v51  ;;  %v5762_v7 = vand.u32 4294901760, %v5761_v22  ;;  %v9685_v42 = vpack.c.bf16 %v17318_v14, %v17317_v53 }
 0x4be   :  { %v5755_v55 = vand.u32 4294901760, %v5754_v46  ;;  %v9687_v30 = vpack.c.bf16 %v14051_v44, %v14049_v20  ;;  %v9689_v12 = vpack.c.bf16 %v14064_v15, %v14053_v59  ;;  %v9691_v33 = vpack.c.bf16 %v14068_v60, %v14066_v63 }
 0x4bf   :  { %v9677_v10 = vpack.c.bf16 %v5874_v36, %v5867_v9  ;;  %v9695_v51 = vpack.c.bf16 %v14086_v4, %v14084_v17  ;;  %v9697_v46 = vpack.c.bf16 %v14300_v61, %v14298_v56  ;;  %v9699_v22 = vpack.c.bf16 %v14304_v41, %v14302_v18  ;;  %v2919_v41 = vld [vmem:[%s14908_s4] sm:$0x3] }
 0x4c0   :  { %v9679_v39 = vpack.c.bf16 %v5762_v7, %v5755_v55  ;;  %v9693_v7 = vpack.c.bf16 %v14082_v3, %v14070_v38  ;;  %v9701_v9 = vpack.c.bf16 %v14308_v27, %v14306_v28  ;;  %v9703_v36 = vpack.c.bf16 %v14312_v58, %v14310_v5  ;;  %v17319_v27 = vld [vmem:[#allocation88_spill] sm:$0xff] }
 0x4c1   :  { %v9705_v55 = vpack.c.bf16 %v14317_v11, %v14315_v0  ;;  %v9707_v32 = vpack.c.bf16 %v14321_v57, %v14319_v49  ;;  %v9709_v4 = vpack.c.bf16 %v14325_v54, %v14323_v19  ;;  %v9711_v61 = vpack.c.bf16 %v14331_v35, %v14329_v34 }
 0x4c2   :  { %v17320_v28 = vsub.s32 0, %v17319_v27  ;;  %v17321_v58 = vsub.s32 1, %v17319_v27 }
 0x4c4   :  { %v2924_v18 = vrot.slane %v2919_v41, %v17320_v28  ;;  %v2928_v5 = vrot.slane %v2919_v41, %v17321_v58  ;;  %v17325_v58 = vld [vmem:[#allocation97_spill] sm:$0xff] }
 0x572   :  { %v5494_v11 = vpop.f32.mrb[2].mxu0 }
 0x573   :  { %v9959_v0 = vadd.f32 %v5494_v11, %v2924_v18  ;;  %v5496_v56 = vpop.f32.mrb[3].mxu0  ;;  %v17324_v18 = vld [vmem:[#allocation84_spill] sm:$0xff]  ;;  %v17332_v11 = vld [vmem:[#allocation113_spill] sm:$0xff] }
 0x574   :  { %v9960_v57 = vadd.f32 %v5496_v56, %v2928_v5 }
 0x575   :  { %v5499_v49 = vmax.f32 %v9959_v0, 0.0  ;;  %v17329_v0 = vld [vmem:[#allocation154_spill] sm:$0xff] }
 0x576   :  { %v5500_v17 = vmax.f32 %v9960_v57, 0.0  ;;  %v17334_v57 = vand.u32 4294901760, %v17294_v21  ;;  %v17341_v21 = vand.u32 4294901760, %v14049_v20 }
 0x577   :  { %v14513_v54 = vand.u32 4294901760, %v5499_v49 }
 0x578   :  { %v14515_v19 = vand.u32 4294901760, %v5500_v17 }
 0x579   :  { %v14518_v35 = vsub.f32 %v5499_v49, %v14513_v54  ;;  %v17333_v49 = vld [vmem:[#allocation159_spill] sm:$0xff] }
 0x57a   :  { %v5637_v34 = vsub.f32 %v5500_v17, %v14515_v19  ;;  %v17323_v17 = vld [vmem:[#allocation74_spill] sm:$0xff] }
 0x57b   :  { %v5644_v28 = vand.u32 4294901760, %v14518_v35 }
 0x57c   :  { %v5638_v3 = vand.u32 4294901760, %v5637_v34 }
 0x57d   :  { %v5645_v27 = vsub.f32 %v14518_v35, %v5644_v28 }
 0x57e   :  { %v5639_v41 = vsub.f32 %v5637_v34, %v5638_v3 }
 0x57f   :  { %v5646_v56 = vand.u32 4294901760, %v5645_v27  ;;  %v17366_v27 = vld [vmem:[#allocation87_spill] sm:$0xff] }
 0x580   :  { %v5640_v5 = vand.u32 4294901760, %v5639_v41  ;;  %v17367_v41 = vand.u32 4294901760, %v17366_v27 }
 0x582   :  { %5641 = vmatprep.mubr.f32.mxu1 %v5640_v5  ;;  %v17368_v5 = vld [vmem:[#allocation167_spill] sm:$0xff] }
 0x583   :  { %5647 = vmatmul.mubr.f32.vlgmr.msra.gmra.mrb[4].mxu1 %v5646_v56  ;;  %v17369_v56 = vand.u32 4294901760, %v17368_v5 }
 0x584   :  { %9652 = vmatpush3.bf16.msra.mxu1 %v14362_v16  ;;  %5877 = vmatprep.mubr.f32.mxu1 %v14515_v19 }
 0x585   :  { %9654 = vmatprep.subr.bf16.mxu1 %v14370_v43  ;;  %v17339_v43 = vand.u32 4294901760, %v17317_v53 }
 0x588   :  { %9656 = vmatpush3.bf16.msra.mxu1 %v14375_v13  ;;  %v17340_v13 = vand.u32 4294901760, %v17318_v14  ;;  %v17345_v14 = vand.u32 4294901760, %v14066_v63 }
 0x589   :  { %9658 = vmatprep.subr.bf16.mxu1 %v14388_v26 }
 0x58a   :  { %v9749_v26 = vpack.c.bf16 %v17340_v13, %v17339_v43  ;;  %v17374_v43 = vld [vmem:[#allocation19_spill] sm:$0xff] }
 0x58b   :  { %v17375_v13 = vand.u32 4294901760, %v17374_v43 }
 0x58c   :  { %9660 = vmatpush3.bf16.msra.mxu1 %v14405_v8  ;;  %v17338_v8 = vand.u32 4294901760, %v17298_v37  ;;  %v17343_v37 = vand.u32 4294901760, %v14053_v59 }
 0x58d   :  { %9662 = vmatprep.subr.bf16.mxu1 %v14407_v1 }
 0x590   :  { %9664 = vmatpush3.bf16.msra.mxu1 %v14414_v50  ;;  %v17337_v50 = vand.u32 4294901760, %v17296_v24 }
 0x591   :  { %9666 = vmatprep.subr.bf16.mxu1 %v14421_v31  ;;  %v17347_v31 = vand.u32 4294901760, %v14070_v38 }
 0x592   :  { %v9747_v16 = vpack.c.bf16 %v17338_v8, %v17337_v50  ;;  %v17372_v50 = vld [vmem:[#allocation98_spill] sm:$0xff] }
 0x593   :  { %v17373_v8 = vand.u32 4294901760, %v17372_v50 }
 0x594   :  { %9668 = vmatpush3.bf16.msra.mxu1 %v14438_v52  ;;  %v17344_v52 = vand.u32 4294901760, %v14064_v15  ;;  %v17354_v15 = vld [vmem:[#allocation160_spill] sm:$0xff] }
 0x595   :  { %9670 = vmatprep.subr.bf16.mxu1 %v14448_v48  ;;  %v17330_v48 = vld [vmem:[#allocation156_spill] sm:$0xff] }
 0x596   :  { %v9753_v53 = vpack.c.bf16 %v17344_v52, %v17343_v37  ;;  %v17380_v52 = vld [vmem:[#allocation49_spill] sm:$0xff] }
 0x598   :  { %9672 = vmatpush3.bf16.msra.mxu1 %v14453_v40 }
 0x599   :  { %9674 = vmatprep.subr.bf16.mxu1 %v9673_v25  ;;  %v17352_v25 = vld [vmem:[#allocation107_spill] sm:$0xff] }
 0x59a   :  { %v17353_v59 = vand.u32 4294901760, %v17352_v25  ;;  %v6408_v25 = vld [vmem:[%s14911_s7 + $0x28] sm:$0xff] }
 0x59c   :  { %9676 = vmatpush3.bf16.msra.mxu1 %v9675_v2 }
 0x59d   :  { %9678 = vmatprep.subr.bf16.mxu1 %v9677_v10  ;;  %v17336_v10 = vld [vmem:[#allocation105_spill] sm:$0xff] }
 0x5a0   :  { %9680 = vmatpush3.bf16.msra.mxu1 %v9679_v39  ;;  %v17322_v39 = vld [vmem:[#allocation66_spill] sm:$0xff] }
 0x5a1   :  { %9682 = vmatprep.subr.bf16.mxu1 %v9681_v47  ;;  %v17335_v47 = vand.u32 4294901760, %v17295_v23  ;;  %v17342_v23 = vand.u32 4294901760, %v14051_v44  ;;  %v17350_v44 = vld [vmem:[#allocation99_spill] sm:$0xff] }
 0x5a3   :  { %5879 = vmatmul.mubr.f32.vlgmr.msra.gmra.mrb[6].mxu1 %v14513_v54  ;;  %v9751_v24 = vpack.c.bf16 %v17342_v23, %v17341_v21 }
 0x5a4   :  { %9684 = vmatpush3.bf16.msra.mxu1 %v9683_v45  ;;  %6014 = vmatprep.mubr.f32.mxu1 %v5637_v34  ;;  %v9745_v34 = vpack.c.bf16 %v17335_v47, %v17334_v57  ;;  %v17348_v45 = vld [vmem:[#allocation103_spill] sm:$0xff]  ;;  %v9767_v57 = vpack.c.bf16 %v17369_v56, %v17367_v41 }
 0x5a5   :  { %9686 = vmatprep.subr.bf16.mxu1 %v9685_v42  ;;  %v17349_v20 = vand.u32 4294901760, %v17348_v45  ;;  %v17351_v42 = vand.u32 4294901760, %v17350_v44  ;;  %v17370_v47 = vld [vmem:[#allocation91_spill] sm:$0xff] }
 0x5a7   :  { %v9757_v40 = vpack.c.bf16 %v17349_v20, %v17347_v31  ;;  %v9759_v2 = vpack.c.bf16 %v17353_v59, %v17351_v42  ;;  %v17384_v31 = vld [vmem:[#allocation81_spill] sm:$0xff]  ;;  %v6407_v42 = vld [vmem:[%s14911_s7 + $0x20] sm:$0xff] }
 0x5a8   :  { %9688 = vmatpush3.bf16.msra.mxu1 %v9687_v30  ;;  %v17355_v30 = vand.u32 4294901760, %v17354_v15  ;;  %v17385_v45 = vand.u32 4294901760, %v17384_v31  ;;  %v6435_v59 = vand.u32 4294901760, %v6407_v42 }
 0x5a9   :  { %9690 = vmatprep.subr.bf16.mxu1 %v9689_v12  ;;  %v17356_v12 = vld [vmem:[#allocation161_spill] sm:$0xff] }
 0x5aa   :  { %v17357_v63 = vand.u32 4294901760, %v17356_v12 }
 0x5ac   :  { %9692 = vmatpush3.bf16.msra.mxu1 %v9691_v33  ;;  %v9761_v33 = vpack.c.bf16 %v17357_v63, %v17355_v30  ;;  %v6409_v63 = vld [vmem:[%s14911_s7 + $0x30] sm:$0xff] }
 0x5ad   :  { %9694 = vmatprep.subr.bf16.mxu1 %v9693_v7 }
 0x5b0   :  { %9696 = vmatpush3.bf16.msra.mxu1 %v9695_v51  ;;  %v17360_v51 = vld [vmem:[#allocation51_spill] sm:$0xff] }
 0x5b1   :  { %9698 = vmatprep.subr.bf16.mxu1 %v9697_v46  ;;  %v17361_v38 = vand.u32 4294901760, %v17360_v51  ;;  %v14688_v51 = vsub.f32 %v6407_v42, %v6435_v59 }
 0x5b4   :  { %9700 = vmatpush3.bf16.msra.mxu1 %v9699_v22  ;;  %v17362_v22 = vld [vmem:[#allocation164_spill] sm:$0xff] }
 0x5b5   :  { %9702 = vmatprep.subr.bf16.mxu1 %v9701_v9  ;;  %v17363_v9 = vand.u32 4294901760, %v17362_v22 }
 0x5b8   :  { %9704 = vmatpush3.bf16.msra.mxu1 %v9703_v36  ;;  %v17364_v36 = vld [vmem:[#allocation165_spill] sm:$0xff] }
 0x5b9   :  { %9706 = vmatprep.subr.bf16.mxu1 %v9705_v55  ;;  %v17365_v55 = vand.u32 4294901760, %v17364_v36 }
 0x5bc   :  { %9708 = vmatpush3.bf16.msra.mxu1 %v9707_v32  ;;  %v17326_v32 = vld [vmem:[#allocation109_spill] sm:$0xff] }
 0x5bd   :  { %9710 = vmatprep.subr.bf16.mxu1 %v9709_v4  ;;  %v17327_v4 = vld [vmem:[#allocation110_spill] sm:$0xff] }
 0x5c0   :  { %9712 = vmatpush3.bf16.msra.mxu1 %v9711_v61  ;;  %v17328_v61 = vld [vmem:[#allocation153_spill] sm:$0xff] }
 0x5c1   :  { %9714 = vmatprep.subr.bf16.mxu1 %v17322_v39 }
 0x5c3   :  { %6017 = vmatmul.mubr.f32.vlgmr.msra.gmra.mrb[8].mxu1 %v14518_v35  ;;  %v17346_v35 = vand.u32 4294901760, %v14068_v60  ;;  %v17358_v60 = vld [vmem:[#allocation162_spill] sm:$0xff] }
 0x5c4   :  { %9716 = vmatpush3.bf16.msra.mxu1 %v17323_v17  ;;  %6121 = vmatprep.mubr.f32.mxu1 %v5638_v3  ;;  %v17331_v3 = vld [vmem:[#allocation112_spill] sm:$0xff]  ;;  %v17359_v7 = vand.u32 4294901760, %v17358_v60 }
 0x5c5   :  { %9718 = vmatprep.subr.bf16.mxu1 %v17324_v18  ;;  %v9755_v1 = vpack.c.bf16 %v17346_v35, %v17345_v14  ;;  %v17382_v35 = vld [vmem:[#allocation75_spill] sm:$0xff] }
 0x5c6   :  { %v9763_v46 = vpack.c.bf16 %v17361_v38, %v17359_v7 }
 0x5c8   :  { %9720 = vmatpush3.bf16.msra.mxu1 %v14047_v29 }
 0x5c9   :  { %9722 = vmatprep.subr.bf16.mxu1 %v14062_v6 }
 0x5cc   :  { %9724 = vmatpush3.bf16.msra.mxu1 %v14077_v62 }
 0x5cd   :  { %9726 = vmatprep.subr.bf16.mxu1 %v17325_v58 }
 0x5d0   :  { %9728 = vmatpush3.bf16.msra.mxu1 %v17326_v32 }
 0x5d1   :  { %9730 = vmatprep.subr.bf16.mxu1 %v17327_v4 }
 0x5d4   :  { %9732 = vmatpush3.bf16.msra.mxu1 %v17328_v61 }
 0x5d5   :  { %9734 = vmatprep.subr.bf16.mxu1 %v17329_v0 }
 0x5d8   :  { %9736 = vmatpush3.bf16.msra.mxu1 %v17330_v48 }
 0x5d9   :  { %9738 = vmatprep.subr.bf16.mxu1 %v17331_v3 }
 0x5dc   :  { %9740 = vmatpush3.bf16.msra.mxu1 %v17332_v11 }
 0x5dd   :  { %9742 = vmatprep.subr.bf16.mxu1 %v17333_v49 }
 0x5e0   :  { %9744 = vmatpush3.bf16.msra.mxu1 %v17336_v10 }
 0x5e1   :  { %9746 = vmatprep.subr.bf16.mxu1 %v9745_v34  ;;  %v17371_v34 = vand.u32 4294901760, %v17370_v47 }
 0x5e3   :  { %6125 = vmatmul.mubr.f32.vlgmr.msra.gmra.mrb[10].mxu1 %v5644_v28  ;;  %v9765_v28 = vpack.c.bf16 %v17365_v55, %v17363_v9  ;;  %v10114_v9 = vmov 0.0  }
 0x5e4   :  { %9748 = vmatpush3.bf16.msra.mxu1 %v9747_v16  ;;  %6291 = vmatprep.mubr.f32.mxu1 %v14515_v19  ;;  %v9769_v16 = vpack.c.bf16 %v17373_v8, %v17371_v34 }
 0x5e5   :  { %9750 = vmatprep.subr.bf16.mxu1 %v9749_v26  ;;  %v17376_v26 = vld [vmem:[#allocation22_spill] sm:$0xff] }
 0x5e6   :  { %v17377_v21 = vand.u32 4294901760, %v17376_v26 }
 0x5e8   :  { %9752 = vmatpush3.bf16.msra.mxu1 %v9751_v24  ;;  %v9771_v23 = vpack.c.bf16 %v17377_v21, %v17375_v13  ;;  %v17378_v24 = vld [vmem:[#allocation28_spill] sm:$0xff]  ;;  %v6536_v21 = vand.u32 4294901760, %v14688_v51 }
 0x5e9   :  { %9754 = vmatprep.subr.bf16.mxu1 %v9753_v53  ;;  %v17379_v37 = vand.u32 4294901760, %v17378_v24  ;;  %v17381_v53 = vand.u32 4294901760, %v17380_v52 }
 0x5eb   :  { %v9773_v14 = vpack.c.bf16 %v17381_v53, %v17379_v37  ;;  %v6537_v37 = vsub.f32 %v14688_v51, %v6536_v21 }
 0x5ec   :  { %9756 = vmatpush3.bf16.msra.mxu1 %v9755_v1  ;;  %v17383_v1 = vand.u32 4294901760, %v17382_v35 }
 0x5ed   :  { %9758 = vmatprep.subr.bf16.mxu1 %v9757_v40  ;;  %v6538_v53 = vand.u32 4294901760, %v6537_v37 }
 0x5ee   :  { %v9775_v20 = vpack.c.bf16 %v17385_v45, %v17383_v1 }
 0x5f0   :  { %9760 = vmatpush3.bf16.msra.mxu1 %v9759_v2  ;;  %v6438_v2 = vand.u32 4294901760, %v6408_v25 }
 0x5f1   :  { %9762 = vmatprep.subr.bf16.mxu1 %v9761_v33  ;;  %v6410_v33 = vld [vmem:[%s14911_s7 + $0x38] sm:$0xff] }
 0x5f2   :  { %v14675_v12 = vpack.c.bf16 %v6438_v2, %v6435_v59  ;;  %v14690_v38 = vsub.f32 %v6408_v25, %v6438_v2  ;;  %v6444_v22 = vand.u32 4294901760, %v6410_v33 }
 0x5f4   :  { %9764 = vmatpush3.bf16.msra.mxu1 %v9763_v46  ;;  %v6441_v46 = vand.u32 4294901760, %v6409_v63  ;;  %v14701_v41 = vsub.f32 %v6410_v33, %v6444_v22 }
 0x5f5   :  { %9766 = vmatprep.subr.bf16.mxu1 %v9765_v28 }
 0x5f6   :  { %v14697_v28 = vpack.c.bf16 %v6444_v22, %v6441_v46  ;;  %v14699_v27 = vsub.f32 %v6409_v63, %v6441_v46  ;;  %v6557_v1 = vand.u32 4294901760, %v14701_v41 }
 0x5f8   :  { %9768 = vmatpush3.bf16.msra.mxu1 %v9767_v57  ;;  %v6550_v35 = vand.u32 4294901760, %v14699_v27 }
 0x5f9   :  { %9770 = vmatprep.subr.bf16.mxu1 %v9769_v16 }
 0x5fa   :  { %v6551_v45 = vsub.f32 %v14699_v27, %v6550_v35  ;;  %v9867_v59 = vpack.c.bf16 %v6557_v1, %v6550_v35 }
 0x5fc   :  { %9772 = vmatpush3.bf16.msra.mxu1 %v9771_v23  ;;  %v6543_v23 = vand.u32 4294901760, %v14690_v38 }
 0x5fd   :  { %9774 = vmatprep.subr.bf16.mxu1 %v9773_v14 }
 0x5fe   :  { %v6544_v52 = vsub.f32 %v14690_v38, %v6543_v23  ;;  %v9864_v25 = vpack.c.bf16 %v6543_v23, %v6536_v21  ;;  %v6966_v23 = vld [vmem:[%s14913_s9 + $0x30] sm:$0xff] }
 0x5ff   :  { %v6997_v37 = vand.u32 4294901760, %v6966_v23 }
 0x600   :  { %9776 = vmatpush3.bf16.msra.mxu1 %v9775_v20  ;;  %v6545_v14 = vand.u32 4294901760, %v6544_v52  ;;  %v6558_v20 = vsub.f32 %v14701_v41, %v6557_v1 }
 0x601   :  { %9778 = vmatprep.subr.bf16.mxu1 %v17322_v39  ;;  %v6404_v39 = vld [vmem:[%s14911_s7 + $0x8] sm:$0xff] }
 0x602   :  { %v9828_v31 = vpack.c.bf16 %v6545_v14, %v6538_v53 }
 0x603   :  { %6293 = vmatmul.mubr.f32.vlgmr.msra.gmra.mrb[12].mxu1 %v14513_v54 }
 0x604   :  { %9780 = vmatpush3.bf16.msra.mxu1 %v17323_v17  ;;  %6395 = vmatprep.mubr.f32.mxu1 %v14515_v19  ;;  %v6403_v19 = vld [vmem:[%s14911_s7] sm:$0xff] }
 0x605   :  { %9782 = vmatprep.subr.bf16.mxu1 %v17324_v18  ;;  %v7532_v17 = vld [vmem:[%s14910_s6] ss:$0 sm:$0xff]  ;;  %v6423_v18 = vand.u32 4294901760, %v6403_v19  ;;  %s7522_s6 = sshll.u32 %s10115_s15, 4  ;;  %s7523_s6 = int_to_ptr.vmem [resolvable:$true] %s7522_s6 }
 0x606   :  { %s10078_s16 = scalar_lea.vmem %s7523_s6, 128  ;;  %p10083_p3 = scmp.lt.s32.totalorder %s7523_s6, %s7523_s6 }
 0x607   :  { %v14671_v15 = vsub.f32 %v6403_v19, %v6423_v18  ;;  %p10079_p2 = scmp.ne.s32.totalorder %s7523_s6, %s10078_s16  ;;  %p10084_p4 = scmp.lt.s32.totalorder %s10078_s16, %s10078_s16 }
 0x608   :  { %9784 = vmatpush3.bf16.msra.mxu1 %v14047_v29 }
 0x609   :  { %9786 = vmatprep.subr.bf16.mxu1 %v14062_v6  ;;  %v6508_v36 = vand.u32 4294901760, %v14671_v15  ;;  %p10085_p5 = por %p10084_p4, %p10083_p3 }
 0x60b   :  { %v6509_v5 = vsub.f32 %v14671_v15, %v6508_v36  ;;  %p10086_p6 = pnand %p10085_p5, %p10079_p2 }
 0x60c   :  { %9788 = vmatpush3.bf16.msra.mxu1 %v14077_v62 }
 0x60d   :  { %9790 = vmatprep.subr.bf16.mxu1 %v17325_v58  ;;  %v6426_v58 = vand.u32 4294901760, %v6404_v39  ;;  %v6510_v34 = vand.u32 4294901760, %v6509_v5 }
 0x60f   :  { %v14673_v30 = vsub.f32 %v6404_v39, %v6426_v58 }
 0x610   :  { %9792 = vmatpush3.bf16.msra.mxu1 %v17326_v32 }
 0x611   :  { %9794 = vmatprep.subr.bf16.mxu1 %v17327_v4  ;;  %v6515_v55 = vand.u32 4294901760, %v14673_v30 }
 0x613   :  { %v6516_v56 = vsub.f32 %v14673_v30, %v6515_v55 }
 0x614   :  { %9796 = vmatpush3.bf16.msra.mxu1 %v17328_v61 }
 0x615   :  { %9798 = vmatprep.subr.bf16.mxu1 %v17329_v0  ;;  %v6517_v50 = vand.u32 4294901760, %v6516_v56  ;;  %v6963_v56 = vld [vmem:[%s14913_s9 + $0x18] sm:$0xff] }
 0x617   :  { %v9822_v43 = vpack.c.bf16 %v6517_v50, %v6510_v34  ;;  %v6964_v50 = vld [vmem:[%s14913_s9 + $0x20] sm:$0xff] }
 0x618   :  { %9800 = vmatpush3.bf16.msra.mxu1 %v17330_v48  ;;  %v10112_v48 = vmov 0.0|0.0  }
 0x619   :  { %9802 = vmatprep.subr.bf16.mxu1 %v17331_v3  ;;  %v6405_v3 = vld [vmem:[%s14911_s7 + $0x10] sm:$0xff] }
 0x61c   :  { %9804 = vmatpush3.bf16.msra.mxu1 %v17332_v11  ;;  %v6406_v11 = vld [vmem:[%s14911_s7 + $0x18] sm:$0xff] }
 0x61d   :  { %9806 = vmatprep.subr.bf16.mxu1 %v17333_v49  ;;  %v6429_v49 = vand.u32 4294901760, %v6405_v3 }
 0x61f   :  { %v14683_v60 = vsub.f32 %v6405_v3, %v6429_v49 }
 0x620   :  { %9808 = vmatpush3.bf16.msra.mxu1 %v17336_v10  ;;  %v6432_v10 = vand.u32 4294901760, %v6406_v11 }
 0x621   :  { %9809 = vmatprep.subr.bf16.mxu1 %v10112_v48  ;;  %v6522_v57 = vand.u32 4294901760, %v14683_v60 }
 0x622   :  { %v14661_v44 = vpack.c.bf16 %v6432_v10, %v6429_v49  ;;  %v14685_v7 = vsub.f32 %v6406_v11, %v6432_v10  ;;  %v9858_v49 = vpack.c.bf16 %v6515_v55, %v6508_v36 }
 0x623   :  { %6397 = vmatmul.mubr.f32.vlgmr.msra.gmra.mrb[14].mxu1 %v14513_v54  ;;  %v14650_v54 = vpack.c.bf16 %v6426_v58, %v6423_v18  ;;  %v6523_v8 = vsub.f32 %v14683_v60, %v6522_v57  ;;  %v9834_v18 = vpack.c.bf16 %v14673_v30, %v14671_v15 }
 0x624   :  { %7869 = vmatprep.mubr.msk.f32.mxu1 %vm10113_vm0, %v10114_v9  ;;  %v6529_v47 = vand.u32 4294901760, %v14685_v7 }
 0x625   :  { %9811 = vmatpush3.bf16.msra.mxu1 %v14650_v54  ;;  %v6524_v13 = vand.u32 4294901760, %v6523_v8  ;;  %v6965_v8 = vld [vmem:[%s14913_s9 + $0x28] sm:$0xff] }
 0x626   :  { %9812 = vmatprep.subr.bf16.mxu1 %v10112_v48  ;;  %v6530_v16 = vsub.f32 %v14685_v7, %v6529_v47  ;;  %v9861_v42 = vpack.c.bf16 %v6529_v47, %v6522_v57  ;;  %v6988_v47 = vand.u32 4294901760, %v6963_v56 }
 0x628   :  { %v6531_v26 = vand.u32 4294901760, %v6530_v16  ;;  %v6991_v16 = vand.u32 4294901760, %v6964_v50  ;;  %v14812_v1 = vsub.f32 %v6963_v56, %v6988_v47 }
 0x629   :  { %9814 = vmatpush3.bf16.msra.mxu1 %v14661_v44 }
 0x62a   :  { %9815 = vmatprep.subr.bf16.mxu1 %v10112_v48  ;;  %v9825_v24 = vpack.c.bf16 %v6531_v26, %v6524_v13 }
 0x62d   :  { %9817 = vmatpush3.bf16.msra.mxu1 %v14675_v12 }
 0x62e   :  { %9818 = vmatprep.subr.bf16.mxu1 %v10112_v48 }
 0x631   :  { %9820 = vmatpush3.bf16.msra.mxu1 %v14697_v28 }
 0x632   :  { %9821 = vmatprep.subr.bf16.mxu1 %v10112_v48 }
 0x656   :  { %v7567_v6 = vpop.f32.mrb[4].mxu1 }
 0x657   :  { %v7568_v29 = vpop.f32.mrb[5].mxu1 }
 0x658   :  { %v7569_v62 = vadd.f32 %v7568_v29, %v7567_v6  ;;  %v6552_v6 = vand.u32 4294901760, %v6551_v45  ;;  %v6559_v29 = vand.u32 4294901760, %v6558_v20 }
 0x65a   :  { %v5649_v61 = vadd.f32 %v7569_v62, %v7532_v17  ;;  %v9831_v62 = vpack.c.bf16 %v6559_v29, %v6552_v6  ;;  %v14820_v6 = vsub.f32 %v6966_v23, %v6997_v37 }
 0x676   :  { %v7602_v32 = vpop.f32.mrb[6].mxu1 }
 0x677   :  { %v7603_v4 = vpop.f32.mrb[7].mxu1 }
 0x678   :  { %v7604_v0 = vadd.f32 %v7603_v4, %v7602_v32  ;;  %v9837_v32 = vpack.c.bf16 %v14685_v7, %v14683_v60  ;;  %v9840_v4 = vpack.c.bf16 %v14690_v38, %v14688_v51 }
 0x67a   :  { %v5881_v40 = vadd.f32 %v7604_v0, %v5649_v61  ;;  %v9843_v61 = vpack.c.bf16 %v14701_v41, %v14699_v27 }
 0x696   :  { %v7637_v19 = vpop.f32.mrb[8].mxu1 }
 0x697   :  { %v7638_v39 = vpop.f32.mrb[9].mxu1 }
 0x698   :  { %v7639_v17 = vadd.f32 %v7638_v39, %v7637_v19 }
 0x69a   :  { %v6019_v58 = vadd.f32 %v7639_v17, %v5881_v40 }
 0x6b6   :  { %v7672_v0 = vpop.f32.mrb[10].mxu1 }
 0x6b7   :  { %v7673_v3 = vpop.f32.mrb[11].mxu1 }
 0x6b8   :  { %v7674_v11 = vadd.f32 %v7673_v3, %v7672_v0 }
 0x6ba   :  { %v6127_v10 = vadd.f32 %v7674_v11, %v6019_v58 }
 0x6d6   :  { %v7707_v2 = vpop.f32.mrb[12].mxu1 }
 0x6d7   :  { %v7708_v15 = vpop.f32.mrb[13].mxu1 }
 0x6d8   :  { %v7709_v40 = vadd.f32 %v7708_v15, %v7707_v2  ;;  %v7106_v15 = vand.u32 4294901760, %v14820_v6 }
 0x6da   :  { %v6295_v30 = vadd.f32 %v7709_v40, %v6127_v10 }
 0x6f6   :  { %v7742_v63 = vpop.f32.mrb[14].mxu1 }
 0x6f7   :  { %v7743_v33 = vpop.f32.mrb[15].mxu1 }
 0x6f8   :  { %v7744_v60 = vadd.f32 %v7743_v33, %v7742_v63  ;;  %v7107_v63 = vsub.f32 %v14820_v6, %v7106_v15 }
 0x6fa   :  { %v6399_v7 = vadd.f32 %v7744_v60, %v6295_v30  ;;  %v7108_v60 = vand.u32 4294901760, %v7107_v63 }
 0x6fc   :  { %v6402_v51 = vmax.f32 %v6399_v7, 0.0 }
 0x6fe   :  { %v6420_v38 = vsel %vm6418_vm1, %v6402_v51, 0 }
 0x6ff   :  { %v6495_v46 = vand.u32 4294901760, %v6420_v38 }
 0x701   :  { %v6496_v22 = vsub.f32 %v6420_v38, %v6495_v46 }
 0x703   :  { %v6497_v27 = vand.u32 4294901760, %v6496_v22 }
 0x705   :  { %v6498_v36 = vsub.f32 %v6496_v22, %v6497_v27 }
 0x707   :  { %v6499_v55 = vand.u32 4294901760, %v6498_v36 }
 0x709   :  { %7870 = vmatmul.mubr.f32.vlgmr.msra.gmra.mrb[16].mxu1 %v6499_v55 }
 0x70a   :  { %9823 = vmatpush3.bf16.msra.mxu1 %v9822_v43  ;;  %7888 = vmatprep.mubr.msk.f32.mxu1 %vm10113_vm0, %v10114_v9  ;;  %v6994_v43 = vand.u32 4294901760, %v6965_v8 }
 0x70b   :  { %9824 = vmatprep.subr.bf16.mxu1 %v10112_v48 }
 0x70c   :  { %v14798_v21 = vpack.c.bf16 %v6994_v43, %v6991_v16  ;;  %v14816_v45 = vsub.f32 %v6965_v8, %v6994_v43 }
 0x70e   :  { %9826 = vmatpush3.bf16.msra.mxu1 %v9825_v24  ;;  %v6967_v24 = vld [vmem:[%s14913_s9 + $0x38] sm:$0xff] }
 0x70f   :  { %9827 = vmatprep.subr.bf16.mxu1 %v10112_v48  ;;  %v7000_v52 = vand.u32 4294901760, %v6967_v24 }
 0x711   :  { %v14818_v20 = vpack.c.bf16 %v7000_v52, %v6997_v37  ;;  %v14822_v29 = vsub.f32 %v6967_v24, %v7000_v52 }
 0x712   :  { %9829 = vmatpush3.bf16.msra.mxu1 %v9828_v31  ;;  %v14814_v31 = vsub.f32 %v6964_v50, %v6991_v16 }
 0x713   :  { %9830 = vmatprep.subr.bf16.mxu1 %v10112_v48  ;;  %v7113_v40 = vand.u32 4294901760, %v14822_v29 }
 0x714   :  { %v7092_v11 = vand.u32 4294901760, %v14814_v31 }
 0x715   :  { %v7114_v33 = vsub.f32 %v14822_v29, %v7113_v40 }
 0x716   :  { %9832 = vmatpush3.bf16.msra.mxu1 %v9831_v62 }
 0x717   :  { %9833 = vmatprep.subr.bf16.mxu1 %v10112_v48  ;;  %v7115_v7 = vand.u32 4294901760, %v7114_v33 }
 0x719   :  { %7889 = vmatmul.mubr.f32.vlgmr.msra.gmra.mrb[16].mxu1 %v6495_v46  ;;  %v9903_v51 = vpack.c.bf16 %v7115_v7, %v7108_v60 }
 0x71a   :  { %9835 = vmatpush3.bf16.msra.mxu1 %v9834_v18  ;;  %7907 = vmatprep.mubr.msk.f32.mxu1 %vm10113_vm0, %v10114_v9  ;;  %v7085_v18 = vand.u32 4294901760, %v14812_v1 }
 0x71b   :  { %9836 = vmatprep.subr.bf16.mxu1 %v10112_v48 }
 0x71e   :  { %9838 = vmatpush3.bf16.msra.mxu1 %v9837_v32 }
 0x71f   :  { %9839 = vmatprep.subr.bf16.mxu1 %v10112_v48 }
 0x722   :  { %9841 = vmatpush3.bf16.msra.mxu1 %v9840_v4  ;;  %v7086_v4 = vsub.f32 %v14812_v1, %v7085_v18 }
 0x723   :  { %9842 = vmatprep.subr.bf16.mxu1 %v10112_v48 }
 0x724   :  { %v7087_v3 = vand.u32 4294901760, %v7086_v4 }
 0x726   :  { %9844 = vmatpush3.bf16.msra.mxu1 %v9843_v61 }
 0x727   :  { %9845 = vmatprep.subr.bf16.mxu1 %v10112_v48 }
 0x729   :  { %7908 = vmatmul.mubr.f32.vlgmr.msra.gmra.mrb[16].mxu1 %v6496_v22  ;;  %v9912_v22 = vpack.c.bf16 %v14816_v45, %v14814_v31 }
 0x72a   :  { %9847 = vmatpush3.bf16.msra.mxu1 %v14650_v54  ;;  %7926 = vmatprep.mubr.msk.f32.mxu1 %vm10113_vm0, %v10114_v9 }
 0x72b   :  { %9848 = vmatprep.subr.bf16.mxu1 %v10112_v48 }
 0x72e   :  { %9850 = vmatpush3.bf16.msra.mxu1 %v14661_v44 }
 0x72f   :  { %9851 = vmatprep.subr.bf16.mxu1 %v10112_v48 }
 0x732   :  { %9853 = vmatpush3.bf16.msra.mxu1 %v14675_v12 }
 0x733   :  { %9854 = vmatprep.subr.bf16.mxu1 %v10112_v48 }
 0x736   :  { %9856 = vmatpush3.bf16.msra.mxu1 %v14697_v28 }
 0x737   :  { %9857 = vmatprep.subr.bf16.mxu1 %v10112_v48 }
 0x739   :  { %7927 = vmatmul.mubr.f32.vlgmr.msra.gmra.mrb[16].mxu1 %v6497_v27  ;;  %v9915_v27 = vpack.c.bf16 %v14822_v29, %v14820_v6 }
 0x73a   :  { %9859 = vmatpush3.bf16.msra.mxu1 %v9858_v49  ;;  %7945 = vmatprep.mubr.msk.f32.mxu1 %vm10113_vm0, %v10114_v9  ;;  %v7099_v49 = vand.u32 4294901760, %v14816_v45 }
 0x73b   :  { %9860 = vmatprep.subr.bf16.mxu1 %v10112_v48 }
 0x73e   :  { %9862 = vmatpush3.bf16.msra.mxu1 %v9861_v42  ;;  %v7093_v42 = vsub.f32 %v14814_v31, %v7092_v11 }
 0x73f   :  { %9863 = vmatprep.subr.bf16.mxu1 %v10112_v48 }
 0x742   :  { %9865 = vmatpush3.bf16.msra.mxu1 %v9864_v25  ;;  %v7100_v25 = vsub.f32 %v14816_v45, %v7099_v49 }
 0x743   :  { %9866 = vmatprep.subr.bf16.mxu1 %v10112_v48 }
 0x744   :  { %v7101_v2 = vand.u32 4294901760, %v7100_v25 }
 0x746   :  { %9868 = vmatpush3.bf16.msra.mxu1 %v9867_v59  ;;  %v7094_v59 = vand.u32 4294901760, %v7093_v42 }
 0x747   :  { %9869 = vmatprep.subr.bf16.mxu1 %v10112_v48 }
 0x748   :  { %v9900_v30 = vpack.c.bf16 %v7101_v2, %v7094_v59 }
 0x749   :  { %7946 = vmatmul.mubr.f32.vlgmr.msra.gmra.mrb[16].mxu1 %v6495_v46 }
 0x74a   :  { %9871 = vmatpush3.bf16.msra.mxu1 %v14650_v54  ;;  %7964 = vmatprep.mubr.msk.f32.mxu1 %vm10113_vm0, %v10114_v9  ;;  %v6960_v54 = vld [vmem:[%s14913_s9] sm:$0xff] }
 0x74b   :  { %9872 = vmatprep.subr.bf16.mxu1 %v10112_v48  ;;  %v6979_v41 = vand.u32 4294901760, %v6960_v54 }
 0x74d   :  { %v14794_v13 = vsub.f32 %v6960_v54, %v6979_v41  ;;  %v9936_v54 = vpack.c.bf16 %v7099_v49, %v7092_v11 }
 0x74e   :  { %9874 = vmatpush3.bf16.msra.mxu1 %v14661_v44  ;;  %v6961_v44 = vld [vmem:[%s14913_s9 + $0x8] sm:$0xff] }
 0x74f   :  { %9875 = vmatprep.subr.bf16.mxu1 %v10112_v48  ;;  %v7064_v53 = vand.u32 4294901760, %v14794_v13 }
 0x751   :  { %v7065_v62 = vsub.f32 %v14794_v13, %v7064_v53 }
 0x752   :  { %9877 = vmatpush3.bf16.msra.mxu1 %v14675_v12  ;;  %v6982_v12 = vand.u32 4294901760, %v6961_v44 }
 0x753   :  { %9878 = vmatprep.subr.bf16.mxu1 %v10112_v48  ;;  %v7066_v39 = vand.u32 4294901760, %v7065_v62 }
 0x754   :  { %v14774_v5 = vpack.c.bf16 %v6982_v12, %v6979_v41  ;;  %v14796_v26 = vsub.f32 %v6961_v44, %v6982_v12  ;;  %v9939_v44 = vpack.c.bf16 %v7113_v40, %v7106_v15  ;;  %v7533_v41 = vld [vmem:[%s14912_s8] ss:$0 sm:$0xff] }
 0x756   :  { %9880 = vmatpush3.bf16.msra.mxu1 %v14697_v28  ;;  %v6962_v28 = vld [vmem:[%s14913_s9 + $0x10] sm:$0xff]  ;;  %v7071_v14 = vand.u32 4294901760, %v14796_v26  ;;  %v9906_v38 = vpack.c.bf16 %v14796_v26, %v14794_v13 }
 0x757   :  { %9881 = vmatprep.subr.bf16.mxu1 %v10112_v48  ;;  %v6985_v57 = vand.u32 4294901760, %v6962_v28 }
 0x758   :  { %v7072_v19 = vsub.f32 %v14796_v26, %v7071_v14  ;;  %v9930_v36 = vpack.c.bf16 %v7071_v14, %v7064_v53 }
 0x759   :  { %7965 = vmatmul.mubr.f32.vlgmr.msra.gmra.mrb[16].mxu1 %v6495_v46  ;;  %v14784_v34 = vpack.c.bf16 %v6988_v47, %v6985_v57  ;;  %v14810_v35 = vsub.f32 %v6962_v28, %v6985_v57 }
 0x75a   :  { %7983 = vmatprep.mubr.msk.f32.mxu1 %vm10113_vm0, %v10114_v9  ;;  %9883 = vmatpush3.bf16.msra.mxu1 %v14774_v5  ;;  %v7073_v58 = vand.u32 4294901760, %v7072_v19 }
 0x75b   :  { %9884 = vmatprep.subr.bf16.mxu1 %v10112_v48  ;;  %v7078_v17 = vand.u32 4294901760, %v14810_v35  ;;  %v9909_v46 = vpack.c.bf16 %v14812_v1, %v14810_v35 }
 0x75c   :  { %v9894_v61 = vpack.c.bf16 %v7073_v58, %v7066_v39 }
 0x75d   :  { %v7079_v32 = vsub.f32 %v14810_v35, %v7078_v17  ;;  %v9933_v55 = vpack.c.bf16 %v7085_v18, %v7078_v17 }
 0x75e   :  { %9886 = vmatpush3.bf16.msra.mxu1 %v14784_v34 }
 0x75f   :  { %9887 = vmatprep.subr.bf16.mxu1 %v10112_v48  ;;  %v7080_v0 = vand.u32 4294901760, %v7079_v32 }
 0x761   :  { %v9897_v10 = vpack.c.bf16 %v7087_v3, %v7080_v0 }
 0x762   :  { %9889 = vmatpush3.bf16.msra.mxu1 %v14798_v21 }
 0x763   :  { %9890 = vmatprep.subr.bf16.mxu1 %v10112_v48 }
 0x766   :  { %9892 = vmatpush3.bf16.msra.mxu1 %v14818_v20 }
 0x767   :  { %9893 = vmatprep.subr.bf16.mxu1 %v10112_v48 }
 0x82c   :  { %v6955_v12 = vpop.f32.mrb[16].mxu1 }
 0x82d   :  { %v9961_v28 = vadd.f32 %v7533_v41, %v6955_v12  ;;  %v7966_v56 = vpop.f32.mrb[17].mxu1 }
 0x82f   :  { %v6959_v57 = vmax.f32 %v9961_v28, 0.0 }
 0x831   :  { %v6976_v47 = vsel %vm6418_vm1, %v6959_v57, 0 }
 0x832   :  { %v7051_v50 = vand.u32 4294901760, %v6976_v47 }
 0x834   :  { %v7052_v8 = vsub.f32 %v6976_v47, %v7051_v50 }
 0x836   :  { %v7053_v16 = vand.u32 4294901760, %v7052_v8 }
 0x838   :  { %v7054_v43 = vsub.f32 %v7052_v8, %v7053_v16 }
 0x83a   :  { %v7055_v13 = vand.u32 4294901760, %v7054_v43 }
 0x83c   :  { %7984 = vmatmul.mubr.f32.vlgmr.msra.gmra.mrb[18].mxu1 %v7055_v13 }
 0x83d   :  { %9895 = vmatpush3.bf16.msra.mxu1 %v9894_v61  ;;  %8002 = vmatprep.mubr.msk.f32.mxu1 %vm10113_vm0, %v10114_v9 }
 0x83e   :  { %9896 = vmatprep.subr.bf16.mxu1 %v10112_v48 }
 0x841   :  { %9898 = vmatpush3.bf16.msra.mxu1 %v9897_v10 }
 0x842   :  { %9899 = vmatprep.subr.bf16.mxu1 %v10112_v48 }
 0x845   :  { %9901 = vmatpush3.bf16.msra.mxu1 %v9900_v30 }
 0x846   :  { %9902 = vmatprep.subr.bf16.mxu1 %v10112_v48 }
 0x849   :  { %9904 = vmatpush3.bf16.msra.mxu1 %v9903_v51 }
 0x84a   :  { %9905 = vmatprep.subr.bf16.mxu1 %v10112_v48 }
 0x84c   :  { %8003 = vmatmul.mubr.f32.vlgmr.msra.gmra.mrb[18].mxu1 %v7051_v50 }
 0x84d   :  { %9907 = vmatpush3.bf16.msra.mxu1 %v9906_v38  ;;  %8021 = vmatprep.mubr.msk.f32.mxu1 %vm10113_vm0, %v10114_v9 }
 0x84e   :  { %9908 = vmatprep.subr.bf16.mxu1 %v10112_v48 }
 0x851   :  { %9910 = vmatpush3.bf16.msra.mxu1 %v9909_v46 }
 0x852   :  { %9911 = vmatprep.subr.bf16.mxu1 %v10112_v48 }
 0x855   :  { %9913 = vmatpush3.bf16.msra.mxu1 %v9912_v22 }
 0x856   :  { %9914 = vmatprep.subr.bf16.mxu1 %v10112_v48 }
 0x859   :  { %9916 = vmatpush3.bf16.msra.mxu1 %v9915_v27 }
 0x85a   :  { %9917 = vmatprep.subr.bf16.mxu1 %v10112_v48 }
 0x85c   :  { %8022 = vmatmul.mubr.f32.vlgmr.msra.gmra.mrb[18].mxu1 %v7052_v8 }
 0x85d   :  { %9919 = vmatpush3.bf16.msra.mxu1 %v14774_v5  ;;  %8040 = vmatprep.mubr.msk.f32.mxu1 %vm10113_vm0, %v10114_v9 }
 0x85e   :  { %9920 = vmatprep.subr.bf16.mxu1 %v10112_v48 }
 0x861   :  { %9922 = vmatpush3.bf16.msra.mxu1 %v14784_v34 }
 0x862   :  { %9923 = vmatprep.subr.bf16.mxu1 %v10112_v48 }
 0x865   :  { %9925 = vmatpush3.bf16.msra.mxu1 %v14798_v21 }
 0x866   :  { %9926 = vmatprep.subr.bf16.mxu1 %v10112_v48 }
 0x869   :  { %9928 = vmatpush3.bf16.msra.mxu1 %v14818_v20 }
 0x86a   :  { %9929 = vmatprep.subr.bf16.mxu1 %v10112_v48 }
 0x86c   :  { %8041 = vmatmul.mubr.f32.vlgmr.msra.gmra.mrb[18].mxu1 %v7053_v16 }
 0x86d   :  { %9931 = vmatpush3.bf16.msra.mxu1 %v9930_v36  ;;  %8059 = vmatprep.mubr.msk.f32.mxu1 %vm10113_vm0, %v10114_v9 }
 0x86e   :  { %9932 = vmatprep.subr.bf16.mxu1 %v10112_v48 }
 0x871   :  { %9934 = vmatpush3.bf16.msra.mxu1 %v9933_v55 }
 0x872   :  { %9935 = vmatprep.subr.bf16.mxu1 %v10112_v48 }
 0x875   :  { %9937 = vmatpush3.bf16.msra.mxu1 %v9936_v54 }
 0x876   :  { %9938 = vmatprep.subr.bf16.mxu1 %v10112_v48 }
 0x879   :  { %9940 = vmatpush3.bf16.msra.mxu1 %v9939_v44 }
 0x87a   :  { %9941 = vmatprep.subr.bf16.mxu1 %v10112_v48 }
 0x87c   :  { %8060 = vmatmul.mubr.f32.vlgmr.msra.gmra.mrb[18].mxu1 %v7051_v50 }
 0x87d   :  { %9943 = vmatpush3.bf16.msra.mxu1 %v14774_v5  ;;  %8078 = vmatprep.mubr.msk.f32.mxu1 %vm10113_vm0, %v10114_v9  ;;  %v7534_v5 = vld [vmem:[%s14914_s10] ss:$0 sm:$0xff] }
 0x87e   :  { %9944 = vmatprep.subr.bf16.mxu1 %v10112_v48 }
 0x881   :  { %9946 = vmatpush3.bf16.msra.mxu1 %v14784_v34 }
 0x882   :  { %9947 = vmatprep.subr.bf16.mxu1 %v10112_v48 }
 0x885   :  { %9949 = vmatpush3.bf16.msra.mxu1 %v14798_v21 }
 0x886   :  { %9950 = vmatprep.subr.bf16.mxu1 %v10112_v48 }
 0x889   :  { %9952 = vmatpush3.bf16.msra.mxu1 %v14818_v20 }
 0x88c   :  { %8079 = vmatmul.mubr.f32.vlgmr.msra.gmra.mrb[18].mxu1 %v7051_v50 }
 0x95f   :  { %v7511_v9 = vpop.f32.mrb[18].mxu1 }
 0x960   :  { %v9962_v26 = vadd.f32 %v7534_v5, %v7511_v9  ;;  %v8080_v23 = vpop.f32.mrb[19].mxu1 }
 0x962   :  { %7515 = vst [vmem:[#allocation7] sm:$0xff] %v9962_v26 }
 0x963   :  { %10089 = shalt.err (!%p10086_p6)
}
 0x964   :  { %s10090_s20 = scalar_lea.hbm %s14915_s11, 128 }
 0x965   :  { %p10091_p7 = scmp.ne.s32.totalorder %s14915_s11, %s10090_s20  ;;  %p10094_p8 = scmp.lt.u32.totalorder %s10090_s20, %s14915_s11 }
 0x967   :  { %p10096_p9 = pnand %p10094_p8, %p10091_p7 }
 0x969   :  { %10099 = shalt.err (!%p10096_p9)
}
 0x96a   :  { %7525 = dma.vmem_to_hbm [thread:$0]  %s7523_s6, 128, %s14915_s11, [#allocation4]  }
 0x96b   :  { %10104 = dma.done.wait [#allocation4], 128  }
 0x96c   :  { %10105 = vsyncadd [#allocation4], 4294967168 }
 0x96d   :  { %7529 = vsyncpa [#allocation3], 1 }
 0x96e   :  { %7530 = vsyncpa [#allocation6], 1 }
 0x96f   :  { %7531 = vsyncpa [#allocation4], 1 }

</bundles_post_ra>
